<compile_context>
chip_gen: v7x
topology: tpu7x:2x2x1
jax: 0.10.0
libtpu: 0.0.40
codegen_flags: <defaults>
</compile_context>

<pallas_src>
from functools import lru_cache
from math import exp

import numpy as np
import jax
import jax.numpy as jnp
from jax.experimental import pallas as pl
from jax.experimental.pallas import tpu as pltpu

LEVELS = 5
_MS_WEIGHTS = (0.0448, 0.2856, 0.3001, 0.2363, 0.1333)
_L = 2.0                      # val_range=None in the reference -> L = 2
_C1 = (0.01 * _L) ** 2
_C2 = (0.03 * _L) ** 2
_OUT_LANES = 128              # lane-dense per-plane output row


# ---------------- deterministic "parameters" (matches gaussian/create_window) --------
def _gaussian_1d(window_size: int, sigma: float = 1.5) -> np.ndarray:
    g = np.array(
        [exp(-(x - window_size // 2) ** 2 / (2.0 * sigma ** 2)) for x in range(window_size)],
        dtype=np.float64,
    )
    return g / g.sum()


def _band_matrices(h: int, w: int, ws: int):
    """Banded matrices so that the separable valid Gaussian filter is Wv @ x @ Wh."""
    g = _gaussian_1d(ws).astype(np.float32)
    hout, wout = h - ws + 1, w - ws + 1
    wv = np.zeros((hout, h), np.float32)
    for i in range(hout):
        wv[i, i:i + ws] = g
    wh = np.zeros((w, wout), np.float32)
    for j in range(wout):
        wh[j:j + ws, j] = g
    return wv, wh


def _recip(x):
    """1/x via EUP approximate reciprocal + one Newton step (keeps the VALU slot free)."""
    r = pl.reciprocal(x, approx=True)
    return r * (2.0 - x * r)


# ---------------- one-time probe: is f32-exact (HIGHEST) MXU matmul available? -------
@lru_cache(maxsize=1)
def _mxu_f32_exact_ok() -> bool:
    """Compile+run a tiny unaligned f32 matmul at precision=HIGHEST and check accuracy.

    If the lowering rejects it, or it silently runs at bf16 precision, fall back to the
    (exact, previously-validated) VPU tap-loop filter path.
    """
    try:
        def k(a_ref, b_ref, o_ref):
            o_ref[...] = jnp.dot(a_ref[...], b_ref[...],
                                 preferred_element_type=jnp.float32,
                                 precision=jax.lax.Precision.HIGHEST)

        a = np.linspace(0.5, 1.5, 6 * 22, dtype=np.float32).reshape(6, 22)
        b = np.linspace(-1.0, 1.0, 22 * 36, dtype=np.float32).reshape(22, 36)
        out = pl.pallas_call(
            k, out_shape=jax.ShapeDtypeStruct((6, 36), jnp.float32),
        )(jnp.asarray(a), jnp.asarray(b))
        out = np.asarray(jax.block_until_ready(out))
        ref = a.astype(np.float64) @ b.astype(np.float64)
        return bool(np.allclose(out, ref, rtol=1e-4, atol=1e-3))
    except Exception:
        return False


# ---------------- fused 5-level SSIM Pallas kernel (built & cached per shape) --------
@lru_cache(maxsize=None)
def _build_msssim_call(N, C, H, W, window_size):
    if H < 2 ** (LEVELS - 1) or W < 2 ** (LEVELS - 1):
        raise ValueError("MS-SSIM with 5 levels needs spatial dims >= 16")

    G = N * C
    mxu_ok = _mxu_f32_exact_ok()

    levels = []
    band_arrays = []
    h, w = H, W
    for lvl in range(LEVELS):
        ws = min(window_size, h, w)          # real_size = min(window_size, h, w)
        hout, wout = h - ws + 1, w - ws + 1
        # MXU path only where the filtered output is non-degenerate; tiny deep levels
        # stay on the (negligible-cost, exact) VPU tap loop.
        use_mxu = mxu_ok and min(hout, wout) >= 4
        lv = dict(
            h=h, w=w, ws=ws, hout=hout, wout=wout, use_mxu=use_mxu,
            w1d=tuple(float(v) for v in _gaussian_1d(ws)),
            inv=1.0 / float(G * hout * wout),
            shift=float(lvl + 1),            # cumulative in-place "+1" of the reference
        )
        if use_mxu:
            wv, wh = _band_matrices(h, w, ws)
            lv["band_idx"] = len(band_arrays)
            band_arrays.append(wv)
            band_arrays.append(wh)
        levels.append(lv)
        h //= 2
        w //= 2

    n_band = len(band_arrays)

    def kernel(*refs):
        x1_refs = refs[0:LEVELS]
        x2_refs = refs[LEVELS:2 * LEVELS]
        band_refs = refs[2 * LEVELS:2 * LEVELS + n_band]
        out_ref = refs[-1]                   # (1, 2, 128) block for this (n, c) plane

        ssim_vals, cs_vals = [], []
        for lvl in range(LEVELS):
            lv = levels[lvl]
            x1 = x1_refs[lvl][0]             # (h, w) raw (unshifted) plane
            x2 = x2_refs[lvl][0]

            if lv["use_mxu"]:
                wv = band_refs[lv["band_idx"]][...]       # (hout, h)
                wh = band_refs[lv["band_idx"] + 1][...]   # (w, wout)

                def filt(q, wv=wv, wh=wh):
                    t = jnp.dot(wv, q, preferred_element_type=jnp.float32,
                                precision=jax.lax.Precision.HIGHEST)
                    return jnp.dot(t, wh, preferred_element_type=jnp.float32,
                                   precision=jax.lax.Precision.HIGHEST)
            else:
                ws, hout, wout, w1d = lv["ws"], lv["hout"], lv["wout"], lv["w1d"]

                def filt(q, ws=ws, hout=hout, wout=wout, w1d=w1d):
                    # separable "valid" Gaussian: vertical (sublane) then lane pass.
                    acc = w1d[0] * q[0:hout, :]
                    for dy in range(1, ws):
                        acc = acc + w1d[dy] * q[dy:dy + hout, :]
                    out = w1d[0] * acc[:, 0:wout]
                    for dx in range(1, ws):
                        out = out + w1d[dx] * acc[:, dx:dx + wout]
                    return out

            mu1r = filt(x1)
            mu2r = filt(x2)
            s11 = filt(x1 * x1)
            s22 = filt(x2 * x2)
            s12 = filt(x1 * x2)

            # sigma terms are shift-invariant (window weights sum to 1), so they are
            # computed from the raw filtered quantities (better conditioned than the
            # reference's shifted E[x^2] - E[x]^2, mathematically identical).
            sigma1_sq = s11 - mu1r * mu1r
            sigma2_sq = s22 - mu2r * mu2r
            sigma12 = s12 - mu1r * mu2r

            k = lv["shift"]                  # analytic fold of the reference's img += 1
            mu1 = mu1r + k
            mu2 = mu2r + k
            mu1_sq = mu1 * mu1
            mu2_sq = mu2 * mu2
            mu12 = mu1 * mu2

            v1 = 2.0 * sigma12 + _C2
            v2 = sigma1_sq + sigma2_sq + _C2
            cs_map = v1 * _recip(v2)
            ssim_map = (2.0 * mu12 + _C1) * cs_map * _recip(mu1_sq + mu2_sq + _C1)

            ssim_vals.append(jnp.sum(ssim_map) * lv["inv"])
            cs_vals.append(jnp.sum(cs_map) * lv["inv"])

        # Lane-dense per-plane partial-sum row: row 0 = ssim, row 1 = cs, lanes 0..4.
        rows = jax.lax.broadcasted_iota(jnp.int32, (2, _OUT_LANES), 0)
        lanes = jax.lax.broadcasted_iota(jnp.int32, (2, _OUT_LANES), 1)
        out = jnp.zeros((2, _OUT_LANES), jnp.float32)
        for lvl in range(LEVELS):
            out = jnp.where((rows == 0) & (lanes == lvl), ssim_vals[lvl], out)
            out = jnp.where((rows == 1) & (lanes == lvl), cs_vals[lvl], out)
        out_ref[0] = out

    # ---- specs -----------------------------------------------------------------
    in_specs = []
    for lv in levels:                        # x1 pyramid, one (h, w) plane per step
        in_specs.append(pl.BlockSpec((1, lv["h"], lv["w"]), lambda g: (g, 0, 0)))
    for lv in levels:                        # x2 pyramid
        in_specs.append(pl.BlockSpec((1, lv["h"], lv["w"]), lambda g: (g, 0, 0)))
    for arr in band_arrays:                  # tiny constant band matrices
        in_specs.append(pl.BlockSpec(arr.shape, lambda g: (0, 0)))

    out_spec = pl.BlockSpec((1, 2, _OUT_LANES), lambda g: (g, 0, 0))

    # Explicit VMEM budget: per-step residency x (double buffering + headroom).
    per_step = sum(2 * lv["h"] * lv["w"] * 4 for lv in levels)
    per_step += sum(a.size * 4 for a in band_arrays) + 2 * _OUT_LANES * 4
    vmem_limit = int(min(max(4 * per_step + (4 << 20), 32 << 20), 100 << 20))
    # TODO(synk): for very large planes (per-plane pyramid approaching the v7x 64 MiB
    # VMEM), split the grid further into H-tiles with a (ws-1) halo and move the 2x2
    # pooling in-kernel; at these sizes a plane easily fits.

    call = pl.pallas_call(
        kernel,
        out_shape=jax.ShapeDtypeStruct((G, 2, _OUT_LANES), jnp.float32),
        grid_spec=pltpu.PrefetchScalarGridSpec(
            num_scalar_prefetch=0,
            grid=(G,),
            in_specs=in_specs,
            out_specs=out_spec,
        ),
        compiler_params=pltpu.CompilerParams(
            dimension_semantics=("parallel",),          # v7x megacore shards planes
            vmem_limit_bytes=vmem_limit,
        ),
    )
    return call, tuple(band_arrays)


# ---------------- glue (plain JAX, jitted) ----------------
def _avg_pool2(x):
    """F.avg_pool2d(x, (2, 2)): kernel=stride=2, no padding, floor output size."""
    n, c, h, w = x.shape
    h2, w2 = h // 2, w // 2
    x = x[:, :, :h2 * 2, :w2 * 2]
    return x.reshape(n, c, h2, 2, w2, 2).mean(axis=(3, 5))


def _msssim_impl(img1, img2, window_size):
    n, c, h, w = img1.shape
    call, bands = _build_msssim_call(n, c, h, w, window_size)

    x1 = img1.astype(jnp.float32)
    x2 = img2.astype(jnp.float32)
    x1_lv, x2_lv = [], []
    for lvl in range(LEVELS):
        # RAW (unshifted) pyramid; the reference's cumulative in-place "+1" per level is
        # folded into the kernel analytically (pooling and the unit-sum window are affine).
        g = x1.shape[0] * x1.shape[1]
        x1_lv.append(x1.reshape(g, x1.shape[2], x1.shape[3]))
        x2_lv.append(x2.reshape(g, x2.shape[2], x2.shape[3]))
        if lvl + 1 < LEVELS:
            x1 = _avg_pool2(x1)
            x2 = _avg_pool2(x2)

    out = call(*x1_lv, *x2_lv, *bands)              # (N*C, 2, 128) per-plane partials
    ssim_sums = jnp.sum(out[:, 0, :LEVELS], axis=0)
    cs_sums = jnp.sum(out[:, 1, :LEVELS], axis=0)

    sims = jax.nn.relu(ssim_sums)                   # normalize='relu'
    mcs = jax.nn.relu(cs_sums)
    weights = jnp.asarray(_MS_WEIGHTS, jnp.float32)
    pow1 = mcs ** weights
    pow2 = sims ** weights
    # mirrors the reference exactly (pow2[-1] broadcast over the 4 leading mcs terms)
    return jnp.prod(pow1[:-1] * pow2[-1])


_msssim_jit = jax.jit(_msssim_impl, static_argnums=2)


def msssim_pallas(img1, img2, window_size=11):
    """Matches MSSIM.forward (msssim with size_average=True, val_range=None, relu)."""
    n, c, h, w = img1.shape
    _build_msssim_call(n, c, h, w, window_size)     # probe/build outside the jit trace
    return _msssim_jit(img1, img2, window_size)


# ---------------- pure-JAX reference (for correctness check only) ----------------
def _ssim_level_ref(x1, x2, ws):
    c = x1.shape[1]
    g = _gaussian_1d(ws)
    w2d = jnp.asarray(np.outer(g, g), dtype=jnp.float32)
    filt = jnp.broadcast_to(w2d, (c, 1, ws, ws))
    conv = lambda x: jax.lax.conv_general_dilated(
        x, filt, (1, 1), "VALID", feature_group_count=c,
        dimension_numbers=("NCHW", "OIHW", "NCHW"),
        precision=jax.lax.Precision.HIGHEST)
    mu1, mu2 = conv(x1), conv(x2)
    mu1_sq, mu2_sq, mu12 = mu1 * mu1, mu2 * mu2, mu1 * mu2
    sigma1_sq = conv(x1 * x1) - mu1_sq
    sigma2_sq = conv(x2 * x2) - mu2_sq
    sigma12 = conv(x1 * x2) - mu12
    v1 = 2.0 * sigma12 + _C2
    v2 = sigma1_sq + sigma2_sq + _C2
    cs = jnp.mean(v1 / v2)
    ssim_map = (2.0 * mu12 + _C1) * v1 / ((mu1_sq + mu2_sq + _C1) * v2)
    return jnp.mean(ssim_map), cs


def msssim_ref(img1, img2, window_size=11):
    weights = jnp.asarray(_MS_WEIGHTS, jnp.float32)
    x1 = img1.astype(jnp.float32)
    x2 = img2.astype(jnp.float32)
    ssims, mcs = [], []
    for _ in range(LEVELS):
        x1 = x1 + 1.0
        x2 = x2 + 1.0
        _, _, h, w = x1.shape
        ws = min(window_size, h, w)
        sim, cs = _ssim_level_ref(x1, x2, ws)
        ssims.append(jax.nn.relu(sim))
        mcs.append(jax.nn.relu(cs))
        x1 = _avg_pool2(x1)
        x2 = _avg_pool2(x2)
    ssims, mcs = jnp.stack(ssims), jnp.stack(mcs)
    pow1, pow2 = mcs ** weights, ssims ** weights
    return jnp.prod(pow1[:-1] * pow2[-1])


if __name__ == "__main__":
    key = jax.random.PRNGKey(0)
    k1, k2 = jax.random.split(key)
    # spatial=32 so all 5 MS-SSIM levels (and the 2x2 pooling between them) are well
    # defined, exactly as the PyTorch module requires; channel=3 (module default).
    img1 = jax.random.normal(k1, (2, 3, 32, 32), dtype=jnp.float32)
    # correlated pair -> every per-level ssim/cs is solidly positive, so the
    # relu / fractional-power / product tail is numerically well conditioned.
    img2 = img1 + 0.1 * jax.random.normal(k2, (2, 3, 32, 32), dtype=jnp.float32)

    out = jax.block_until_ready(msssim_pallas(img1, img2))
    ref = jax.block_until_ready(msssim_ref(img1, img2))
    np.testing.assert_allclose(np.asarray(out), np.asarray(ref), rtol=1e-3, atol=1e-4)

    print("KERNEL_OK")
</pallas_src>

<mosaic_0001>
module attributes {stable_mosaic.version = 11 : i64} {
  func.func @k(%arg0: memref<6x22xf32, #tpu.memory_space<vmem>>, %arg1: memref<22x36xf32, #tpu.memory_space<vmem>>, %arg2: memref<6x36xf32, #tpu.memory_space<vmem>>) attributes {dimension_semantics = [], scalar_prefetch = 0 : i64, scratch_operands = 0 : i64, tpu.core_type = #tpu.core_type<tc>} {
    %c0 = arith.constant 0 : index
    %c0_0 = arith.constant 0 : index
    %0 = vector.load %arg0[%c0, %c0_0] : memref<6x22xf32, #tpu.memory_space<vmem>>, vector<6x22xf32>
    %c0_1 = arith.constant 0 : index
    %c0_2 = arith.constant 0 : index
    %1 = vector.load %arg1[%c0_1, %c0_2] : memref<22x36xf32, #tpu.memory_space<vmem>>, vector<22x36xf32>
    %cst = arith.constant dense<0.000000e+00> : vector<6x36xf32>
    %2 = tpu.matmul %0, %1, %cst {dimension_numbers = #tpu.dot_dimension_numbers<[1], [0], [0], [1], [0, 0, 1, 1], [], []>, precision = #tpu.contract_precision<fp32>} : vector<6x22xf32>, vector<22x36xf32>, vector<6x36xf32> -> vector<6x36xf32>
    %c0_3 = arith.constant 0 : index
    %c0_4 = arith.constant 0 : index
    %3 = vector.load %arg2[%c0_3, %c0_4] : memref<6x36xf32, #tpu.memory_space<vmem>>, vector<6x36xf32>
    tpu.vector_store %arg2[%c0_3, %c0_4], %2 {strides = array<i32>} : memref<6x36xf32, #tpu.memory_space<vmem>>, vector<6x36xf32>,
    return
  }
}

module attributes {stable_mosaic.version = 11 : i64} {
  func.func @kernel(%arg0: i32, %arg1: memref<1x32x32xf32, #tpu.memory_space<vmem>>, %arg2: memref<1x16x16xf32, #tpu.memory_space<vmem>>, %arg3: memref<1x8x8xf32, #tpu.memory_space<vmem>>, %arg4: memref<1x4x4xf32, #tpu.memory_space<vmem>>, %arg5: memref<1x2x2xf32, #tpu.memory_space<vmem>>, %arg6: memref<1x32x32xf32, #tpu.memory_space<vmem>>, %arg7: memref<1x16x16xf32, #tpu.memory_space<vmem>>, %arg8: memref<1x8x8xf32, #tpu.memory_space<vmem>>, %arg9: memref<1x4x4xf32, #tpu.memory_space<vmem>>, %arg10: memref<1x2x2xf32, #tpu.memory_space<vmem>>, %arg11: memref<1x2x128xf32, #tpu.memory_space<vmem>>) attributes {dimension_semantics = [#tpu.dimension_semantics<parallel>], iteration_bounds = array<i64: 6>, scalar_prefetch = 0 : i64, scratch_operands = 0 : i64, tpu.core_type = #tpu.core_type<tc>, window_params = [{transform_indices = @transform_0, window_bounds = array<i64: 1, 32, 32>}, {transform_indices = @transform_1, window_bounds = array<i64: 1, 16, 16>}, {transform_indices = @transform_2, window_bounds = array<i64: 1, 8, 8>}, {transform_indices = @transform_3, window_bounds = array<i64: 1, 4, 4>}, {transform_indices = @transform_4, window_bounds = array<i64: 1, 2, 2>}, {transform_indices = @transform_5, window_bounds = array<i64: 1, 32, 32>}, {transform_indices = @transform_6, window_bounds = array<i64: 1, 16, 16>}, {transform_indices = @transform_7, window_bounds = array<i64: 1, 8, 8>}, {transform_indices = @transform_8, window_bounds = array<i64: 1, 4, 4>}, {transform_indices = @transform_9, window_bounds = array<i64: 1, 2, 2>}, {transform_indices = @transform_10, window_bounds = array<i64: 1, 2, 128>}]} {
    %c0 = arith.constant 0 : index
    %c0_0 = arith.constant 0 : index
    %c0_1 = arith.constant 0 : index
    %0 = vector.load %arg1[%c0, %c0_0, %c0_1] : memref<1x32x32xf32, #tpu.memory_space<vmem>>, vector<1x32x32xf32>
    %1 = vector.shape_cast %0 : vector<1x32x32xf32> to vector<32x32xf32>
    %c0_2 = arith.constant 0 : index
    %c0_3 = arith.constant 0 : index
    %c0_4 = arith.constant 0 : index
    %2 = vector.load %arg6[%c0_2, %c0_3, %c0_4] : memref<1x32x32xf32, #tpu.memory_space<vmem>>, vector<1x32x32xf32>
    %3 = vector.shape_cast %2 : vector<1x32x32xf32> to vector<32x32xf32>
    %4 = vector.extract_strided_slice %1 {offsets = [0, 0], sizes = [22, 32], strides = [1, 1]} : vector<32x32xf32> to vector<22x32xf32>
    %cst = arith.constant 0.00102838012 : f32
    %5 = vector.broadcast %cst : f32 to vector<22x32xf32>
    %6 = arith.mulf %5, %4 : vector<22x32xf32>
    %7 = vector.extract_strided_slice %1 {offsets = [1, 0], sizes = [22, 32], strides = [1, 1]} : vector<32x32xf32> to vector<22x32xf32>
    %cst_5 = arith.constant 0.00759875821 : f32
    %8 = vector.broadcast %cst_5 : f32 to vector<22x32xf32>
    %9 = arith.mulf %8, %7 : vector<22x32xf32>
    %10 = arith.addf %6, %9 : vector<22x32xf32>
    %11 = vector.extract_strided_slice %1 {offsets = [2, 0], sizes = [22, 32], strides = [1, 1]} : vector<32x32xf32> to vector<22x32xf32>
    %cst_6 = arith.constant 0.0360007733 : f32
    %12 = vector.broadcast %cst_6 : f32 to vector<22x32xf32>
    %13 = arith.mulf %12, %11 : vector<22x32xf32>
    %14 = arith.addf %10, %13 : vector<22x32xf32>
    %15 = vector.extract_strided_slice %1 {offsets = [3, 0], sizes = [22, 32], strides = [1, 1]} : vector<32x32xf32> to vector<22x32xf32>
    %cst_7 = arith.constant 0.109360687 : f32
    %16 = vector.broadcast %cst_7 : f32 to vector<22x32xf32>
    %17 = arith.mulf %16, %15 : vector<22x32xf32>
    %18 = arith.addf %14, %17 : vector<22x32xf32>
    %19 = vector.extract_strided_slice %1 {offsets = [4, 0], sizes = [22, 32], strides = [1, 1]} : vector<32x32xf32> to vector<22x32xf32>
    %cst_8 = arith.constant 0.213005543 : f32
    %20 = vector.broadcast %cst_8 : f32 to vector<22x32xf32>
    %21 = arith.mulf %20, %19 : vector<22x32xf32>
    %22 = arith.addf %18, %21 : vector<22x32xf32>
    %23 = vector.extract_strided_slice %1 {offsets = [5, 0], sizes = [22, 32], strides = [1, 1]} : vector<32x32xf32> to vector<22x32xf32>
    %cst_9 = arith.constant 0.266011715 : f32
    %24 = vector.broadcast %cst_9 : f32 to vector<22x32xf32>
    %25 = arith.mulf %24, %23 : vector<22x32xf32>
    %26 = arith.addf %22, %25 : vector<22x32xf32>
    %27 = vector.extract_strided_slice %1 {offsets = [6, 0], sizes = [22, 32], strides = [1, 1]} : vector<32x32xf32> to vector<22x32xf32>
    %cst_10 = arith.constant 0.213005543 : f32
    %28 = vector.broadcast %cst_10 : f32 to vector<22x32xf32>
    %29 = arith.mulf %28, %27 : vector<22x32xf32>
    %30 = arith.addf %26, %29 : vector<22x32xf32>
    %31 = vector.extract_strided_slice %1 {offsets = [7, 0], sizes = [22, 32], strides = [1, 1]} : vector<32x32xf32> to vector<22x32xf32>
    %cst_11 = arith.constant 0.109360687 : f32
    %32 = vector.broadcast %cst_11 : f32 to vector<22x32xf32>
    %33 = arith.mulf %32, %31 : vector<22x32xf32>
    %34 = arith.addf %30, %33 : vector<22x32xf32>
    %35 = vector.extract_strided_slice %1 {offsets = [8, 0], sizes = [22, 32], strides = [1, 1]} : vector<32x32xf32> to vector<22x32xf32>
    %cst_12 = arith.constant 0.0360007733 : f32
    %36 = vector.broadcast %cst_12 : f32 to vector<22x32xf32>
    %37 = arith.mulf %36, %35 : vector<22x32xf32>
    %38 = arith.addf %34, %37 : vector<22x32xf32>
    %39 = vector.extract_strided_slice %1 {offsets = [9, 0], sizes = [22, 32], strides = [1, 1]} : vector<32x32xf32> to vector<22x32xf32>
    %cst_13 = arith.constant 0.00759875821 : f32
    %40 = vector.broadcast %cst_13 : f32 to vector<22x32xf32>
    %41 = arith.mulf %40, %39 : vector<22x32xf32>
    %42 = arith.addf %38, %41 : vector<22x32xf32>
    %43 = vector.extract_strided_slice %1 {offsets = [10, 0], sizes = [22, 32], strides = [1, 1]} : vector<32x32xf32> to vector<22x32xf32>
    %cst_14 = arith.constant 0.00102838012 : f32
    %44 = vector.broadcast %cst_14 : f32 to vector<22x32xf32>
    %45 = arith.mulf %44, %43 : vector<22x32xf32>
    %46 = arith.addf %42, %45 : vector<22x32xf32>
    %47 = vector.extract_strided_slice %46 {offsets = [0, 0], sizes = [22, 22], strides = [1, 1]} : vector<22x32xf32> to vector<22x22xf32>
    %cst_15 = arith.constant 0.00102838012 : f32
    %48 = vector.broadcast %cst_15 : f32 to vector<22x22xf32>
    %49 = arith.mulf %48, %47 : vector<22x22xf32>
    %50 = vector.extract_strided_slice %46 {offsets = [0, 1], sizes = [22, 22], strides = [1, 1]} : vector<22x32xf32> to vector<22x22xf32>
    %cst_16 = arith.constant 0.00759875821 : f32
    %51 = vector.broadcast %cst_16 : f32 to vector<22x22xf32>
    %52 = arith.mulf %51, %50 : vector<22x22xf32>
    %53 = arith.addf %49, %52 : vector<22x22xf32>
    %54 = vector.extract_strided_slice %46 {offsets = [0, 2], sizes = [22, 22], strides = [1, 1]} : vector<22x32xf32> to vector<22x22xf32>
    %cst_17 = arith.constant 0.0360007733 : f32
    %55 = vector.broadcast %cst_17 : f32 to vector<22x22xf32>
    %56 = arith.mulf %55, %54 : vector<22x22xf32>
    %57 = arith.addf %53, %56 : vector<22x22xf32>
    %58 = vector.extract_strided_slice %46 {offsets = [0, 3], sizes = [22, 22], strides = [1, 1]} : vector<22x32xf32> to vector<22x22xf32>
    %cst_18 = arith.constant 0.109360687 : f32
    %59 = vector.broadcast %cst_18 : f32 to vector<22x22xf32>
    %60 = arith.mulf %59, %58 : vector<22x22xf32>
    %61 = arith.addf %57, %60 : vector<22x22xf32>
    %62 = vector.extract_strided_slice %46 {offsets = [0, 4], sizes = [22, 22], strides = [1, 1]} : vector<22x32xf32> to vector<22x22xf32>
    %cst_19 = arith.constant 0.213005543 : f32
    %63 = vector.broadcast %cst_19 : f32 to vector<22x22xf32>
    %64 = arith.mulf %63, %62 : vector<22x22xf32>
    %65 = arith.addf %61, %64 : vector<22x22xf32>
    %66 = vector.extract_strided_slice %46 {offsets = [0, 5], sizes = [22, 22], strides = [1, 1]} : vector<22x32xf32> to vector<22x22xf32>
    %cst_20 = arith.constant 0.266011715 : f32
    %67 = vector.broadcast %cst_20 : f32 to vector<22x22xf32>
    %68 = arith.mulf %67, %66 : vector<22x22xf32>
    %69 = arith.addf %65, %68 : vector<22x22xf32>
    %70 = vector.extract_strided_slice %46 {offsets = [0, 6], sizes = [22, 22], strides = [1, 1]} : vector<22x32xf32> to vector<22x22xf32>
    %cst_21 = arith.constant 0.213005543 : f32
    %71 = vector.broadcast %cst_21 : f32 to vector<22x22xf32>
    %72 = arith.mulf %71, %70 : vector<22x22xf32>
    %73 = arith.addf %69, %72 : vector<22x22xf32>
    %74 = vector.extract_strided_slice %46 {offsets = [0, 7], sizes = [22, 22], strides = [1, 1]} : vector<22x32xf32> to vector<22x22xf32>
    %cst_22 = arith.constant 0.109360687 : f32
    %75 = vector.broadcast %cst_22 : f32 to vector<22x22xf32>
    %76 = arith.mulf %75, %74 : vector<22x22xf32>
    %77 = arith.addf %73, %76 : vector<22x22xf32>
    %78 = vector.extract_strided_slice %46 {offsets = [0, 8], sizes = [22, 22], strides = [1, 1]} : vector<22x32xf32> to vector<22x22xf32>
    %cst_23 = arith.constant 0.0360007733 : f32
    %79 = vector.broadcast %cst_23 : f32 to vector<22x22xf32>
    %80 = arith.mulf %79, %78 : vector<22x22xf32>
    %81 = arith.addf %77, %80 : vector<22x22xf32>
    %82 = vector.extract_strided_slice %46 {offsets = [0, 9], sizes = [22, 22], strides = [1, 1]} : vector<22x32xf32> to vector<22x22xf32>
    %cst_24 = arith.constant 0.00759875821 : f32
    %83 = vector.broadcast %cst_24 : f32 to vector<22x22xf32>
    %84 = arith.mulf %83, %82 : vector<22x22xf32>
    %85 = arith.addf %81, %84 : vector<22x22xf32>
    %86 = vector.extract_strided_slice %46 {offsets = [0, 10], sizes = [22, 22], strides = [1, 1]} : vector<22x32xf32> to vector<22x22xf32>
    %cst_25 = arith.constant 0.00102838012 : f32
    %87 = vector.broadcast %cst_25 : f32 to vector<22x22xf32>
    %88 = arith.mulf %87, %86 : vector<22x22xf32>
    %89 = arith.addf %85, %88 : vector<22x22xf32>
    %90 = vector.extract_strided_slice %3 {offsets = [0, 0], sizes = [22, 32], strides = [1, 1]} : vector<32x32xf32> to vector<22x32xf32>
    %cst_26 = arith.constant 0.00102838012 : f32
    %91 = vector.broadcast %cst_26 : f32 to vector<22x32xf32>
    %92 = arith.mulf %91, %90 : vector<22x32xf32>
    %93 = vector.extract_strided_slice %3 {offsets = [1, 0], sizes = [22, 32], strides = [1, 1]} : vector<32x32xf32> to vector<22x32xf32>
    %cst_27 = arith.constant 0.00759875821 : f32
    %94 = vector.broadcast %cst_27 : f32 to vector<22x32xf32>
    %95 = arith.mulf %94, %93 : vector<22x32xf32>
    %96 = arith.addf %92, %95 : vector<22x32xf32>
    %97 = vector.extract_strided_slice %3 {offsets = [2, 0], sizes = [22, 32], strides = [1, 1]} : vector<32x32xf32> to vector<22x32xf32>
    %cst_28 = arith.constant 0.0360007733 : f32
    %98 = vector.broadcast %cst_28 : f32 to vector<22x32xf32>
    %99 = arith.mulf %98, %97 : vector<22x32xf32>
    %100 = arith.addf %96, %99 : vector<22x32xf32>
    %101 = vector.extract_strided_slice %3 {offsets = [3, 0], sizes = [22, 32], strides = [1, 1]} : vector<32x32xf32> to vector<22x32xf32>
    %cst_29 = arith.constant 0.109360687 : f32
    %102 = vector.broadcast %cst_29 : f32 to vector<22x32xf32>
    %103 = arith.mulf %102, %101 : vector<22x32xf32>
    %104 = arith.addf %100, %103 : vector<22x32xf32>
    %105 = vector.extract_strided_slice %3 {offsets = [4, 0], sizes = [22, 32], strides = [1, 1]} : vector<32x32xf32> to vector<22x32xf32>
    %cst_30 = arith.constant 0.213005543 : f32
    %106 = vector.broadcast %cst_30 : f32 to vector<22x32xf32>
    %107 = arith.mulf %106, %105 : vector<22x32xf32>
    %108 = arith.addf %104, %107 : vector<22x32xf32>
    %109 = vector.extract_strided_slice %3 {offsets = [5, 0], sizes = [22, 32], strides = [1, 1]} : vector<32x32xf32> to vector<22x32xf32>
    %cst_31 = arith.constant 0.266011715 : f32
    %110 = vector.broadcast %cst_31 : f32 to vector<22x32xf32>
    %111 = arith.mulf %110, %109 : vector<22x32xf32>
    %112 = arith.addf %108, %111 : vector<22x32xf32>
    %113 = vector.extract_strided_slice %3 {offsets = [6, 0], sizes = [22, 32], strides = [1, 1]} : vector<32x32xf32> to vector<22x32xf32>
    %cst_32 = arith.constant 0.213005543 : f32
    %114 = vector.broadcast %cst_32 : f32 to vector<22x32xf32>
    %115 = arith.mulf %114, %113 : vector<22x32xf32>
    %116 = arith.addf %112, %115 : vector<22x32xf32>
    %117 = vector.extract_strided_slice %3 {offsets = [7, 0], sizes = [22, 32], strides = [1, 1]} : vector<32x32xf32> to vector<22x32xf32>
    %cst_33 = arith.constant 0.109360687 : f32
    %118 = vector.broadcast %cst_33 : f32 to vector<22x32xf32>
    %119 = arith.mulf %118, %117 : vector<22x32xf32>
    %120 = arith.addf %116, %119 : vector<22x32xf32>
    %121 = vector.extract_strided_slice %3 {offsets = [8, 0], sizes = [22, 32], strides = [1, 1]} : vector<32x32xf32> to vector<22x32xf32>
    %cst_34 = arith.constant 0.0360007733 : f32
    %122 = vector.broadcast %cst_34 : f32 to vector<22x32xf32>
    %123 = arith.mulf %122, %121 : vector<22x32xf32>
    %124 = arith.addf %120, %123 : vector<22x32xf32>
    %125 = vector.extract_strided_slice %3 {offsets = [9, 0], sizes = [22, 32], strides = [1, 1]} : vector<32x32xf32> to vector<22x32xf32>
    %cst_35 = arith.constant 0.00759875821 : f32
    %126 = vector.broadcast %cst_35 : f32 to vector<22x32xf32>
    %127 = arith.mulf %126, %125 : vector<22x32xf32>
    %128 = arith.addf %124, %127 : vector<22x32xf32>
    %129 = vector.extract_strided_slice %3 {offsets = [10, 0], sizes = [22, 32], strides = [1, 1]} : vector<32x32xf32> to vector<22x32xf32>
    %cst_36 = arith.constant 0.00102838012 : f32
    %130 = vector.broadcast %cst_36 : f32 to vector<22x32xf32>
    %131 = arith.mulf %130, %129 : vector<22x32xf32>
    %132 = arith.addf %128, %131 : vector<22x32xf32>
    %133 = vector.extract_strided_slice %132 {offsets = [0, 0], sizes = [22, 22], strides = [1, 1]} : vector<22x32xf32> to vector<22x22xf32>
    %cst_37 = arith.constant 0.00102838012 : f32
    %134 = vector.broadcast %cst_37 : f32 to vector<22x22xf32>
    %135 = arith.mulf %134, %133 : vector<22x22xf32>
    %136 = vector.extract_strided_slice %132 {offsets = [0, 1], sizes = [22, 22], strides = [1, 1]} : vector<22x32xf32> to vector<22x22xf32>
    %cst_38 = arith.constant 0.00759875821 : f32
    %137 = vector.broadcast %cst_38 : f32 to vector<22x22xf32>
    %138 = arith.mulf %137, %136 : vector<22x22xf32>
    %139 = arith.addf %135, %138 : vector<22x22xf32>
    %140 = vector.extract_strided_slice %132 {offsets = [0, 2], sizes = [22, 22], strides = [1, 1]} : vector<22x32xf32> to vector<22x22xf32>
    %cst_39 = arith.constant 0.0360007733 : f32
    %141 = vector.broadcast %cst_39 : f32 to vector<22x22xf32>
    %142 = arith.mulf %141, %140 : vector<22x22xf32>
    %143 = arith.addf %139, %142 : vector<22x22xf32>
    %144 = vector.extract_strided_slice %132 {offsets = [0, 3], sizes = [22, 22], strides = [1, 1]} : vector<22x32xf32> to vector<22x22xf32>
    %cst_40 = arith.constant 0.109360687 : f32
    %145 = vector.broadcast %cst_40 : f32 to vector<22x22xf32>
    %146 = arith.mulf %145, %144 : vector<22x22xf32>
    %147 = arith.addf %143, %146 : vector<22x22xf32>
    %148 = vector.extract_strided_slice %132 {offsets = [0, 4], sizes = [22, 22], strides = [1, 1]} : vector<22x32xf32> to vector<22x22xf32>
    %cst_41 = arith.constant 0.213005543 : f32
    %149 = vector.broadcast %cst_41 : f32 to vector<22x22xf32>
    %150 = arith.mulf %149, %148 : vector<22x22xf32>
    %151 = arith.addf %147, %150 : vector<22x22xf32>
    %152 = vector.extract_strided_slice %132 {offsets = [0, 5], sizes = [22, 22], strides = [1, 1]} : vector<22x32xf32> to vector<22x22xf32>
    %cst_42 = arith.constant 0.266011715 : f32
    %153 = vector.broadcast %cst_42 : f32 to vector<22x22xf32>
    %154 = arith.mulf %153, %152 : vector<22x22xf32>
    %155 = arith.addf %151, %154 : vector<22x22xf32>
    %156 = vector.extract_strided_slice %132 {offsets = [0, 6], sizes = [22, 22], strides = [1, 1]} : vector<22x32xf32> to vector<22x22xf32>
    %cst_43 = arith.constant 0.213005543 : f32
    %157 = vector.broadcast %cst_43 : f32 to vector<22x22xf32>
    %158 = arith.mulf %157, %156 : vector<22x22xf32>
    %159 = arith.addf %155, %158 : vector<22x22xf32>
    %160 = vector.extract_strided_slice %132 {offsets = [0, 7], sizes = [22, 22], strides = [1, 1]} : vector<22x32xf32> to vector<22x22xf32>
    %cst_44 = arith.constant 0.109360687 : f32
    %161 = vector.broadcast %cst_44 : f32 to vector<22x22xf32>
    %162 = arith.mulf %161, %160 : vector<22x22xf32>
    %163 = arith.addf %159, %162 : vector<22x22xf32>
    %164 = vector.extract_strided_slice %132 {offsets = [0, 8], sizes = [22, 22], strides = [1, 1]} : vector<22x32xf32> to vector<22x22xf32>
    %cst_45 = arith.constant 0.0360007733 : f32
    %165 = vector.broadcast %cst_45 : f32 to vector<22x22xf32>
    %166 = arith.mulf %165, %164 : vector<22x22xf32>
    %167 = arith.addf %163, %166 : vector<22x22xf32>
    %168 = vector.extract_strided_slice %132 {offsets = [0, 9], sizes = [22, 22], strides = [1, 1]} : vector<22x32xf32> to vector<22x22xf32>
    %cst_46 = arith.constant 0.00759875821 : f32
    %169 = vector.broadcast %cst_46 : f32 to vector<22x22xf32>
    %170 = arith.mulf %169, %168 : vector<22x22xf32>
    %171 = arith.addf %167, %170 : vector<22x22xf32>
    %172 = vector.extract_strided_slice %132 {offsets = [0, 10], sizes = [22, 22], strides = [1, 1]} : vector<22x32xf32> to vector<22x22xf32>
    %cst_47 = arith.constant 0.00102838012 : f32
    %173 = vector.broadcast %cst_47 : f32 to vector<22x22xf32>
    %174 = arith.mulf %173, %172 : vector<22x22xf32>
    %175 = arith.addf %171, %174 : vector<22x22xf32>
    %176 = arith.mulf %1, %1 : vector<32x32xf32>
    %177 = vector.extract_strided_slice %176 {offsets = [0, 0], sizes = [22, 32], strides = [1, 1]} : vector<32x32xf32> to vector<22x32xf32>
    %cst_48 = arith.constant 0.00102838012 : f32
    %178 = vector.broadcast %cst_48 : f32 to vector<22x32xf32>
    %179 = arith.mulf %178, %177 : vector<22x32xf32>
    %180 = vector.extract_strided_slice %176 {offsets = [1, 0], sizes = [22, 32], strides = [1, 1]} : vector<32x32xf32> to vector<22x32xf32>
    %cst_49 = arith.constant 0.00759875821 : f32
    %181 = vector.broadcast %cst_49 : f32 to vector<22x32xf32>
    %182 = arith.mulf %181, %180 : vector<22x32xf32>
    %183 = arith.addf %179, %182 : vector<22x32xf32>
    %184 = vector.extract_strided_slice %176 {offsets = [2, 0], sizes = [22, 32], strides = [1, 1]} : vector<32x32xf32> to vector<22x32xf32>
    %cst_50 = arith.constant 0.0360007733 : f32
    %185 = vector.broadcast %cst_50 : f32 to vector<22x32xf32>
    %186 = arith.mulf %185, %184 : vector<22x32xf32>
    %187 = arith.addf %183, %186 : vector<22x32xf32>
    %188 = vector.extract_strided_slice %176 {offsets = [3, 0], sizes = [22, 32], strides = [1, 1]} : vector<32x32xf32> to vector<22x32xf32>
    %cst_51 = arith.constant 0.109360687 : f32
    %189 = vector.broadcast %cst_51 : f32 to vector<22x32xf32>
    %190 = arith.mulf %189, %188 : vector<22x32xf32>
    %191 = arith.addf %187, %190 : vector<22x32xf32>
    %192 = vector.extract_strided_slice %176 {offsets = [4, 0], sizes = [22, 32], strides = [1, 1]} : vector<32x32xf32> to vector<22x32xf32>
    %cst_52 = arith.constant 0.213005543 : f32
    %193 = vector.broadcast %cst_52 : f32 to vector<22x32xf32>
    %194 = arith.mulf %193, %192 : vector<22x32xf32>
    %195 = arith.addf %191, %194 : vector<22x32xf32>
    %196 = vector.extract_strided_slice %176 {offsets = [5, 0], sizes = [22, 32], strides = [1, 1]} : vector<32x32xf32> to vector<22x32xf32>
    %cst_53 = arith.constant 0.266011715 : f32
    %197 = vector.broadcast %cst_53 : f32 to vector<22x32xf32>
    %198 = arith.mulf %197, %196 : vector<22x32xf32>
    %199 = arith.addf %195, %198 : vector<22x32xf32>
    %200 = vector.extract_strided_slice %176 {offsets = [6, 0], sizes = [22, 32], strides = [1, 1]} : vector<32x32xf32> to vector<22x32xf32>
    %cst_54 = arith.constant 0.213005543 : f32
    %201 = vector.broadcast %cst_54 : f32 to vector<22x32xf32>
    %202 = arith.mulf %201, %200 : vector<22x32xf32>
    %203 = arith.addf %199, %202 : vector<22x32xf32>
    %204 = vector.extract_strided_slice %176 {offsets = [7, 0], sizes = [22, 32], strides = [1, 1]} : vector<32x32xf32> to vector<22x32xf32>
    %cst_55 = arith.constant 0.109360687 : f32
    %205 = vector.broadcast %cst_55 : f32 to vector<22x32xf32>
    %206 = arith.mulf %205, %204 : vector<22x32xf32>
    %207 = arith.addf %203, %206 : vector<22x32xf32>
    %208 = vector.extract_strided_slice %176 {offsets = [8, 0], sizes = [22, 32], strides = [1, 1]} : vector<32x32xf32> to vector<22x32xf32>
    %cst_56 = arith.constant 0.0360007733 : f32
    %209 = vector.broadcast %cst_56 : f32 to vector<22x32xf32>
    %210 = arith.mulf %209, %208 : vector<22x32xf32>
    %211 = arith.addf %207, %210 : vector<22x32xf32>
    %212 = vector.extract_strided_slice %176 {offsets = [9, 0], sizes = [22, 32], strides = [1, 1]} : vector<32x32xf32> to vector<22x32xf32>
    %cst_57 = arith.constant 0.00759875821 : f32
    %213 = vector.broadcast %cst_57 : f32 to vector<22x32xf32>
    %214 = arith.mulf %213, %212 : vector<22x32xf32>
    %215 = arith.addf %211, %214 : vector<22x32xf32>
    %216 = vector.extract_strided_slice %176 {offsets = [10, 0], sizes = [22, 32], strides = [1, 1]} : vector<32x32xf32> to vector<22x32xf32>
    %cst_58 = arith.constant 0.00102838012 : f32
    %217 = vector.broadcast %cst_58 : f32 to vector<22x32xf32>
    %218 = arith.mulf %217, %216 : vector<22x32xf32>
    %219 = arith.addf %215, %218 : vector<22x32xf32>
    %220 = vector.extract_strided_slice %219 {offsets = [0, 0], sizes = [22, 22], strides = [1, 1]} : vector<22x32xf32> to vector<22x22xf32>
    %cst_59 = arith.constant 0.00102838012 : f32
    %221 = vector.broadcast %cst_59 : f32 to vector<22x22xf32>
    %222 = arith.mulf %221, %220 : vector<22x22xf32>
    %223 = vector.extract_strided_slice %219 {offsets = [0, 1], sizes = [22, 22], strides = [1, 1]} : vector<22x32xf32> to vector<22x22xf32>
    %cst_60 = arith.constant 0.00759875821 : f32
    %224 = vector.broadcast %cst_60 : f32 to vector<22x22xf32>
    %225 = arith.mulf %224, %223 : vector<22x22xf32>
    %226 = arith.addf %222, %225 : vector<22x22xf32>
    %227 = vector.extract_strided_slice %219 {offsets = [0, 2], sizes = [22, 22], strides = [1, 1]} : vector<22x32xf32> to vector<22x22xf32>
    %cst_61 = arith.constant 0.0360007733 : f32
    %228 = vector.broadcast %cst_61 : f32 to vector<22x22xf32>
    %229 = arith.mulf %228, %227 : vector<22x22xf32>
    %230 = arith.addf %226, %229 : vector<22x22xf32>
    %231 = vector.extract_strided_slice %219 {offsets = [0, 3], sizes = [22, 22], strides = [1, 1]} : vector<22x32xf32> to vector<22x22xf32>
    %cst_62 = arith.constant 0.109360687 : f32
    %232 = vector.broadcast %cst_62 : f32 to vector<22x22xf32>
    %233 = arith.mulf %232, %231 : vector<22x22xf32>
    %234 = arith.addf %230, %233 : vector<22x22xf32>
    %235 = vector.extract_strided_slice %219 {offsets = [0, 4], sizes = [22, 22], strides = [1, 1]} : vector<22x32xf32> to vector<22x22xf32>
    %cst_63 = arith.constant 0.213005543 : f32
    %236 = vector.broadcast %cst_63 : f32 to vector<22x22xf32>
    %237 = arith.mulf %236, %235 : vector<22x22xf32>
    %238 = arith.addf %234, %237 : vector<22x22xf32>
    %239 = vector.extract_strided_slice %219 {offsets = [0, 5], sizes = [22, 22], strides = [1, 1]} : vector<22x32xf32> to vector<22x22xf32>
    %cst_64 = arith.constant 0.266011715 : f32
    %240 = vector.broadcast %cst_64 : f32 to vector<22x22xf32>
    %241 = arith.mulf %240, %239 : vector<22x22xf32>
    %242 = arith.addf %238, %241 : vector<22x22xf32>
    %243 = vector.extract_strided_slice %219 {offsets = [0, 6], sizes = [22, 22], strides = [1, 1]} : vector<22x32xf32> to vector<22x22xf32>
    %cst_65 = arith.constant 0.213005543 : f32
    %244 = vector.broadcast %cst_65 : f32 to vector<22x22xf32>
    %245 = arith.mulf %244, %243 : vector<22x22xf32>
    %246 = arith.addf %242, %245 : vector<22x22xf32>
    %247 = vector.extract_strided_slice %219 {offsets = [0, 7], sizes = [22, 22], strides = [1, 1]} : vector<22x32xf32> to vector<22x22xf32>
    %cst_66 = arith.constant 0.109360687 : f32
    %248 = vector.broadcast %cst_66 : f32 to vector<22x22xf32>
    %249 = arith.mulf %248, %247 : vector<22x22xf32>
    %250 = arith.addf %246, %249 : vector<22x22xf32>
    %251 = vector.extract_strided_slice %219 {offsets = [0, 8], sizes = [22, 22], strides = [1, 1]} : vector<22x32xf32> to vector<22x22xf32>
    %cst_67 = arith.constant 0.0360007733 : f32
    %252 = vector.broadcast %cst_67 : f32 to vector<22x22xf32>
    %253 = arith.mulf %252, %251 : vector<22x22xf32>
    %254 = arith.addf %250, %253 : vector<22x22xf32>
    %255 = vector.extract_strided_slice %219 {offsets = [0, 9], sizes = [22, 22], strides = [1, 1]} : vector<22x32xf32> to vector<22x22xf32>
    %cst_68 = arith.constant 0.00759875821 : f32
    %256 = vector.broadcast %cst_68 : f32 to vector<22x22xf32>
    %257 = arith.mulf %256, %255 : vector<22x22xf32>
    %258 = arith.addf %254, %257 : vector<22x22xf32>
    %259 = vector.extract_strided_slice %219 {offsets = [0, 10], sizes = [22, 22], strides = [1, 1]} : vector<22x32xf32> to vector<22x22xf32>
    %cst_69 = arith.constant 0.00102838012 : f32
    %260 = vector.broadcast %cst_69 : f32 to vector<22x22xf32>
    %261 = arith.mulf %260, %259 : vector<22x22xf32>
    %262 = arith.addf %258, %261 : vector<22x22xf32>
    %263 = arith.mulf %3, %3 : vector<32x32xf32>
    %264 = vector.extract_strided_slice %263 {offsets = [0, 0], sizes = [22, 32], strides = [1, 1]} : vector<32x32xf32> to vector<22x32xf32>
    %cst_70 = arith.constant 0.00102838012 : f32
    %265 = vector.broadcast %cst_70 : f32 to vector<22x32xf32>
    %266 = arith.mulf %265, %264 : vector<22x32xf32>
    %267 = vector.extract_strided_slice %263 {offsets = [1, 0], sizes = [22, 32], strides = [1, 1]} : vector<32x32xf32> to vector<22x32xf32>
    %cst_71 = arith.constant 0.00759875821 : f32
    %268 = vector.broadcast %cst_71 : f32 to vector<22x32xf32>
    %269 = arith.mulf %268, %267 : vector<22x32xf32>
    %270 = arith.addf %266, %269 : vector<22x32xf32>
    %271 = vector.extract_strided_slice %263 {offsets = [2, 0], sizes = [22, 32], strides = [1, 1]} : vector<32x32xf32> to vector<22x32xf32>
    %cst_72 = arith.constant 0.0360007733 : f32
    %272 = vector.broadcast %cst_72 : f32 to vector<22x32xf32>
    %273 = arith.mulf %272, %271 : vector<22x32xf32>
    %274 = arith.addf %270, %273 : vector<22x32xf32>
    %275 = vector.extract_strided_slice %263 {offsets = [3, 0], sizes = [22, 32], strides = [1, 1]} : vector<32x32xf32> to vector<22x32xf32>
    %cst_73 = arith.constant 0.109360687 : f32
    %276 = vector.broadcast %cst_73 : f32 to vector<22x32xf32>
    %277 = arith.mulf %276, %275 : vector<22x32xf32>
    %278 = arith.addf %274, %277 : vector<22x32xf32>
    %279 = vector.extract_strided_slice %263 {offsets = [4, 0], sizes = [22, 32], strides = [1, 1]} : vector<32x32xf32> to vector<22x32xf32>
    %cst_74 = arith.constant 0.213005543 : f32
    %280 = vector.broadcast %cst_74 : f32 to vector<22x32xf32>
    %281 = arith.mulf %280, %279 : vector<22x32xf32>
    %282 = arith.addf %278, %281 : vector<22x32xf32>
    %283 = vector.extract_strided_slice %263 {offsets = [5, 0], sizes = [22, 32], strides = [1, 1]} : vector<32x32xf32> to vector<22x32xf32>
    %cst_75 = arith.constant 0.266011715 : f32
    %284 = vector.broadcast %cst_75 : f32 to vector<22x32xf32>
    %285 = arith.mulf %284, %283 : vector<22x32xf32>
    %286 = arith.addf %282, %285 : vector<22x32xf32>
    %287 = vector.extract_strided_slice %263 {offsets = [6, 0], sizes = [22, 32], strides = [1, 1]} : vector<32x32xf32> to vector<22x32xf32>
    %cst_76 = arith.constant 0.213005543 : f32
    %288 = vector.broadcast %cst_76 : f32 to vector<22x32xf32>
    %289 = arith.mulf %288, %287 : vector<22x32xf32>
    %290 = arith.addf %286, %289 : vector<22x32xf32>
    %291 = vector.extract_strided_slice %263 {offsets = [7, 0], sizes = [22, 32], strides = [1, 1]} : vector<32x32xf32> to vector<22x32xf32>
    %cst_77 = arith.constant 0.109360687 : f32
    %292 = vector.broadcast %cst_77 : f32 to vector<22x32xf32>
    %293 = arith.mulf %292, %291 : vector<22x32xf32>
    %294 = arith.addf %290, %293 : vector<22x32xf32>
    %295 = vector.extract_strided_slice %263 {offsets = [8, 0], sizes = [22, 32], strides = [1, 1]} : vector<32x32xf32> to vector<22x32xf32>
    %cst_78 = arith.constant 0.0360007733 : f32
    %296 = vector.broadcast %cst_78 : f32 to vector<22x32xf32>
    %297 = arith.mulf %296, %295 : vector<22x32xf32>
    %298 = arith.addf %294, %297 : vector<22x32xf32>
    %299 = vector.extract_strided_slice %263 {offsets = [9, 0], sizes = [22, 32], strides = [1, 1]} : vector<32x32xf32> to vector<22x32xf32>
    %cst_79 = arith.constant 0.00759875821 : f32
    %300 = vector.broadcast %cst_79 : f32 to vector<22x32xf32>
    %301 = arith.mulf %300, %299 : vector<22x32xf32>
    %302 = arith.addf %298, %301 : vector<22x32xf32>
    %303 = vector.extract_strided_slice %263 {offsets = [10, 0], sizes = [22, 32], strides = [1, 1]} : vector<32x32xf32> to vector<22x32xf32>
    %cst_80 = arith.constant 0.00102838012 : f32
    %304 = vector.broadcast %cst_80 : f32 to vector<22x32xf32>
    %305 = arith.mulf %304, %303 : vector<22x32xf32>
    %306 = arith.addf %302, %305 : vector<22x32xf32>
    %307 = vector.extract_strided_slice %306 {offsets = [0, 0], sizes = [22, 22], strides = [1, 1]} : vector<22x32xf32> to vector<22x22xf32>
    %cst_81 = arith.constant 0.00102838012 : f32
    %308 = vector.broadcast %cst_81 : f32 to vector<22x22xf32>
    %309 = arith.mulf %308, %307 : vector<22x22xf32>
    %310 = vector.extract_strided_slice %306 {offsets = [0, 1], sizes = [22, 22], strides = [1, 1]} : vector<22x32xf32> to vector<22x22xf32>
    %cst_82 = arith.constant 0.00759875821 : f32
    %311 = vector.broadcast %cst_82 : f32 to vector<22x22xf32>
    %312 = arith.mulf %311, %310 : vector<22x22xf32>
    %313 = arith.addf %309, %312 : vector<22x22xf32>
    %314 = vector.extract_strided_slice %306 {offsets = [0, 2], sizes = [22, 22], strides = [1, 1]} : vector<22x32xf32> to vector<22x22xf32>
    %cst_83 = arith.constant 0.0360007733 : f32
    %315 = vector.broadcast %cst_83 : f32 to vector<22x22xf32>
    %316 = arith.mulf %315, %314 : vector<22x22xf32>
    %317 = arith.addf %313, %316 : vector<22x22xf32>
    %318 = vector.extract_strided_slice %306 {offsets = [0, 3], sizes = [22, 22], strides = [1, 1]} : vector<22x32xf32> to vector<22x22xf32>
    %cst_84 = arith.constant 0.109360687 : f32
    %319 = vector.broadcast %cst_84 : f32 to vector<22x22xf32>
    %320 = arith.mulf %319, %318 : vector<22x22xf32>
    %321 = arith.addf %317, %320 : vector<22x22xf32>
    %322 = vector.extract_strided_slice %306 {offsets = [0, 4], sizes = [22, 22], strides = [1, 1]} : vector<22x32xf32> to vector<22x22xf32>
    %cst_85 = arith.constant 0.213005543 : f32
    %323 = vector.broadcast %cst_85 : f32 to vector<22x22xf32>
    %324 = arith.mulf %323, %322 : vector<22x22xf32>
    %325 = arith.addf %321, %324 : vector<22x22xf32>
    %326 = vector.extract_strided_slice %306 {offsets = [0, 5], sizes = [22, 22], strides = [1, 1]} : vector<22x32xf32> to vector<22x22xf32>
    %cst_86 = arith.constant 0.266011715 : f32
    %327 = vector.broadcast %cst_86 : f32 to vector<22x22xf32>
    %328 = arith.mulf %327, %326 : vector<22x22xf32>
    %329 = arith.addf %325, %328 : vector<22x22xf32>
    %330 = vector.extract_strided_slice %306 {offsets = [0, 6], sizes = [22, 22], strides = [1, 1]} : vector<22x32xf32> to vector<22x22xf32>
    %cst_87 = arith.constant 0.213005543 : f32
    %331 = vector.broadcast %cst_87 : f32 to vector<22x22xf32>
    %332 = arith.mulf %331, %330 : vector<22x22xf32>
    %333 = arith.addf %329, %332 : vector<22x22xf32>
    %334 = vector.extract_strided_slice %306 {offsets = [0, 7], sizes = [22, 22], strides = [1, 1]} : vector<22x32xf32> to vector<22x22xf32>
    %cst_88 = arith.constant 0.109360687 : f32
    %335 = vector.broadcast %cst_88 : f32 to vector<22x22xf32>
    %336 = arith.mulf %335, %334 : vector<22x22xf32>
    %337 = arith.addf %333, %336 : vector<22x22xf32>
    %338 = vector.extract_strided_slice %306 {offsets = [0, 8], sizes = [22, 22], strides = [1, 1]} : vector<22x32xf32> to vector<22x22xf32>
    %cst_89 = arith.constant 0.0360007733 : f32
    %339 = vector.broadcast %cst_89 : f32 to vector<22x22xf32>
    %340 = arith.mulf %339, %338 : vector<22x22xf32>
    %341 = arith.addf %337, %340 : vector<22x22xf32>
    %342 = vector.extract_strided_slice %306 {offsets = [0, 9], sizes = [22, 22], strides = [1, 1]} : vector<22x32xf32> to vector<22x22xf32>
    %cst_90 = arith.constant 0.00759875821 : f32
    %343 = vector.broadcast %cst_90 : f32 to vector<22x22xf32>
    %344 = arith.mulf %343, %342 : vector<22x22xf32>
    %345 = arith.addf %341, %344 : vector<22x22xf32>
    %346 = vector.extract_strided_slice %306 {offsets = [0, 10], sizes = [22, 22], strides = [1, 1]} : vector<22x32xf32> to vector<22x22xf32>
    %cst_91 = arith.constant 0.00102838012 : f32
    %347 = vector.broadcast %cst_91 : f32 to vector<22x22xf32>
    %348 = arith.mulf %347, %346 : vector<22x22xf32>
    %349 = arith.addf %345, %348 : vector<22x22xf32>
    %350 = arith.mulf %1, %3 : vector<32x32xf32>
    %351 = vector.extract_strided_slice %350 {offsets = [0, 0], sizes = [22, 32], strides = [1, 1]} : vector<32x32xf32> to vector<22x32xf32>
    %cst_92 = arith.constant 0.00102838012 : f32
    %352 = vector.broadcast %cst_92 : f32 to vector<22x32xf32>
    %353 = arith.mulf %352, %351 : vector<22x32xf32>
    %354 = vector.extract_strided_slice %350 {offsets = [1, 0], sizes = [22, 32], strides = [1, 1]} : vector<32x32xf32> to vector<22x32xf32>
    %cst_93 = arith.constant 0.00759875821 : f32
    %355 = vector.broadcast %cst_93 : f32 to vector<22x32xf32>
    %356 = arith.mulf %355, %354 : vector<22x32xf32>
    %357 = arith.addf %353, %356 : vector<22x32xf32>
    %358 = vector.extract_strided_slice %350 {offsets = [2, 0], sizes = [22, 32], strides = [1, 1]} : vector<32x32xf32> to vector<22x32xf32>
    %cst_94 = arith.constant 0.0360007733 : f32
    %359 = vector.broadcast %cst_94 : f32 to vector<22x32xf32>
    %360 = arith.mulf %359, %358 : vector<22x32xf32>
    %361 = arith.addf %357, %360 : vector<22x32xf32>
    %362 = vector.extract_strided_slice %350 {offsets = [3, 0], sizes = [22, 32], strides = [1, 1]} : vector<32x32xf32> to vector<22x32xf32>
    %cst_95 = arith.constant 0.109360687 : f32
    %363 = vector.broadcast %cst_95 : f32 to vector<22x32xf32>
    %364 = arith.mulf %363, %362 : vector<22x32xf32>
    %365 = arith.addf %361, %364 : vector<22x32xf32>
    %366 = vector.extract_strided_slice %350 {offsets = [4, 0], sizes = [22, 32], strides = [1, 1]} : vector<32x32xf32> to vector<22x32xf32>
    %cst_96 = arith.constant 0.213005543 : f32
    %367 = vector.broadcast %cst_96 : f32 to vector<22x32xf32>
    %368 = arith.mulf %367, %366 : vector<22x32xf32>
    %369 = arith.addf %365, %368 : vector<22x32xf32>
    %370 = vector.extract_strided_slice %350 {offsets = [5, 0], sizes = [22, 32], strides = [1, 1]} : vector<32x32xf32> to vector<22x32xf32>
    %cst_97 = arith.constant 0.266011715 : f32
    %371 = vector.broadcast %cst_97 : f32 to vector<22x32xf32>
    %372 = arith.mulf %371, %370 : vector<22x32xf32>
    %373 = arith.addf %369, %372 : vector<22x32xf32>
    %374 = vector.extract_strided_slice %350 {offsets = [6, 0], sizes = [22, 32], strides = [1, 1]} : vector<32x32xf32> to vector<22x32xf32>
    %cst_98 = arith.constant 0.213005543 : f32
    %375 = vector.broadcast %cst_98 : f32 to vector<22x32xf32>
    %376 = arith.mulf %375, %374 : vector<22x32xf32>
    %377 = arith.addf %373, %376 : vector<22x32xf32>
    %378 = vector.extract_strided_slice %350 {offsets = [7, 0], sizes = [22, 32], strides = [1, 1]} : vector<32x32xf32> to vector<22x32xf32>
    %cst_99 = arith.constant 0.109360687 : f32
    %379 = vector.broadcast %cst_99 : f32 to vector<22x32xf32>
    %380 = arith.mulf %379, %378 : vector<22x32xf32>
    %381 = arith.addf %377, %380 : vector<22x32xf32>
    %382 = vector.extract_strided_slice %350 {offsets = [8, 0], sizes = [22, 32], strides = [1, 1]} : vector<32x32xf32> to vector<22x32xf32>
    %cst_100 = arith.constant 0.0360007733 : f32
    %383 = vector.broadcast %cst_100 : f32 to vector<22x32xf32>
    %384 = arith.mulf %383, %382 : vector<22x32xf32>
    %385 = arith.addf %381, %384 : vector<22x32xf32>
    %386 = vector.extract_strided_slice %350 {offsets = [9, 0], sizes = [22, 32], strides = [1, 1]} : vector<32x32xf32> to vector<22x32xf32>
    %cst_101 = arith.constant 0.00759875821 : f32
    %387 = vector.broadcast %cst_101 : f32 to vector<22x32xf32>
    %388 = arith.mulf %387, %386 : vector<22x32xf32>
    %389 = arith.addf %385, %388 : vector<22x32xf32>
    %390 = vector.extract_strided_slice %350 {offsets = [10, 0], sizes = [22, 32], strides = [1, 1]} : vector<32x32xf32> to vector<22x32xf32>
    %cst_102 = arith.constant 0.00102838012 : f32
    %391 = vector.broadcast %cst_102 : f32 to vector<22x32xf32>
    %392 = arith.mulf %391, %390 : vector<22x32xf32>
    %393 = arith.addf %389, %392 : vector<22x32xf32>
    %394 = vector.extract_strided_slice %393 {offsets = [0, 0], sizes = [22, 22], strides = [1, 1]} : vector<22x32xf32> to vector<22x22xf32>
    %cst_103 = arith.constant 0.00102838012 : f32
    %395 = vector.broadcast %cst_103 : f32 to vector<22x22xf32>
    %396 = arith.mulf %395, %394 : vector<22x22xf32>
    %397 = vector.extract_strided_slice %393 {offsets = [0, 1], sizes = [22, 22], strides = [1, 1]} : vector<22x32xf32> to vector<22x22xf32>
    %cst_104 = arith.constant 0.00759875821 : f32
    %398 = vector.broadcast %cst_104 : f32 to vector<22x22xf32>
    %399 = arith.mulf %398, %397 : vector<22x22xf32>
    %400 = arith.addf %396, %399 : vector<22x22xf32>
    %401 = vector.extract_strided_slice %393 {offsets = [0, 2], sizes = [22, 22], strides = [1, 1]} : vector<22x32xf32> to vector<22x22xf32>
    %cst_105 = arith.constant 0.0360007733 : f32
    %402 = vector.broadcast %cst_105 : f32 to vector<22x22xf32>
    %403 = arith.mulf %402, %401 : vector<22x22xf32>
    %404 = arith.addf %400, %403 : vector<22x22xf32>
    %405 = vector.extract_strided_slice %393 {offsets = [0, 3], sizes = [22, 22], strides = [1, 1]} : vector<22x32xf32> to vector<22x22xf32>
    %cst_106 = arith.constant 0.109360687 : f32
    %406 = vector.broadcast %cst_106 : f32 to vector<22x22xf32>
    %407 = arith.mulf %406, %405 : vector<22x22xf32>
    %408 = arith.addf %404, %407 : vector<22x22xf32>
    %409 = vector.extract_strided_slice %393 {offsets = [0, 4], sizes = [22, 22], strides = [1, 1]} : vector<22x32xf32> to vector<22x22xf32>
    %cst_107 = arith.constant 0.213005543 : f32
    %410 = vector.broadcast %cst_107 : f32 to vector<22x22xf32>
    %411 = arith.mulf %410, %409 : vector<22x22xf32>
    %412 = arith.addf %408, %411 : vector<22x22xf32>
    %413 = vector.extract_strided_slice %393 {offsets = [0, 5], sizes = [22, 22], strides = [1, 1]} : vector<22x32xf32> to vector<22x22xf32>
    %cst_108 = arith.constant 0.266011715 : f32
    %414 = vector.broadcast %cst_108 : f32 to vector<22x22xf32>
    %415 = arith.mulf %414, %413 : vector<22x22xf32>
    %416 = arith.addf %412, %415 : vector<22x22xf32>
    %417 = vector.extract_strided_slice %393 {offsets = [0, 6], sizes = [22, 22], strides = [1, 1]} : vector<22x32xf32> to vector<22x22xf32>
    %cst_109 = arith.constant 0.213005543 : f32
    %418 = vector.broadcast %cst_109 : f32 to vector<22x22xf32>
    %419 = arith.mulf %418, %417 : vector<22x22xf32>
    %420 = arith.addf %416, %419 : vector<22x22xf32>
    %421 = vector.extract_strided_slice %393 {offsets = [0, 7], sizes = [22, 22], strides = [1, 1]} : vector<22x32xf32> to vector<22x22xf32>
    %cst_110 = arith.constant 0.109360687 : f32
    %422 = vector.broadcast %cst_110 : f32 to vector<22x22xf32>
    %423 = arith.mulf %422, %421 : vector<22x22xf32>
    %424 = arith.addf %420, %423 : vector<22x22xf32>
    %425 = vector.extract_strided_slice %393 {offsets = [0, 8], sizes = [22, 22], strides = [1, 1]} : vector<22x32xf32> to vector<22x22xf32>
    %cst_111 = arith.constant 0.0360007733 : f32
    %426 = vector.broadcast %cst_111 : f32 to vector<22x22xf32>
    %427 = arith.mulf %426, %425 : vector<22x22xf32>
    %428 = arith.addf %424, %427 : vector<22x22xf32>
    %429 = vector.extract_strided_slice %393 {offsets = [0, 9], sizes = [22, 22], strides = [1, 1]} : vector<22x32xf32> to vector<22x22xf32>
    %cst_112 = arith.constant 0.00759875821 : f32
    %430 = vector.broadcast %cst_112 : f32 to vector<22x22xf32>
    %431 = arith.mulf %430, %429 : vector<22x22xf32>
    %432 = arith.addf %428, %431 : vector<22x22xf32>
    %433 = vector.extract_strided_slice %393 {offsets = [0, 10], sizes = [22, 22], strides = [1, 1]} : vector<22x32xf32> to vector<22x22xf32>
    %cst_113 = arith.constant 0.00102838012 : f32
    %434 = vector.broadcast %cst_113 : f32 to vector<22x22xf32>
    %435 = arith.mulf %434, %433 : vector<22x22xf32>
    %436 = arith.addf %432, %435 : vector<22x22xf32>
    %437 = arith.mulf %89, %89 : vector<22x22xf32>
    %438 = arith.subf %262, %437 : vector<22x22xf32>
    %439 = arith.mulf %175, %175 : vector<22x22xf32>
    %440 = arith.subf %349, %439 : vector<22x22xf32>
    %441 = arith.mulf %89, %175 : vector<22x22xf32>
    %442 = arith.subf %436, %441 : vector<22x22xf32>
    %cst_114 = arith.constant 1.000000e+00 : f32
    %443 = vector.broadcast %cst_114 : f32 to vector<22x22xf32>
    %444 = arith.addf %89, %443 : vector<22x22xf32>
    %cst_115 = arith.constant 1.000000e+00 : f32
    %445 = vector.broadcast %cst_115 : f32 to vector<22x22xf32>
    %446 = arith.addf %175, %445 : vector<22x22xf32>
    %447 = arith.mulf %444, %444 : vector<22x22xf32>
    %448 = arith.mulf %446, %446 : vector<22x22xf32>
    %449 = arith.mulf %444, %446 : vector<22x22xf32>
    %cst_116 = arith.constant 2.000000e+00 : f32
    %450 = vector.broadcast %cst_116 : f32 to vector<22x22xf32>
    %451 = arith.mulf %450, %442 : vector<22x22xf32>
    %cst_117 = arith.constant 3.600000e-03 : f32
    %452 = vector.broadcast %cst_117 : f32 to vector<22x22xf32>
    %453 = arith.addf %451, %452 : vector<22x22xf32>
    %454 = arith.addf %438, %440 : vector<22x22xf32>
    %cst_118 = arith.constant 3.600000e-03 : f32
    %455 = vector.broadcast %cst_118 : f32 to vector<22x22xf32>
    %456 = arith.addf %454, %455 : vector<22x22xf32>
    %457 = tpu.reciprocal %456 {approx = true} : vector<22x22xf32> -> vector<22x22xf32>
    %458 = arith.mulf %456, %457 : vector<22x22xf32>
    %cst_119 = arith.constant 2.000000e+00 : f32
    %459 = vector.broadcast %cst_119 : f32 to vector<22x22xf32>
    %460 = arith.subf %459, %458 : vector<22x22xf32>
    %461 = arith.mulf %457, %460 : vector<22x22xf32>
    %462 = arith.mulf %453, %461 : vector<22x22xf32>
    %cst_120 = arith.constant 2.000000e+00 : f32
    %463 = vector.broadcast %cst_120 : f32 to vector<22x22xf32>
    %464 = arith.mulf %463, %449 : vector<22x22xf32>
    %cst_121 = arith.constant 4.000000e-04 : f32
    %465 = vector.broadcast %cst_121 : f32 to vector<22x22xf32>
    %466 = arith.addf %464, %465 : vector<22x22xf32>
    %467 = arith.mulf %466, %462 : vector<22x22xf32>
    %468 = arith.addf %447, %448 : vector<22x22xf32>
    %cst_122 = arith.constant 4.000000e-04 : f32
    %469 = vector.broadcast %cst_122 : f32 to vector<22x22xf32>
    %470 = arith.addf %468, %469 : vector<22x22xf32>
    %471 = tpu.reciprocal %470 {approx = true} : vector<22x22xf32> -> vector<22x22xf32>
    %472 = arith.mulf %470, %471 : vector<22x22xf32>
    %cst_123 = arith.constant 2.000000e+00 : f32
    %473 = vector.broadcast %cst_123 : f32 to vector<22x22xf32>
    %474 = arith.subf %473, %472 : vector<22x22xf32>
    %475 = arith.mulf %471, %474 : vector<22x22xf32>
    %476 = arith.mulf %467, %475 : vector<22x22xf32>
    %477 = vector.shape_cast %476 : vector<22x22xf32> to vector<1x22x22xf32>
    %cst_124 = arith.constant dense<0.000000e+00> : vector<1xf32>
    %478 = vector.multi_reduction <add>, %477, %cst_124 [1, 2] : vector<1x22x22xf32> to vector<1xf32>
    %479 = vector.shape_cast %478 : vector<1xf32> to vector<1x1x1xf32>
    %480 = vector.extract %479[0, 0, 0] : f32 from vector<1x1x1xf32>
    %cst_125 = arith.constant 3.44352622E-4 : f32
    %481 = arith.mulf %480, %cst_125 : f32
    %482 = vector.shape_cast %462 : vector<22x22xf32> to vector<1x22x22xf32>
    %cst_126 = arith.constant dense<0.000000e+00> : vector<1xf32>
    %483 = vector.multi_reduction <add>, %482, %cst_126 [1, 2] : vector<1x22x22xf32> to vector<1xf32>
    %484 = vector.shape_cast %483 : vector<1xf32> to vector<1x1x1xf32>
    %485 = vector.extract %484[0, 0, 0] : f32 from vector<1x1x1xf32>
    %cst_127 = arith.constant 3.44352622E-4 : f32
    %486 = arith.mulf %485, %cst_127 : f32
    %c0_128 = arith.constant 0 : index
    %c0_129 = arith.constant 0 : index
    %c0_130 = arith.constant 0 : index
    %487 = vector.load %arg2[%c0_128, %c0_129, %c0_130] : memref<1x16x16xf32, #tpu.memory_space<vmem>>, vector<1x16x16xf32>
    %488 = vector.shape_cast %487 : vector<1x16x16xf32> to vector<16x16xf32>
    %c0_131 = arith.constant 0 : index
    %c0_132 = arith.constant 0 : index
    %c0_133 = arith.constant 0 : index
    %489 = vector.load %arg7[%c0_131, %c0_132, %c0_133] : memref<1x16x16xf32, #tpu.memory_space<vmem>>, vector<1x16x16xf32>
    %490 = vector.shape_cast %489 : vector<1x16x16xf32> to vector<16x16xf32>
    %491 = vector.extract_strided_slice %488 {offsets = [0, 0], sizes = [6, 16], strides = [1, 1]} : vector<16x16xf32> to vector<6x16xf32>
    %cst_134 = arith.constant 0.00102838012 : f32
    %492 = vector.broadcast %cst_134 : f32 to vector<6x16xf32>
    %493 = arith.mulf %492, %491 : vector<6x16xf32>
    %494 = vector.extract_strided_slice %488 {offsets = [1, 0], sizes = [6, 16], strides = [1, 1]} : vector<16x16xf32> to vector<6x16xf32>
    %cst_135 = arith.constant 0.00759875821 : f32
    %495 = vector.broadcast %cst_135 : f32 to vector<6x16xf32>
    %496 = arith.mulf %495, %494 : vector<6x16xf32>
    %497 = arith.addf %493, %496 : vector<6x16xf32>
    %498 = vector.extract_strided_slice %488 {offsets = [2, 0], sizes = [6, 16], strides = [1, 1]} : vector<16x16xf32> to vector<6x16xf32>
    %cst_136 = arith.constant 0.0360007733 : f32
    %499 = vector.broadcast %cst_136 : f32 to vector<6x16xf32>
    %500 = arith.mulf %499, %498 : vector<6x16xf32>
    %501 = arith.addf %497, %500 : vector<6x16xf32>
    %502 = vector.extract_strided_slice %488 {offsets = [3, 0], sizes = [6, 16], strides = [1, 1]} : vector<16x16xf32> to vector<6x16xf32>
    %cst_137 = arith.constant 0.109360687 : f32
    %503 = vector.broadcast %cst_137 : f32 to vector<6x16xf32>
    %504 = arith.mulf %503, %502 : vector<6x16xf32>
    %505 = arith.addf %501, %504 : vector<6x16xf32>
    %506 = vector.extract_strided_slice %488 {offsets = [4, 0], sizes = [6, 16], strides = [1, 1]} : vector<16x16xf32> to vector<6x16xf32>
    %cst_138 = arith.constant 0.213005543 : f32
    %507 = vector.broadcast %cst_138 : f32 to vector<6x16xf32>
    %508 = arith.mulf %507, %506 : vector<6x16xf32>
    %509 = arith.addf %505, %508 : vector<6x16xf32>
    %510 = vector.extract_strided_slice %488 {offsets = [5, 0], sizes = [6, 16], strides = [1, 1]} : vector<16x16xf32> to vector<6x16xf32>
    %cst_139 = arith.constant 0.266011715 : f32
    %511 = vector.broadcast %cst_139 : f32 to vector<6x16xf32>
    %512 = arith.mulf %511, %510 : vector<6x16xf32>
    %513 = arith.addf %509, %512 : vector<6x16xf32>
    %514 = vector.extract_strided_slice %488 {offsets = [6, 0], sizes = [6, 16], strides = [1, 1]} : vector<16x16xf32> to vector<6x16xf32>
    %cst_140 = arith.constant 0.213005543 : f32
    %515 = vector.broadcast %cst_140 : f32 to vector<6x16xf32>
    %516 = arith.mulf %515, %514 : vector<6x16xf32>
    %517 = arith.addf %513, %516 : vector<6x16xf32>
    %518 = vector.extract_strided_slice %488 {offsets = [7, 0], sizes = [6, 16], strides = [1, 1]} : vector<16x16xf32> to vector<6x16xf32>
    %cst_141 = arith.constant 0.109360687 : f32
    %519 = vector.broadcast %cst_141 : f32 to vector<6x16xf32>
    %520 = arith.mulf %519, %518 : vector<6x16xf32>
    %521 = arith.addf %517, %520 : vector<6x16xf32>
    %522 = vector.extract_strided_slice %488 {offsets = [8, 0], sizes = [6, 16], strides = [1, 1]} : vector<16x16xf32> to vector<6x16xf32>
    %cst_142 = arith.constant 0.0360007733 : f32
    %523 = vector.broadcast %cst_142 : f32 to vector<6x16xf32>
    %524 = arith.mulf %523, %522 : vector<6x16xf32>
    %525 = arith.addf %521, %524 : vector<6x16xf32>
    %526 = vector.extract_strided_slice %488 {offsets = [9, 0], sizes = [6, 16], strides = [1, 1]} : vector<16x16xf32> to vector<6x16xf32>
    %cst_143 = arith.constant 0.00759875821 : f32
    %527 = vector.broadcast %cst_143 : f32 to vector<6x16xf32>
    %528 = arith.mulf %527, %526 : vector<6x16xf32>
    %529 = arith.addf %525, %528 : vector<6x16xf32>
    %530 = vector.extract_strided_slice %488 {offsets = [10, 0], sizes = [6, 16], strides = [1, 1]} : vector<16x16xf32> to vector<6x16xf32>
    %cst_144 = arith.constant 0.00102838012 : f32
    %531 = vector.broadcast %cst_144 : f32 to vector<6x16xf32>
    %532 = arith.mulf %531, %530 : vector<6x16xf32>
    %533 = arith.addf %529, %532 : vector<6x16xf32>
    %534 = vector.extract_strided_slice %533 {offsets = [0, 0], sizes = [6, 6], strides = [1, 1]} : vector<6x16xf32> to vector<6x6xf32>
    %cst_145 = arith.constant 0.00102838012 : f32
    %535 = vector.broadcast %cst_145 : f32 to vector<6x6xf32>
    %536 = arith.mulf %535, %534 : vector<6x6xf32>
    %537 = vector.extract_strided_slice %533 {offsets = [0, 1], sizes = [6, 6], strides = [1, 1]} : vector<6x16xf32> to vector<6x6xf32>
    %cst_146 = arith.constant 0.00759875821 : f32
    %538 = vector.broadcast %cst_146 : f32 to vector<6x6xf32>
    %539 = arith.mulf %538, %537 : vector<6x6xf32>
    %540 = arith.addf %536, %539 : vector<6x6xf32>
    %541 = vector.extract_strided_slice %533 {offsets = [0, 2], sizes = [6, 6], strides = [1, 1]} : vector<6x16xf32> to vector<6x6xf32>
    %cst_147 = arith.constant 0.0360007733 : f32
    %542 = vector.broadcast %cst_147 : f32 to vector<6x6xf32>
    %543 = arith.mulf %542, %541 : vector<6x6xf32>
    %544 = arith.addf %540, %543 : vector<6x6xf32>
    %545 = vector.extract_strided_slice %533 {offsets = [0, 3], sizes = [6, 6], strides = [1, 1]} : vector<6x16xf32> to vector<6x6xf32>
    %cst_148 = arith.constant 0.109360687 : f32
    %546 = vector.broadcast %cst_148 : f32 to vector<6x6xf32>
    %547 = arith.mulf %546, %545 : vector<6x6xf32>
    %548 = arith.addf %544, %547 : vector<6x6xf32>
    %549 = vector.extract_strided_slice %533 {offsets = [0, 4], sizes = [6, 6], strides = [1, 1]} : vector<6x16xf32> to vector<6x6xf32>
    %cst_149 = arith.constant 0.213005543 : f32
    %550 = vector.broadcast %cst_149 : f32 to vector<6x6xf32>
    %551 = arith.mulf %550, %549 : vector<6x6xf32>
    %552 = arith.addf %548, %551 : vector<6x6xf32>
    %553 = vector.extract_strided_slice %533 {offsets = [0, 5], sizes = [6, 6], strides = [1, 1]} : vector<6x16xf32> to vector<6x6xf32>
    %cst_150 = arith.constant 0.266011715 : f32
    %554 = vector.broadcast %cst_150 : f32 to vector<6x6xf32>
    %555 = arith.mulf %554, %553 : vector<6x6xf32>
    %556 = arith.addf %552, %555 : vector<6x6xf32>
    %557 = vector.extract_strided_slice %533 {offsets = [0, 6], sizes = [6, 6], strides = [1, 1]} : vector<6x16xf32> to vector<6x6xf32>
    %cst_151 = arith.constant 0.213005543 : f32
    %558 = vector.broadcast %cst_151 : f32 to vector<6x6xf32>
    %559 = arith.mulf %558, %557 : vector<6x6xf32>
    %560 = arith.addf %556, %559 : vector<6x6xf32>
    %561 = vector.extract_strided_slice %533 {offsets = [0, 7], sizes = [6, 6], strides = [1, 1]} : vector<6x16xf32> to vector<6x6xf32>
    %cst_152 = arith.constant 0.109360687 : f32
    %562 = vector.broadcast %cst_152 : f32 to vector<6x6xf32>
    %563 = arith.mulf %562, %561 : vector<6x6xf32>
    %564 = arith.addf %560, %563 : vector<6x6xf32>
    %565 = vector.extract_strided_slice %533 {offsets = [0, 8], sizes = [6, 6], strides = [1, 1]} : vector<6x16xf32> to vector<6x6xf32>
    %cst_153 = arith.constant 0.0360007733 : f32
    %566 = vector.broadcast %cst_153 : f32 to vector<6x6xf32>
    %567 = arith.mulf %566, %565 : vector<6x6xf32>
    %568 = arith.addf %564, %567 : vector<6x6xf32>
    %569 = vector.extract_strided_slice %533 {offsets = [0, 9], sizes = [6, 6], strides = [1, 1]} : vector<6x16xf32> to vector<6x6xf32>
    %cst_154 = arith.constant 0.00759875821 : f32
    %570 = vector.broadcast %cst_154 : f32 to vector<6x6xf32>
    %571 = arith.mulf %570, %569 : vector<6x6xf32>
    %572 = arith.addf %568, %571 : vector<6x6xf32>
    %573 = vector.extract_strided_slice %533 {offsets = [0, 10], sizes = [6, 6], strides = [1, 1]} : vector<6x16xf32> to vector<6x6xf32>
    %cst_155 = arith.constant 0.00102838012 : f32
    %574 = vector.broadcast %cst_155 : f32 to vector<6x6xf32>
    %575 = arith.mulf %574, %573 : vector<6x6xf32>
    %576 = arith.addf %572, %575 : vector<6x6xf32>
    %577 = vector.extract_strided_slice %490 {offsets = [0, 0], sizes = [6, 16], strides = [1, 1]} : vector<16x16xf32> to vector<6x16xf32>
    %cst_156 = arith.constant 0.00102838012 : f32
    %578 = vector.broadcast %cst_156 : f32 to vector<6x16xf32>
    %579 = arith.mulf %578, %577 : vector<6x16xf32>
    %580 = vector.extract_strided_slice %490 {offsets = [1, 0], sizes = [6, 16], strides = [1, 1]} : vector<16x16xf32> to vector<6x16xf32>
    %cst_157 = arith.constant 0.00759875821 : f32
    %581 = vector.broadcast %cst_157 : f32 to vector<6x16xf32>
    %582 = arith.mulf %581, %580 : vector<6x16xf32>
    %583 = arith.addf %579, %582 : vector<6x16xf32>
    %584 = vector.extract_strided_slice %490 {offsets = [2, 0], sizes = [6, 16], strides = [1, 1]} : vector<16x16xf32> to vector<6x16xf32>
    %cst_158 = arith.constant 0.0360007733 : f32
    %585 = vector.broadcast %cst_158 : f32 to vector<6x16xf32>
    %586 = arith.mulf %585, %584 : vector<6x16xf32>
    %587 = arith.addf %583, %586 : vector<6x16xf32>
    %588 = vector.extract_strided_slice %490 {offsets = [3, 0], sizes = [6, 16], strides = [1, 1]} : vector<16x16xf32> to vector<6x16xf32>
    %cst_159 = arith.constant 0.109360687 : f32
    %589 = vector.broadcast %cst_159 : f32 to vector<6x16xf32>
    %590 = arith.mulf %589, %588 : vector<6x16xf32>
    %591 = arith.addf %587, %590 : vector<6x16xf32>
    %592 = vector.extract_strided_slice %490 {offsets = [4, 0], sizes = [6, 16], strides = [1, 1]} : vector<16x16xf32> to vector<6x16xf32>
    %cst_160 = arith.constant 0.213005543 : f32
    %593 = vector.broadcast %cst_160 : f32 to vector<6x16xf32>
    %594 = arith.mulf %593, %592 : vector<6x16xf32>
    %595 = arith.addf %591, %594 : vector<6x16xf32>
    %596 = vector.extract_strided_slice %490 {offsets = [5, 0], sizes = [6, 16], strides = [1, 1]} : vector<16x16xf32> to vector<6x16xf32>
    %cst_161 = arith.constant 0.266011715 : f32
    %597 = vector.broadcast %cst_161 : f32 to vector<6x16xf32>
    %598 = arith.mulf %597, %596 : vector<6x16xf32>
    %599 = arith.addf %595, %598 : vector<6x16xf32>
    %600 = vector.extract_strided_slice %490 {offsets = [6, 0], sizes = [6, 16], strides = [1, 1]} : vector<16x16xf32> to vector<6x16xf32>
    %cst_162 = arith.constant 0.213005543 : f32
    %601 = vector.broadcast %cst_162 : f32 to vector<6x16xf32>
    %602 = arith.mulf %601, %600 : vector<6x16xf32>
    %603 = arith.addf %599, %602 : vector<6x16xf32>
    %604 = vector.extract_strided_slice %490 {offsets = [7, 0], sizes = [6, 16], strides = [1, 1]} : vector<16x16xf32> to vector<6x16xf32>
    %cst_163 = arith.constant 0.109360687 : f32
    %605 = vector.broadcast %cst_163 : f32 to vector<6x16xf32>
    %606 = arith.mulf %605, %604 : vector<6x16xf32>
    %607 = arith.addf %603, %606 : vector<6x16xf32>
    %608 = vector.extract_strided_slice %490 {offsets = [8, 0], sizes = [6, 16], strides = [1, 1]} : vector<16x16xf32> to vector<6x16xf32>
    %cst_164 = arith.constant 0.0360007733 : f32
    %609 = vector.broadcast %cst_164 : f32 to vector<6x16xf32>
    %610 = arith.mulf %609, %608 : vector<6x16xf32>
    %611 = arith.addf %607, %610 : vector<6x16xf32>
    %612 = vector.extract_strided_slice %490 {offsets = [9, 0], sizes = [6, 16], strides = [1, 1]} : vector<16x16xf32> to vector<6x16xf32>
    %cst_165 = arith.constant 0.00759875821 : f32
    %613 = vector.broadcast %cst_165 : f32 to vector<6x16xf32>
    %614 = arith.mulf %613, %612 : vector<6x16xf32>
    %615 = arith.addf %611, %614 : vector<6x16xf32>
    %616 = vector.extract_strided_slice %490 {offsets = [10, 0], sizes = [6, 16], strides = [1, 1]} : vector<16x16xf32> to vector<6x16xf32>
    %cst_166 = arith.constant 0.00102838012 : f32
    %617 = vector.broadcast %cst_166 : f32 to vector<6x16xf32>
    %618 = arith.mulf %617, %616 : vector<6x16xf32>
    %619 = arith.addf %615, %618 : vector<6x16xf32>
    %620 = vector.extract_strided_slice %619 {offsets = [0, 0], sizes = [6, 6], strides = [1, 1]} : vector<6x16xf32> to vector<6x6xf32>
    %cst_167 = arith.constant 0.00102838012 : f32
    %621 = vector.broadcast %cst_167 : f32 to vector<6x6xf32>
    %622 = arith.mulf %621, %620 : vector<6x6xf32>
    %623 = vector.extract_strided_slice %619 {offsets = [0, 1], sizes = [6, 6], strides = [1, 1]} : vector<6x16xf32> to vector<6x6xf32>
    %cst_168 = arith.constant 0.00759875821 : f32
    %624 = vector.broadcast %cst_168 : f32 to vector<6x6xf32>
    %625 = arith.mulf %624, %623 : vector<6x6xf32>
    %626 = arith.addf %622, %625 : vector<6x6xf32>
    %627 = vector.extract_strided_slice %619 {offsets = [0, 2], sizes = [6, 6], strides = [1, 1]} : vector<6x16xf32> to vector<6x6xf32>
    %cst_169 = arith.constant 0.0360007733 : f32
    %628 = vector.broadcast %cst_169 : f32 to vector<6x6xf32>
    %629 = arith.mulf %628, %627 : vector<6x6xf32>
    %630 = arith.addf %626, %629 : vector<6x6xf32>
    %631 = vector.extract_strided_slice %619 {offsets = [0, 3], sizes = [6, 6], strides = [1, 1]} : vector<6x16xf32> to vector<6x6xf32>
    %cst_170 = arith.constant 0.109360687 : f32
    %632 = vector.broadcast %cst_170 : f32 to vector<6x6xf32>
    %633 = arith.mulf %632, %631 : vector<6x6xf32>
    %634 = arith.addf %630, %633 : vector<6x6xf32>
    %635 = vector.extract_strided_slice %619 {offsets = [0, 4], sizes = [6, 6], strides = [1, 1]} : vector<6x16xf32> to vector<6x6xf32>
    %cst_171 = arith.constant 0.213005543 : f32
    %636 = vector.broadcast %cst_171 : f32 to vector<6x6xf32>
    %637 = arith.mulf %636, %635 : vector<6x6xf32>
    %638 = arith.addf %634, %637 : vector<6x6xf32>
    %639 = vector.extract_strided_slice %619 {offsets = [0, 5], sizes = [6, 6], strides = [1, 1]} : vector<6x16xf32> to vector<6x6xf32>
    %cst_172 = arith.constant 0.266011715 : f32
    %640 = vector.broadcast %cst_172 : f32 to vector<6x6xf32>
    %641 = arith.mulf %640, %639 : vector<6x6xf32>
    %642 = arith.addf %638, %641 : vector<6x6xf32>
    %643 = vector.extract_strided_slice %619 {offsets = [0, 6], sizes = [6, 6], strides = [1, 1]} : vector<6x16xf32> to vector<6x6xf32>
    %cst_173 = arith.constant 0.213005543 : f32
    %644 = vector.broadcast %cst_173 : f32 to vector<6x6xf32>
    %645 = arith.mulf %644, %643 : vector<6x6xf32>
    %646 = arith.addf %642, %645 : vector<6x6xf32>
    %647 = vector.extract_strided_slice %619 {offsets = [0, 7], sizes = [6, 6], strides = [1, 1]} : vector<6x16xf32> to vector<6x6xf32>
    %cst_174 = arith.constant 0.109360687 : f32
    %648 = vector.broadcast %cst_174 : f32 to vector<6x6xf32>
    %649 = arith.mulf %648, %647 : vector<6x6xf32>
    %650 = arith.addf %646, %649 : vector<6x6xf32>
    %651 = vector.extract_strided_slice %619 {offsets = [0, 8], sizes = [6, 6], strides = [1, 1]} : vector<6x16xf32> to vector<6x6xf32>
    %cst_175 = arith.constant 0.0360007733 : f32
    %652 = vector.broadcast %cst_175 : f32 to vector<6x6xf32>
    %653 = arith.mulf %652, %651 : vector<6x6xf32>
    %654 = arith.addf %650, %653 : vector<6x6xf32>
    %655 = vector.extract_strided_slice %619 {offsets = [0, 9], sizes = [6, 6], strides = [1, 1]} : vector<6x16xf32> to vector<6x6xf32>
    %cst_176 = arith.constant 0.00759875821 : f32
    %656 = vector.broadcast %cst_176 : f32 to vector<6x6xf32>
    %657 = arith.mulf %656, %655 : vector<6x6xf32>
    %658 = arith.addf %654, %657 : vector<6x6xf32>
    %659 = vector.extract_strided_slice %619 {offsets = [0, 10], sizes = [6, 6], strides = [1, 1]} : vector<6x16xf32> to vector<6x6xf32>
    %cst_177 = arith.constant 0.00102838012 : f32
    %660 = vector.broadcast %cst_177 : f32 to vector<6x6xf32>
    %661 = arith.mulf %660, %659 : vector<6x6xf32>
    %662 = arith.addf %658, %661 : vector<6x6xf32>
    %663 = arith.mulf %488, %488 : vector<16x16xf32>
    %664 = vector.extract_strided_slice %663 {offsets = [0, 0], sizes = [6, 16], strides = [1, 1]} : vector<16x16xf32> to vector<6x16xf32>
    %cst_178 = arith.constant 0.00102838012 : f32
    %665 = vector.broadcast %cst_178 : f32 to vector<6x16xf32>
    %666 = arith.mulf %665, %664 : vector<6x16xf32>
    %667 = vector.extract_strided_slice %663 {offsets = [1, 0], sizes = [6, 16], strides = [1, 1]} : vector<16x16xf32> to vector<6x16xf32>
    %cst_179 = arith.constant 0.00759875821 : f32
    %668 = vector.broadcast %cst_179 : f32 to vector<6x16xf32>
    %669 = arith.mulf %668, %667 : vector<6x16xf32>
    %670 = arith.addf %666, %669 : vector<6x16xf32>
    %671 = vector.extract_strided_slice %663 {offsets = [2, 0], sizes = [6, 16], strides = [1, 1]} : vector<16x16xf32> to vector<6x16xf32>
    %cst_180 = arith.constant 0.0360007733 : f32
    %672 = vector.broadcast %cst_180 : f32 to vector<6x16xf32>
    %673 = arith.mulf %672, %671 : vector<6x16xf32>
    %674 = arith.addf %670, %673 : vector<6x16xf32>
    %675 = vector.extract_strided_slice %663 {offsets = [3, 0], sizes = [6, 16], strides = [1, 1]} : vector<16x16xf32> to vector<6x16xf32>
    %cst_181 = arith.constant 0.109360687 : f32
    %676 = vector.broadcast %cst_181 : f32 to vector<6x16xf32>
    %677 = arith.mulf %676, %675 : vector<6x16xf32>
    %678 = arith.addf %674, %677 : vector<6x16xf32>
    %679 = vector.extract_strided_slice %663 {offsets = [4, 0], sizes = [6, 16], strides = [1, 1]} : vector<16x16xf32> to vector<6x16xf32>
    %cst_182 = arith.constant 0.213005543 : f32
    %680 = vector.broadcast %cst_182 : f32 to vector<6x16xf32>
    %681 = arith.mulf %680, %679 : vector<6x16xf32>
    %682 = arith.addf %678, %681 : vector<6x16xf32>
    %683 = vector.extract_strided_slice %663 {offsets = [5, 0], sizes = [6, 16], strides = [1, 1]} : vector<16x16xf32> to vector<6x16xf32>
    %cst_183 = arith.constant 0.266011715 : f32
    %684 = vector.broadcast %cst_183 : f32 to vector<6x16xf32>
    %685 = arith.mulf %684, %683 : vector<6x16xf32>
    %686 = arith.addf %682, %685 : vector<6x16xf32>
    %687 = vector.extract_strided_slice %663 {offsets = [6, 0], sizes = [6, 16], strides = [1, 1]} : vector<16x16xf32> to vector<6x16xf32>
    %cst_184 = arith.constant 0.213005543 : f32
    %688 = vector.broadcast %cst_184 : f32 to vector<6x16xf32>
    %689 = arith.mulf %688, %687 : vector<6x16xf32>
    %690 = arith.addf %686, %689 : vector<6x16xf32>
    %691 = vector.extract_strided_slice %663 {offsets = [7, 0], sizes = [6, 16], strides = [1, 1]} : vector<16x16xf32> to vector<6x16xf32>
    %cst_185 = arith.constant 0.109360687 : f32
    %692 = vector.broadcast %cst_185 : f32 to vector<6x16xf32>
    %693 = arith.mulf %692, %691 : vector<6x16xf32>
    %694 = arith.addf %690, %693 : vector<6x16xf32>
    %695 = vector.extract_strided_slice %663 {offsets = [8, 0], sizes = [6, 16], strides = [1, 1]} : vector<16x16xf32> to vector<6x16xf32>
    %cst_186 = arith.constant 0.0360007733 : f32
    %696 = vector.broadcast %cst_186 : f32 to vector<6x16xf32>
    %697 = arith.mulf %696, %695 : vector<6x16xf32>
    %698 = arith.addf %694, %697 : vector<6x16xf32>
    %699 = vector.extract_strided_slice %663 {offsets = [9, 0], sizes = [6, 16], strides = [1, 1]} : vector<16x16xf32> to vector<6x16xf32>
    %cst_187 = arith.constant 0.00759875821 : f32
    %700 = vector.broadcast %cst_187 : f32 to vector<6x16xf32>
    %701 = arith.mulf %700, %699 : vector<6x16xf32>
    %702 = arith.addf %698, %701 : vector<6x16xf32>
    %703 = vector.extract_strided_slice %663 {offsets = [10, 0], sizes = [6, 16], strides = [1, 1]} : vector<16x16xf32> to vector<6x16xf32>
    %cst_188 = arith.constant 0.00102838012 : f32
    %704 = vector.broadcast %cst_188 : f32 to vector<6x16xf32>
    %705 = arith.mulf %704, %703 : vector<6x16xf32>
    %706 = arith.addf %702, %705 : vector<6x16xf32>
    %707 = vector.extract_strided_slice %706 {offsets = [0, 0], sizes = [6, 6], strides = [1, 1]} : vector<6x16xf32> to vector<6x6xf32>
    %cst_189 = arith.constant 0.00102838012 : f32
    %708 = vector.broadcast %cst_189 : f32 to vector<6x6xf32>
    %709 = arith.mulf %708, %707 : vector<6x6xf32>
    %710 = vector.extract_strided_slice %706 {offsets = [0, 1], sizes = [6, 6], strides = [1, 1]} : vector<6x16xf32> to vector<6x6xf32>
    %cst_190 = arith.constant 0.00759875821 : f32
    %711 = vector.broadcast %cst_190 : f32 to vector<6x6xf32>
    %712 = arith.mulf %711, %710 : vector<6x6xf32>
    %713 = arith.addf %709, %712 : vector<6x6xf32>
    %714 = vector.extract_strided_slice %706 {offsets = [0, 2], sizes = [6, 6], strides = [1, 1]} : vector<6x16xf32> to vector<6x6xf32>
    %cst_191 = arith.constant 0.0360007733 : f32
    %715 = vector.broadcast %cst_191 : f32 to vector<6x6xf32>
    %716 = arith.mulf %715, %714 : vector<6x6xf32>
    %717 = arith.addf %713, %716 : vector<6x6xf32>
    %718 = vector.extract_strided_slice %706 {offsets = [0, 3], sizes = [6, 6], strides = [1, 1]} : vector<6x16xf32> to vector<6x6xf32>
    %cst_192 = arith.constant 0.109360687 : f32
    %719 = vector.broadcast %cst_192 : f32 to vector<6x6xf32>
    %720 = arith.mulf %719, %718 : vector<6x6xf32>
    %721 = arith.addf %717, %720 : vector<6x6xf32>
    %722 = vector.extract_strided_slice %706 {offsets = [0, 4], sizes = [6, 6], strides = [1, 1]} : vector<6x16xf32> to vector<6x6xf32>
    %cst_193 = arith.constant 0.213005543 : f32
    %723 = vector.broadcast %cst_193 : f32 to vector<6x6xf32>
    %724 = arith.mulf %723, %722 : vector<6x6xf32>
    %725 = arith.addf %721, %724 : vector<6x6xf32>
    %726 = vector.extract_strided_slice %706 {offsets = [0, 5], sizes = [6, 6], strides = [1, 1]} : vector<6x16xf32> to vector<6x6xf32>
    %cst_194 = arith.constant 0.266011715 : f32
    %727 = vector.broadcast %cst_194 : f32 to vector<6x6xf32>
    %728 = arith.mulf %727, %726 : vector<6x6xf32>
    %729 = arith.addf %725, %728 : vector<6x6xf32>
    %730 = vector.extract_strided_slice %706 {offsets = [0, 6], sizes = [6, 6], strides = [1, 1]} : vector<6x16xf32> to vector<6x6xf32>
    %cst_195 = arith.constant 0.213005543 : f32
    %731 = vector.broadcast %cst_195 : f32 to vector<6x6xf32>
    %732 = arith.mulf %731, %730 : vector<6x6xf32>
    %733 = arith.addf %729, %732 : vector<6x6xf32>
    %734 = vector.extract_strided_slice %706 {offsets = [0, 7], sizes = [6, 6], strides = [1, 1]} : vector<6x16xf32> to vector<6x6xf32>
    %cst_196 = arith.constant 0.109360687 : f32
    %735 = vector.broadcast %cst_196 : f32 to vector<6x6xf32>
    %736 = arith.mulf %735, %734 : vector<6x6xf32>
    %737 = arith.addf %733, %736 : vector<6x6xf32>
    %738 = vector.extract_strided_slice %706 {offsets = [0, 8], sizes = [6, 6], strides = [1, 1]} : vector<6x16xf32> to vector<6x6xf32>
    %cst_197 = arith.constant 0.0360007733 : f32
    %739 = vector.broadcast %cst_197 : f32 to vector<6x6xf32>
    %740 = arith.mulf %739, %738 : vector<6x6xf32>
    %741 = arith.addf %737, %740 : vector<6x6xf32>
    %742 = vector.extract_strided_slice %706 {offsets = [0, 9], sizes = [6, 6], strides = [1, 1]} : vector<6x16xf32> to vector<6x6xf32>
    %cst_198 = arith.constant 0.00759875821 : f32
    %743 = vector.broadcast %cst_198 : f32 to vector<6x6xf32>
    %744 = arith.mulf %743, %742 : vector<6x6xf32>
    %745 = arith.addf %741, %744 : vector<6x6xf32>
    %746 = vector.extract_strided_slice %706 {offsets = [0, 10], sizes = [6, 6], strides = [1, 1]} : vector<6x16xf32> to vector<6x6xf32>
    %cst_199 = arith.constant 0.00102838012 : f32
    %747 = vector.broadcast %cst_199 : f32 to vector<6x6xf32>
    %748 = arith.mulf %747, %746 : vector<6x6xf32>
    %749 = arith.addf %745, %748 : vector<6x6xf32>
    %750 = arith.mulf %490, %490 : vector<16x16xf32>
    %751 = vector.extract_strided_slice %750 {offsets = [0, 0], sizes = [6, 16], strides = [1, 1]} : vector<16x16xf32> to vector<6x16xf32>
    %cst_200 = arith.constant 0.00102838012 : f32
    %752 = vector.broadcast %cst_200 : f32 to vector<6x16xf32>
    %753 = arith.mulf %752, %751 : vector<6x16xf32>
    %754 = vector.extract_strided_slice %750 {offsets = [1, 0], sizes = [6, 16], strides = [1, 1]} : vector<16x16xf32> to vector<6x16xf32>
    %cst_201 = arith.constant 0.00759875821 : f32
    %755 = vector.broadcast %cst_201 : f32 to vector<6x16xf32>
    %756 = arith.mulf %755, %754 : vector<6x16xf32>
    %757 = arith.addf %753, %756 : vector<6x16xf32>
    %758 = vector.extract_strided_slice %750 {offsets = [2, 0], sizes = [6, 16], strides = [1, 1]} : vector<16x16xf32> to vector<6x16xf32>
    %cst_202 = arith.constant 0.0360007733 : f32
    %759 = vector.broadcast %cst_202 : f32 to vector<6x16xf32>
    %760 = arith.mulf %759, %758 : vector<6x16xf32>
    %761 = arith.addf %757, %760 : vector<6x16xf32>
    %762 = vector.extract_strided_slice %750 {offsets = [3, 0], sizes = [6, 16], strides = [1, 1]} : vector<16x16xf32> to vector<6x16xf32>
    %cst_203 = arith.constant 0.109360687 : f32
    %763 = vector.broadcast %cst_203 : f32 to vector<6x16xf32>
    %764 = arith.mulf %763, %762 : vector<6x16xf32>
    %765 = arith.addf %761, %764 : vector<6x16xf32>
    %766 = vector.extract_strided_slice %750 {offsets = [4, 0], sizes = [6, 16], strides = [1, 1]} : vector<16x16xf32> to vector<6x16xf32>
    %cst_204 = arith.constant 0.213005543 : f32
    %767 = vector.broadcast %cst_204 : f32 to vector<6x16xf32>
    %768 = arith.mulf %767, %766 : vector<6x16xf32>
    %769 = arith.addf %765, %768 : vector<6x16xf32>
    %770 = vector.extract_strided_slice %750 {offsets = [5, 0], sizes = [6, 16], strides = [1, 1]} : vector<16x16xf32> to vector<6x16xf32>
    %cst_205 = arith.constant 0.266011715 : f32
    %771 = vector.broadcast %cst_205 : f32 to vector<6x16xf32>
    %772 = arith.mulf %771, %770 : vector<6x16xf32>
    %773 = arith.addf %769, %772 : vector<6x16xf32>
    %774 = vector.extract_strided_slice %750 {offsets = [6, 0], sizes = [6, 16], strides = [1, 1]} : vector<16x16xf32> to vector<6x16xf32>
    %cst_206 = arith.constant 0.213005543 : f32
    %775 = vector.broadcast %cst_206 : f32 to vector<6x16xf32>
    %776 = arith.mulf %775, %774 : vector<6x16xf32>
    %777 = arith.addf %773, %776 : vector<6x16xf32>
    %778 = vector.extract_strided_slice %750 {offsets = [7, 0], sizes = [6, 16], strides = [1, 1]} : vector<16x16xf32> to vector<6x16xf32>
    %cst_207 = arith.constant 0.109360687 : f32
    %779 = vector.broadcast %cst_207 : f32 to vector<6x16xf32>
    %780 = arith.mulf %779, %778 : vector<6x16xf32>
    %781 = arith.addf %777, %780 : vector<6x16xf32>
    %782 = vector.extract_strided_slice %750 {offsets = [8, 0], sizes = [6, 16], strides = [1, 1]} : vector<16x16xf32> to vector<6x16xf32>
    %cst_208 = arith.constant 0.0360007733 : f32
    %783 = vector.broadcast %cst_208 : f32 to vector<6x16xf32>
    %784 = arith.mulf %783, %782 : vector<6x16xf32>
    %785 = arith.addf %781, %784 : vector<6x16xf32>
    %786 = vector.extract_strided_slice %750 {offsets = [9, 0], sizes = [6, 16], strides = [1, 1]} : vector<16x16xf32> to vector<6x16xf32>
    %cst_209 = arith.constant 0.00759875821 : f32
    %787 = vector.broadcast %cst_209 : f32 to vector<6x16xf32>
    %788 = arith.mulf %787, %786 : vector<6x16xf32>
    %789 = arith.addf %785, %788 : vector<6x16xf32>
    %790 = vector.extract_strided_slice %750 {offsets = [10, 0], sizes = [6, 16], strides = [1, 1]} : vector<16x16xf32> to vector<6x16xf32>
    %cst_210 = arith.constant 0.00102838012 : f32
    %791 = vector.broadcast %cst_210 : f32 to vector<6x16xf32>
    %792 = arith.mulf %791, %790 : vector<6x16xf32>
    %793 = arith.addf %789, %792 : vector<6x16xf32>
    %794 = vector.extract_strided_slice %793 {offsets = [0, 0], sizes = [6, 6], strides = [1, 1]} : vector<6x16xf32> to vector<6x6xf32>
    %cst_211 = arith.constant 0.00102838012 : f32
    %795 = vector.broadcast %cst_211 : f32 to vector<6x6xf32>
    %796 = arith.mulf %795, %794 : vector<6x6xf32>
    %797 = vector.extract_strided_slice %793 {offsets = [0, 1], sizes = [6, 6], strides = [1, 1]} : vector<6x16xf32> to vector<6x6xf32>
    %cst_212 = arith.constant 0.00759875821 : f32
    %798 = vector.broadcast %cst_212 : f32 to vector<6x6xf32>
    %799 = arith.mulf %798, %797 : vector<6x6xf32>
    %800 = arith.addf %796, %799 : vector<6x6xf32>
    %801 = vector.extract_strided_slice %793 {offsets = [0, 2], sizes = [6, 6], strides = [1, 1]} : vector<6x16xf32> to vector<6x6xf32>
    %cst_213 = arith.constant 0.0360007733 : f32
    %802 = vector.broadcast %cst_213 : f32 to vector<6x6xf32>
    %803 = arith.mulf %802, %801 : vector<6x6xf32>
    %804 = arith.addf %800, %803 : vector<6x6xf32>
    %805 = vector.extract_strided_slice %793 {offsets = [0, 3], sizes = [6, 6], strides = [1, 1]} : vector<6x16xf32> to vector<6x6xf32>
    %cst_214 = arith.constant 0.109360687 : f32
    %806 = vector.broadcast %cst_214 : f32 to vector<6x6xf32>
    %807 = arith.mulf %806, %805 : vector<6x6xf32>
    %808 = arith.addf %804, %807 : vector<6x6xf32>
    %809 = vector.extract_strided_slice %793 {offsets = [0, 4], sizes = [6, 6], strides = [1, 1]} : vector<6x16xf32> to vector<6x6xf32>
    %cst_215 = arith.constant 0.213005543 : f32
    %810 = vector.broadcast %cst_215 : f32 to vector<6x6xf32>
    %811 = arith.mulf %810, %809 : vector<6x6xf32>
    %812 = arith.addf %808, %811 : vector<6x6xf32>
    %813 = vector.extract_strided_slice %793 {offsets = [0, 5], sizes = [6, 6], strides = [1, 1]} : vector<6x16xf32> to vector<6x6xf32>
    %cst_216 = arith.constant 0.266011715 : f32
    %814 = vector.broadcast %cst_216 : f32 to vector<6x6xf32>
    %815 = arith.mulf %814, %813 : vector<6x6xf32>
    %816 = arith.addf %812, %815 : vector<6x6xf32>
    %817 = vector.extract_strided_slice %793 {offsets = [0, 6], sizes = [6, 6], strides = [1, 1]} : vector<6x16xf32> to vector<6x6xf32>
    %cst_217 = arith.constant 0.213005543 : f32
    %818 = vector.broadcast %cst_217 : f32 to vector<6x6xf32>
    %819 = arith.mulf %818, %817 : vector<6x6xf32>
    %820 = arith.addf %816, %819 : vector<6x6xf32>
    %821 = vector.extract_strided_slice %793 {offsets = [0, 7], sizes = [6, 6], strides = [1, 1]} : vector<6x16xf32> to vector<6x6xf32>
    %cst_218 = arith.constant 0.109360687 : f32
    %822 = vector.broadcast %cst_218 : f32 to vector<6x6xf32>
    %823 = arith.mulf %822, %821 : vector<6x6xf32>
    %824 = arith.addf %820, %823 : vector<6x6xf32>
    %825 = vector.extract_strided_slice %793 {offsets = [0, 8], sizes = [6, 6], strides = [1, 1]} : vector<6x16xf32> to vector<6x6xf32>
    %cst_219 = arith.constant 0.0360007733 : f32
    %826 = vector.broadcast %cst_219 : f32 to vector<6x6xf32>
    %827 = arith.mulf %826, %825 : vector<6x6xf32>
    %828 = arith.addf %824, %827 : vector<6x6xf32>
    %829 = vector.extract_strided_slice %793 {offsets = [0, 9], sizes = [6, 6], strides = [1, 1]} : vector<6x16xf32> to vector<6x6xf32>
    %cst_220 = arith.constant 0.00759875821 : f32
    %830 = vector.broadcast %cst_220 : f32 to vector<6x6xf32>
    %831 = arith.mulf %830, %829 : vector<6x6xf32>
    %832 = arith.addf %828, %831 : vector<6x6xf32>
    %833 = vector.extract_strided_slice %793 {offsets = [0, 10], sizes = [6, 6], strides = [1, 1]} : vector<6x16xf32> to vector<6x6xf32>
    %cst_221 = arith.constant 0.00102838012 : f32
    %834 = vector.broadcast %cst_221 : f32 to vector<6x6xf32>
    %835 = arith.mulf %834, %833 : vector<6x6xf32>
    %836 = arith.addf %832, %835 : vector<6x6xf32>
    %837 = arith.mulf %488, %490 : vector<16x16xf32>
    %838 = vector.extract_strided_slice %837 {offsets = [0, 0], sizes = [6, 16], strides = [1, 1]} : vector<16x16xf32> to vector<6x16xf32>
    %cst_222 = arith.constant 0.00102838012 : f32
    %839 = vector.broadcast %cst_222 : f32 to vector<6x16xf32>
    %840 = arith.mulf %839, %838 : vector<6x16xf32>
    %841 = vector.extract_strided_slice %837 {offsets = [1, 0], sizes = [6, 16], strides = [1, 1]} : vector<16x16xf32> to vector<6x16xf32>
    %cst_223 = arith.constant 0.00759875821 : f32
    %842 = vector.broadcast %cst_223 : f32 to vector<6x16xf32>
    %843 = arith.mulf %842, %841 : vector<6x16xf32>
    %844 = arith.addf %840, %843 : vector<6x16xf32>
    %845 = vector.extract_strided_slice %837 {offsets = [2, 0], sizes = [6, 16], strides = [1, 1]} : vector<16x16xf32> to vector<6x16xf32>
    %cst_224 = arith.constant 0.0360007733 : f32
    %846 = vector.broadcast %cst_224 : f32 to vector<6x16xf32>
    %847 = arith.mulf %846, %845 : vector<6x16xf32>
    %848 = arith.addf %844, %847 : vector<6x16xf32>
    %849 = vector.extract_strided_slice %837 {offsets = [3, 0], sizes = [6, 16], strides = [1, 1]} : vector<16x16xf32> to vector<6x16xf32>
    %cst_225 = arith.constant 0.109360687 : f32
    %850 = vector.broadcast %cst_225 : f32 to vector<6x16xf32>
    %851 = arith.mulf %850, %849 : vector<6x16xf32>
    %852 = arith.addf %848, %851 : vector<6x16xf32>
    %853 = vector.extract_strided_slice %837 {offsets = [4, 0], sizes = [6, 16], strides = [1, 1]} : vector<16x16xf32> to vector<6x16xf32>
    %cst_226 = arith.constant 0.213005543 : f32
    %854 = vector.broadcast %cst_226 : f32 to vector<6x16xf32>
    %855 = arith.mulf %854, %853 : vector<6x16xf32>
    %856 = arith.addf %852, %855 : vector<6x16xf32>
    %857 = vector.extract_strided_slice %837 {offsets = [5, 0], sizes = [6, 16], strides = [1, 1]} : vector<16x16xf32> to vector<6x16xf32>
    %cst_227 = arith.constant 0.266011715 : f32
    %858 = vector.broadcast %cst_227 : f32 to vector<6x16xf32>
    %859 = arith.mulf %858, %857 : vector<6x16xf32>
    %860 = arith.addf %856, %859 : vector<6x16xf32>
    %861 = vector.extract_strided_slice %837 {offsets = [6, 0], sizes = [6, 16], strides = [1, 1]} : vector<16x16xf32> to vector<6x16xf32>
    %cst_228 = arith.constant 0.213005543 : f32
    %862 = vector.broadcast %cst_228 : f32 to vector<6x16xf32>
    %863 = arith.mulf %862, %861 : vector<6x16xf32>
    %864 = arith.addf %860, %863 : vector<6x16xf32>
    %865 = vector.extract_strided_slice %837 {offsets = [7, 0], sizes = [6, 16], strides = [1, 1]} : vector<16x16xf32> to vector<6x16xf32>
    %cst_229 = arith.constant 0.109360687 : f32
    %866 = vector.broadcast %cst_229 : f32 to vector<6x16xf32>
    %867 = arith.mulf %866, %865 : vector<6x16xf32>
    %868 = arith.addf %864, %867 : vector<6x16xf32>
    %869 = vector.extract_strided_slice %837 {offsets = [8, 0], sizes = [6, 16], strides = [1, 1]} : vector<16x16xf32> to vector<6x16xf32>
    %cst_230 = arith.constant 0.0360007733 : f32
    %870 = vector.broadcast %cst_230 : f32 to vector<6x16xf32>
    %871 = arith.mulf %870, %869 : vector<6x16xf32>
    %872 = arith.addf %868, %871 : vector<6x16xf32>
    %873 = vector.extract_strided_slice %837 {offsets = [9, 0], sizes = [6, 16], strides = [1, 1]} : vector<16x16xf32> to vector<6x16xf32>
    %cst_231 = arith.constant 0.00759875821 : f32
    %874 = vector.broadcast %cst_231 : f32 to vector<6x16xf32>
    %875 = arith.mulf %874, %873 : vector<6x16xf32>
    %876 = arith.addf %872, %875 : vector<6x16xf32>
    %877 = vector.extract_strided_slice %837 {offsets = [10, 0], sizes = [6, 16], strides = [1, 1]} : vector<16x16xf32> to vector<6x16xf32>
    %cst_232 = arith.constant 0.00102838012 : f32
    %878 = vector.broadcast %cst_232 : f32 to vector<6x16xf32>
    %879 = arith.mulf %878, %877 : vector<6x16xf32>
    %880 = arith.addf %876, %879 : vector<6x16xf32>
    %881 = vector.extract_strided_slice %880 {offsets = [0, 0], sizes = [6, 6], strides = [1, 1]} : vector<6x16xf32> to vector<6x6xf32>
    %cst_233 = arith.constant 0.00102838012 : f32
    %882 = vector.broadcast %cst_233 : f32 to vector<6x6xf32>
    %883 = arith.mulf %882, %881 : vector<6x6xf32>
    %884 = vector.extract_strided_slice %880 {offsets = [0, 1], sizes = [6, 6], strides = [1, 1]} : vector<6x16xf32> to vector<6x6xf32>
    %cst_234 = arith.constant 0.00759875821 : f32
    %885 = vector.broadcast %cst_234 : f32 to vector<6x6xf32>
    %886 = arith.mulf %885, %884 : vector<6x6xf32>
    %887 = arith.addf %883, %886 : vector<6x6xf32>
    %888 = vector.extract_strided_slice %880 {offsets = [0, 2], sizes = [6, 6], strides = [1, 1]} : vector<6x16xf32> to vector<6x6xf32>
    %cst_235 = arith.constant 0.0360007733 : f32
    %889 = vector.broadcast %cst_235 : f32 to vector<6x6xf32>
    %890 = arith.mulf %889, %888 : vector<6x6xf32>
    %891 = arith.addf %887, %890 : vector<6x6xf32>
    %892 = vector.extract_strided_slice %880 {offsets = [0, 3], sizes = [6, 6], strides = [1, 1]} : vector<6x16xf32> to vector<6x6xf32>
    %cst_236 = arith.constant 0.109360687 : f32
    %893 = vector.broadcast %cst_236 : f32 to vector<6x6xf32>
    %894 = arith.mulf %893, %892 : vector<6x6xf32>
    %895 = arith.addf %891, %894 : vector<6x6xf32>
    %896 = vector.extract_strided_slice %880 {offsets = [0, 4], sizes = [6, 6], strides = [1, 1]} : vector<6x16xf32> to vector<6x6xf32>
    %cst_237 = arith.constant 0.213005543 : f32
    %897 = vector.broadcast %cst_237 : f32 to vector<6x6xf32>
    %898 = arith.mulf %897, %896 : vector<6x6xf32>
    %899 = arith.addf %895, %898 : vector<6x6xf32>
    %900 = vector.extract_strided_slice %880 {offsets = [0, 5], sizes = [6, 6], strides = [1, 1]} : vector<6x16xf32> to vector<6x6xf32>
    %cst_238 = arith.constant 0.266011715 : f32
    %901 = vector.broadcast %cst_238 : f32 to vector<6x6xf32>
    %902 = arith.mulf %901, %900 : vector<6x6xf32>
    %903 = arith.addf %899, %902 : vector<6x6xf32>
    %904 = vector.extract_strided_slice %880 {offsets = [0, 6], sizes = [6, 6], strides = [1, 1]} : vector<6x16xf32> to vector<6x6xf32>
    %cst_239 = arith.constant 0.213005543 : f32
    %905 = vector.broadcast %cst_239 : f32 to vector<6x6xf32>
    %906 = arith.mulf %905, %904 : vector<6x6xf32>
    %907 = arith.addf %903, %906 : vector<6x6xf32>
    %908 = vector.extract_strided_slice %880 {offsets = [0, 7], sizes = [6, 6], strides = [1, 1]} : vector<6x16xf32> to vector<6x6xf32>
    %cst_240 = arith.constant 0.109360687 : f32
    %909 = vector.broadcast %cst_240 : f32 to vector<6x6xf32>
    %910 = arith.mulf %909, %908 : vector<6x6xf32>
    %911 = arith.addf %907, %910 : vector<6x6xf32>
    %912 = vector.extract_strided_slice %880 {offsets = [0, 8], sizes = [6, 6], strides = [1, 1]} : vector<6x16xf32> to vector<6x6xf32>
    %cst_241 = arith.constant 0.0360007733 : f32
    %913 = vector.broadcast %cst_241 : f32 to vector<6x6xf32>
    %914 = arith.mulf %913, %912 : vector<6x6xf32>
    %915 = arith.addf %911, %914 : vector<6x6xf32>
    %916 = vector.extract_strided_slice %880 {offsets = [0, 9], sizes = [6, 6], strides = [1, 1]} : vector<6x16xf32> to vector<6x6xf32>
    %cst_242 = arith.constant 0.00759875821 : f32
    %917 = vector.broadcast %cst_242 : f32 to vector<6x6xf32>
    %918 = arith.mulf %917, %916 : vector<6x6xf32>
    %919 = arith.addf %915, %918 : vector<6x6xf32>
    %920 = vector.extract_strided_slice %880 {offsets = [0, 10], sizes = [6, 6], strides = [1, 1]} : vector<6x16xf32> to vector<6x6xf32>
    %cst_243 = arith.constant 0.00102838012 : f32
    %921 = vector.broadcast %cst_243 : f32 to vector<6x6xf32>
    %922 = arith.mulf %921, %920 : vector<6x6xf32>
    %923 = arith.addf %919, %922 : vector<6x6xf32>
    %924 = arith.mulf %576, %576 : vector<6x6xf32>
    %925 = arith.subf %749, %924 : vector<6x6xf32>
    %926 = arith.mulf %662, %662 : vector<6x6xf32>
    %927 = arith.subf %836, %926 : vector<6x6xf32>
    %928 = arith.mulf %576, %662 : vector<6x6xf32>
    %929 = arith.subf %923, %928 : vector<6x6xf32>
    %cst_244 = arith.constant 2.000000e+00 : f32
    %930 = vector.broadcast %cst_244 : f32 to vector<6x6xf32>
    %931 = arith.addf %576, %930 : vector<6x6xf32>
    %cst_245 = arith.constant 2.000000e+00 : f32
    %932 = vector.broadcast %cst_245 : f32 to vector<6x6xf32>
    %933 = arith.addf %662, %932 : vector<6x6xf32>
    %934 = arith.mulf %931, %931 : vector<6x6xf32>
    %935 = arith.mulf %933, %933 : vector<6x6xf32>
    %936 = arith.mulf %931, %933 : vector<6x6xf32>
    %cst_246 = arith.constant 2.000000e+00 : f32
    %937 = vector.broadcast %cst_246 : f32 to vector<6x6xf32>
    %938 = arith.mulf %937, %929 : vector<6x6xf32>
    %cst_247 = arith.constant 3.600000e-03 : f32
    %939 = vector.broadcast %cst_247 : f32 to vector<6x6xf32>
    %940 = arith.addf %938, %939 : vector<6x6xf32>
    %941 = arith.addf %925, %927 : vector<6x6xf32>
    %cst_248 = arith.constant 3.600000e-03 : f32
    %942 = vector.broadcast %cst_248 : f32 to vector<6x6xf32>
    %943 = arith.addf %941, %942 : vector<6x6xf32>
    %944 = tpu.reciprocal %943 {approx = true} : vector<6x6xf32> -> vector<6x6xf32>
    %945 = arith.mulf %943, %944 : vector<6x6xf32>
    %cst_249 = arith.constant 2.000000e+00 : f32
    %946 = vector.broadcast %cst_249 : f32 to vector<6x6xf32>
    %947 = arith.subf %946, %945 : vector<6x6xf32>
    %948 = arith.mulf %944, %947 : vector<6x6xf32>
    %949 = arith.mulf %940, %948 : vector<6x6xf32>
    %cst_250 = arith.constant 2.000000e+00 : f32
    %950 = vector.broadcast %cst_250 : f32 to vector<6x6xf32>
    %951 = arith.mulf %950, %936 : vector<6x6xf32>
    %cst_251 = arith.constant 4.000000e-04 : f32
    %952 = vector.broadcast %cst_251 : f32 to vector<6x6xf32>
    %953 = arith.addf %951, %952 : vector<6x6xf32>
    %954 = arith.mulf %953, %949 : vector<6x6xf32>
    %955 = arith.addf %934, %935 : vector<6x6xf32>
    %cst_252 = arith.constant 4.000000e-04 : f32
    %956 = vector.broadcast %cst_252 : f32 to vector<6x6xf32>
    %957 = arith.addf %955, %956 : vector<6x6xf32>
    %958 = tpu.reciprocal %957 {approx = true} : vector<6x6xf32> -> vector<6x6xf32>
    %959 = arith.mulf %957, %958 : vector<6x6xf32>
    %cst_253 = arith.constant 2.000000e+00 : f32
    %960 = vector.broadcast %cst_253 : f32 to vector<6x6xf32>
    %961 = arith.subf %960, %959 : vector<6x6xf32>
    %962 = arith.mulf %958, %961 : vector<6x6xf32>
    %963 = arith.mulf %954, %962 : vector<6x6xf32>
    %964 = vector.shape_cast %963 : vector<6x6xf32> to vector<1x6x6xf32>
    %cst_254 = arith.constant dense<0.000000e+00> : vector<1xf32>
    %965 = vector.multi_reduction <add>, %964, %cst_254 [1, 2] : vector<1x6x6xf32> to vector<1xf32>
    %966 = vector.shape_cast %965 : vector<1xf32> to vector<1x1x1xf32>
    %967 = vector.extract %966[0, 0, 0] : f32 from vector<1x1x1xf32>
    %cst_255 = arith.constant 0.00462962966 : f32
    %968 = arith.mulf %967, %cst_255 : f32
    %969 = vector.shape_cast %949 : vector<6x6xf32> to vector<1x6x6xf32>
    %cst_256 = arith.constant dense<0.000000e+00> : vector<1xf32>
    %970 = vector.multi_reduction <add>, %969, %cst_256 [1, 2] : vector<1x6x6xf32> to vector<1xf32>
    %971 = vector.shape_cast %970 : vector<1xf32> to vector<1x1x1xf32>
    %972 = vector.extract %971[0, 0, 0] : f32 from vector<1x1x1xf32>
    %cst_257 = arith.constant 0.00462962966 : f32
    %973 = arith.mulf %972, %cst_257 : f32
    %c0_258 = arith.constant 0 : index
    %c0_259 = arith.constant 0 : index
    %c0_260 = arith.constant 0 : index
    %974 = vector.load %arg3[%c0_258, %c0_259, %c0_260] : memref<1x8x8xf32, #tpu.memory_space<vmem>>, vector<1x8x8xf32>
    %975 = vector.shape_cast %974 : vector<1x8x8xf32> to vector<8x8xf32>
    %c0_261 = arith.constant 0 : index
    %c0_262 = arith.constant 0 : index
    %c0_263 = arith.constant 0 : index
    %976 = vector.load %arg8[%c0_261, %c0_262, %c0_263] : memref<1x8x8xf32, #tpu.memory_space<vmem>>, vector<1x8x8xf32>
    %977 = vector.shape_cast %976 : vector<1x8x8xf32> to vector<8x8xf32>
    %978 = vector.extract_strided_slice %975 {offsets = [0, 0], sizes = [1, 8], strides = [1, 1]} : vector<8x8xf32> to vector<1x8xf32>
    %cst_264 = arith.constant 0.00767284352 : f32
    %979 = vector.broadcast %cst_264 : f32 to vector<1x8xf32>
    %980 = arith.mulf %979, %978 : vector<1x8xf32>
    %981 = vector.extract_strided_slice %975 {offsets = [1, 0], sizes = [1, 8], strides = [1, 1]} : vector<8x8xf32> to vector<1x8xf32>
    %cst_265 = arith.constant 0.0363517664 : f32
    %982 = vector.broadcast %cst_265 : f32 to vector<1x8xf32>
    %983 = arith.mulf %982, %981 : vector<1x8xf32>
    %984 = arith.addf %980, %983 : vector<1x8xf32>
    %985 = vector.extract_strided_slice %975 {offsets = [2, 0], sizes = [1, 8], strides = [1, 1]} : vector<8x8xf32> to vector<1x8xf32>
    %cst_266 = arith.constant 0.110426918 : f32
    %986 = vector.broadcast %cst_266 : f32 to vector<1x8xf32>
    %987 = arith.mulf %986, %985 : vector<1x8xf32>
    %988 = arith.addf %984, %987 : vector<1x8xf32>
    %989 = vector.extract_strided_slice %975 {offsets = [3, 0], sizes = [1, 8], strides = [1, 1]} : vector<8x8xf32> to vector<1x8xf32>
    %cst_267 = arith.constant 0.215082273 : f32
    %990 = vector.broadcast %cst_267 : f32 to vector<1x8xf32>
    %991 = arith.mulf %990, %989 : vector<1x8xf32>
    %992 = arith.addf %988, %991 : vector<1x8xf32>
    %993 = vector.extract_strided_slice %975 {offsets = [4, 0], sizes = [1, 8], strides = [1, 1]} : vector<8x8xf32> to vector<1x8xf32>
    %cst_268 = arith.constant 0.268605262 : f32
    %994 = vector.broadcast %cst_268 : f32 to vector<1x8xf32>
    %995 = arith.mulf %994, %993 : vector<1x8xf32>
    %996 = arith.addf %992, %995 : vector<1x8xf32>
    %997 = vector.extract_strided_slice %975 {offsets = [5, 0], sizes = [1, 8], strides = [1, 1]} : vector<8x8xf32> to vector<1x8xf32>
    %cst_269 = arith.constant 0.215082273 : f32
    %998 = vector.broadcast %cst_269 : f32 to vector<1x8xf32>
    %999 = arith.mulf %998, %997 : vector<1x8xf32>
    %1000 = arith.addf %996, %999 : vector<1x8xf32>
    %1001 = vector.extract_strided_slice %975 {offsets = [6, 0], sizes = [1, 8], strides = [1, 1]} : vector<8x8xf32> to vector<1x8xf32>
    %cst_270 = arith.constant 0.110426918 : f32
    %1002 = vector.broadcast %cst_270 : f32 to vector<1x8xf32>
    %1003 = arith.mulf %1002, %1001 : vector<1x8xf32>
    %1004 = arith.addf %1000, %1003 : vector<1x8xf32>
    %1005 = vector.extract_strided_slice %975 {offsets = [7, 0], sizes = [1, 8], strides = [1, 1]} : vector<8x8xf32> to vector<1x8xf32>
    %cst_271 = arith.constant 0.0363517664 : f32
    %1006 = vector.broadcast %cst_271 : f32 to vector<1x8xf32>
    %1007 = arith.mulf %1006, %1005 : vector<1x8xf32>
    %1008 = arith.addf %1004, %1007 : vector<1x8xf32>
    %1009 = vector.extract_strided_slice %1008 {offsets = [0, 0], sizes = [1, 1], strides = [1, 1]} : vector<1x8xf32> to vector<1x1xf32>
    %cst_272 = arith.constant 0.00767284352 : f32
    %1010 = vector.broadcast %cst_272 : f32 to vector<1x1xf32>
    %1011 = arith.mulf %1010, %1009 : vector<1x1xf32>
    %1012 = vector.extract_strided_slice %1008 {offsets = [0, 1], sizes = [1, 1], strides = [1, 1]} : vector<1x8xf32> to vector<1x1xf32>
    %cst_273 = arith.constant 0.0363517664 : f32
    %1013 = vector.broadcast %cst_273 : f32 to vector<1x1xf32>
    %1014 = arith.mulf %1013, %1012 : vector<1x1xf32>
    %1015 = arith.addf %1011, %1014 : vector<1x1xf32>
    %1016 = vector.extract_strided_slice %1008 {offsets = [0, 2], sizes = [1, 1], strides = [1, 1]} : vector<1x8xf32> to vector<1x1xf32>
    %cst_274 = arith.constant 0.110426918 : f32
    %1017 = vector.broadcast %cst_274 : f32 to vector<1x1xf32>
    %1018 = arith.mulf %1017, %1016 : vector<1x1xf32>
    %1019 = arith.addf %1015, %1018 : vector<1x1xf32>
    %1020 = vector.extract_strided_slice %1008 {offsets = [0, 3], sizes = [1, 1], strides = [1, 1]} : vector<1x8xf32> to vector<1x1xf32>
    %cst_275 = arith.constant 0.215082273 : f32
    %1021 = vector.broadcast %cst_275 : f32 to vector<1x1xf32>
    %1022 = arith.mulf %1021, %1020 : vector<1x1xf32>
    %1023 = arith.addf %1019, %1022 : vector<1x1xf32>
    %1024 = vector.extract_strided_slice %1008 {offsets = [0, 4], sizes = [1, 1], strides = [1, 1]} : vector<1x8xf32> to vector<1x1xf32>
    %cst_276 = arith.constant 0.268605262 : f32
    %1025 = vector.broadcast %cst_276 : f32 to vector<1x1xf32>
    %1026 = arith.mulf %1025, %1024 : vector<1x1xf32>
    %1027 = arith.addf %1023, %1026 : vector<1x1xf32>
    %1028 = vector.extract_strided_slice %1008 {offsets = [0, 5], sizes = [1, 1], strides = [1, 1]} : vector<1x8xf32> to vector<1x1xf32>
    %cst_277 = arith.constant 0.215082273 : f32
    %1029 = vector.broadcast %cst_277 : f32 to vector<1x1xf32>
    %1030 = arith.mulf %1029, %1028 : vector<1x1xf32>
    %1031 = arith.addf %1027, %1030 : vector<1x1xf32>
    %1032 = vector.extract_strided_slice %1008 {offsets = [0, 6], sizes = [1, 1], strides = [1, 1]} : vector<1x8xf32> to vector<1x1xf32>
    %cst_278 = arith.constant 0.110426918 : f32
    %1033 = vector.broadcast %cst_278 : f32 to vector<1x1xf32>
    %1034 = arith.mulf %1033, %1032 : vector<1x1xf32>
    %1035 = arith.addf %1031, %1034 : vector<1x1xf32>
    %1036 = vector.extract_strided_slice %1008 {offsets = [0, 7], sizes = [1, 1], strides = [1, 1]} : vector<1x8xf32> to vector<1x1xf32>
    %cst_279 = arith.constant 0.0363517664 : f32
    %1037 = vector.broadcast %cst_279 : f32 to vector<1x1xf32>
    %1038 = arith.mulf %1037, %1036 : vector<1x1xf32>
    %1039 = arith.addf %1035, %1038 : vector<1x1xf32>
    %1040 = vector.extract_strided_slice %977 {offsets = [0, 0], sizes = [1, 8], strides = [1, 1]} : vector<8x8xf32> to vector<1x8xf32>
    %cst_280 = arith.constant 0.00767284352 : f32
    %1041 = vector.broadcast %cst_280 : f32 to vector<1x8xf32>
    %1042 = arith.mulf %1041, %1040 : vector<1x8xf32>
    %1043 = vector.extract_strided_slice %977 {offsets = [1, 0], sizes = [1, 8], strides = [1, 1]} : vector<8x8xf32> to vector<1x8xf32>
    %cst_281 = arith.constant 0.0363517664 : f32
    %1044 = vector.broadcast %cst_281 : f32 to vector<1x8xf32>
    %1045 = arith.mulf %1044, %1043 : vector<1x8xf32>
    %1046 = arith.addf %1042, %1045 : vector<1x8xf32>
    %1047 = vector.extract_strided_slice %977 {offsets = [2, 0], sizes = [1, 8], strides = [1, 1]} : vector<8x8xf32> to vector<1x8xf32>
    %cst_282 = arith.constant 0.110426918 : f32
    %1048 = vector.broadcast %cst_282 : f32 to vector<1x8xf32>
    %1049 = arith.mulf %1048, %1047 : vector<1x8xf32>
    %1050 = arith.addf %1046, %1049 : vector<1x8xf32>
    %1051 = vector.extract_strided_slice %977 {offsets = [3, 0], sizes = [1, 8], strides = [1, 1]} : vector<8x8xf32> to vector<1x8xf32>
    %cst_283 = arith.constant 0.215082273 : f32
    %1052 = vector.broadcast %cst_283 : f32 to vector<1x8xf32>
    %1053 = arith.mulf %1052, %1051 : vector<1x8xf32>
    %1054 = arith.addf %1050, %1053 : vector<1x8xf32>
    %1055 = vector.extract_strided_slice %977 {offsets = [4, 0], sizes = [1, 8], strides = [1, 1]} : vector<8x8xf32> to vector<1x8xf32>
    %cst_284 = arith.constant 0.268605262 : f32
    %1056 = vector.broadcast %cst_284 : f32 to vector<1x8xf32>
    %1057 = arith.mulf %1056, %1055 : vector<1x8xf32>
    %1058 = arith.addf %1054, %1057 : vector<1x8xf32>
    %1059 = vector.extract_strided_slice %977 {offsets = [5, 0], sizes = [1, 8], strides = [1, 1]} : vector<8x8xf32> to vector<1x8xf32>
    %cst_285 = arith.constant 0.215082273 : f32
    %1060 = vector.broadcast %cst_285 : f32 to vector<1x8xf32>
    %1061 = arith.mulf %1060, %1059 : vector<1x8xf32>
    %1062 = arith.addf %1058, %1061 : vector<1x8xf32>
    %1063 = vector.extract_strided_slice %977 {offsets = [6, 0], sizes = [1, 8], strides = [1, 1]} : vector<8x8xf32> to vector<1x8xf32>
    %cst_286 = arith.constant 0.110426918 : f32
    %1064 = vector.broadcast %cst_286 : f32 to vector<1x8xf32>
    %1065 = arith.mulf %1064, %1063 : vector<1x8xf32>
    %1066 = arith.addf %1062, %1065 : vector<1x8xf32>
    %1067 = vector.extract_strided_slice %977 {offsets = [7, 0], sizes = [1, 8], strides = [1, 1]} : vector<8x8xf32> to vector<1x8xf32>
    %cst_287 = arith.constant 0.0363517664 : f32
    %1068 = vector.broadcast %cst_287 : f32 to vector<1x8xf32>
    %1069 = arith.mulf %1068, %1067 : vector<1x8xf32>
    %1070 = arith.addf %1066, %1069 : vector<1x8xf32>
    %1071 = vector.extract_strided_slice %1070 {offsets = [0, 0], sizes = [1, 1], strides = [1, 1]} : vector<1x8xf32> to vector<1x1xf32>
    %cst_288 = arith.constant 0.00767284352 : f32
    %1072 = vector.broadcast %cst_288 : f32 to vector<1x1xf32>
    %1073 = arith.mulf %1072, %1071 : vector<1x1xf32>
    %1074 = vector.extract_strided_slice %1070 {offsets = [0, 1], sizes = [1, 1], strides = [1, 1]} : vector<1x8xf32> to vector<1x1xf32>
    %cst_289 = arith.constant 0.0363517664 : f32
    %1075 = vector.broadcast %cst_289 : f32 to vector<1x1xf32>
    %1076 = arith.mulf %1075, %1074 : vector<1x1xf32>
    %1077 = arith.addf %1073, %1076 : vector<1x1xf32>
    %1078 = vector.extract_strided_slice %1070 {offsets = [0, 2], sizes = [1, 1], strides = [1, 1]} : vector<1x8xf32> to vector<1x1xf32>
    %cst_290 = arith.constant 0.110426918 : f32
    %1079 = vector.broadcast %cst_290 : f32 to vector<1x1xf32>
    %1080 = arith.mulf %1079, %1078 : vector<1x1xf32>
    %1081 = arith.addf %1077, %1080 : vector<1x1xf32>
    %1082 = vector.extract_strided_slice %1070 {offsets = [0, 3], sizes = [1, 1], strides = [1, 1]} : vector<1x8xf32> to vector<1x1xf32>
    %cst_291 = arith.constant 0.215082273 : f32
    %1083 = vector.broadcast %cst_291 : f32 to vector<1x1xf32>
    %1084 = arith.mulf %1083, %1082 : vector<1x1xf32>
    %1085 = arith.addf %1081, %1084 : vector<1x1xf32>
    %1086 = vector.extract_strided_slice %1070 {offsets = [0, 4], sizes = [1, 1], strides = [1, 1]} : vector<1x8xf32> to vector<1x1xf32>
    %cst_292 = arith.constant 0.268605262 : f32
    %1087 = vector.broadcast %cst_292 : f32 to vector<1x1xf32>
    %1088 = arith.mulf %1087, %1086 : vector<1x1xf32>
    %1089 = arith.addf %1085, %1088 : vector<1x1xf32>
    %1090 = vector.extract_strided_slice %1070 {offsets = [0, 5], sizes = [1, 1], strides = [1, 1]} : vector<1x8xf32> to vector<1x1xf32>
    %cst_293 = arith.constant 0.215082273 : f32
    %1091 = vector.broadcast %cst_293 : f32 to vector<1x1xf32>
    %1092 = arith.mulf %1091, %1090 : vector<1x1xf32>
    %1093 = arith.addf %1089, %1092 : vector<1x1xf32>
    %1094 = vector.extract_strided_slice %1070 {offsets = [0, 6], sizes = [1, 1], strides = [1, 1]} : vector<1x8xf32> to vector<1x1xf32>
    %cst_294 = arith.constant 0.110426918 : f32
    %1095 = vector.broadcast %cst_294 : f32 to vector<1x1xf32>
    %1096 = arith.mulf %1095, %1094 : vector<1x1xf32>
    %1097 = arith.addf %1093, %1096 : vector<1x1xf32>
    %1098 = vector.extract_strided_slice %1070 {offsets = [0, 7], sizes = [1, 1], strides = [1, 1]} : vector<1x8xf32> to vector<1x1xf32>
    %cst_295 = arith.constant 0.0363517664 : f32
    %1099 = vector.broadcast %cst_295 : f32 to vector<1x1xf32>
    %1100 = arith.mulf %1099, %1098 : vector<1x1xf32>
    %1101 = arith.addf %1097, %1100 : vector<1x1xf32>
    %1102 = arith.mulf %975, %975 : vector<8x8xf32>
    %1103 = vector.extract_strided_slice %1102 {offsets = [0, 0], sizes = [1, 8], strides = [1, 1]} : vector<8x8xf32> to vector<1x8xf32>
    %cst_296 = arith.constant 0.00767284352 : f32
    %1104 = vector.broadcast %cst_296 : f32 to vector<1x8xf32>
    %1105 = arith.mulf %1104, %1103 : vector<1x8xf32>
    %1106 = vector.extract_strided_slice %1102 {offsets = [1, 0], sizes = [1, 8], strides = [1, 1]} : vector<8x8xf32> to vector<1x8xf32>
    %cst_297 = arith.constant 0.0363517664 : f32
    %1107 = vector.broadcast %cst_297 : f32 to vector<1x8xf32>
    %1108 = arith.mulf %1107, %1106 : vector<1x8xf32>
    %1109 = arith.addf %1105, %1108 : vector<1x8xf32>
    %1110 = vector.extract_strided_slice %1102 {offsets = [2, 0], sizes = [1, 8], strides = [1, 1]} : vector<8x8xf32> to vector<1x8xf32>
    %cst_298 = arith.constant 0.110426918 : f32
    %1111 = vector.broadcast %cst_298 : f32 to vector<1x8xf32>
    %1112 = arith.mulf %1111, %1110 : vector<1x8xf32>
    %1113 = arith.addf %1109, %1112 : vector<1x8xf32>
    %1114 = vector.extract_strided_slice %1102 {offsets = [3, 0], sizes = [1, 8], strides = [1, 1]} : vector<8x8xf32> to vector<1x8xf32>
    %cst_299 = arith.constant 0.215082273 : f32
    %1115 = vector.broadcast %cst_299 : f32 to vector<1x8xf32>
    %1116 = arith.mulf %1115, %1114 : vector<1x8xf32>
    %1117 = arith.addf %1113, %1116 : vector<1x8xf32>
    %1118 = vector.extract_strided_slice %1102 {offsets = [4, 0], sizes = [1, 8], strides = [1, 1]} : vector<8x8xf32> to vector<1x8xf32>
    %cst_300 = arith.constant 0.268605262 : f32
    %1119 = vector.broadcast %cst_300 : f32 to vector<1x8xf32>
    %1120 = arith.mulf %1119, %1118 : vector<1x8xf32>
    %1121 = arith.addf %1117, %1120 : vector<1x8xf32>
    %1122 = vector.extract_strided_slice %1102 {offsets = [5, 0], sizes = [1, 8], strides = [1, 1]} : vector<8x8xf32> to vector<1x8xf32>
    %cst_301 = arith.constant 0.215082273 : f32
    %1123 = vector.broadcast %cst_301 : f32 to vector<1x8xf32>
    %1124 = arith.mulf %1123, %1122 : vector<1x8xf32>
    %1125 = arith.addf %1121, %1124 : vector<1x8xf32>
    %1126 = vector.extract_strided_slice %1102 {offsets = [6, 0], sizes = [1, 8], strides = [1, 1]} : vector<8x8xf32> to vector<1x8xf32>
    %cst_302 = arith.constant 0.110426918 : f32
    %1127 = vector.broadcast %cst_302 : f32 to vector<1x8xf32>
    %1128 = arith.mulf %1127, %1126 : vector<1x8xf32>
    %1129 = arith.addf %1125, %1128 : vector<1x8xf32>
    %1130 = vector.extract_strided_slice %1102 {offsets = [7, 0], sizes = [1, 8], strides = [1, 1]} : vector<8x8xf32> to vector<1x8xf32>
    %cst_303 = arith.constant 0.0363517664 : f32
    %1131 = vector.broadcast %cst_303 : f32 to vector<1x8xf32>
    %1132 = arith.mulf %1131, %1130 : vector<1x8xf32>
    %1133 = arith.addf %1129, %1132 : vector<1x8xf32>
    %1134 = vector.extract_strided_slice %1133 {offsets = [0, 0], sizes = [1, 1], strides = [1, 1]} : vector<1x8xf32> to vector<1x1xf32>
    %cst_304 = arith.constant 0.00767284352 : f32
    %1135 = vector.broadcast %cst_304 : f32 to vector<1x1xf32>
    %1136 = arith.mulf %1135, %1134 : vector<1x1xf32>
    %1137 = vector.extract_strided_slice %1133 {offsets = [0, 1], sizes = [1, 1], strides = [1, 1]} : vector<1x8xf32> to vector<1x1xf32>
    %cst_305 = arith.constant 0.0363517664 : f32
    %1138 = vector.broadcast %cst_305 : f32 to vector<1x1xf32>
    %1139 = arith.mulf %1138, %1137 : vector<1x1xf32>
    %1140 = arith.addf %1136, %1139 : vector<1x1xf32>
    %1141 = vector.extract_strided_slice %1133 {offsets = [0, 2], sizes = [1, 1], strides = [1, 1]} : vector<1x8xf32> to vector<1x1xf32>
    %cst_306 = arith.constant 0.110426918 : f32
    %1142 = vector.broadcast %cst_306 : f32 to vector<1x1xf32>
    %1143 = arith.mulf %1142, %1141 : vector<1x1xf32>
    %1144 = arith.addf %1140, %1143 : vector<1x1xf32>
    %1145 = vector.extract_strided_slice %1133 {offsets = [0, 3], sizes = [1, 1], strides = [1, 1]} : vector<1x8xf32> to vector<1x1xf32>
    %cst_307 = arith.constant 0.215082273 : f32
    %1146 = vector.broadcast %cst_307 : f32 to vector<1x1xf32>
    %1147 = arith.mulf %1146, %1145 : vector<1x1xf32>
    %1148 = arith.addf %1144, %1147 : vector<1x1xf32>
    %1149 = vector.extract_strided_slice %1133 {offsets = [0, 4], sizes = [1, 1], strides = [1, 1]} : vector<1x8xf32> to vector<1x1xf32>
    %cst_308 = arith.constant 0.268605262 : f32
    %1150 = vector.broadcast %cst_308 : f32 to vector<1x1xf32>
    %1151 = arith.mulf %1150, %1149 : vector<1x1xf32>
    %1152 = arith.addf %1148, %1151 : vector<1x1xf32>
    %1153 = vector.extract_strided_slice %1133 {offsets = [0, 5], sizes = [1, 1], strides = [1, 1]} : vector<1x8xf32> to vector<1x1xf32>
    %cst_309 = arith.constant 0.215082273 : f32
    %1154 = vector.broadcast %cst_309 : f32 to vector<1x1xf32>
    %1155 = arith.mulf %1154, %1153 : vector<1x1xf32>
    %1156 = arith.addf %1152, %1155 : vector<1x1xf32>
    %1157 = vector.extract_strided_slice %1133 {offsets = [0, 6], sizes = [1, 1], strides = [1, 1]} : vector<1x8xf32> to vector<1x1xf32>
    %cst_310 = arith.constant 0.110426918 : f32
    %1158 = vector.broadcast %cst_310 : f32 to vector<1x1xf32>
    %1159 = arith.mulf %1158, %1157 : vector<1x1xf32>
    %1160 = arith.addf %1156, %1159 : vector<1x1xf32>
    %1161 = vector.extract_strided_slice %1133 {offsets = [0, 7], sizes = [1, 1], strides = [1, 1]} : vector<1x8xf32> to vector<1x1xf32>
    %cst_311 = arith.constant 0.0363517664 : f32
    %1162 = vector.broadcast %cst_311 : f32 to vector<1x1xf32>
    %1163 = arith.mulf %1162, %1161 : vector<1x1xf32>
    %1164 = arith.addf %1160, %1163 : vector<1x1xf32>
    %1165 = arith.mulf %977, %977 : vector<8x8xf32>
    %1166 = vector.extract_strided_slice %1165 {offsets = [0, 0], sizes = [1, 8], strides = [1, 1]} : vector<8x8xf32> to vector<1x8xf32>
    %cst_312 = arith.constant 0.00767284352 : f32
    %1167 = vector.broadcast %cst_312 : f32 to vector<1x8xf32>
    %1168 = arith.mulf %1167, %1166 : vector<1x8xf32>
    %1169 = vector.extract_strided_slice %1165 {offsets = [1, 0], sizes = [1, 8], strides = [1, 1]} : vector<8x8xf32> to vector<1x8xf32>
    %cst_313 = arith.constant 0.0363517664 : f32
    %1170 = vector.broadcast %cst_313 : f32 to vector<1x8xf32>
    %1171 = arith.mulf %1170, %1169 : vector<1x8xf32>
    %1172 = arith.addf %1168, %1171 : vector<1x8xf32>
    %1173 = vector.extract_strided_slice %1165 {offsets = [2, 0], sizes = [1, 8], strides = [1, 1]} : vector<8x8xf32> to vector<1x8xf32>
    %cst_314 = arith.constant 0.110426918 : f32
    %1174 = vector.broadcast %cst_314 : f32 to vector<1x8xf32>
    %1175 = arith.mulf %1174, %1173 : vector<1x8xf32>
    %1176 = arith.addf %1172, %1175 : vector<1x8xf32>
    %1177 = vector.extract_strided_slice %1165 {offsets = [3, 0], sizes = [1, 8], strides = [1, 1]} : vector<8x8xf32> to vector<1x8xf32>
    %cst_315 = arith.constant 0.215082273 : f32
    %1178 = vector.broadcast %cst_315 : f32 to vector<1x8xf32>
    %1179 = arith.mulf %1178, %1177 : vector<1x8xf32>
    %1180 = arith.addf %1176, %1179 : vector<1x8xf32>
    %1181 = vector.extract_strided_slice %1165 {offsets = [4, 0], sizes = [1, 8], strides = [1, 1]} : vector<8x8xf32> to vector<1x8xf32>
    %cst_316 = arith.constant 0.268605262 : f32
    %1182 = vector.broadcast %cst_316 : f32 to vector<1x8xf32>
    %1183 = arith.mulf %1182, %1181 : vector<1x8xf32>
    %1184 = arith.addf %1180, %1183 : vector<1x8xf32>
    %1185 = vector.extract_strided_slice %1165 {offsets = [5, 0], sizes = [1, 8], strides = [1, 1]} : vector<8x8xf32> to vector<1x8xf32>
    %cst_317 = arith.constant 0.215082273 : f32
    %1186 = vector.broadcast %cst_317 : f32 to vector<1x8xf32>
    %1187 = arith.mulf %1186, %1185 : vector<1x8xf32>
    %1188 = arith.addf %1184, %1187 : vector<1x8xf32>
    %1189 = vector.extract_strided_slice %1165 {offsets = [6, 0], sizes = [1, 8], strides = [1, 1]} : vector<8x8xf32> to vector<1x8xf32>
    %cst_318 = arith.constant 0.110426918 : f32
    %1190 = vector.broadcast %cst_318 : f32 to vector<1x8xf32>
    %1191 = arith.mulf %1190, %1189 : vector<1x8xf32>
    %1192 = arith.addf %1188, %1191 : vector<1x8xf32>
    %1193 = vector.extract_strided_slice %1165 {offsets = [7, 0], sizes = [1, 8], strides = [1, 1]} : vector<8x8xf32> to vector<1x8xf32>
    %cst_319 = arith.constant 0.0363517664 : f32
    %1194 = vector.broadcast %cst_319 : f32 to vector<1x8xf32>
    %1195 = arith.mulf %1194, %1193 : vector<1x8xf32>
    %1196 = arith.addf %1192, %1195 : vector<1x8xf32>
    %1197 = vector.extract_strided_slice %1196 {offsets = [0, 0], sizes = [1, 1], strides = [1, 1]} : vector<1x8xf32> to vector<1x1xf32>
    %cst_320 = arith.constant 0.00767284352 : f32
    %1198 = vector.broadcast %cst_320 : f32 to vector<1x1xf32>
    %1199 = arith.mulf %1198, %1197 : vector<1x1xf32>
    %1200 = vector.extract_strided_slice %1196 {offsets = [0, 1], sizes = [1, 1], strides = [1, 1]} : vector<1x8xf32> to vector<1x1xf32>
    %cst_321 = arith.constant 0.0363517664 : f32
    %1201 = vector.broadcast %cst_321 : f32 to vector<1x1xf32>
    %1202 = arith.mulf %1201, %1200 : vector<1x1xf32>
    %1203 = arith.addf %1199, %1202 : vector<1x1xf32>
    %1204 = vector.extract_strided_slice %1196 {offsets = [0, 2], sizes = [1, 1], strides = [1, 1]} : vector<1x8xf32> to vector<1x1xf32>
    %cst_322 = arith.constant 0.110426918 : f32
    %1205 = vector.broadcast %cst_322 : f32 to vector<1x1xf32>
    %1206 = arith.mulf %1205, %1204 : vector<1x1xf32>
    %1207 = arith.addf %1203, %1206 : vector<1x1xf32>
    %1208 = vector.extract_strided_slice %1196 {offsets = [0, 3], sizes = [1, 1], strides = [1, 1]} : vector<1x8xf32> to vector<1x1xf32>
    %cst_323 = arith.constant 0.215082273 : f32
    %1209 = vector.broadcast %cst_323 : f32 to vector<1x1xf32>
    %1210 = arith.mulf %1209, %1208 : vector<1x1xf32>
    %1211 = arith.addf %1207, %1210 : vector<1x1xf32>
    %1212 = vector.extract_strided_slice %1196 {offsets = [0, 4], sizes = [1, 1], strides = [1, 1]} : vector<1x8xf32> to vector<1x1xf32>
    %cst_324 = arith.constant 0.268605262 : f32
    %1213 = vector.broadcast %cst_324 : f32 to vector<1x1xf32>
    %1214 = arith.mulf %1213, %1212 : vector<1x1xf32>
    %1215 = arith.addf %1211, %1214 : vector<1x1xf32>
    %1216 = vector.extract_strided_slice %1196 {offsets = [0, 5], sizes = [1, 1], strides = [1, 1]} : vector<1x8xf32> to vector<1x1xf32>
    %cst_325 = arith.constant 0.215082273 : f32
    %1217 = vector.broadcast %cst_325 : f32 to vector<1x1xf32>
    %1218 = arith.mulf %1217, %1216 : vector<1x1xf32>
    %1219 = arith.addf %1215, %1218 : vector<1x1xf32>
    %1220 = vector.extract_strided_slice %1196 {offsets = [0, 6], sizes = [1, 1], strides = [1, 1]} : vector<1x8xf32> to vector<1x1xf32>
    %cst_326 = arith.constant 0.110426918 : f32
    %1221 = vector.broadcast %cst_326 : f32 to vector<1x1xf32>
    %1222 = arith.mulf %1221, %1220 : vector<1x1xf32>
    %1223 = arith.addf %1219, %1222 : vector<1x1xf32>
    %1224 = vector.extract_strided_slice %1196 {offsets = [0, 7], sizes = [1, 1], strides = [1, 1]} : vector<1x8xf32> to vector<1x1xf32>
    %cst_327 = arith.constant 0.0363517664 : f32
    %1225 = vector.broadcast %cst_327 : f32 to vector<1x1xf32>
    %1226 = arith.mulf %1225, %1224 : vector<1x1xf32>
    %1227 = arith.addf %1223, %1226 : vector<1x1xf32>
    %1228 = arith.mulf %975, %977 : vector<8x8xf32>
    %1229 = vector.extract_strided_slice %1228 {offsets = [0, 0], sizes = [1, 8], strides = [1, 1]} : vector<8x8xf32> to vector<1x8xf32>
    %cst_328 = arith.constant 0.00767284352 : f32
    %1230 = vector.broadcast %cst_328 : f32 to vector<1x8xf32>
    %1231 = arith.mulf %1230, %1229 : vector<1x8xf32>
    %1232 = vector.extract_strided_slice %1228 {offsets = [1, 0], sizes = [1, 8], strides = [1, 1]} : vector<8x8xf32> to vector<1x8xf32>
    %cst_329 = arith.constant 0.0363517664 : f32
    %1233 = vector.broadcast %cst_329 : f32 to vector<1x8xf32>
    %1234 = arith.mulf %1233, %1232 : vector<1x8xf32>
    %1235 = arith.addf %1231, %1234 : vector<1x8xf32>
    %1236 = vector.extract_strided_slice %1228 {offsets = [2, 0], sizes = [1, 8], strides = [1, 1]} : vector<8x8xf32> to vector<1x8xf32>
    %cst_330 = arith.constant 0.110426918 : f32
    %1237 = vector.broadcast %cst_330 : f32 to vector<1x8xf32>
    %1238 = arith.mulf %1237, %1236 : vector<1x8xf32>
    %1239 = arith.addf %1235, %1238 : vector<1x8xf32>
    %1240 = vector.extract_strided_slice %1228 {offsets = [3, 0], sizes = [1, 8], strides = [1, 1]} : vector<8x8xf32> to vector<1x8xf32>
    %cst_331 = arith.constant 0.215082273 : f32
    %1241 = vector.broadcast %cst_331 : f32 to vector<1x8xf32>
    %1242 = arith.mulf %1241, %1240 : vector<1x8xf32>
    %1243 = arith.addf %1239, %1242 : vector<1x8xf32>
    %1244 = vector.extract_strided_slice %1228 {offsets = [4, 0], sizes = [1, 8], strides = [1, 1]} : vector<8x8xf32> to vector<1x8xf32>
    %cst_332 = arith.constant 0.268605262 : f32
    %1245 = vector.broadcast %cst_332 : f32 to vector<1x8xf32>
    %1246 = arith.mulf %1245, %1244 : vector<1x8xf32>
    %1247 = arith.addf %1243, %1246 : vector<1x8xf32>
    %1248 = vector.extract_strided_slice %1228 {offsets = [5, 0], sizes = [1, 8], strides = [1, 1]} : vector<8x8xf32> to vector<1x8xf32>
    %cst_333 = arith.constant 0.215082273 : f32
    %1249 = vector.broadcast %cst_333 : f32 to vector<1x8xf32>
    %1250 = arith.mulf %1249, %1248 : vector<1x8xf32>
    %1251 = arith.addf %1247, %1250 : vector<1x8xf32>
    %1252 = vector.extract_strided_slice %1228 {offsets = [6, 0], sizes = [1, 8], strides = [1, 1]} : vector<8x8xf32> to vector<1x8xf32>
    %cst_334 = arith.constant 0.110426918 : f32
    %1253 = vector.broadcast %cst_334 : f32 to vector<1x8xf32>
    %1254 = arith.mulf %1253, %1252 : vector<1x8xf32>
    %1255 = arith.addf %1251, %1254 : vector<1x8xf32>
    %1256 = vector.extract_strided_slice %1228 {offsets = [7, 0], sizes = [1, 8], strides = [1, 1]} : vector<8x8xf32> to vector<1x8xf32>
    %cst_335 = arith.constant 0.0363517664 : f32
    %1257 = vector.broadcast %cst_335 : f32 to vector<1x8xf32>
    %1258 = arith.mulf %1257, %1256 : vector<1x8xf32>
    %1259 = arith.addf %1255, %1258 : vector<1x8xf32>
    %1260 = vector.extract_strided_slice %1259 {offsets = [0, 0], sizes = [1, 1], strides = [1, 1]} : vector<1x8xf32> to vector<1x1xf32>
    %cst_336 = arith.constant 0.00767284352 : f32
    %1261 = vector.broadcast %cst_336 : f32 to vector<1x1xf32>
    %1262 = arith.mulf %1261, %1260 : vector<1x1xf32>
    %1263 = vector.extract_strided_slice %1259 {offsets = [0, 1], sizes = [1, 1], strides = [1, 1]} : vector<1x8xf32> to vector<1x1xf32>
    %cst_337 = arith.constant 0.0363517664 : f32
    %1264 = vector.broadcast %cst_337 : f32 to vector<1x1xf32>
    %1265 = arith.mulf %1264, %1263 : vector<1x1xf32>
    %1266 = arith.addf %1262, %1265 : vector<1x1xf32>
    %1267 = vector.extract_strided_slice %1259 {offsets = [0, 2], sizes = [1, 1], strides = [1, 1]} : vector<1x8xf32> to vector<1x1xf32>
    %cst_338 = arith.constant 0.110426918 : f32
    %1268 = vector.broadcast %cst_338 : f32 to vector<1x1xf32>
    %1269 = arith.mulf %1268, %1267 : vector<1x1xf32>
    %1270 = arith.addf %1266, %1269 : vector<1x1xf32>
    %1271 = vector.extract_strided_slice %1259 {offsets = [0, 3], sizes = [1, 1], strides = [1, 1]} : vector<1x8xf32> to vector<1x1xf32>
    %cst_339 = arith.constant 0.215082273 : f32
    %1272 = vector.broadcast %cst_339 : f32 to vector<1x1xf32>
    %1273 = arith.mulf %1272, %1271 : vector<1x1xf32>
    %1274 = arith.addf %1270, %1273 : vector<1x1xf32>
    %1275 = vector.extract_strided_slice %1259 {offsets = [0, 4], sizes = [1, 1], strides = [1, 1]} : vector<1x8xf32> to vector<1x1xf32>
    %cst_340 = arith.constant 0.268605262 : f32
    %1276 = vector.broadcast %cst_340 : f32 to vector<1x1xf32>
    %1277 = arith.mulf %1276, %1275 : vector<1x1xf32>
    %1278 = arith.addf %1274, %1277 : vector<1x1xf32>
    %1279 = vector.extract_strided_slice %1259 {offsets = [0, 5], sizes = [1, 1], strides = [1, 1]} : vector<1x8xf32> to vector<1x1xf32>
    %cst_341 = arith.constant 0.215082273 : f32
    %1280 = vector.broadcast %cst_341 : f32 to vector<1x1xf32>
    %1281 = arith.mulf %1280, %1279 : vector<1x1xf32>
    %1282 = arith.addf %1278, %1281 : vector<1x1xf32>
    %1283 = vector.extract_strided_slice %1259 {offsets = [0, 6], sizes = [1, 1], strides = [1, 1]} : vector<1x8xf32> to vector<1x1xf32>
    %cst_342 = arith.constant 0.110426918 : f32
    %1284 = vector.broadcast %cst_342 : f32 to vector<1x1xf32>
    %1285 = arith.mulf %1284, %1283 : vector<1x1xf32>
    %1286 = arith.addf %1282, %1285 : vector<1x1xf32>
    %1287 = vector.extract_strided_slice %1259 {offsets = [0, 7], sizes = [1, 1], strides = [1, 1]} : vector<1x8xf32> to vector<1x1xf32>
    %cst_343 = arith.constant 0.0363517664 : f32
    %1288 = vector.broadcast %cst_343 : f32 to vector<1x1xf32>
    %1289 = arith.mulf %1288, %1287 : vector<1x1xf32>
    %1290 = arith.addf %1286, %1289 : vector<1x1xf32>
    %1291 = arith.mulf %1039, %1039 : vector<1x1xf32>
    %1292 = arith.subf %1164, %1291 : vector<1x1xf32>
    %1293 = arith.mulf %1101, %1101 : vector<1x1xf32>
    %1294 = arith.subf %1227, %1293 : vector<1x1xf32>
    %1295 = arith.mulf %1039, %1101 : vector<1x1xf32>
    %1296 = arith.subf %1290, %1295 : vector<1x1xf32>
    %cst_344 = arith.constant 3.000000e+00 : f32
    %1297 = vector.broadcast %cst_344 : f32 to vector<1x1xf32>
    %1298 = arith.addf %1039, %1297 : vector<1x1xf32>
    %cst_345 = arith.constant 3.000000e+00 : f32
    %1299 = vector.broadcast %cst_345 : f32 to vector<1x1xf32>
    %1300 = arith.addf %1101, %1299 : vector<1x1xf32>
    %1301 = arith.mulf %1298, %1298 : vector<1x1xf32>
    %1302 = arith.mulf %1300, %1300 : vector<1x1xf32>
    %1303 = arith.mulf %1298, %1300 : vector<1x1xf32>
    %cst_346 = arith.constant 2.000000e+00 : f32
    %1304 = vector.broadcast %cst_346 : f32 to vector<1x1xf32>
    %1305 = arith.mulf %1304, %1296 : vector<1x1xf32>
    %cst_347 = arith.constant 3.600000e-03 : f32
    %1306 = vector.broadcast %cst_347 : f32 to vector<1x1xf32>
    %1307 = arith.addf %1305, %1306 : vector<1x1xf32>
    %1308 = arith.addf %1292, %1294 : vector<1x1xf32>
    %cst_348 = arith.constant 3.600000e-03 : f32
    %1309 = vector.broadcast %cst_348 : f32 to vector<1x1xf32>
    %1310 = arith.addf %1308, %1309 : vector<1x1xf32>
    %1311 = tpu.reciprocal %1310 {approx = true} : vector<1x1xf32> -> vector<1x1xf32>
    %1312 = arith.mulf %1310, %1311 : vector<1x1xf32>
    %cst_349 = arith.constant 2.000000e+00 : f32
    %1313 = vector.broadcast %cst_349 : f32 to vector<1x1xf32>
    %1314 = arith.subf %1313, %1312 : vector<1x1xf32>
    %1315 = arith.mulf %1311, %1314 : vector<1x1xf32>
    %1316 = arith.mulf %1307, %1315 : vector<1x1xf32>
    %cst_350 = arith.constant 2.000000e+00 : f32
    %1317 = vector.broadcast %cst_350 : f32 to vector<1x1xf32>
    %1318 = arith.mulf %1317, %1303 : vector<1x1xf32>
    %cst_351 = arith.constant 4.000000e-04 : f32
    %1319 = vector.broadcast %cst_351 : f32 to vector<1x1xf32>
    %1320 = arith.addf %1318, %1319 : vector<1x1xf32>
    %1321 = arith.mulf %1320, %1316 : vector<1x1xf32>
    %1322 = arith.addf %1301, %1302 : vector<1x1xf32>
    %cst_352 = arith.constant 4.000000e-04 : f32
    %1323 = vector.broadcast %cst_352 : f32 to vector<1x1xf32>
    %1324 = arith.addf %1322, %1323 : vector<1x1xf32>
    %1325 = tpu.reciprocal %1324 {approx = true} : vector<1x1xf32> -> vector<1x1xf32>
    %1326 = arith.mulf %1324, %1325 : vector<1x1xf32>
    %cst_353 = arith.constant 2.000000e+00 : f32
    %1327 = vector.broadcast %cst_353 : f32 to vector<1x1xf32>
    %1328 = arith.subf %1327, %1326 : vector<1x1xf32>
    %1329 = arith.mulf %1325, %1328 : vector<1x1xf32>
    %1330 = arith.mulf %1321, %1329 : vector<1x1xf32>
    %1331 = vector.shape_cast %1330 : vector<1x1xf32> to vector<1x1x1xf32>
    %cst_354 = arith.constant dense<0.000000e+00> : vector<1xf32>
    %1332 = vector.multi_reduction <add>, %1331, %cst_354 [1, 2] : vector<1x1x1xf32> to vector<1xf32>
    %1333 = vector.shape_cast %1332 : vector<1xf32> to vector<1x1x1xf32>
    %1334 = vector.extract %1333[0, 0, 0] : f32 from vector<1x1x1xf32>
    %cst_355 = arith.constant 0.166666672 : f32
    %1335 = arith.mulf %1334, %cst_355 : f32
    %1336 = vector.shape_cast %1316 : vector<1x1xf32> to vector<1x1x1xf32>
    %cst_356 = arith.constant dense<0.000000e+00> : vector<1xf32>
    %1337 = vector.multi_reduction <add>, %1336, %cst_356 [1, 2] : vector<1x1x1xf32> to vector<1xf32>
    %1338 = vector.shape_cast %1337 : vector<1xf32> to vector<1x1x1xf32>
    %1339 = vector.extract %1338[0, 0, 0] : f32 from vector<1x1x1xf32>
    %cst_357 = arith.constant 0.166666672 : f32
    %1340 = arith.mulf %1339, %cst_357 : f32
    %c0_358 = arith.constant 0 : index
    %c0_359 = arith.constant 0 : index
    %c0_360 = arith.constant 0 : index
    %1341 = vector.load %arg4[%c0_358, %c0_359, %c0_360] : memref<1x4x4xf32, #tpu.memory_space<vmem>>, vector<1x4x4xf32>
    %1342 = vector.shape_cast %1341 : vector<1x4x4xf32> to vector<4x4xf32>
    %c0_361 = arith.constant 0 : index
    %c0_362 = arith.constant 0 : index
    %c0_363 = arith.constant 0 : index
    %1343 = vector.load %arg9[%c0_361, %c0_362, %c0_363] : memref<1x4x4xf32, #tpu.memory_space<vmem>>, vector<1x4x4xf32>
    %1344 = vector.shape_cast %1343 : vector<1x4x4xf32> to vector<4x4xf32>
    %1345 = vector.extract_strided_slice %1342 {offsets = [0, 0], sizes = [1, 4], strides = [1, 1]} : vector<4x4xf32> to vector<1x4xf32>
    %cst_364 = arith.constant 0.136464864 : f32
    %1346 = vector.broadcast %cst_364 : f32 to vector<1x4xf32>
    %1347 = arith.mulf %1346, %1345 : vector<1x4xf32>
    %1348 = vector.extract_strided_slice %1342 {offsets = [1, 0], sizes = [1, 4], strides = [1, 1]} : vector<4x4xf32> to vector<1x4xf32>
    %cst_365 = arith.constant 0.265797257 : f32
    %1349 = vector.broadcast %cst_365 : f32 to vector<1x4xf32>
    %1350 = arith.mulf %1349, %1348 : vector<1x4xf32>
    %1351 = arith.addf %1347, %1350 : vector<1x4xf32>
    %1352 = vector.extract_strided_slice %1342 {offsets = [2, 0], sizes = [1, 4], strides = [1, 1]} : vector<4x4xf32> to vector<1x4xf32>
    %cst_366 = arith.constant 0.331940621 : f32
    %1353 = vector.broadcast %cst_366 : f32 to vector<1x4xf32>
    %1354 = arith.mulf %1353, %1352 : vector<1x4xf32>
    %1355 = arith.addf %1351, %1354 : vector<1x4xf32>
    %1356 = vector.extract_strided_slice %1342 {offsets = [3, 0], sizes = [1, 4], strides = [1, 1]} : vector<4x4xf32> to vector<1x4xf32>
    %cst_367 = arith.constant 0.265797257 : f32
    %1357 = vector.broadcast %cst_367 : f32 to vector<1x4xf32>
    %1358 = arith.mulf %1357, %1356 : vector<1x4xf32>
    %1359 = arith.addf %1355, %1358 : vector<1x4xf32>
    %1360 = vector.extract_strided_slice %1359 {offsets = [0, 0], sizes = [1, 1], strides = [1, 1]} : vector<1x4xf32> to vector<1x1xf32>
    %cst_368 = arith.constant 0.136464864 : f32
    %1361 = vector.broadcast %cst_368 : f32 to vector<1x1xf32>
    %1362 = arith.mulf %1361, %1360 : vector<1x1xf32>
    %1363 = vector.extract_strided_slice %1359 {offsets = [0, 1], sizes = [1, 1], strides = [1, 1]} : vector<1x4xf32> to vector<1x1xf32>
    %cst_369 = arith.constant 0.265797257 : f32
    %1364 = vector.broadcast %cst_369 : f32 to vector<1x1xf32>
    %1365 = arith.mulf %1364, %1363 : vector<1x1xf32>
    %1366 = arith.addf %1362, %1365 : vector<1x1xf32>
    %1367 = vector.extract_strided_slice %1359 {offsets = [0, 2], sizes = [1, 1], strides = [1, 1]} : vector<1x4xf32> to vector<1x1xf32>
    %cst_370 = arith.constant 0.331940621 : f32
    %1368 = vector.broadcast %cst_370 : f32 to vector<1x1xf32>
    %1369 = arith.mulf %1368, %1367 : vector<1x1xf32>
    %1370 = arith.addf %1366, %1369 : vector<1x1xf32>
    %1371 = vector.extract_strided_slice %1359 {offsets = [0, 3], sizes = [1, 1], strides = [1, 1]} : vector<1x4xf32> to vector<1x1xf32>
    %cst_371 = arith.constant 0.265797257 : f32
    %1372 = vector.broadcast %cst_371 : f32 to vector<1x1xf32>
    %1373 = arith.mulf %1372, %1371 : vector<1x1xf32>
    %1374 = arith.addf %1370, %1373 : vector<1x1xf32>
    %1375 = vector.extract_strided_slice %1344 {offsets = [0, 0], sizes = [1, 4], strides = [1, 1]} : vector<4x4xf32> to vector<1x4xf32>
    %cst_372 = arith.constant 0.136464864 : f32
    %1376 = vector.broadcast %cst_372 : f32 to vector<1x4xf32>
    %1377 = arith.mulf %1376, %1375 : vector<1x4xf32>
    %1378 = vector.extract_strided_slice %1344 {offsets = [1, 0], sizes = [1, 4], strides = [1, 1]} : vector<4x4xf32> to vector<1x4xf32>
    %cst_373 = arith.constant 0.265797257 : f32
    %1379 = vector.broadcast %cst_373 : f32 to vector<1x4xf32>
    %1380 = arith.mulf %1379, %1378 : vector<1x4xf32>
    %1381 = arith.addf %1377, %1380 : vector<1x4xf32>
    %1382 = vector.extract_strided_slice %1344 {offsets = [2, 0], sizes = [1, 4], strides = [1, 1]} : vector<4x4xf32> to vector<1x4xf32>
    %cst_374 = arith.constant 0.331940621 : f32
    %1383 = vector.broadcast %cst_374 : f32 to vector<1x4xf32>
    %1384 = arith.mulf %1383, %1382 : vector<1x4xf32>
    %1385 = arith.addf %1381, %1384 : vector<1x4xf32>
    %1386 = vector.extract_strided_slice %1344 {offsets = [3, 0], sizes = [1, 4], strides = [1, 1]} : vector<4x4xf32> to vector<1x4xf32>
    %cst_375 = arith.constant 0.265797257 : f32
    %1387 = vector.broadcast %cst_375 : f32 to vector<1x4xf32>
    %1388 = arith.mulf %1387, %1386 : vector<1x4xf32>
    %1389 = arith.addf %1385, %1388 : vector<1x4xf32>
    %1390 = vector.extract_strided_slice %1389 {offsets = [0, 0], sizes = [1, 1], strides = [1, 1]} : vector<1x4xf32> to vector<1x1xf32>
    %cst_376 = arith.constant 0.136464864 : f32
    %1391 = vector.broadcast %cst_376 : f32 to vector<1x1xf32>
    %1392 = arith.mulf %1391, %1390 : vector<1x1xf32>
    %1393 = vector.extract_strided_slice %1389 {offsets = [0, 1], sizes = [1, 1], strides = [1, 1]} : vector<1x4xf32> to vector<1x1xf32>
    %cst_377 = arith.constant 0.265797257 : f32
    %1394 = vector.broadcast %cst_377 : f32 to vector<1x1xf32>
    %1395 = arith.mulf %1394, %1393 : vector<1x1xf32>
    %1396 = arith.addf %1392, %1395 : vector<1x1xf32>
    %1397 = vector.extract_strided_slice %1389 {offsets = [0, 2], sizes = [1, 1], strides = [1, 1]} : vector<1x4xf32> to vector<1x1xf32>
    %cst_378 = arith.constant 0.331940621 : f32
    %1398 = vector.broadcast %cst_378 : f32 to vector<1x1xf32>
    %1399 = arith.mulf %1398, %1397 : vector<1x1xf32>
    %1400 = arith.addf %1396, %1399 : vector<1x1xf32>
    %1401 = vector.extract_strided_slice %1389 {offsets = [0, 3], sizes = [1, 1], strides = [1, 1]} : vector<1x4xf32> to vector<1x1xf32>
    %cst_379 = arith.constant 0.265797257 : f32
    %1402 = vector.broadcast %cst_379 : f32 to vector<1x1xf32>
    %1403 = arith.mulf %1402, %1401 : vector<1x1xf32>
    %1404 = arith.addf %1400, %1403 : vector<1x1xf32>
    %1405 = arith.mulf %1342, %1342 : vector<4x4xf32>
    %1406 = vector.extract_strided_slice %1405 {offsets = [0, 0], sizes = [1, 4], strides = [1, 1]} : vector<4x4xf32> to vector<1x4xf32>
    %cst_380 = arith.constant 0.136464864 : f32
    %1407 = vector.broadcast %cst_380 : f32 to vector<1x4xf32>
    %1408 = arith.mulf %1407, %1406 : vector<1x4xf32>
    %1409 = vector.extract_strided_slice %1405 {offsets = [1, 0], sizes = [1, 4], strides = [1, 1]} : vector<4x4xf32> to vector<1x4xf32>
    %cst_381 = arith.constant 0.265797257 : f32
    %1410 = vector.broadcast %cst_381 : f32 to vector<1x4xf32>
    %1411 = arith.mulf %1410, %1409 : vector<1x4xf32>
    %1412 = arith.addf %1408, %1411 : vector<1x4xf32>
    %1413 = vector.extract_strided_slice %1405 {offsets = [2, 0], sizes = [1, 4], strides = [1, 1]} : vector<4x4xf32> to vector<1x4xf32>
    %cst_382 = arith.constant 0.331940621 : f32
    %1414 = vector.broadcast %cst_382 : f32 to vector<1x4xf32>
    %1415 = arith.mulf %1414, %1413 : vector<1x4xf32>
    %1416 = arith.addf %1412, %1415 : vector<1x4xf32>
    %1417 = vector.extract_strided_slice %1405 {offsets = [3, 0], sizes = [1, 4], strides = [1, 1]} : vector<4x4xf32> to vector<1x4xf32>
    %cst_383 = arith.constant 0.265797257 : f32
    %1418 = vector.broadcast %cst_383 : f32 to vector<1x4xf32>
    %1419 = arith.mulf %1418, %1417 : vector<1x4xf32>
    %1420 = arith.addf %1416, %1419 : vector<1x4xf32>
    %1421 = vector.extract_strided_slice %1420 {offsets = [0, 0], sizes = [1, 1], strides = [1, 1]} : vector<1x4xf32> to vector<1x1xf32>
    %cst_384 = arith.constant 0.136464864 : f32
    %1422 = vector.broadcast %cst_384 : f32 to vector<1x1xf32>
    %1423 = arith.mulf %1422, %1421 : vector<1x1xf32>
    %1424 = vector.extract_strided_slice %1420 {offsets = [0, 1], sizes = [1, 1], strides = [1, 1]} : vector<1x4xf32> to vector<1x1xf32>
    %cst_385 = arith.constant 0.265797257 : f32
    %1425 = vector.broadcast %cst_385 : f32 to vector<1x1xf32>
    %1426 = arith.mulf %1425, %1424 : vector<1x1xf32>
    %1427 = arith.addf %1423, %1426 : vector<1x1xf32>
    %1428 = vector.extract_strided_slice %1420 {offsets = [0, 2], sizes = [1, 1], strides = [1, 1]} : vector<1x4xf32> to vector<1x1xf32>
    %cst_386 = arith.constant 0.331940621 : f32
    %1429 = vector.broadcast %cst_386 : f32 to vector<1x1xf32>
    %1430 = arith.mulf %1429, %1428 : vector<1x1xf32>
    %1431 = arith.addf %1427, %1430 : vector<1x1xf32>
    %1432 = vector.extract_strided_slice %1420 {offsets = [0, 3], sizes = [1, 1], strides = [1, 1]} : vector<1x4xf32> to vector<1x1xf32>
    %cst_387 = arith.constant 0.265797257 : f32
    %1433 = vector.broadcast %cst_387 : f32 to vector<1x1xf32>
    %1434 = arith.mulf %1433, %1432 : vector<1x1xf32>
    %1435 = arith.addf %1431, %1434 : vector<1x1xf32>
    %1436 = arith.mulf %1344, %1344 : vector<4x4xf32>
    %1437 = vector.extract_strided_slice %1436 {offsets = [0, 0], sizes = [1, 4], strides = [1, 1]} : vector<4x4xf32> to vector<1x4xf32>
    %cst_388 = arith.constant 0.136464864 : f32
    %1438 = vector.broadcast %cst_388 : f32 to vector<1x4xf32>
    %1439 = arith.mulf %1438, %1437 : vector<1x4xf32>
    %1440 = vector.extract_strided_slice %1436 {offsets = [1, 0], sizes = [1, 4], strides = [1, 1]} : vector<4x4xf32> to vector<1x4xf32>
    %cst_389 = arith.constant 0.265797257 : f32
    %1441 = vector.broadcast %cst_389 : f32 to vector<1x4xf32>
    %1442 = arith.mulf %1441, %1440 : vector<1x4xf32>
    %1443 = arith.addf %1439, %1442 : vector<1x4xf32>
    %1444 = vector.extract_strided_slice %1436 {offsets = [2, 0], sizes = [1, 4], strides = [1, 1]} : vector<4x4xf32> to vector<1x4xf32>
    %cst_390 = arith.constant 0.331940621 : f32
    %1445 = vector.broadcast %cst_390 : f32 to vector<1x4xf32>
    %1446 = arith.mulf %1445, %1444 : vector<1x4xf32>
    %1447 = arith.addf %1443, %1446 : vector<1x4xf32>
    %1448 = vector.extract_strided_slice %1436 {offsets = [3, 0], sizes = [1, 4], strides = [1, 1]} : vector<4x4xf32> to vector<1x4xf32>
    %cst_391 = arith.constant 0.265797257 : f32
    %1449 = vector.broadcast %cst_391 : f32 to vector<1x4xf32>
    %1450 = arith.mulf %1449, %1448 : vector<1x4xf32>
    %1451 = arith.addf %1447, %1450 : vector<1x4xf32>
    %1452 = vector.extract_strided_slice %1451 {offsets = [0, 0], sizes = [1, 1], strides = [1, 1]} : vector<1x4xf32> to vector<1x1xf32>
    %cst_392 = arith.constant 0.136464864 : f32
    %1453 = vector.broadcast %cst_392 : f32 to vector<1x1xf32>
    %1454 = arith.mulf %1453, %1452 : vector<1x1xf32>
    %1455 = vector.extract_strided_slice %1451 {offsets = [0, 1], sizes = [1, 1], strides = [1, 1]} : vector<1x4xf32> to vector<1x1xf32>
    %cst_393 = arith.constant 0.265797257 : f32
    %1456 = vector.broadcast %cst_393 : f32 to vector<1x1xf32>
    %1457 = arith.mulf %1456, %1455 : vector<1x1xf32>
    %1458 = arith.addf %1454, %1457 : vector<1x1xf32>
    %1459 = vector.extract_strided_slice %1451 {offsets = [0, 2], sizes = [1, 1], strides = [1, 1]} : vector<1x4xf32> to vector<1x1xf32>
    %cst_394 = arith.constant 0.331940621 : f32
    %1460 = vector.broadcast %cst_394 : f32 to vector<1x1xf32>
    %1461 = arith.mulf %1460, %1459 : vector<1x1xf32>
    %1462 = arith.addf %1458, %1461 : vector<1x1xf32>
    %1463 = vector.extract_strided_slice %1451 {offsets = [0, 3], sizes = [1, 1], strides = [1, 1]} : vector<1x4xf32> to vector<1x1xf32>
    %cst_395 = arith.constant 0.265797257 : f32
    %1464 = vector.broadcast %cst_395 : f32 to vector<1x1xf32>
    %1465 = arith.mulf %1464, %1463 : vector<1x1xf32>
    %1466 = arith.addf %1462, %1465 : vector<1x1xf32>
    %1467 = arith.mulf %1342, %1344 : vector<4x4xf32>
    %1468 = vector.extract_strided_slice %1467 {offsets = [0, 0], sizes = [1, 4], strides = [1, 1]} : vector<4x4xf32> to vector<1x4xf32>
    %cst_396 = arith.constant 0.136464864 : f32
    %1469 = vector.broadcast %cst_396 : f32 to vector<1x4xf32>
    %1470 = arith.mulf %1469, %1468 : vector<1x4xf32>
    %1471 = vector.extract_strided_slice %1467 {offsets = [1, 0], sizes = [1, 4], strides = [1, 1]} : vector<4x4xf32> to vector<1x4xf32>
    %cst_397 = arith.constant 0.265797257 : f32
    %1472 = vector.broadcast %cst_397 : f32 to vector<1x4xf32>
    %1473 = arith.mulf %1472, %1471 : vector<1x4xf32>
    %1474 = arith.addf %1470, %1473 : vector<1x4xf32>
    %1475 = vector.extract_strided_slice %1467 {offsets = [2, 0], sizes = [1, 4], strides = [1, 1]} : vector<4x4xf32> to vector<1x4xf32>
    %cst_398 = arith.constant 0.331940621 : f32
    %1476 = vector.broadcast %cst_398 : f32 to vector<1x4xf32>
    %1477 = arith.mulf %1476, %1475 : vector<1x4xf32>
    %1478 = arith.addf %1474, %1477 : vector<1x4xf32>
    %1479 = vector.extract_strided_slice %1467 {offsets = [3, 0], sizes = [1, 4], strides = [1, 1]} : vector<4x4xf32> to vector<1x4xf32>
    %cst_399 = arith.constant 0.265797257 : f32
    %1480 = vector.broadcast %cst_399 : f32 to vector<1x4xf32>
    %1481 = arith.mulf %1480, %1479 : vector<1x4xf32>
    %1482 = arith.addf %1478, %1481 : vector<1x4xf32>
    %1483 = vector.extract_strided_slice %1482 {offsets = [0, 0], sizes = [1, 1], strides = [1, 1]} : vector<1x4xf32> to vector<1x1xf32>
    %cst_400 = arith.constant 0.136464864 : f32
    %1484 = vector.broadcast %cst_400 : f32 to vector<1x1xf32>
    %1485 = arith.mulf %1484, %1483 : vector<1x1xf32>
    %1486 = vector.extract_strided_slice %1482 {offsets = [0, 1], sizes = [1, 1], strides = [1, 1]} : vector<1x4xf32> to vector<1x1xf32>
    %cst_401 = arith.constant 0.265797257 : f32
    %1487 = vector.broadcast %cst_401 : f32 to vector<1x1xf32>
    %1488 = arith.mulf %1487, %1486 : vector<1x1xf32>
    %1489 = arith.addf %1485, %1488 : vector<1x1xf32>
    %1490 = vector.extract_strided_slice %1482 {offsets = [0, 2], sizes = [1, 1], strides = [1, 1]} : vector<1x4xf32> to vector<1x1xf32>
    %cst_402 = arith.constant 0.331940621 : f32
    %1491 = vector.broadcast %cst_402 : f32 to vector<1x1xf32>
    %1492 = arith.mulf %1491, %1490 : vector<1x1xf32>
    %1493 = arith.addf %1489, %1492 : vector<1x1xf32>
    %1494 = vector.extract_strided_slice %1482 {offsets = [0, 3], sizes = [1, 1], strides = [1, 1]} : vector<1x4xf32> to vector<1x1xf32>
    %cst_403 = arith.constant 0.265797257 : f32
    %1495 = vector.broadcast %cst_403 : f32 to vector<1x1xf32>
    %1496 = arith.mulf %1495, %1494 : vector<1x1xf32>
    %1497 = arith.addf %1493, %1496 : vector<1x1xf32>
    %1498 = arith.mulf %1374, %1374 : vector<1x1xf32>
    %1499 = arith.subf %1435, %1498 : vector<1x1xf32>
    %1500 = arith.mulf %1404, %1404 : vector<1x1xf32>
    %1501 = arith.subf %1466, %1500 : vector<1x1xf32>
    %1502 = arith.mulf %1374, %1404 : vector<1x1xf32>
    %1503 = arith.subf %1497, %1502 : vector<1x1xf32>
    %cst_404 = arith.constant 4.000000e+00 : f32
    %1504 = vector.broadcast %cst_404 : f32 to vector<1x1xf32>
    %1505 = arith.addf %1374, %1504 : vector<1x1xf32>
    %cst_405 = arith.constant 4.000000e+00 : f32
    %1506 = vector.broadcast %cst_405 : f32 to vector<1x1xf32>
    %1507 = arith.addf %1404, %1506 : vector<1x1xf32>
    %1508 = arith.mulf %1505, %1505 : vector<1x1xf32>
    %1509 = arith.mulf %1507, %1507 : vector<1x1xf32>
    %1510 = arith.mulf %1505, %1507 : vector<1x1xf32>
    %cst_406 = arith.constant 2.000000e+00 : f32
    %1511 = vector.broadcast %cst_406 : f32 to vector<1x1xf32>
    %1512 = arith.mulf %1511, %1503 : vector<1x1xf32>
    %cst_407 = arith.constant 3.600000e-03 : f32
    %1513 = vector.broadcast %cst_407 : f32 to vector<1x1xf32>
    %1514 = arith.addf %1512, %1513 : vector<1x1xf32>
    %1515 = arith.addf %1499, %1501 : vector<1x1xf32>
    %cst_408 = arith.constant 3.600000e-03 : f32
    %1516 = vector.broadcast %cst_408 : f32 to vector<1x1xf32>
    %1517 = arith.addf %1515, %1516 : vector<1x1xf32>
    %1518 = tpu.reciprocal %1517 {approx = true} : vector<1x1xf32> -> vector<1x1xf32>
    %1519 = arith.mulf %1517, %1518 : vector<1x1xf32>
    %cst_409 = arith.constant 2.000000e+00 : f32
    %1520 = vector.broadcast %cst_409 : f32 to vector<1x1xf32>
    %1521 = arith.subf %1520, %1519 : vector<1x1xf32>
    %1522 = arith.mulf %1518, %1521 : vector<1x1xf32>
    %1523 = arith.mulf %1514, %1522 : vector<1x1xf32>
    %cst_410 = arith.constant 2.000000e+00 : f32
    %1524 = vector.broadcast %cst_410 : f32 to vector<1x1xf32>
    %1525 = arith.mulf %1524, %1510 : vector<1x1xf32>
    %cst_411 = arith.constant 4.000000e-04 : f32
    %1526 = vector.broadcast %cst_411 : f32 to vector<1x1xf32>
    %1527 = arith.addf %1525, %1526 : vector<1x1xf32>
    %1528 = arith.mulf %1527, %1523 : vector<1x1xf32>
    %1529 = arith.addf %1508, %1509 : vector<1x1xf32>
    %cst_412 = arith.constant 4.000000e-04 : f32
    %1530 = vector.broadcast %cst_412 : f32 to vector<1x1xf32>
    %1531 = arith.addf %1529, %1530 : vector<1x1xf32>
    %1532 = tpu.reciprocal %1531 {approx = true} : vector<1x1xf32> -> vector<1x1xf32>
    %1533 = arith.mulf %1531, %1532 : vector<1x1xf32>
    %cst_413 = arith.constant 2.000000e+00 : f32
    %1534 = vector.broadcast %cst_413 : f32 to vector<1x1xf32>
    %1535 = arith.subf %1534, %1533 : vector<1x1xf32>
    %1536 = arith.mulf %1532, %1535 : vector<1x1xf32>
    %1537 = arith.mulf %1528, %1536 : vector<1x1xf32>
    %1538 = vector.shape_cast %1537 : vector<1x1xf32> to vector<1x1x1xf32>
    %cst_414 = arith.constant dense<0.000000e+00> : vector<1xf32>
    %1539 = vector.multi_reduction <add>, %1538, %cst_414 [1, 2] : vector<1x1x1xf32> to vector<1xf32>
    %1540 = vector.shape_cast %1539 : vector<1xf32> to vector<1x1x1xf32>
    %1541 = vector.extract %1540[0, 0, 0] : f32 from vector<1x1x1xf32>
    %cst_415 = arith.constant 0.166666672 : f32
    %1542 = arith.mulf %1541, %cst_415 : f32
    %1543 = vector.shape_cast %1523 : vector<1x1xf32> to vector<1x1x1xf32>
    %cst_416 = arith.constant dense<0.000000e+00> : vector<1xf32>
    %1544 = vector.multi_reduction <add>, %1543, %cst_416 [1, 2] : vector<1x1x1xf32> to vector<1xf32>
    %1545 = vector.shape_cast %1544 : vector<1xf32> to vector<1x1x1xf32>
    %1546 = vector.extract %1545[0, 0, 0] : f32 from vector<1x1x1xf32>
    %cst_417 = arith.constant 0.166666672 : f32
    %1547 = arith.mulf %1546, %cst_417 : f32
    %c0_418 = arith.constant 0 : index
    %c0_419 = arith.constant 0 : index
    %c0_420 = arith.constant 0 : index
    %1548 = vector.load %arg5[%c0_418, %c0_419, %c0_420] : memref<1x2x2xf32, #tpu.memory_space<vmem>>, vector<1x2x2xf32>
    %1549 = vector.shape_cast %1548 : vector<1x2x2xf32> to vector<2x2xf32>
    %c0_421 = arith.constant 0 : index
    %c0_422 = arith.constant 0 : index
    %c0_423 = arith.constant 0 : index
    %1550 = vector.load %arg10[%c0_421, %c0_422, %c0_423] : memref<1x2x2xf32, #tpu.memory_space<vmem>>, vector<1x2x2xf32>
    %1551 = vector.shape_cast %1550 : vector<1x2x2xf32> to vector<2x2xf32>
    %1552 = vector.extract_strided_slice %1549 {offsets = [0, 0], sizes = [1, 2], strides = [1, 1]} : vector<2x2xf32> to vector<1x2xf32>
    %cst_424 = arith.constant 0.444671959 : f32
    %1553 = vector.broadcast %cst_424 : f32 to vector<1x2xf32>
    %1554 = arith.mulf %1553, %1552 : vector<1x2xf32>
    %1555 = vector.extract_strided_slice %1549 {offsets = [1, 0], sizes = [1, 2], strides = [1, 1]} : vector<2x2xf32> to vector<1x2xf32>
    %cst_425 = arith.constant 0.555328071 : f32
    %1556 = vector.broadcast %cst_425 : f32 to vector<1x2xf32>
    %1557 = arith.mulf %1556, %1555 : vector<1x2xf32>
    %1558 = arith.addf %1554, %1557 : vector<1x2xf32>
    %1559 = vector.extract_strided_slice %1558 {offsets = [0, 0], sizes = [1, 1], strides = [1, 1]} : vector<1x2xf32> to vector<1x1xf32>
    %cst_426 = arith.constant 0.444671959 : f32
    %1560 = vector.broadcast %cst_426 : f32 to vector<1x1xf32>
    %1561 = arith.mulf %1560, %1559 : vector<1x1xf32>
    %1562 = vector.extract_strided_slice %1558 {offsets = [0, 1], sizes = [1, 1], strides = [1, 1]} : vector<1x2xf32> to vector<1x1xf32>
    %cst_427 = arith.constant 0.555328071 : f32
    %1563 = vector.broadcast %cst_427 : f32 to vector<1x1xf32>
    %1564 = arith.mulf %1563, %1562 : vector<1x1xf32>
    %1565 = arith.addf %1561, %1564 : vector<1x1xf32>
    %1566 = vector.extract_strided_slice %1551 {offsets = [0, 0], sizes = [1, 2], strides = [1, 1]} : vector<2x2xf32> to vector<1x2xf32>
    %cst_428 = arith.constant 0.444671959 : f32
    %1567 = vector.broadcast %cst_428 : f32 to vector<1x2xf32>
    %1568 = arith.mulf %1567, %1566 : vector<1x2xf32>
    %1569 = vector.extract_strided_slice %1551 {offsets = [1, 0], sizes = [1, 2], strides = [1, 1]} : vector<2x2xf32> to vector<1x2xf32>
    %cst_429 = arith.constant 0.555328071 : f32
    %1570 = vector.broadcast %cst_429 : f32 to vector<1x2xf32>
    %1571 = arith.mulf %1570, %1569 : vector<1x2xf32>
    %1572 = arith.addf %1568, %1571 : vector<1x2xf32>
    %1573 = vector.extract_strided_slice %1572 {offsets = [0, 0], sizes = [1, 1], strides = [1, 1]} : vector<1x2xf32> to vector<1x1xf32>
    %cst_430 = arith.constant 0.444671959 : f32
    %1574 = vector.broadcast %cst_430 : f32 to vector<1x1xf32>
    %1575 = arith.mulf %1574, %1573 : vector<1x1xf32>
    %1576 = vector.extract_strided_slice %1572 {offsets = [0, 1], sizes = [1, 1], strides = [1, 1]} : vector<1x2xf32> to vector<1x1xf32>
    %cst_431 = arith.constant 0.555328071 : f32
    %1577 = vector.broadcast %cst_431 : f32 to vector<1x1xf32>
    %1578 = arith.mulf %1577, %1576 : vector<1x1xf32>
    %1579 = arith.addf %1575, %1578 : vector<1x1xf32>
    %1580 = arith.mulf %1549, %1549 : vector<2x2xf32>
    %1581 = vector.extract_strided_slice %1580 {offsets = [0, 0], sizes = [1, 2], strides = [1, 1]} : vector<2x2xf32> to vector<1x2xf32>
    %cst_432 = arith.constant 0.444671959 : f32
    %1582 = vector.broadcast %cst_432 : f32 to vector<1x2xf32>
    %1583 = arith.mulf %1582, %1581 : vector<1x2xf32>
    %1584 = vector.extract_strided_slice %1580 {offsets = [1, 0], sizes = [1, 2], strides = [1, 1]} : vector<2x2xf32> to vector<1x2xf32>
    %cst_433 = arith.constant 0.555328071 : f32
    %1585 = vector.broadcast %cst_433 : f32 to vector<1x2xf32>
    %1586 = arith.mulf %1585, %1584 : vector<1x2xf32>
    %1587 = arith.addf %1583, %1586 : vector<1x2xf32>
    %1588 = vector.extract_strided_slice %1587 {offsets = [0, 0], sizes = [1, 1], strides = [1, 1]} : vector<1x2xf32> to vector<1x1xf32>
    %cst_434 = arith.constant 0.444671959 : f32
    %1589 = vector.broadcast %cst_434 : f32 to vector<1x1xf32>
    %1590 = arith.mulf %1589, %1588 : vector<1x1xf32>
    %1591 = vector.extract_strided_slice %1587 {offsets = [0, 1], sizes = [1, 1], strides = [1, 1]} : vector<1x2xf32> to vector<1x1xf32>
    %cst_435 = arith.constant 0.555328071 : f32
    %1592 = vector.broadcast %cst_435 : f32 to vector<1x1xf32>
    %1593 = arith.mulf %1592, %1591 : vector<1x1xf32>
    %1594 = arith.addf %1590, %1593 : vector<1x1xf32>
    %1595 = arith.mulf %1551, %1551 : vector<2x2xf32>
    %1596 = vector.extract_strided_slice %1595 {offsets = [0, 0], sizes = [1, 2], strides = [1, 1]} : vector<2x2xf32> to vector<1x2xf32>
    %cst_436 = arith.constant 0.444671959 : f32
    %1597 = vector.broadcast %cst_436 : f32 to vector<1x2xf32>
    %1598 = arith.mulf %1597, %1596 : vector<1x2xf32>
    %1599 = vector.extract_strided_slice %1595 {offsets = [1, 0], sizes = [1, 2], strides = [1, 1]} : vector<2x2xf32> to vector<1x2xf32>
    %cst_437 = arith.constant 0.555328071 : f32
    %1600 = vector.broadcast %cst_437 : f32 to vector<1x2xf32>
    %1601 = arith.mulf %1600, %1599 : vector<1x2xf32>
    %1602 = arith.addf %1598, %1601 : vector<1x2xf32>
    %1603 = vector.extract_strided_slice %1602 {offsets = [0, 0], sizes = [1, 1], strides = [1, 1]} : vector<1x2xf32> to vector<1x1xf32>
    %cst_438 = arith.constant 0.444671959 : f32
    %1604 = vector.broadcast %cst_438 : f32 to vector<1x1xf32>
    %1605 = arith.mulf %1604, %1603 : vector<1x1xf32>
    %1606 = vector.extract_strided_slice %1602 {offsets = [0, 1], sizes = [1, 1], strides = [1, 1]} : vector<1x2xf32> to vector<1x1xf32>
    %cst_439 = arith.constant 0.555328071 : f32
    %1607 = vector.broadcast %cst_439 : f32 to vector<1x1xf32>
    %1608 = arith.mulf %1607, %1606 : vector<1x1xf32>
    %1609 = arith.addf %1605, %1608 : vector<1x1xf32>
    %1610 = arith.mulf %1549, %1551 : vector<2x2xf32>
    %1611 = vector.extract_strided_slice %1610 {offsets = [0, 0], sizes = [1, 2], strides = [1, 1]} : vector<2x2xf32> to vector<1x2xf32>
    %cst_440 = arith.constant 0.444671959 : f32
    %1612 = vector.broadcast %cst_440 : f32 to vector<1x2xf32>
    %1613 = arith.mulf %1612, %1611 : vector<1x2xf32>
    %1614 = vector.extract_strided_slice %1610 {offsets = [1, 0], sizes = [1, 2], strides = [1, 1]} : vector<2x2xf32> to vector<1x2xf32>
    %cst_441 = arith.constant 0.555328071 : f32
    %1615 = vector.broadcast %cst_441 : f32 to vector<1x2xf32>
    %1616 = arith.mulf %1615, %1614 : vector<1x2xf32>
    %1617 = arith.addf %1613, %1616 : vector<1x2xf32>
    %1618 = vector.extract_strided_slice %1617 {offsets = [0, 0], sizes = [1, 1], strides = [1, 1]} : vector<1x2xf32> to vector<1x1xf32>
    %cst_442 = arith.constant 0.444671959 : f32
    %1619 = vector.broadcast %cst_442 : f32 to vector<1x1xf32>
    %1620 = arith.mulf %1619, %1618 : vector<1x1xf32>
    %1621 = vector.extract_strided_slice %1617 {offsets = [0, 1], sizes = [1, 1], strides = [1, 1]} : vector<1x2xf32> to vector<1x1xf32>
    %cst_443 = arith.constant 0.555328071 : f32
    %1622 = vector.broadcast %cst_443 : f32 to vector<1x1xf32>
    %1623 = arith.mulf %1622, %1621 : vector<1x1xf32>
    %1624 = arith.addf %1620, %1623 : vector<1x1xf32>
    %1625 = arith.mulf %1565, %1565 : vector<1x1xf32>
    %1626 = arith.subf %1594, %1625 : vector<1x1xf32>
    %1627 = arith.mulf %1579, %1579 : vector<1x1xf32>
    %1628 = arith.subf %1609, %1627 : vector<1x1xf32>
    %1629 = arith.mulf %1565, %1579 : vector<1x1xf32>
    %1630 = arith.subf %1624, %1629 : vector<1x1xf32>
    %cst_444 = arith.constant 5.000000e+00 : f32
    %1631 = vector.broadcast %cst_444 : f32 to vector<1x1xf32>
    %1632 = arith.addf %1565, %1631 : vector<1x1xf32>
    %cst_445 = arith.constant 5.000000e+00 : f32
    %1633 = vector.broadcast %cst_445 : f32 to vector<1x1xf32>
    %1634 = arith.addf %1579, %1633 : vector<1x1xf32>
    %1635 = arith.mulf %1632, %1632 : vector<1x1xf32>
    %1636 = arith.mulf %1634, %1634 : vector<1x1xf32>
    %1637 = arith.mulf %1632, %1634 : vector<1x1xf32>
    %cst_446 = arith.constant 2.000000e+00 : f32
    %1638 = vector.broadcast %cst_446 : f32 to vector<1x1xf32>
    %1639 = arith.mulf %1638, %1630 : vector<1x1xf32>
    %cst_447 = arith.constant 3.600000e-03 : f32
    %1640 = vector.broadcast %cst_447 : f32 to vector<1x1xf32>
    %1641 = arith.addf %1639, %1640 : vector<1x1xf32>
    %1642 = arith.addf %1626, %1628 : vector<1x1xf32>
    %cst_448 = arith.constant 3.600000e-03 : f32
    %1643 = vector.broadcast %cst_448 : f32 to vector<1x1xf32>
    %1644 = arith.addf %1642, %1643 : vector<1x1xf32>
    %1645 = tpu.reciprocal %1644 {approx = true} : vector<1x1xf32> -> vector<1x1xf32>
    %1646 = arith.mulf %1644, %1645 : vector<1x1xf32>
    %cst_449 = arith.constant 2.000000e+00 : f32
    %1647 = vector.broadcast %cst_449 : f32 to vector<1x1xf32>
    %1648 = arith.subf %1647, %1646 : vector<1x1xf32>
    %1649 = arith.mulf %1645, %1648 : vector<1x1xf32>
    %1650 = arith.mulf %1641, %1649 : vector<1x1xf32>
    %cst_450 = arith.constant 2.000000e+00 : f32
    %1651 = vector.broadcast %cst_450 : f32 to vector<1x1xf32>
    %1652 = arith.mulf %1651, %1637 : vector<1x1xf32>
    %cst_451 = arith.constant 4.000000e-04 : f32
    %1653 = vector.broadcast %cst_451 : f32 to vector<1x1xf32>
    %1654 = arith.addf %1652, %1653 : vector<1x1xf32>
    %1655 = arith.mulf %1654, %1650 : vector<1x1xf32>
    %1656 = arith.addf %1635, %1636 : vector<1x1xf32>
    %cst_452 = arith.constant 4.000000e-04 : f32
    %1657 = vector.broadcast %cst_452 : f32 to vector<1x1xf32>
    %1658 = arith.addf %1656, %1657 : vector<1x1xf32>
    %1659 = tpu.reciprocal %1658 {approx = true} : vector<1x1xf32> -> vector<1x1xf32>
    %1660 = arith.mulf %1658, %1659 : vector<1x1xf32>
    %cst_453 = arith.constant 2.000000e+00 : f32
    %1661 = vector.broadcast %cst_453 : f32 to vector<1x1xf32>
    %1662 = arith.subf %1661, %1660 : vector<1x1xf32>
    %1663 = arith.mulf %1659, %1662 : vector<1x1xf32>
    %1664 = arith.mulf %1655, %1663 : vector<1x1xf32>
    %1665 = vector.shape_cast %1664 : vector<1x1xf32> to vector<1x1x1xf32>
    %cst_454 = arith.constant dense<0.000000e+00> : vector<1xf32>
    %1666 = vector.multi_reduction <add>, %1665, %cst_454 [1, 2] : vector<1x1x1xf32> to vector<1xf32>
    %1667 = vector.shape_cast %1666 : vector<1xf32> to vector<1x1x1xf32>
    %1668 = vector.extract %1667[0, 0, 0] : f32 from vector<1x1x1xf32>
    %cst_455 = arith.constant 0.166666672 : f32
    %1669 = arith.mulf %1668, %cst_455 : f32
    %1670 = vector.shape_cast %1650 : vector<1x1xf32> to vector<1x1x1xf32>
    %cst_456 = arith.constant dense<0.000000e+00> : vector<1xf32>
    %1671 = vector.multi_reduction <add>, %1670, %cst_456 [1, 2] : vector<1x1x1xf32> to vector<1xf32>
    %1672 = vector.shape_cast %1671 : vector<1xf32> to vector<1x1x1xf32>
    %1673 = vector.extract %1672[0, 0, 0] : f32 from vector<1x1x1xf32>
    %cst_457 = arith.constant 0.166666672 : f32
    %1674 = arith.mulf %1673, %cst_457 : f32
    %1675 = tpu.iota {dimensions = array<i32: 0>} : vector<2x128xi32>
    %1676 = tpu.iota {dimensions = array<i32: 1>} : vector<2x128xi32>
    %cst_458 = arith.constant 0.000000e+00 : f32
    %1677 = vector.broadcast %cst_458 : f32 to vector<2x128xf32>
    %c0_i32 = arith.constant 0 : i32
    %1678 = vector.broadcast %c0_i32 : i32 to vector<2x128xi32>
    %1679 = arith.cmpi eq, %1675, %1678 : vector<2x128xi32>
    %c0_i32_459 = arith.constant 0 : i32
    %1680 = vector.broadcast %c0_i32_459 : i32 to vector<2x128xi32>
    %1681 = arith.cmpi eq, %1676, %1680 : vector<2x128xi32>
    %1682 = arith.andi %1679, %1681 : vector<2x128xi1>
    %1683 = vector.broadcast %481 : f32 to vector<2x128xf32>
    %1684 = arith.select %1682, %1683, %1677 : vector<2x128xi1>, vector<2x128xf32>
    %c1_i32 = arith.constant 1 : i32
    %1685 = vector.broadcast %c1_i32 : i32 to vector<2x128xi32>
    %1686 = arith.cmpi eq, %1675, %1685 : vector<2x128xi32>
    %c0_i32_460 = arith.constant 0 : i32
    %1687 = vector.broadcast %c0_i32_460 : i32 to vector<2x128xi32>
    %1688 = arith.cmpi eq, %1676, %1687 : vector<2x128xi32>
    %1689 = arith.andi %1686, %1688 : vector<2x128xi1>
    %1690 = vector.broadcast %486 : f32 to vector<2x128xf32>
    %1691 = arith.select %1689, %1690, %1684 : vector<2x128xi1>, vector<2x128xf32>
    %c0_i32_461 = arith.constant 0 : i32
    %1692 = vector.broadcast %c0_i32_461 : i32 to vector<2x128xi32>
    %1693 = arith.cmpi eq, %1675, %1692 : vector<2x128xi32>
    %c1_i32_462 = arith.constant 1 : i32
    %1694 = vector.broadcast %c1_i32_462 : i32 to vector<2x128xi32>
    %1695 = arith.cmpi eq, %1676, %1694 : vector<2x128xi32>
    %1696 = arith.andi %1693, %1695 : vector<2x128xi1>
    %1697 = vector.broadcast %968 : f32 to vector<2x128xf32>
    %1698 = arith.select %1696, %1697, %1691 : vector<2x128xi1>, vector<2x128xf32>
    %c1_i32_463 = arith.constant 1 : i32
    %1699 = vector.broadcast %c1_i32_463 : i32 to vector<2x128xi32>
    %1700 = arith.cmpi eq, %1675, %1699 : vector<2x128xi32>
    %c1_i32_464 = arith.constant 1 : i32
    %1701 = vector.broadcast %c1_i32_464 : i32 to vector<2x128xi32>
    %1702 = arith.cmpi eq, %1676, %1701 : vector<2x128xi32>
    %1703 = arith.andi %1700, %1702 : vector<2x128xi1>
    %1704 = vector.broadcast %973 : f32 to vector<2x128xf32>
    %1705 = arith.select %1703, %1704, %1698 : vector<2x128xi1>, vector<2x128xf32>
    %c0_i32_465 = arith.constant 0 : i32
    %1706 = vector.broadcast %c0_i32_465 : i32 to vector<2x128xi32>
    %1707 = arith.cmpi eq, %1675, %1706 : vector<2x128xi32>
    %c2_i32 = arith.constant 2 : i32
    %1708 = vector.broadcast %c2_i32 : i32 to vector<2x128xi32>
    %1709 = arith.cmpi eq, %1676, %1708 : vector<2x128xi32>
    %1710 = arith.andi %1707, %1709 : vector<2x128xi1>
    %1711 = vector.broadcast %1335 : f32 to vector<2x128xf32>
    %1712 = arith.select %1710, %1711, %1705 : vector<2x128xi1>, vector<2x128xf32>
    %c1_i32_466 = arith.constant 1 : i32
    %1713 = vector.broadcast %c1_i32_466 : i32 to vector<2x128xi32>
    %1714 = arith.cmpi eq, %1675, %1713 : vector<2x128xi32>
    %c2_i32_467 = arith.constant 2 : i32
    %1715 = vector.broadcast %c2_i32_467 : i32 to vector<2x128xi32>
    %1716 = arith.cmpi eq, %1676, %1715 : vector<2x128xi32>
    %1717 = arith.andi %1714, %1716 : vector<2x128xi1>
    %1718 = vector.broadcast %1340 : f32 to vector<2x128xf32>
    %1719 = arith.select %1717, %1718, %1712 : vector<2x128xi1>, vector<2x128xf32>
    %c0_i32_468 = arith.constant 0 : i32
    %1720 = vector.broadcast %c0_i32_468 : i32 to vector<2x128xi32>
    %1721 = arith.cmpi eq, %1675, %1720 : vector<2x128xi32>
    %c3_i32 = arith.constant 3 : i32
    %1722 = vector.broadcast %c3_i32 : i32 to vector<2x128xi32>
    %1723 = arith.cmpi eq, %1676, %1722 : vector<2x128xi32>
    %1724 = arith.andi %1721, %1723 : vector<2x128xi1>
    %1725 = vector.broadcast %1542 : f32 to vector<2x128xf32>
    %1726 = arith.select %1724, %1725, %1719 : vector<2x128xi1>, vector<2x128xf32>
    %c1_i32_469 = arith.constant 1 : i32
    %1727 = vector.broadcast %c1_i32_469 : i32 to vector<2x128xi32>
    %1728 = arith.cmpi eq, %1675, %1727 : vector<2x128xi32>
    %c3_i32_470 = arith.constant 3 : i32
    %1729 = vector.broadcast %c3_i32_470 : i32 to vector<2x128xi32>
    %1730 = arith.cmpi eq, %1676, %1729 : vector<2x128xi32>
    %1731 = arith.andi %1728, %1730 : vector<2x128xi1>
    %1732 = vector.broadcast %1547 : f32 to vector<2x128xf32>
    %1733 = arith.select %1731, %1732, %1726 : vector<2x128xi1>, vector<2x128xf32>
    %c0_i32_471 = arith.constant 0 : i32
    %1734 = vector.broadcast %c0_i32_471 : i32 to vector<2x128xi32>
    %1735 = arith.cmpi eq, %1675, %1734 : vector<2x128xi32>
    %c4_i32 = arith.constant 4 : i32
    %1736 = vector.broadcast %c4_i32 : i32 to vector<2x128xi32>
    %1737 = arith.cmpi eq, %1676, %1736 : vector<2x128xi32>
    %1738 = arith.andi %1735, %1737 : vector<2x128xi1>
    %1739 = vector.broadcast %1669 : f32 to vector<2x128xf32>
    %1740 = arith.select %1738, %1739, %1733 : vector<2x128xi1>, vector<2x128xf32>
    %c1_i32_472 = arith.constant 1 : i32
    %1741 = vector.broadcast %c1_i32_472 : i32 to vector<2x128xi32>
    %1742 = arith.cmpi eq, %1675, %1741 : vector<2x128xi32>
    %c4_i32_473 = arith.constant 4 : i32
    %1743 = vector.broadcast %c4_i32_473 : i32 to vector<2x128xi32>
    %1744 = arith.cmpi eq, %1676, %1743 : vector<2x128xi32>
    %1745 = arith.andi %1742, %1744 : vector<2x128xi1>
    %1746 = vector.broadcast %1674 : f32 to vector<2x128xf32>
    %1747 = arith.select %1745, %1746, %1740 : vector<2x128xi1>, vector<2x128xf32>
    %c0_474 = arith.constant 0 : index
    %c0_475 = arith.constant 0 : index
    %c0_476 = arith.constant 0 : index
    %1748 = vector.load %arg11[%c0_474, %c0_475, %c0_476] : memref<1x2x128xf32, #tpu.memory_space<vmem>>, vector<1x2x128xf32>
    %1749 = vector.shape_cast %1748 : vector<1x2x128xf32> to vector<2x128xf32>
    %1750 = vector.shape_cast %1747 : vector<2x128xf32> to vector<1x2x128xf32>
    tpu.vector_store %arg11[%c0_474, %c0_475, %c0_476], %1750 {strides = array<i32>} : memref<1x2x128xf32, #tpu.memory_space<vmem>>, vector<1x2x128xf32>,
    return
  }
  func.func @transform_0(%arg0: i32) -> (i32, i32, i32) {
    %c0_i32 = arith.constant 0 : i32
    %c0_i32_0 = arith.constant 0 : i32
    %c0_i32_1 = arith.constant 0 : i32
    return %arg0, %c0_i32, %c0_i32_0 : i32, i32, i32
  }
  func.func @transform_1(%arg0: i32) -> (i32, i32, i32) {
    %c0_i32 = arith.constant 0 : i32
    %c0_i32_0 = arith.constant 0 : i32
    %c0_i32_1 = arith.constant 0 : i32
    return %arg0, %c0_i32, %c0_i32_0 : i32, i32, i32
  }
  func.func @transform_2(%arg0: i32) -> (i32, i32, i32) {
    %c0_i32 = arith.constant 0 : i32
    %c0_i32_0 = arith.constant 0 : i32
    %c0_i32_1 = arith.constant 0 : i32
    return %arg0, %c0_i32, %c0_i32_0 : i32, i32, i32
  }
  func.func @transform_3(%arg0: i32) -> (i32, i32, i32) {
    %c0_i32 = arith.constant 0 : i32
    %c0_i32_0 = arith.constant 0 : i32
    %c0_i32_1 = arith.constant 0 : i32
    return %arg0, %c0_i32, %c0_i32_0 : i32, i32, i32
  }
  func.func @transform_4(%arg0: i32) -> (i32, i32, i32) {
    %c0_i32 = arith.constant 0 : i32
    %c0_i32_0 = arith.constant 0 : i32
    %c0_i32_1 = arith.constant 0 : i32
    return %arg0, %c0_i32, %c0_i32_0 : i32, i32, i32
  }
  func.func @transform_5(%arg0: i32) -> (i32, i32, i32) {
    %c0_i32 = arith.constant 0 : i32
    %c0_i32_0 = arith.constant 0 : i32
    %c0_i32_1 = arith.constant 0 : i32
    return %arg0, %c0_i32, %c0_i32_0 : i32, i32, i32
  }
  func.func @transform_6(%arg0: i32) -> (i32, i32, i32) {
    %c0_i32 = arith.constant 0 : i32
    %c0_i32_0 = arith.constant 0 : i32
    %c0_i32_1 = arith.constant 0 : i32
    return %arg0, %c0_i32, %c0_i32_0 : i32, i32, i32
  }
  func.func @transform_7(%arg0: i32) -> (i32, i32, i32) {
    %c0_i32 = arith.constant 0 : i32
    %c0_i32_0 = arith.constant 0 : i32
    %c0_i32_1 = arith.constant 0 : i32
    return %arg0, %c0_i32, %c0_i32_0 : i32, i32, i32
  }
  func.func @transform_8(%arg0: i32) -> (i32, i32, i32) {
    %c0_i32 = arith.constant 0 : i32
    %c0_i32_0 = arith.constant 0 : i32
    %c0_i32_1 = arith.constant 0 : i32
    return %arg0, %c0_i32, %c0_i32_0 : i32, i32, i32
  }
  func.func @transform_9(%arg0: i32) -> (i32, i32, i32) {
    %c0_i32 = arith.constant 0 : i32
    %c0_i32_0 = arith.constant 0 : i32
    %c0_i32_1 = arith.constant 0 : i32
    return %arg0, %c0_i32, %c0_i32_0 : i32, i32, i32
  }
  func.func @transform_10(%arg0: i32) -> (i32, i32, i32) {
    %c0_i32 = arith.constant 0 : i32
    %c0_i32_0 = arith.constant 0 : i32
    %c0_i32_1 = arith.constant 0 : i32
    return %arg0, %c0_i32, %c0_i32_0 : i32, i32, i32
  }
}

</mosaic_0001>

<bundles_post_ra>
// kernel: tpu_custom_call.1
= control target key start
LH: loop header
LB: loop body
LE: loop exit
PB: predicated region body
PF: predicated region fallthrough
CT: control target
= control target key end

     0   :  { %7 = vsyncpa [#allocation3], 0  ;;  %s797_s0 = inlined_call_operand.hbm [shape: f32[6,22], index: 0, kind: input, shape index: {}]   ;;  %s798_s1 = inlined_call_operand.hbm [shape: f32[22,36], index: 1, kind: input, shape index: {}]   ;;  %s799_s2 = inlined_call_operand.hbm [shape: f32[6,36], index: 2, kind: output, shape index: {}]  }
   0x1   :  { %8 = vsyncpa [#allocation6], 0 }
   0x2   :  { %9 = vsyncpa [#allocation4], 0  ;;  %s725_s9 = smov [#allocation2]   ;;  %s726_s11 = smov [#allocation5]  }
   0x3   :  { %s16_s10 = sshll.u32 %s725_s9, 4  ;;  %s25_s12 = sshll.u32 %s726_s11, 4  ;;  %s17_s10 = int_to_ptr.vmem [resolvable:$true] %s16_s10  ;;  %s748_s12 = int_to_ptr.vmem [resolvable:$true] %s25_s12 }
   0x4   :  { %s653_s15 = scalar_lea.hbm %s797_s0, 128 }
   0x5   :  { %p654_p0 = scmp.ne.s32.totalorder %s797_s0, %s653_s15  ;;  %p657_p1 = scmp.lt.u32.totalorder %s653_s15, %s797_s0 }
   0x7   :  { %p659_p2 = pnand %p657_p1, %p654_p0 }
   0x9   :  { %662 = shalt.err (!%p659_p2)
}
   0xa   :  { %s663_s20 = scalar_lea.vmem %s17_s10, 128  ;;  %p668_p4 = scmp.lt.s32.totalorder %s17_s10, %s17_s10 }
   0xb   :  { %p664_p3 = scmp.ne.s32.totalorder %s17_s10, %s663_s20  ;;  %p669_p5 = scmp.lt.s32.totalorder %s663_s20, %s663_s20 }
   0xd   :  { %p670_p6 = por %p669_p5, %p668_p4 }
   0xf   :  { %p671_p7 = pnand %p670_p6, %p664_p3 }
  0x11   :  { %674 = shalt.err (!%p671_p7)
}
  0x12   :  { %19 = dma.hbm_to_vmem [thread:$0]  %s797_s0, 128, %s17_s10, [#allocation3]  }
  0x13   :  { %s675_s25 = scalar_lea.hbm %s798_s1, 384 }
  0x14   :  { %p676_p8 = scmp.ne.s32.totalorder %s798_s1, %s675_s25  ;;  %p679_p9 = scmp.lt.u32.totalorder %s675_s25, %s798_s1 }
  0x16   :  { %p681_p10 = pnand %p679_p9, %p676_p8 }
  0x18   :  { %684 = shalt.err (!%p681_p10)
}
  0x19   :  { %s685_s30 = scalar_lea.vmem %s748_s12, 384  ;;  %p690_p12 = scmp.lt.s32.totalorder %s748_s12, %s748_s12 }
  0x1a   :  { %p686_p11 = scmp.ne.s32.totalorder %s748_s12, %s685_s30  ;;  %p691_p13 = scmp.lt.s32.totalorder %s685_s30, %s685_s30 }
  0x1c   :  { %p692_p0 = por %p691_p13, %p690_p12 }
  0x1e   :  { %p693_p1 = pnand %p692_p0, %p686_p11 }
  0x20   :  { %696 = shalt.err (!%p693_p1)
}
  0x21   :  { %s727_s0 = smov 128   ;;  %s728_s3 = smov 8  }
  0x22   :  { %31 = dma.hbm_to_vmem [thread:$0]  %s798_s1, 384, %s748_s12, [#allocation6], %s727_s0, %s727_s0, %s728_s3  }
  0x23   :  { %719 = dma.done.wait [#allocation3], 128  }
  0x24   :  { %720 = vsyncadd [#allocation3], 4294967168 }
  0x25   :  { %721 = dma.done.wait [#allocation6], 384  }
  0x26   :  { %722 = vsyncadd [#allocation6], 4294966912  ;;  %v729_v0 = vmov 0.0|0.0   ;;  %vm730_vm0 = vmmov 0   ;;  %v731_v1 = vmov 0.0   ;;  %vm46_vm1 = vcmask 1045504  }
  0x27   :  { %627 = vmatprep.subr.bf16.mxu0 %v729_v0  ;;  %618 = vmatprep.subr.bf16.mxu1 %v729_v0  ;;  %vm42_vm2 = vcmask 179200   ;;  %v39_v2 = vld [vmem:[#allocation5] sm:$0xff]  ;;  %v40_v3 = vld [vmem:[#allocation5 + $0x8] sm:$0xff]  ;;  %v41_v4 = vld [vmem:[#allocation5 + $0x10] sm:$0x3f]  ;;  %s732_s1 = smov [#allocation7]  }
  0x28   :  { %597 = vmatprep.mubr.msk.f32.mxu0 %vm730_vm0, %v731_v1  ;;  %570 = vmatprep.mubr.msk.f32.mxu1 %vm730_vm0, %v731_v1  ;;  %v51_v5 = vand.u32 4294901760, %v39_v2  ;;  %v54_v6 = vand.u32 4294901760, %v40_v3  ;;  %v48_v7 = vsel %vm46_vm1, %v41_v4, 0  ;;  %v38_v8 = vld [vmem:[#allocation2] sm:$0x3f]  ;;  %s530_s6 = sshll.u32 %s732_s1, 4  ;;  %s531_s6 = int_to_ptr.vmem [resolvable:$true] %s530_s6 }
  0x29   :  { %v57_v9 = vand.u32 4294901760, %v48_v7  ;;  %v44_v10 = vsel %vm42_vm2, %v38_v8, 0  ;;  %vm522_vm3 = vcmask 291840   ;;  %s697_s7 = scalar_lea.vmem %s531_s6, 128  ;;  %p702_p3 = scmp.lt.s32.totalorder %s531_s6, %s531_s6 }
  0x2a   :  { %v619_v11 = vpack.c.bf16 %v54_v6, %v51_v5  ;;  %v130_v12 = vsub.f32 %v39_v2, %v51_v5  ;;  %v137_v13 = vsub.f32 %v40_v3, %v54_v6  ;;  %v118_v14 = vand.u32 4294901760, %v44_v10  ;;  %p698_p2 = scmp.ne.s32.totalorder %s531_s6, %s697_s7  ;;  %p703_p4 = scmp.lt.s32.totalorder %s697_s7, %s697_s7 }
  0x2b   :  { %v144_v15 = vsub.f32 %v48_v7, %v57_v9 }
  0x2c   :  { %629 = vmatpush3.bf16.msra.mxu0 %v619_v11  ;;  %620 = vmatpush3.bf16.msra.mxu1 %v619_v11  ;;  %v119_v16 = vsub.f32 %v44_v10, %v118_v14  ;;  %v131_v17 = vand.u32 4294901760, %v130_v12  ;;  %v138_v18 = vand.u32 4294901760, %v137_v13  ;;  %v625_v31 = vpack.c.bf16 %v137_v13, %v130_v12  ;;  %p704_p5 = por %p703_p4, %p702_p3 }
  0x2d   :  { %595 = vmatprep.subr.mxu0 %v731_v1  ;;  %568 = vmatprep.subr.mxu1 %v731_v1  ;;  %v145_v19 = vand.u32 4294901760, %v144_v15 }
  0x2e   :  { %v120_v20 = vand.u32 4294901760, %v119_v16  ;;  %v132_v21 = vsub.f32 %v130_v12, %v131_v17  ;;  %v139_v22 = vsub.f32 %v137_v13, %v138_v18  ;;  %v631_v23 = vpack.c.bf16 %v138_v18, %v131_v17  ;;  %p705_p6 = pnand %p704_p5, %p698_p2 }
  0x2f   :  { %v146_v27 = vsub.f32 %v144_v15, %v145_v19 }
  0x30   :  { %596 = vmatpush3.msra.mxu0 %v57_v9  ;;  %569 = vmatpush3.msra.mxu1 %v57_v9  ;;  %v121_v24 = vsub.f32 %v119_v16, %v120_v20  ;;  %v133_v25 = vand.u32 4294901760, %v132_v21  ;;  %v140_v26 = vand.u32 4294901760, %v139_v22 }
  0x31   :  { %598 = vmatmul.mubr.f32.vlgmr.msra.gmra.mrb[0].mxu0 %v120_v20  ;;  %621 = vmatprep.subr.bf16.mxu1 %v729_v0  ;;  %v147_v30 = vand.u32 4294901760, %v146_v27 }
  0x32   :  { %v122_v28 = vand.u32 4294901760, %v121_v24  ;;  %630 = vmatprep.subr.bf16.mxu0 %v729_v0  ;;  %v622_v29 = vpack.c.bf16 %v140_v26, %v133_v25  ;;  %606 = vmatprep.mubr.msk.f32.mxu0 %vm730_vm0, %v731_v1 }
  0x33   :  { %632 = vmatpush3.bf16.msra.mxu0 %v631_v23 }
  0x34   :  { %571 = vmatmul.mubr.f32.vlgmr.msra.gmra.mrb[0].mxu1 %v122_v28  ;;  %604 = vmatprep.subr.mxu0 %v731_v1 }
  0x35   :  { %623 = vmatpush3.bf16.msra.mxu1 %v622_v29  ;;  %579 = vmatprep.mubr.msk.f32.mxu1 %vm730_vm0, %v731_v1 }
  0x36   :  { %577 = vmatprep.subr.mxu1 %v731_v1 }
  0x37   :  { %605 = vmatpush3.msra.mxu0 %v145_v19 }
  0x38   :  { %633 = vmatprep.subr.bf16.mxu0 %v729_v0 }
  0x39   :  { %578 = vmatpush3.msra.mxu1 %v147_v30  ;;  %607 = vmatmul.mubr.f32.vlgmr.msra.gmra.mrb[0].mxu0 %v118_v14 }
  0x3a   :  { %624 = vmatprep.subr.bf16.mxu1 %v729_v0  ;;  %635 = vmatpush3.bf16.msra.mxu0 %v619_v11 }
  0x3b   :  { %613 = vmatprep.subr.mxu0 %v731_v1  ;;  %615 = vmatprep.mubr.msk.f32.mxu0 %vm730_vm0, %v731_v1 }
  0x3c   :  { %580 = vmatmul.mubr.f32.vlgmr.msra.gmra.mrb[0].mxu1 %v118_v14 }
  0x3d   :  { %626 = vmatpush3.bf16.msra.mxu1 %v625_v31  ;;  %588 = vmatprep.mubr.msk.f32.mxu1 %vm730_vm0, %v731_v1 }
  0x3e   :  { %586 = vmatprep.subr.mxu1 %v731_v1  ;;  %614 = vmatpush3.msra.mxu0 %v57_v9 }
  0x41   :  { %587 = vmatpush3.msra.mxu1 %v144_v15  ;;  %616 = vmatmul.mubr.f32.vlgmr.msra.gmra.mrb[0].mxu0 %v118_v14 }
  0x44   :  { %589 = vmatmul.mubr.f32.vlgmr.msra.gmra.mrb[0].mxu1 %v119_v16 }
 0x114   :  { %v518_v32 = vpop.f32.mrb[0].mxu0 }
 0x115   :  { %v617_v33 = vpop.f32.mrb[1].mxu0 }
 0x117   :  { %v288_v34 = vpop.f32.mrb[0].mxu1 }
 0x118   :  { %v636_v35 = vadd.f32 %v518_v32, %v288_v34  ;;  %v590_v36 = vpop.f32.mrb[1].mxu1 }
 0x11a   :  { %523 = vst.msk [vmem:[#allocation7] sm:$0x3f] %vm522_vm3, %v636_v35 }
 0x11b   :  { %708 = shalt.err (!%p705_p6)
}
 0x11c   :  { %s709_s10 = scalar_lea.hbm %s799_s2, 128 }
 0x11d   :  { %p710_p7 = scmp.ne.s32.totalorder %s799_s2, %s709_s10  ;;  %p713_p8 = scmp.lt.u32.totalorder %s709_s10, %s799_s2 }
 0x11f   :  { %p715_p9 = pnand %p713_p8, %p710_p7 }
 0x121   :  { %718 = shalt.err (!%p715_p9)
}
 0x122   :  { %533 = dma.vmem_to_hbm [thread:$0]  %s531_s6, 128, %s799_s2, [#allocation4]  }
 0x123   :  { %723 = dma.done.wait [#allocation4], 128  }
 0x124   :  { %724 = vsyncadd [#allocation4], 4294967168 }
 0x125   :  { %537 = vsyncpa [#allocation3], 1 }
 0x126   :  { %538 = vsyncpa [#allocation6], 1 }
 0x127   :  { %539 = vsyncpa [#allocation4], 1 }

// kernel: _msssim_impl.1
= control target key start
LH: loop header
LB: loop body
LE: loop exit
PB: predicated region body
PF: predicated region fallthrough
CT: control target
= control target key end

     0   :  { %s3897_s13 = smov 0   ;;  %s6337_s0 = inlined_call_operand.vmem [shape: f32[6,32,32], index: 0, kind: input, shape index: {}]   ;;  %s6338_s1 = inlined_call_operand.vmem [shape: f32[6,16,16], index: 1, kind: input, shape index: {}]   ;;  %s6339_s2 = inlined_call_operand.vmem [shape: f32[6,8,8], index: 2, kind: input, shape index: {}]   ;;  %s6340_s3 = inlined_call_operand.vmem [shape: f32[6,4,4], index: 3, kind: input, shape index: {}]   ;;  %s6341_s4 = inlined_call_operand.vmem [shape: f32[6,2,2], index: 4, kind: input, shape index: {}]   ;;  %s6342_s5 = inlined_call_operand.vmem [shape: f32[6,32,32], index: 5, kind: input, shape index: {}]   ;;  %s6343_s6 = inlined_call_operand.vmem [shape: f32[6,16,16], index: 6, kind: input, shape index: {}]   ;;  %s6344_s7 = inlined_call_operand.vmem [shape: f32[6,8,8], index: 7, kind: input, shape index: {}]   ;;  %s6345_s8 = inlined_call_operand.vmem [shape: f32[6,4,4], index: 8, kind: input, shape index: {}]   ;;  %s6346_s9 = inlined_call_operand.vmem [shape: f32[6,2,2], index: 9, kind: input, shape index: {}]   ;;  %s6347_s10 = inlined_call_operand.vmem [shape: f32[6,2,128], index: 10, kind: output, shape index: {}]  }
   0x1 LB: > { %s3723_s14 = sadd.s32 4294967295, %s3830_s13   ;;  %p3727_p0 = scmp.ge.s32.totalorder %s3830_s13, 1  ;;  %s3830_s13 = sphi %s3897_s13, %s20_s13  }
   0x2   : > { %p396_p1 = scmp.lt.s32.totalorder %s3830_s13, 7 }
   0x4   : > { %p397_p2 = pnand %p3727_p0, %p396_p1 }
   0x6   : > { %400 = sbr.rel (%p397_p2) target bundleno = 952 (0x3b8), region = 60 }
   0xd   : > { %p472_p3 = scmp.lt.s32.totalorder %s3723_s14, 5  ;;  %vm575_vm0 = vcmask 1044480   ;;  %vm597_vm1 = vcmask 1043456   ;;  %vm619_vm2 = vcmask 1042432   ;;  %vm633_vm3 = vcmask 1041408   ;;  %s3832_s22 = smov 125  }
   0xe   : > { %vm647_vm4 = vcmask 1040384   ;;  %vm537_vm5 = vcmask 1046528   ;;  %vm555_vm6 = vcmask 1045504   ;;  %s3833_s23 = smov 127   ;;  %s3834_s24 = smov 123   ;;  %vm2187_vm7 = vcmask 179200  }
   0xf   : > { %s6588_s14 = smov (!%p472_p3, %s3723_s14), 5  ;;  %s3835_s25 = smov 126   ;;  %vm2191_vm8 = vcmask 177152   ;;  %vm2819_vm9 = vcmask 46080  }
  0x10   : > { %s3745_s15 = sshll.u32 %s6588_s14, 5  ;;  %s3836_s26 = smov 124  }
  0x11   : > { %s3913_s18 = scalar_lea.vmem %s6337_s0, %s3745_s15  ;;  %s4036_s21 = scalar_lea.vmem %s6342_s5, %s3745_s15 }
  0x12   : > { %v3916_v0 = vld [vmem:[%s3913_s18 + $0x10] sm:$0xff]  ;;  %v3919_v1 = vld [vmem:[%s3913_s18 + $0x18] sm:$0xff]  ;;  %v3952_v25 = vld [vmem:[%s3913_s18] sm:$0xff]  ;;  %s3837_s27 = smov 122   ;;  %s3838_s28 = smov 121  }
  0x13   : > { %v3922_v2 = vmul.f32 0.0010283801, %v3916_v0  ;;  %v533_v3 = vmul.f32 0.007598758, %v3916_v0  ;;  %v3926_v4 = vmul.f32 0.036000773, %v3916_v0 }
  0x14   : > { %v3929_v5 = vmul.f32 0.10936069, %v3916_v0  ;;  %v570_v6 = vmul.f32 0.10936069, %v3919_v1  ;;  %v3935_v8 = vmul.f32 0.21300554, %v3916_v0 }
  0x15   : > { %v3932_v7 = vrot.slane %v533_v3, 1  ;;  %v592_v9 = vmul.f32 0.21300554, %v3919_v1  ;;  %v559_v10 = vrot.slane %v3926_v4, 2  ;;  %v3941_v13 = vmul.f32 0.26601171, %v3916_v0 }
  0x16   : > { %v579_v11 = vrot.slane %v3929_v5, 3  ;;  %v581_v12 = vrot.slane %v570_v6, 3  ;;  %v601_v15 = vrot.slane %v3935_v8, 4  ;;  %v614_v17 = vmul.f32 0.26601171, %v3919_v1  ;;  %v3964_v30 = vld [vmem:[%s3913_s18 + $0x8] sm:$0xff] }
  0x17   : > { %v548_v14 = vadd.f32 %v3932_v7, %v3922_v2  ;;  %v603_v16 = vrot.slane %v592_v9, 4  ;;  %v623_v19 = vrot.slane %v3941_v13, 5  ;;  %v637_v20 = vrot.slane %v3935_v8, 6  ;;  %s3839_s29 = smov 120   ;;  %s3840_s30 = smov 119  }
  0x18   : > { %v582_v18 = vsel %vm575_vm0, %v579_v11, %v581_v12  ;;  %v639_v21 = vrot.slane %v592_v9, 6  ;;  %v625_v23 = vrot.slane %v614_v17, 5  ;;  %v651_v24 = vrot.slane %v3929_v5, 7  ;;  %s3841_s11 = smov 118   ;;  %s3746_s12 = sshll.u32 %s6588_s14, 4 }
  0x19   : > { %v566_v22 = vadd.f32 %v559_v10, %v548_v14  ;;  %v604_v26 = vsel %vm597_vm1, %v601_v15, %v603_v16  ;;  %v653_v28 = vrot.slane %v570_v6, 7  ;;  %v3961_v29 = vmul.f32 0.007598758, %v3919_v1  ;;  %s481_s17 = scalar_lea.vmem %s6338_s1, %s3746_s12  ;;  %s503_s20 = scalar_lea.vmem %s6343_s6, %s3746_s12 }
  0x1a   : > { %v640_v27 = vsel %vm633_vm3, %v637_v20, %v639_v21  ;;  %v626_v32 = vsel %vm619_vm2, %v623_v19, %v625_v23  ;;  %v661_v33 = vmul.f32 0.036000773, %v3919_v1  ;;  %v3971_v34 = vmul.f32 0.0010283801, %v3919_v1 }
  0x1b   : > { %v588_v31 = vadd.f32 %v582_v18, %v566_v22  ;;  %v654_v35 = vsel %vm647_vm4, %v651_v24, %v653_v28  ;;  %v667_v36 = vrot.slane %v3961_v29, 1  ;;  %v528_v37 = vmul.f32 0.0010283801, %v3952_v25 }
  0x1c   : > { %v531_v38 = vmul.f32 0.007598758, %v3952_v25  ;;  %v3980_v40 = vmul.f32 0.0010283801, %v3964_v30  ;;  %v532_v41 = vmul.f32 0.007598758, %v3964_v30 }
  0x1d   : > { %v610_v39 = vadd.f32 %v604_v26, %v588_v31  ;;  %v549_v42 = vmul.f32 0.036000773, %v3952_v25  ;;  %v681_v43 = vrot.slane %v3971_v34, 2  ;;  %v3986_v45 = vmul.f32 0.036000773, %v3964_v30 }
  0x1e   : > { %v538_v44 = vrot.slane %v531_v38, 1  ;;  %v567_v46 = vmul.f32 0.10936069, %v3952_v25  ;;  %v539_v48 = vrot.slane %v532_v41, 1  ;;  %v568_v50 = vmul.f32 0.10936069, %v3964_v30 }
  0x1f   : > { %v632_v47 = vadd.f32 %v626_v32, %v610_v39  ;;  %v556_v49 = vrot.slane %v549_v42, 2  ;;  %v557_v51 = vrot.slane %v3986_v45, 2  ;;  %v589_v53 = vmul.f32 0.21300554, %v3952_v25 }
  0x20   : > { %v576_v52 = vrot.slane %v567_v46, 3  ;;  %v590_v54 = vmul.f32 0.21300554, %v3964_v30  ;;  %v540_v56 = vsel %vm537_vm5, %v538_v44, %v539_v48  ;;  %v3996_v57 = vsel %vm537_vm5, %v539_v48, %v3932_v7 }
  0x21   : > { %v646_v55 = vadd.f32 %v640_v27, %v632_v47  ;;  %v577_v58 = vrot.slane %v568_v50, 3  ;;  %v546_v59 = vadd.f32 %v540_v56, %v528_v37  ;;  %v547_v60 = vadd.f32 %v3996_v57, %v3980_v40  ;;  %v4056_v56 = vld [vmem:[%s4036_s21 + $0x8] sm:$0xff] }
  0x22   : > { %v558_v61 = vsel %vm555_vm6, %v556_v49, %v557_v51  ;;  %v560_v62 = vsel %vm555_vm6, %v557_v51, %v559_v10  ;;  %v598_v9 = vrot.slane %v589_v53, 4  ;;  %v599_v16 = vrot.slane %v590_v54, 4 }
  0x23   : > { %v660_v63 = vadd.f32 %v654_v35, %v646_v55  ;;  %v578_v3 = vsel %vm575_vm0, %v576_v52, %v577_v58  ;;  %v580_v6 = vsel %vm575_vm0, %v577_v58, %v579_v11  ;;  %v564_v12 = vadd.f32 %v558_v61, %v546_v59  ;;  %v4059_v58 = vld [vmem:[%s4036_s21 + $0x10] sm:$0xff] }
  0x24   : > { %v565_v14 = vadd.f32 %v560_v62, %v547_v60  ;;  %v611_v17 = vmul.f32 0.26601171, %v3952_v25  ;;  %v612_v21 = vmul.f32 0.26601171, %v3964_v30  ;;  %v634_v22 = vrot.slane %v589_v53, 6 }
  0x25   : > { %v664_v18 = vadd.f32 %v661_v33, %v660_v63  ;;  %v635_v23 = vrot.slane %v590_v54, 6  ;;  %v586_v26 = vadd.f32 %v578_v3, %v564_v12  ;;  %v600_v10 = vsel %vm597_vm1, %v598_v9, %v599_v16 }
  0x26   : > { %v587_v27 = vadd.f32 %v580_v6, %v565_v14  ;;  %v602_v28 = vsel %vm597_vm1, %v599_v16, %v601_v15  ;;  %v620_v31 = vrot.slane %v611_v17, 5  ;;  %v621_v32 = vrot.slane %v612_v21, 5 }
  0x27   : > { %v673_v11 = vadd.f32 %v667_v36, %v664_v18  ;;  %v608_v35 = vadd.f32 %v600_v10, %v586_v26  ;;  %v648_v37 = vrot.slane %v567_v46, 7  ;;  %v649_v38 = vrot.slane %v568_v50, 7  ;;  %v4121_v10 = vld [vmem:[%s4036_s21 + $0x18] sm:$0xff] }
  0x28   : > { %v609_v33 = vadd.f32 %v602_v28, %v587_v27  ;;  %v622_v41 = vsel %vm619_vm2, %v620_v31, %v621_v32  ;;  %v636_v42 = vsel %vm633_vm3, %v634_v22, %v635_v23  ;;  %v624_v15 = vsel %vm619_vm2, %v621_v32, %v623_v19 }
  0x29   : > { %v4014_v39 = vadd.f32 %v681_v43, %v673_v11  ;;  %v630_v44 = vadd.f32 %v622_v41, %v608_v35  ;;  %v638_v48 = vsel %vm633_vm3, %v635_v23, %v637_v20  ;;  %v650_v50 = vsel %vm647_vm4, %v648_v37, %v649_v38 }
  0x2a   : > { %v631_v47 = vadd.f32 %v624_v15, %v609_v33  ;;  %v678_v8 = vrot.slane %v3980_v40, 2  ;;  %v679_v52 = vrot.slane %v3922_v2, 2  ;;  %v652_v40 = vsel %vm647_vm4, %v649_v38, %v651_v24  ;;  %v4064_v2 = vld [vmem:[%s4036_s21] sm:$0xff] }
  0x2b   : > { %v4025_v46 = vmul.f32 0.10936069, %v4014_v39  ;;  %v4028_v49 = vmul.f32 0.007598758, %v4014_v39  ;;  %v644_v13 = vadd.f32 %v636_v42, %v630_v44  ;;  %v766_v20 = vmul.f32 0.26601171, %v4014_v39 }
  0x2c   : > { %v645_v19 = vadd.f32 %v638_v48, %v631_v47  ;;  %v4045_v51 = vmul.f32 0.036000773, %v4014_v39  ;;  %v668_v55 = vsel %vm537_vm5, %v3932_v7, %v667_v36  ;;  %v748_v5 = vmul.f32 0.21300554, %v4014_v39 }
  0x2d   : > { %738 = vrot.lane.b32.xlu0 %v4025_v46, %s3832_s22  ;;  %702 = vrot.lane.b32.xlu1 %v4028_v49, %s3833_s23  ;;  %v658_v53 = vadd.f32 %v650_v50, %v644_v13  ;;  %v680_v7 = vsel %vm555_vm6, %v678_v8, %v679_v52  ;;  %v682_v24 = vsel %vm555_vm6, %v679_v52, %v681_v43  ;;  %v849_v36 = vmul.f32 0.007598758, %v4056_v56 }
  0x2e   : > { %v659_v54 = vadd.f32 %v652_v40, %v645_v19  ;;  %v848_v63 = vmul.f32 0.007598758, %v4064_v2  ;;  %v4084_v34 = vmul.f32 0.036000773, %v4056_v56  ;;  %v4092_v6 = vmul.f32 0.036000773, %v4059_v58 }
  0x2f   : > { %v662_v59 = vadd.f32 %v658_v53, %v3986_v45  ;;  %v850_v45 = vmul.f32 0.007598758, %v4059_v58  ;;  %v865_v14 = vmul.f32 0.036000773, %v4064_v2  ;;  %v4105_v17 = vmul.f32 0.0010283801, %v4056_v56 }
  0x30   : > { %v663_v60 = vadd.f32 %v659_v54, %v3926_v4  ;;  %v854_v12 = vrot.slane %v848_v63, 1  ;;  %v872_v18 = vrot.slane %v4084_v34, 2  ;;  %v874_v22 = vrot.slane %v4092_v6, 2 }
  0x31   : > { %774 = vrot.lane.b32.xlu0 %v766_v20, %s3834_s24  ;;  %720 = vrot.lane.b32.xlu1 %v4045_v51, %s3835_s25  ;;  %v671_v29 = vadd.f32 %v662_v59, %v3996_v57  ;;  %v855_v57 = vrot.slane %v849_v36, 1  ;;  %v4089_v3 = vrot.slane %v850_v45, 1  ;;  %v4114_v23 = vmul.f32 0.10936069, %v4056_v56 }
  0x32   : > { %v672_v4 = vadd.f32 %v668_v55, %v663_v60  ;;  %v4117_v26 = vmul.f32 0.10936069, %v4059_v58  ;;  %v845_v27 = vmul.f32 0.0010283801, %v4064_v2  ;;  %v871_v31 = vrot.slane %v865_v14, 2 }
  0x33   : > { %v4077_v61 = vadd.f32 %v680_v7, %v671_v29  ;;  %v4110_v21 = vsel %vm537_vm5, %v855_v57, %v4089_v3  ;;  %v856_v11 = vsel %vm537_vm5, %v854_v12, %v855_v57  ;;  %v4137_v33 = vmul.f32 0.10936069, %v4064_v2 }
  0x34   : > { %v4079_v62 = vadd.f32 %v682_v24, %v672_v4  ;;  %v863_v35 = vadd.f32 %v4110_v21, %v4105_v17  ;;  %v4140_v37 = vmul.f32 0.21300554, %v4056_v56  ;;  %v875_v38 = vsel %vm555_vm6, %v872_v18, %v874_v22 }
  0x35   : > { %756 = vrot.lane.b32.xlu1 %v748_v5, %s3836_s26  ;;  %v4087_v43 = vmul.f32 0.007598758, %v4077_v61  ;;  %v4102_v16 = vmul.f32 0.036000773, %v4077_v61  ;;  %v891_v41 = vrot.slane %v4114_v23, 3  ;;  %v893_v42 = vrot.slane %v4117_v26, 3 }
  0x36   : > { %v4097_v9 = vmul.f32 0.007598758, %v4079_v62  ;;  %v4126_v28 = vmul.f32 0.036000773, %v4079_v62  ;;  %v4132_v32 = vmul.f32 0.10936069, %v4079_v62  ;;  %v862_v47 = vadd.f32 %v856_v11, %v845_v27 }
  0x37   : > { %698 = vrot.lane.b32.xlu0 %v4087_v43, %s3833_s23  ;;  %v4146_v15 = vmul.f32 0.21300554, %v4059_v58  ;;  %v4149_v44 = vmul.f32 0.0010283801, %v4059_v58  ;;  %v4154_v48 = vmul.f32 0.10936069, %v4077_v61  ;;  %v873_v50 = vsel %vm555_vm6, %v871_v31, %v872_v18 }
  0x38   : > { %v4158_v13 = vmul.f32 0.10936069, %v4121_v10  ;;  %v903_v8 = vmul.f32 0.21300554, %v4064_v2  ;;  %v746_v19 = vmul.f32 0.21300554, %v4077_v61  ;;  %v880_v20 = vadd.f32 %v875_v38, %v863_v35 }
  0x39   : > { %786 = vrot.lane.b32.xlu1 %v748_v5, %s3837_s27  ;;  %v890_v52 = vrot.slane %v4137_v33, 3  ;;  %v912_v40 = vrot.slane %v4140_v37, 4  ;;  %v894_v53 = vsel %vm575_vm0, %v891_v41, %v893_v42  ;;  %v914_v54 = vrot.slane %v4146_v15, 4 }
  0x3a   : > { %v925_v55 = vmul.f32 0.26601171, %v4056_v56  ;;  %v926_v59 = vmul.f32 0.26601171, %v4059_v58  ;;  %v864_v60 = vadd.f32 %v4089_v3, %v4149_v44  ;;  %v879_v5 = vadd.f32 %v873_v50, %v862_v47 }
  0x3b   : > { %700 = vrot.lane.b32.xlu0 %v4097_v9, %s3833_s23  ;;  %v747_v7 = vmul.f32 0.21300554, %v4079_v62  ;;  %v765_v24 = vmul.f32 0.26601171, %v4079_v62  ;;  %v895_v29 = vrot.slane %v4158_v13, 3  ;;  %v911_v4 = vrot.slane %v903_v8, 4 }
  0x3c   : > { %v892_v36 = vsel %vm575_vm0, %v890_v52, %v891_v41  ;;  %v901_v45 = vadd.f32 %v894_v53, %v880_v20  ;;  %v924_v63 = vmul.f32 0.26601171, %v4064_v2  ;;  %v906_v57 = vmul.f32 0.21300554, %v4121_v10 }
  0x3d   : > { %716 = vrot.lane.b32.xlu1 %v4102_v16, %s3835_s25  ;;  %v915_v12 = vsel %vm597_vm1, %v912_v40, %v914_v54  ;;  %v933_v14 = vrot.slane %v925_v55, 5  ;;  %v935_v18 = vrot.slane %v926_v59, 5  ;;  %v881_v27 = vadd.f32 %v874_v22, %v864_v60 }
  0x3e   : > { %v764_v11 = vmul.f32 0.26601171, %v4077_v61  ;;  %v896_v31 = vsel %vm575_vm0, %v893_v42, %v895_v29  ;;  %v900_v35 = vadd.f32 %v892_v36, %v879_v5  ;;  %v913_v38 = vsel %vm597_vm1, %v911_v4, %v912_v40 }
  0x3f   : > { %718 = vrot.lane.b32.xlu0 %v4126_v28, %s3835_s25  ;;  %v922_v41 = vadd.f32 %v915_v12, %v901_v45  ;;  %v932_v47 = vrot.slane %v924_v63, 5  ;;  %v916_v50 = vrot.slane %v906_v57, 4  ;;  %v927_v20 = vmul.f32 0.26601171, %v4121_v10 }
  0x40   : > { %v946_v52 = vrot.slane %v4140_v37, 6  ;;  %v936_v22 = vsel %vm619_vm2, %v933_v14, %v935_v18  ;;  %v948_v53 = vrot.slane %v4146_v15, 6  ;;  %v902_v55 = vadd.f32 %v896_v31, %v881_v27 }
  0x41   : > { %736 = vrot.lane.b32.xlu1 %v4132_v32, %s3832_s22  ;;  %v921_v42 = vadd.f32 %v913_v38, %v900_v35  ;;  %v945_v59 = vrot.slane %v903_v8, 6  ;;  %v934_v40 = vsel %vm619_vm2, %v932_v47, %v933_v14  ;;  %v943_v60 = vadd.f32 %v936_v22, %v922_v41 }
  0x42   : > { %v917_v5 = vsel %vm597_vm1, %v914_v54, %v916_v50  ;;  %v959_v29 = vrot.slane %v4114_v23, 7  ;;  %v949_v37 = vsel %vm633_vm3, %v946_v52, %v948_v53  ;;  %v961_v4 = vrot.slane %v4117_v26, 7 }
  0x43   : > { %734 = vrot.lane.b32.xlu0 %v4154_v48, %s3832_s22  ;;  %v942_v15 = vadd.f32 %v934_v40, %v921_v42  ;;  %v958_v36 = vrot.slane %v4137_v33, 7  ;;  %v923_v8 = vadd.f32 %v917_v5, %v902_v55  ;;  %v956_v54 = vadd.f32 %v949_v37, %v943_v60 }
  0x44   : > { %v950_v23 = vrot.slane %v906_v57, 6  ;;  %v962_v63 = vsel %vm647_vm4, %v959_v29, %v961_v4  ;;  %v975_v26 = vmul.f32 0.007598758, %v4121_v10  ;;  %v963_v57 = vrot.slane %v4158_v13, 7 }
  0x45   : > { %752 = vrot.lane.b32.xlu1 %v746_v19, %s3836_s26  ;;  %v969_v12 = vadd.f32 %v962_v63, %v956_v54  ;;  %v984_v27 = vmul.f32 0.0010283801, %v4121_v10  ;;  %v989_v35 = vrot.slane %v4149_v44, 2  ;;  %v971_v47 = vmul.f32 0.036000773, %v4121_v10 }
  0x46   : > { %v951_v14 = vsel %vm633_vm3, %v948_v53, %v950_v23  ;;  %v964_v31 = vsel %vm647_vm4, %v961_v4, %v963_v57  ;;  %v1157_v22 = vmul.f32 %v3916_v0, %v3916_v0  ;;  %v1155_v55 = vmul.f32 %v3952_v25, %v3952_v25 }
  0x47   : > { %754 = vrot.lane.b32.xlu0 %v747_v7, %s3836_s26  ;;  %v991_v38 = vrot.slane %v984_v27, 2 }
  0x48   : > { %v1162_v40 = vmul.f32 0.007598758, %v1155_v55  ;;  %v4313_v54 = vmul.f32 0.10936069, %v1157_v22 }
  0x49   : > { %772 = vrot.lane.b32.xlu1 %v765_v24, %s3834_s24  ;;  %v937_v24 = vrot.slane %v927_v20, 5 }
  0x4a   : > { %v1207_v27 = vrot.slane %v4313_v54, 3 }
  0x4b   : > { %770 = vrot.lane.b32.xlu0 %v764_v11, %s3834_s24  ;;  %v938_v45 = vsel %vm619_vm2, %v935_v18, %v937_v24  ;;  %v977_v18 = vrot.slane %v975_v26, 1  ;;  %v4323_v26 = vmul.f32 %v3919_v1, %v3919_v1 }
  0x4c   : > { %v944_v33 = vadd.f32 %v938_v45, %v923_v8 }
  0x4d   : > { %782 = vrot.lane.b32.xlu1 %v746_v19, %s3837_s27  ;;  %v947_v19 = vsel %vm633_vm3, %v945_v59, %v946_v52  ;;  %v978_v13 = vsel %vm537_vm5, %v4089_v3, %v977_v18  ;;  %v992_v3 = vsel %vm555_vm6, %v989_v35, %v991_v38 }
  0x4e   : > { %v957_v11 = vadd.f32 %v951_v14, %v944_v33  ;;  %v4331_v14 = vmul.f32 0.10936069, %v1155_v55 }
  0x4f   : > { %784 = vrot.lane.b32.xlu0 %v747_v7, %s3837_s27  ;;  %v955_v7 = vadd.f32 %v947_v19, %v942_v15  ;;  %v1168_v15 = vrot.slane %v1162_v40, 1 }
  0x50   : > { %v970_v41 = vadd.f32 %v964_v31, %v957_v11 }
  0x51   : > { %796 = vrot.lane.b32.xlu1 %v4132_v32, %s3838_s28  ;;  %v960_v32 = vsel %vm647_vm4, %v958_v36, %v959_v29  ;;  %v4299_v29 = vmul.f32 0.036000773, %v1157_v22  ;;  %v1179_v36 = vmul.f32 0.036000773, %v1155_v55 }
  0x53   : > { %794 = vrot.lane.b32.xlu0 %v4154_v48, %s3838_s28  ;;  %v968_v48 = vadd.f32 %v960_v32, %v955_v7  ;;  %v1188_v63 = vrot.slane %v4299_v29, 2  ;;  %v1159_v7 = vmul.f32 0.0010283801, %v1155_v55 }
  0x55   : > { %806 = vrot.lane.b32.xlu1 %v4102_v16, %s3839_s29  ;;  %v973_v16 = vadd.f32 %v969_v12, %v4092_v6  ;;  %v988_v6 = vrot.slane %v4105_v17, 2  ;;  %v4248_v17 = vmul.f32 0.0010283801, %v4079_v62  ;;  %v1156_v62 = vmul.f32 %v3964_v30, %v3964_v30 }
  0x56   : > { %v1164_v30 = vmul.f32 0.007598758, %v1157_v22  ;;  %v1185_v12 = vrot.slane %v1179_v36, 2 }
  0x57   : > { %798 = vrot.lane.b32.xlu0 %v4025_v46, %s3838_s28  ;;  %v972_v46 = vadd.f32 %v968_v48, %v4084_v34  ;;  %v982_v44 = vadd.f32 %v978_v13, %v973_v16  ;;  %v1163_v59 = vmul.f32 0.007598758, %v1156_v62  ;;  %v4297_v24 = vmul.f32 0.036000773, %v1156_v62 }
  0x58   : > { %v4295_v5 = vrot.slane %v1164_v30, 1  ;;  %v4301_v37 = vmul.f32 0.0010283801, %v1156_v62  ;;  %v4311_v19 = vmul.f32 0.10936069, %v1156_v62 }
  0x59   : > { %810 = vrot.lane.b32.xlu1 %v4045_v51, %s3839_s29  ;;  %v4230_v51 = vmul.f32 0.0010283801, %v4077_v61  ;;  %v981_v34 = vadd.f32 %v972_v46, %v4110_v21  ;;  %v990_v61 = vsel %vm555_vm6, %v988_v6, %v989_v35  ;;  %v4243_v50 = vadd.f32 %v992_v3, %v982_v44 }
  0x5a   : > { %v1169_v60 = vrot.slane %v1163_v59, 1  ;;  %v1186_v23 = vrot.slane %v4297_v24, 2  ;;  %v4340_v11 = vmul.f32 0.21300554, %v1156_v62  ;;  %v4342_v16 = vmul.f32 0.21300554, %v1157_v22 }
  0x5b   : > { %808 = vrot.lane.b32.xlu0 %v4126_v28, %s3839_s29  ;;  %6375 = vst [vmem:[#allocation2_spill] sm:$0xff] %v4230_v51  ;;  %v974_v28 = vadd.f32 %v971_v47, %v970_v41  ;;  %v4255_v20 = vmul.f32 0.007598758, %v4243_v50  ;;  %v4288_v0 = vmul.f32 0.036000773, %v4243_v50  ;;  %v1204_v6 = vrot.slane %v4331_v14, 3 }
  0x5c   : > { %v4293_v25 = vmul.f32 0.10936069, %v4243_v50  ;;  %v4317_v45 = vsel %vm537_vm5, %v1169_v60, %v4295_v5  ;;  %v1170_v32 = vsel %vm537_vm5, %v1168_v15, %v1169_v60  ;;  %v1189_v48 = vsel %vm555_vm6, %v1186_v23, %v1188_v63 }
  0x5d   : > { %820 = vrot.lane.b32.xlu1 %v4097_v9, %s3840_s30  ;;  %v4240_v9 = vmul.f32 0.0010283801, %v4014_v39  ;;  %v983_v21 = vadd.f32 %v977_v18, %v974_v28  ;;  %v1177_v1 = vadd.f32 %v4317_v45, %v4301_v37  ;;  %v1205_v18 = vrot.slane %v4311_v19, 3 }
  0x5e   : > { %v1057_v31 = vmul.f32 0.21300554, %v4243_v50  ;;  %v4345_v35 = vmul.f32 0.0010283801, %v1157_v22  ;;  %v1075_v13 = vmul.f32 0.26601171, %v4243_v50  ;;  %v1187_v46 = vsel %vm555_vm6, %v1185_v12, %v1186_v23 }
  0x5f   : > { %818 = vrot.lane.b32.xlu0 %v4087_v43, %s3840_s30  ;;  %v4250_v43 = vadd.f32 %v990_v61, %v981_v34  ;;  %v4262_v52 = vadd.f32 %v991_v38, %v983_v21  ;;  %v1176_v38 = vadd.f32 %v1170_v32, %v1159_v7  ;;  %v4352_v41 = vmul.f32 0.10936069, %v4323_v26 }
  0x60   : > { %v1194_v47 = vadd.f32 %v1189_v48, %v1177_v1  ;;  %v1208_v44 = vsel %vm575_vm0, %v1205_v18, %v1207_v27  ;;  %v1217_v3 = vmul.f32 0.21300554, %v1155_v55  ;;  %v1226_v34 = vrot.slane %v4340_v11, 4 }
  0x61   : > { %833 = vrot.lane.b32.xlu1 %v4230_v51, %s3841_s11  ;;  %v4260_v39 = vmul.f32 0.007598758, %v4250_v43  ;;  %v4276_v53 = vmul.f32 0.007598758, %v4262_v52  ;;  %v4283_v42 = vmul.f32 0.036000773, %v4262_v52  ;;  %v1178_v30 = vadd.f32 %v4295_v5, %v4345_v35 }
  0x62   : > { %v4306_v4 = vmul.f32 0.10936069, %v4250_v43  ;;  %v1056_v8 = vmul.f32 0.21300554, %v4250_v43  ;;  %v4328_v33 = vmul.f32 0.10936069, %v4262_v52  ;;  %v1193_v40 = vadd.f32 %v1187_v46, %v1176_v38 }
  0x63   : > { %822 = vrot.lane.b32.xlu0 %v4028_v49, %s3840_s30  ;;  %v4267_v49 = vmul.f32 0.036000773, %v4250_v43  ;;  %v1058_v57 = vmul.f32 0.21300554, %v4262_v52  ;;  %v1228_v28 = vrot.slane %v4342_v16, 4  ;;  %v1209_v60 = vrot.slane %v4352_v41, 3 }
  0x64   : > { %v1239_v61 = vmul.f32 0.26601171, %v1156_v62  ;;  %v1240_v21 = vmul.f32 0.26601171, %v1157_v22  ;;  %v1074_v59 = vmul.f32 0.26601171, %v4250_v43  ;;  %v1206_v36 = vsel %vm575_vm0, %v1204_v6, %v1205_v18 }
  0x65   : > { %837 = vrot.lane.b32.xlu1 %v4240_v9, %s3841_s11  ;;  %v1238_v15 = vmul.f32 0.26601171, %v1155_v55  ;;  %v1215_v23 = vadd.f32 %v1208_v44, %v1194_v47  ;;  %v1225_v7 = vrot.slane %v1217_v3, 4  ;;  %v1220_v62 = vmul.f32 0.21300554, %v4323_v26 }
  0x66   : > { %v1229_v22 = vsel %vm597_vm1, %v1226_v34, %v1228_v28  ;;  %v1247_v32 = vrot.slane %v1239_v61, 5  ;;  %v1249_v12 = vrot.slane %v1240_v21, 5  ;;  %v1076_v1 = vmul.f32 0.26601171, %v4262_v52 }
  0x67   : > { %835 = vrot.lane.b32.xlu0 %v4248_v17, %s3841_s11  ;;  %v1195_v48 = vadd.f32 %v1188_v63, %v1178_v30  ;;  %v1210_v38 = vsel %vm575_vm0, %v1207_v27, %v1209_v60  ;;  %v1214_v55 = vadd.f32 %v1206_v36, %v1193_v40  ;;  %v1246_v46 = vrot.slane %v1238_v15, 5 }
  0x68   : > { %v1227_v18 = vsel %vm597_vm1, %v1225_v7, %v1226_v34  ;;  %v1230_v47 = vrot.slane %v1220_v62, 4  ;;  %v1241_v6 = vmul.f32 0.26601171, %v4323_v26  ;;  %v1260_v44 = vrot.slane %v4340_v11, 6 }
  0x69   : > { %1010 = vrot.lane.b32.xlu1 %v4255_v20, %s3833_s23  ;;  %v1250_v61 = vsel %vm619_vm2, %v1247_v32, %v1249_v12  ;;  %v1262_v21 = vrot.slane %v4342_v16, 6  ;;  %v1216_v63 = vadd.f32 %v1210_v38, %v1195_v48  ;;  %v1235_v27 = vadd.f32 %v1227_v18, %v1214_v55 }
  0x6a   : > { %v1231_v30 = vsel %vm597_vm1, %v1228_v28, %v1230_v47  ;;  %v1251_v40 = vrot.slane %v1241_v6, 5  ;;  %v1273_v60 = vrot.slane %v4311_v19, 7  ;;  %v1275_v15 = vrot.slane %v4313_v54, 7 }
  0x6b   : > { %1008 = vrot.lane.b32.xlu0 %v4260_v39, %s3833_s23  ;;  %v1263_v11 = vsel %vm633_vm3, %v1260_v44, %v1262_v21  ;;  %v1272_v36 = vrot.slane %v4331_v14, 7  ;;  %v1264_v7 = vrot.slane %v1220_v62, 6  ;;  %v1303_v55 = vrot.slane %v4345_v35, 2 }
  0x6c   : > { %v1252_v28 = vsel %vm619_vm2, %v1249_v12, %v1251_v40  ;;  %v1276_v19 = vsel %vm647_vm4, %v1273_v60, %v1275_v15  ;;  %v1277_v12 = vrot.slane %v4352_v41, 7 }
  0x6d   : > { %1026 = vrot.lane.b32.xlu1 %v4267_v49, %s3835_s25 }
  0x6e   : > { %v1278_v38 = vsel %vm647_vm4, %v1275_v15, %v1277_v12 }
  0x6f   : > { %1012 = vrot.lane.b32.xlu0 %v4276_v53, %s3833_s23 }
  0x71   : > { %1030 = vrot.lane.b32.xlu1 %v4283_v42, %s3835_s25 }
  0x73   : > { %1028 = vrot.lane.b32.xlu0 %v4288_v0, %s3835_s25 }
  0x75   : > { %1046 = vrot.lane.b32.xlu1 %v4293_v25, %s3832_s22 }
  0x77   : > { %1044 = vrot.lane.b32.xlu0 %v4306_v4, %s3832_s22 }
  0x79   : > { %1062 = vrot.lane.b32.xlu1 %v1056_v8, %s3836_s26 }
  0x7b   : > { %1048 = vrot.lane.b32.xlu0 %v4328_v33, %s3832_s22 }
  0x7d   : > { %1066 = vrot.lane.b32.xlu1 %v1058_v57, %s3836_s26 }
  0x7f   : > { %1064 = vrot.lane.b32.xlu0 %v1057_v31, %s3836_s26 }
  0x81   : > { %1082 = vrot.lane.b32.xlu1 %v1075_v13, %s3834_s24  ;;  %v1236_v13 = vadd.f32 %v1229_v22, %v1215_v23  ;;  %v1289_v22 = vmul.f32 0.007598758, %v4323_v26 }
  0x83   : > { %1080 = vrot.lane.b32.xlu0 %v1074_v59, %s3834_s24  ;;  %v1259_v59 = vrot.slane %v1217_v3, 6  ;;  %v1257_v34 = vadd.f32 %v1250_v61, %v1236_v13  ;;  %v1237_v3 = vadd.f32 %v1231_v30, %v1216_v63  ;;  %v1291_v62 = vrot.slane %v1289_v22, 1 }
  0x84   : > { %v1285_v13 = vmul.f32 0.036000773, %v4323_v26  ;;  %v4465_v63 = vmul.f32 %v4056_v56, %v4056_v56 }
  0x85   : > { %1092 = vrot.lane.b32.xlu1 %v1056_v8, %s3837_s27  ;;  %v1248_v8 = vsel %vm619_vm2, %v1246_v46, %v1247_v32  ;;  %v1270_v23 = vadd.f32 %v1263_v11, %v1257_v34  ;;  %v1265_v32 = vsel %vm633_vm3, %v1262_v21, %v1264_v7  ;;  %v1292_v41 = vsel %vm537_vm5, %v4295_v5, %v1291_v62 }
  0x86   : > { %v1256_v16 = vadd.f32 %v1248_v8, %v1235_v27  ;;  %v4469_v27 = vmul.f32 %v4059_v58, %v4059_v58  ;;  %v4480_v34 = vmul.f32 %v4064_v2, %v4064_v2  ;;  %v1477_v58 = vmul.f32 0.007598758, %v4465_v63 }
  0x87   : > { %1084 = vrot.lane.b32.xlu0 %v1076_v1, %s3834_s24  ;;  %v1283_v14 = vadd.f32 %v1276_v19, %v1270_v23  ;;  %v1298_v1 = vmul.f32 0.0010283801, %v4323_v26  ;;  %v4426_v26 = vmul.f32 0.0010283801, %v4262_v52 }
  0x88   : > { %v1478_v30 = vmul.f32 0.007598758, %v4469_v27  ;;  %v1476_v11 = vmul.f32 0.007598758, %v4480_v34  ;;  %v4512_v23 = vmul.f32 0.036000773, %v4469_v27 }
  0x89   : > { %1096 = vrot.lane.b32.xlu1 %v1058_v57, %s3837_s27  ;;  %v1261_v57 = vsel %vm633_vm3, %v1259_v59, %v1260_v44  ;;  %v1305_v46 = vrot.slane %v1298_v1, 2  ;;  %6377 = vst [vmem:[#allocation4_spill] sm:$0xff] %v4426_v26  ;;  %v1493_v22 = vmul.f32 0.036000773, %v4480_v34  ;;  %v4542_v1 = vmul.f32 0.10936069, %v4469_v27 }
  0x8a   : > { %v1269_v54 = vadd.f32 %v1261_v57, %v1256_v16  ;;  %v1483_v16 = vrot.slane %v1477_v58, 1  ;;  %v4509_v57 = vmul.f32 0.036000773, %v4465_v63  ;;  %v1482_v19 = vrot.slane %v1476_v11, 1 }
  0x8b   : > { %1094 = vrot.lane.b32.xlu0 %v1057_v31, %s3837_s27  ;;  %v1258_v31 = vadd.f32 %v1252_v28, %v1237_v3  ;;  %v1306_v5 = vsel %vm555_vm6, %v1303_v55, %v1305_v46  ;;  %v1502_v12 = vrot.slane %v4512_v23, 2 }
  0x8d   : > { %1106 = vrot.lane.b32.xlu1 %v4293_v25, %s3838_s28  ;;  %v1274_v25 = vsel %vm647_vm4, %v1272_v36, %v1273_v60  ;;  %v4504_v36 = vrot.slane %v1478_v30, 1 }
  0x8e   : > { %v1282_v48 = vadd.f32 %v1274_v25, %v1269_v54 }
  0x8f   : > { %1104 = vrot.lane.b32.xlu0 %v4306_v4, %s3838_s28  ;;  %v1271_v4 = vadd.f32 %v1265_v32, %v1258_v31  ;;  %v4528_v31 = vmul.f32 0.0010283801, %v4465_v63  ;;  %v4532_v25 = vsel %vm537_vm5, %v1483_v16, %v4504_v36  ;;  %v1500_v32 = vrot.slane %v4509_v57, 2 }
  0x91   : > { %1116 = vrot.lane.b32.xlu1 %v4267_v49, %s3839_s29  ;;  %v1287_v49 = vadd.f32 %v1283_v14, %v4299_v29  ;;  %v1284_v18 = vadd.f32 %v1278_v38, %v1271_v4  ;;  %v1302_v29 = vrot.slane %v4301_v37, 2  ;;  %v4548_v4 = vmul.f32 %v4121_v10, %v4121_v10 }
  0x92   : > { %v1473_v38 = vmul.f32 0.0010283801, %v4480_v34  ;;  %v1491_v10 = vadd.f32 %v4532_v25, %v4528_v31 }
  0x93   : > { %1108 = vrot.lane.b32.xlu0 %v4328_v33, %s3838_s28  ;;  %v1286_v33 = vadd.f32 %v1282_v48, %v4297_v24  ;;  %v1296_v35 = vadd.f32 %v1292_v41, %v1287_v49  ;;  %v1288_v24 = vadd.f32 %v1285_v13, %v1284_v18  ;;  %v1499_v41 = vrot.slane %v1493_v22, 2 }
  0x94   : > { %v4568_v18 = vmul.f32 0.21300554, %v4465_v63  ;;  %v4590_v11 = vmul.f32 0.10936069, %v4548_v4 }
  0x95   : > { %1120 = vrot.lane.b32.xlu1 %v4283_v42, %s3839_s29  ;;  %v4416_v42 = vmul.f32 0.0010283801, %v4250_v43  ;;  %v1304_v43 = vsel %vm555_vm6, %v1302_v29, %v1303_v55  ;;  %v1297_v6 = vadd.f32 %v1291_v62, %v1288_v24  ;;  %v4539_v62 = vmul.f32 0.10936069, %v4465_v63 }
  0x96   : > { %v1484_v55 = vsel %vm537_vm5, %v1482_v19, %v1483_v16  ;;  %v1503_v29 = vsel %vm555_vm6, %v1500_v32, %v1502_v12  ;;  %v4593_v16 = vmul.f32 0.21300554, %v4480_v34  ;;  %v1501_v19 = vsel %vm555_vm6, %v1499_v41, %v1500_v32 }
  0x97   : > { %1118 = vrot.lane.b32.xlu0 %v4288_v0, %s3839_s29  ;;  %6376 = vst [vmem:[#allocation3_spill] sm:$0xff] %v4416_v42  ;;  %v1295_v0 = vadd.f32 %v1286_v33, %v4317_v45  ;;  %v4565_v33 = vmul.f32 0.10936069, %v4480_v34  ;;  %v1490_v30 = vadd.f32 %v1484_v55, %v1473_v38  ;;  %v1508_v22 = vadd.f32 %v1503_v29, %v1491_v10 }
  0x98   : > { %v1523_v10 = vrot.slane %v4590_v11, 3  ;;  %v1539_v29 = vrot.slane %v4593_v16, 4 }
  0x99   : > { %1130 = vrot.lane.b32.xlu1 %v4255_v20, %s3840_s30  ;;  %v4429_v20 = vadd.f32 %v1306_v5, %v1296_v35  ;;  %v4440_v45 = vadd.f32 %v1304_v43, %v1295_v0  ;;  %v1519_v35 = vrot.slane %v4539_v62, 3  ;;  %v1521_v5 = vrot.slane %v4542_v1, 3 }
  0x9a   : > { %v4576_v0 = vmul.f32 0.21300554, %v4469_v27  ;;  %v1507_v41 = vadd.f32 %v1501_v19, %v1490_v30 }
  0x9b   : > { %1128 = vrot.lane.b32.xlu0 %v4260_v39, %s3840_s30  ;;  %v4438_v39 = vmul.f32 0.0010283801, %v4243_v50  ;;  %v4445_v52 = vmul.f32 0.007598758, %v4429_v20  ;;  %v4456_v50 = vadd.f32 %v1305_v46, %v1297_v6  ;;  %v4461_v21 = vmul.f32 0.036000773, %v4440_v45 }
  0x9c   : > { %v4496_v2 = vmul.f32 0.036000773, %v4429_v20  ;;  %v4502_v15 = vmul.f32 0.10936069, %v4429_v20  ;;  %v4519_v7 = vmul.f32 0.10936069, %v4440_v45  ;;  %v1522_v38 = vsel %vm575_vm0, %v1519_v35, %v1521_v5 }
  0x9d   : > { %1143 = vrot.lane.b32.xlu1 %v4416_v42, %s3841_s11  ;;  %v4476_v8 = vmul.f32 0.007598758, %v4456_v50  ;;  %v4485_v56 = vmul.f32 0.036000773, %v4456_v50  ;;  %v4525_v54 = vmul.f32 0.21300554, %v4440_v45 }
  0x9e   : > { %v4553_v49 = vmul.f32 0.10936069, %v4456_v50  ;;  %v4560_v46 = vmul.f32 0.21300554, %v4456_v50  ;;  %v4581_v43 = vmul.f32 0.21300554, %v4429_v20 }
  0x9f   : > { %v4431_v37 = vpop.permute.xlu0 %738  ;;  %v4433_v47 = vpop.permute.xlu1 %702  ;;  %1132 = vrot.lane.b32.xlu0 %v4276_v53, %s3840_s30  ;;  %v4454_v53 = vmul.f32 0.007598758, %v4440_v45  ;;  %v4584_v6 = vmul.f32 0.0010283801, %v4469_v27  ;;  %v1389_v58 = vmul.f32 0.26601171, %v4429_v20 }
  0xa0   : > { %6378 = vst [vmem:[#allocation5_spill] sm:$0xff] %v4431_v37  ;;  %v1542_v55 = vrot.slane %v4576_v0, 4  ;;  %v1554_v42 = vmul.f32 0.26601171, %v4469_v27  ;;  %v1529_v27 = vadd.f32 %v1522_v38, %v1508_v22  ;;  %v1534_v37 = vmul.f32 0.21300554, %v4548_v4 }
  0xa1   : > { %1147 = vrot.lane.b32.xlu1 %v4426_v26, %s3841_s11  ;;  %v1492_v32 = vadd.f32 %v4504_v36, %v4584_v6  ;;  %v1390_v19 = vmul.f32 0.26601171, %v4456_v50 }
  0xa3   : > { %v4447_v44 = vpop.permute.xlu1 %720  ;;  %1145 = vrot.lane.b32.xlu0 %v4438_v39, %s3841_s11  ;;  %v4451_v61 = vpop.permute.xlu0 %774 }
  0xa4   : > { %6379 = vst [vmem:[#allocation6_spill] sm:$0xff] %v4447_v44  ;;  %6380 = vst [vmem:[#allocation7_spill] sm:$0xff] %v4451_v61  ;;  %v1540_v61 = vrot.slane %v4568_v18, 4 }
  0xa5   : > { %1324 = vrot.lane.b32.xlu1 %v4445_v52, %s3833_s23 }
  0xa6   : > { %v1543_v51 = vsel %vm597_vm1, %v1540_v61, %v1542_v55 }
  0xa7   : > { %v4471_v59 = vpop.permute.xlu1 %756  ;;  %1322 = vrot.lane.b32.xlu0 %v4454_v53, %s3833_s23  ;;  %v1550_v22 = vadd.f32 %v1543_v51, %v1529_v27  ;;  %v1573_v51 = vrot.slane %v4593_v16, 6 }
  0xa8   : > { %6381 = vst [vmem:[#allocation8_spill] sm:$0xff] %v4471_v59 }
  0xa9   : > { %1340 = vrot.lane.b32.xlu1 %v4461_v21, %s3835_s25  ;;  %v4489_v40 = vpop.permute.xlu0 %698 }
  0xaa   : > { %6382 = vst [vmem:[#allocation9_spill] sm:$0xff] %v4489_v40 }
  0xab   : > { %v4491_v60 = vpop.permute.xlu1 %786  ;;  %1326 = vrot.lane.b32.xlu0 %v4476_v8, %s3833_s23 }
  0xac   : > { %6383 = vst [vmem:[#allocation10_spill] sm:$0xff] %v4491_v60  ;;  %v1518_v60 = vrot.slane %v4565_v33, 3 }
  0xad   : > { %1344 = vrot.lane.b32.xlu1 %v4485_v56, %s3835_s25  ;;  %v4506_v3 = vpop.permute.xlu0 %700 }
  0xaf   : > { %v4514_v28 = vpop.permute.xlu1 %716  ;;  %1342 = vrot.lane.b32.xlu0 %v4496_v2, %s3835_s25 }
  0xb0   : > { %6384 = vst [vmem:[#allocation11_spill] sm:$0xff] %v4514_v28  ;;  %v1552_v28 = vmul.f32 0.26601171, %v4480_v34  ;;  %v1541_v34 = vsel %vm597_vm1, %v1539_v29, %v1540_v61 }
  0xb1   : > { %1360 = vrot.lane.b32.xlu1 %v4502_v15, %s3832_s22  ;;  %v4534_v14 = vpop.permute.xlu0 %718 }
  0xb2   : > { %v1560_v38 = vrot.slane %v1552_v28, 5 }
  0xb3   : > { %v4544_v48 = vpop.permute.xlu1 %736  ;;  %1358 = vrot.lane.b32.xlu0 %v4519_v7, %s3832_s22 }
  0xb4   : > { %6385 = vst [vmem:[#allocation12_spill] sm:$0xff] %v4544_v48 }
  0xb5   : > { %1376 = vrot.lane.b32.xlu1 %v4525_v54, %s3836_s26  ;;  %v4570_v13 = vpop.permute.xlu0 %734 }
  0xb6   : > { %6386 = vst [vmem:[#allocation13_spill] sm:$0xff] %v4570_v13  ;;  %v1388_v13 = vmul.f32 0.26601171, %v4440_v45 }
  0xb7   : > { %v4578_v24 = vpop.permute.xlu1 %752  ;;  %1362 = vrot.lane.b32.xlu0 %v4553_v49, %s3832_s22 }
  0xb8   : > { %6387 = vst [vmem:[#allocation14_spill] sm:$0xff] %v4578_v24  ;;  %v1553_v24 = vmul.f32 0.26601171, %v4465_v63  ;;  %v1520_v63 = vsel %vm575_vm0, %v1518_v60, %v1519_v35  ;;  %v1524_v60 = vsel %vm575_vm0, %v1521_v5, %v1523_v10 }
  0xb9   : > { %1380 = vrot.lane.b32.xlu1 %v4560_v46, %s3836_s26  ;;  %v4600_v26 = vpop.permute.xlu0 %754  ;;  %v1528_v35 = vadd.f32 %v1520_v63, %v1507_v41  ;;  %v1589_v63 = vrot.slane %v4542_v1, 7 }
  0xba   : > { %6388 = vst [vmem:[#allocation15_spill] sm:$0xff] %v4600_v26  ;;  %v1563_v26 = vrot.slane %v1554_v42, 5  ;;  %v1555_v42 = vmul.f32 0.26601171, %v4548_v4 }
  0xbb   : > { %v4606_v59 = vpop.permute.xlu1 %772  ;;  %1378 = vrot.lane.b32.xlu0 %v4581_v43, %s3836_s26 }
  0xbc   : > { %6389 = vst [vmem:[#allocation16_spill] sm:$0xff] %v4606_v59  ;;  %v1561_v59 = vrot.slane %v1553_v24, 5  ;;  %v1565_v41 = vrot.slane %v1555_v42, 5 }
  0xbd   : > { %1396 = vrot.lane.b32.xlu1 %v1389_v58, %s3834_s24  ;;  %v4619_v40 = vpop.permute.xlu0 %770  ;;  %v1509_v58 = vadd.f32 %v1502_v12, %v1492_v32  ;;  %v1576_v12 = vrot.slane %v4576_v0, 6  ;;  %v1549_v32 = vadd.f32 %v1541_v34, %v1528_v35  ;;  %v1587_v0 = vrot.slane %v4539_v62, 7 }
  0xbe   : > { %6390 = vst [vmem:[#allocation17_spill] sm:$0xff] %v4619_v40  ;;  %v1544_v40 = vrot.slane %v1534_v37, 4  ;;  %v1562_v28 = vsel %vm619_vm2, %v1560_v38, %v1561_v59  ;;  %v1566_v62 = vsel %vm619_vm2, %v1563_v26, %v1565_v41  ;;  %v1612_v38 = vmul.f32 0.0010283801, %v4548_v4 }
  0xbf   : > { %v4622_v30 = vpop.permute.xlu1 %782  ;;  %1394 = vrot.lane.b32.xlu0 %v1388_v13, %s3834_s24  ;;  %v1564_v13 = vsel %vm619_vm2, %v1561_v59, %v1563_v26  ;;  %v1530_v61 = vadd.f32 %v1524_v60, %v1509_v58  ;;  %v1586_v59 = vrot.slane %v4565_v33, 7  ;;  %v1590_v1 = vsel %vm647_vm4, %v1587_v0, %v1589_v63 }
  0xc0   : > { %6391 = vst [vmem:[#allocation18_spill] sm:$0xff] %v4622_v30  ;;  %v1574_v30 = vrot.slane %v4568_v18, 6  ;;  %v1545_v18 = vsel %vm597_vm1, %v1542_v55, %v1544_v40  ;;  %v1603_v60 = vmul.f32 0.007598758, %v4548_v4 }
  0xc1   : > { %1406 = vrot.lane.b32.xlu1 %v4525_v54, %s3837_s27  ;;  %v4631_v24 = vpop.permute.xlu0 %784  ;;  %v1571_v54 = vadd.f32 %v1564_v13, %v1550_v22  ;;  %v1551_v16 = vadd.f32 %v1545_v18, %v1530_v61  ;;  %v1617_v61 = vrot.slane %v4584_v6, 2  ;;  %v1616_v6 = vrot.slane %v4528_v31, 2 }
  0xc2   : > { %6392 = vst [vmem:[#allocation19_spill] sm:$0xff] %v4631_v24  ;;  %v1577_v29 = vsel %vm633_vm3, %v1574_v30, %v1576_v12  ;;  %v1575_v40 = vsel %vm633_vm3, %v1573_v51, %v1574_v30  ;;  %v1591_v30 = vrot.slane %v4590_v11, 7  ;;  %v1605_v22 = vrot.slane %v1603_v60, 1 }
  0xc3   : > { %v4636_v5 = vpop.permute.xlu1 %796  ;;  %1398 = vrot.lane.b32.xlu0 %v1390_v19, %s3834_s24  ;;  %v1584_v55 = vadd.f32 %v1577_v29, %v1571_v54  ;;  %v1578_v19 = vrot.slane %v1534_v37, 6  ;;  %v1572_v35 = vadd.f32 %v1566_v62, %v1551_v16  ;;  %v1619_v51 = vrot.slane %v1612_v38, 2 }
  0xc4   : > { %6393 = vst [vmem:[#allocation20_spill] sm:$0xff] %v4636_v5  ;;  %v4696_v54 = vmul.f32 0.0010283801, %v4440_v45  ;;  %v4710_v45 = vmul.f32 0.0010283801, %v4456_v50 }
  0xc5   : > { %1410 = vrot.lane.b32.xlu1 %v4560_v46, %s3837_s27  ;;  %v4644_v10 = vpop.permute.xlu0 %794  ;;  %v1570_v46 = vadd.f32 %v1562_v28, %v1549_v32  ;;  %v1597_v26 = vadd.f32 %v1590_v1, %v1584_v55  ;;  %v1579_v37 = vsel %vm633_vm3, %v1576_v12, %v1578_v19  ;;  %v1592_v12 = vsel %vm647_vm4, %v1589_v63, %v1591_v30  ;;  %v3816_v55 = vld [vmem:[%s4036_s21 + $0x8] sm:$0xff]  ;;  %v3817_v19 = vld [vmem:[%s3913_s18 + $0x10] sm:$0xff] }
  0xc6   : > { %6394 = vst [vmem:[#allocation21_spill] sm:$0xff] %v4644_v10  ;;  %v1585_v13 = vadd.f32 %v1579_v37, %v1572_v35  ;;  %v1606_v32 = vsel %vm537_vm5, %v4504_v36, %v1605_v22  ;;  %6402 = vst [vmem:[#allocation29_spill] sm:$0xff] %v4696_v54  ;;  %v1620_v41 = vsel %vm555_vm6, %v1617_v61, %v1619_v51  ;;  %v3818_v1 = vld [vmem:[%s4036_s21 + $0x10] sm:$0xff]  ;;  %v3820_v37 = vld [vmem:[%s4036_s21] sm:$0xff] }
  0xc7   : > { %v4649_v27 = vpop.permute.xlu1 %806  ;;  %1408 = vrot.lane.b32.xlu0 %v4581_v43, %s3837_s27  ;;  %v1583_v33 = vadd.f32 %v1575_v40, %v1570_v46  ;;  %6405 = vst [vmem:[#allocation32_spill] sm:$0xff] %v4710_v45  ;;  %v3815_v40 = vld [vmem:[%s3913_s18 + $0x8] sm:$0xff]  ;;  %v4753_v60 = vmul.f32 %v3818_v1, %v3817_v19 }
  0xc8   : > { %6395 = vst [vmem:[#allocation22_spill] sm:$0xff] %v4649_v27  ;;  %v4749_v62 = vmul.f32 %v3816_v55, %v3815_v40 }
  0xc9   : > { %1420 = vrot.lane.b32.xlu1 %v4502_v15, %s3838_s28  ;;  %v4658_v58 = vpop.permute.xlu0 %798  ;;  %v1588_v15 = vsel %vm647_vm4, %v1586_v59, %v1587_v0  ;;  %v4824_v19 = vmul.f32 0.10936069, %v4753_v60 }
  0xca   : > { %6396 = vst [vmem:[#allocation23_spill] sm:$0xff] %v4658_v58  ;;  %v1791_v38 = vmul.f32 0.007598758, %v4749_v62  ;;  %v4821_v55 = vmul.f32 0.10936069, %v4749_v62 }
  0xcb   : > { %v4662_v43 = vpop.permute.xlu1 %810  ;;  %1418 = vrot.lane.b32.xlu0 %v4519_v7, %s3838_s28  ;;  %v1596_v7 = vadd.f32 %v1588_v15, %v1583_v33  ;;  %v1835_v58 = vrot.slane %v4824_v19, 3 }
  0xcc   : > { %6397 = vst [vmem:[#allocation24_spill] sm:$0xff] %v4662_v43  ;;  %v1833_v27 = vrot.slane %v4821_v55, 3 }
  0xcd   : > { %1430 = vrot.lane.b32.xlu1 %v4461_v21, %s3839_s29  ;;  %v4671_v34 = vpop.permute.xlu0 %808  ;;  %v1601_v21 = vadd.f32 %v1597_v26, %v4512_v23  ;;  %v1599_v23 = vmul.f32 0.036000773, %v4548_v4  ;;  %v3819_v26 = vld [vmem:[%s3913_s18] sm:$0xff] }
  0xce   : > { %6398 = vst [vmem:[#allocation25_spill] sm:$0xff] %v4671_v34  ;;  %v4766_v30 = vmul.f32 %v3820_v37, %v3819_v26 }
  0xcf   : > { %v4674_v42 = vpop.permute.xlu1 %820  ;;  %1422 = vrot.lane.b32.xlu0 %v4553_v49, %s3838_s28  ;;  %v1600_v49 = vadd.f32 %v1596_v7, %v4509_v57  ;;  %v1610_v36 = vadd.f32 %v1606_v32, %v1601_v21  ;;  %v1792_v7 = vmul.f32 0.007598758, %v4753_v60 }
  0xd0   : > { %6399 = vst [vmem:[#allocation26_spill] sm:$0xff] %v4674_v42  ;;  %v1836_v42 = vsel %vm575_vm0, %v1833_v27, %v1835_v58 }
  0xd1   : > { %1434 = vrot.lane.b32.xlu1 %v4485_v56, %s3839_s29  ;;  %v4682_v11 = vpop.permute.xlu0 %818  ;;  %v1598_v56 = vadd.f32 %v1592_v12, %v1585_v13  ;;  %v4713_v31 = vadd.f32 %v1620_v41, %v1610_v36  ;;  %v4803_v41 = vmul.f32 0.0010283801, %v4749_v62 }
  0xd2   : > { %6400 = vst [vmem:[#allocation27_spill] sm:$0xff] %v4682_v11 }
  0xd3   : > { %v4687_v28 = vpop.permute.xlu1 %833  ;;  %1432 = vrot.lane.b32.xlu0 %v4496_v2, %s3839_s29  ;;  %v1609_v2 = vadd.f32 %v1600_v49, %v4532_v25  ;;  %v1602_v57 = vadd.f32 %v1599_v23, %v1598_v56  ;;  %v4729_v63 = vmul.f32 0.007598758, %v4713_v31  ;;  %v4782_v12 = vmul.f32 0.036000773, %v4713_v31 }
  0xd4   : > { %6401 = vst [vmem:[#allocation28_spill] sm:$0xff] %v4687_v28  ;;  %v4788_v32 = vmul.f32 0.10936069, %v4713_v31  ;;  %v4790_v49 = vrot.slane %v1792_v7, 1  ;;  %v4795_v23 = vmul.f32 0.036000773, %v4749_v62 }
  0xd5   : > { %1444 = vrot.lane.b32.xlu1 %v4445_v52, %s3840_s30  ;;  %v4699_v18 = vpop.permute.xlu0 %822  ;;  %v1618_v52 = vsel %vm555_vm6, %v1616_v6, %v1617_v61  ;;  %v1611_v25 = vadd.f32 %v1605_v22, %v1602_v57  ;;  %v1790_v61 = vmul.f32 0.007598758, %v4766_v30  ;;  %v4798_v6 = vmul.f32 0.036000773, %v4753_v60  ;;  %v3822_v7 = vld [vmem:[%s4036_s21 + $0x18] sm:$0xff]  ;;  %s3732_s21 = sshll.u32 %s6588_s14, 3 }
  0xd6   : > { %6403 = vst [vmem:[#allocation30_spill] sm:$0xff] %v4699_v18  ;;  %v4724_v50 = vadd.f32 %v1618_v52, %v1609_v2  ;;  %v1807_v52 = vmul.f32 0.036000773, %v4766_v30  ;;  %v1814_v26 = vrot.slane %v4795_v23, 2  ;;  %v1787_v18 = vmul.f32 0.0010283801, %v4766_v30  ;;  %s5677_s16 = scalar_lea.vmem %s6339_s2, %s3732_s21 }
  0xd7   : > { %v4702_v0 = vpop.permute.xlu1 %837  ;;  %1442 = vrot.lane.b32.xlu0 %v4454_v53, %s3840_s30  ;;  %v4722_v53 = vmul.f32 0.0010283801, %v4429_v20  ;;  %v1796_v57 = vrot.slane %v1790_v61, 1  ;;  %v1816_v37 = vrot.slane %v4798_v6, 2 }
  0xd8   : > { %6404 = vst [vmem:[#allocation31_spill] sm:$0xff] %v4702_v0  ;;  %v4738_v20 = vmul.f32 0.007598758, %v4724_v50  ;;  %v4745_v16 = vmul.f32 0.036000773, %v4724_v50  ;;  %v1813_v43 = vrot.slane %v1807_v52, 2 }
  0xd9   : > { %1457 = vrot.lane.b32.xlu1 %v4696_v54, %s3841_s11  ;;  %v4715_v4 = vpop.permute.xlu0 %835  ;;  %6407 = vst [vmem:[#allocation34_spill] sm:$0xff] %v4722_v53  ;;  %v4808_v2 = vmul.f32 0.10936069, %v4724_v50  ;;  %v4860_v52 = vmul.f32 0.21300554, %v4753_v60 }
  0xda   : > { %6406 = vst [vmem:[#allocation33_spill] sm:$0xff] %v4715_v4 }
  0xdb   : > { %v4717_v29 = vpop.permute.xlu1 %1010  ;;  %1446 = vrot.lane.b32.xlu0 %v4476_v8, %s3840_s30  ;;  %v4740_v8 = vadd.f32 %v1619_v51, %v1611_v25  ;;  %v1797_v51 = vrot.slane %v1791_v38, 1  ;;  %v4814_v25 = vmul.f32 0.21300554, %v4724_v50  ;;  %v3821_v38 = vld [vmem:[%s3913_s18 + $0x18] sm:$0xff]  ;;  %s507_s18 = scalar_lea.vmem %s6344_s7, %s3732_s21  ;;  %s6120_s21 = sshll.u32 %s6588_s14, 1 }
  0xdc   : > { %v4832_v61 = vmul.f32 %v3822_v7, %v3821_v38  ;;  %v4849_v7 = vmul.f32 0.10936069, %v4766_v30  ;;  %s515_s15 = scalar_lea.vmem %s6346_s9, %s6120_s21 }
  0xdd   : > { %1461 = vrot.lane.b32.xlu1 %v4710_v45, %s3841_s11  ;;  %v4731_v46 = vpop.permute.xlu0 %1008  ;;  %v4762_v15 = vmul.f32 0.007598758, %v4740_v8  ;;  %v4771_v22 = vmul.f32 0.036000773, %v4740_v8  ;;  %v4818_v40 = vsel %vm537_vm5, %v1797_v51, %v4790_v49  ;;  %v4840_v28 = vmul.f32 0.10936069, %v4740_v8 }
  0xde   : > { %6408 = vst [vmem:[#allocation35_spill] sm:$0xff] %v4731_v46  ;;  %v1798_v11 = vsel %vm537_vm5, %v1796_v57, %v1797_v51  ;;  %v1805_v45 = vadd.f32 %v4818_v40, %v4803_v41  ;;  %v1686_v38 = vmul.f32 0.21300554, %v4740_v8  ;;  %v1817_v51 = vsel %vm555_vm6, %v1814_v26, %v1816_v37 }
  0xdf   : > { %v4733_v59 = vpop.permute.xlu1 %1026  ;;  %1459 = vrot.lane.b32.xlu0 %v4722_v53, %s3841_s11  ;;  %v4857_v57 = vmul.f32 0.21300554, %v4749_v62  ;;  %v1845_v46 = vmul.f32 0.21300554, %v4766_v30 }
  0xe0   : > { %6409 = vst [vmem:[#allocation36_spill] sm:$0xff] %v4733_v59  ;;  %v1822_v4 = vadd.f32 %v1817_v51, %v1805_v45  ;;  %v1832_v59 = vrot.slane %v4849_v7, 3  ;;  %v1702_v45 = vmul.f32 0.26601171, %v4724_v50 }
  0xe1   : > { %1638 = vrot.lane.b32.xlu1 %v4729_v63, %s3833_s23  ;;  %v4755_v33 = vpop.permute.xlu0 %1012  ;;  %v1854_v5 = vrot.slane %v4857_v57, 4 }
  0xe2   : > { %6410 = vst [vmem:[#allocation37_spill] sm:$0xff] %v4755_v33  ;;  %v4875_v33 = vmul.f32 0.10936069, %v4832_v61 }
  0xe3   : > { %v4757_v35 = vpop.permute.xlu1 %1030  ;;  %1636 = vrot.lane.b32.xlu0 %v4738_v20, %s3833_s23 }
  0xe4   : > { %6411 = vst [vmem:[#allocation38_spill] sm:$0xff] %v4757_v35  ;;  %v1804_v35 = vadd.f32 %v1798_v11, %v1787_v18  ;;  %v1856_v11 = vrot.slane %v4860_v52, 4  ;;  %v1868_v18 = vmul.f32 0.26601171, %v4753_v60 }
  0xe5   : > { %1654 = vrot.lane.b32.xlu1 %v4745_v16, %s3835_s25  ;;  %v4775_v13 = vpop.permute.xlu0 %1028 }
  0xe6   : > { %6412 = vst [vmem:[#allocation39_spill] sm:$0xff] %v4775_v13  ;;  %v1877_v53 = vrot.slane %v1868_v18, 5 }
  0xe7   : > { %v4777_v21 = vpop.permute.xlu1 %1046  ;;  %1640 = vrot.lane.b32.xlu0 %v4762_v15, %s3833_s23 }
  0xe8   : > { %6413 = vst [vmem:[#allocation40_spill] sm:$0xff] %v4777_v21  ;;  %v1857_v21 = vsel %vm597_vm1, %v1854_v5, %v1856_v11 }
  0xe9   : > { %1658 = vrot.lane.b32.xlu1 %v4771_v22, %s3835_s25  ;;  %v4792_v56 = vpop.permute.xlu0 %1044 }
  0xea   : > { %6414 = vst [vmem:[#allocation41_spill] sm:$0xff] %v4792_v56  ;;  %v1815_v56 = vsel %vm555_vm6, %v1813_v43, %v1814_v26  ;;  %v1867_v43 = vmul.f32 0.26601171, %v4749_v62  ;;  %v1834_v62 = vsel %vm575_vm0, %v1832_v59, %v1833_v27 }
  0xeb   : > { %v4800_v36 = vpop.permute.xlu1 %1062  ;;  %1656 = vrot.lane.b32.xlu0 %v4782_v12, %s3835_s25  ;;  %v1821_v24 = vadd.f32 %v1815_v56, %v1804_v35  ;;  %v1704_v35 = vmul.f32 0.26601171, %v4740_v8 }
  0xec   : > { %6415 = vst [vmem:[#allocation42_spill] sm:$0xff] %v4800_v36  ;;  %v1703_v36 = vmul.f32 0.26601171, %v4713_v31  ;;  %v1875_v48 = vrot.slane %v1867_v43, 5  ;;  %v1869_v43 = vmul.f32 0.26601171, %v4832_v61 }
  0xed   : > { %1674 = vrot.lane.b32.xlu1 %v4788_v32, %s3832_s22  ;;  %v4826_v1 = vpop.permute.xlu0 %1048  ;;  %v1842_v27 = vadd.f32 %v1834_v62, %v1821_v24  ;;  %v1903_v62 = vrot.slane %v4824_v19, 7 }
  0xee   : > { %6416 = vst [vmem:[#allocation43_spill] sm:$0xff] %v4826_v1  ;;  %v4868_v1 = vmul.f32 0.0010283801, %v4753_v60  ;;  %v1843_v60 = vadd.f32 %v1836_v42, %v1822_v4 }
  0xef   : > { %v4834_v0 = vpop.permute.xlu1 %1066  ;;  %1672 = vrot.lane.b32.xlu0 %v4808_v2, %s3832_s22 }
  0xf0   : > { %6417 = vst [vmem:[#allocation44_spill] sm:$0xff] %v4834_v0  ;;  %v4865_v0 = vmul.f32 0.21300554, %v4713_v31  ;;  %v1806_v51 = vadd.f32 %v4790_v49, %v4868_v1  ;;  %v1864_v59 = vadd.f32 %v1857_v21, %v1843_v60 }
  0xf1   : > { %1690 = vrot.lane.b32.xlu1 %v4814_v25, %s3836_s26  ;;  %v4853_v54 = vpop.permute.xlu0 %1064 }
  0xf2   : > { %6418 = vst [vmem:[#allocation45_spill] sm:$0xff] %v4853_v54  ;;  %v1853_v54 = vrot.slane %v1845_v46, 4 }
  0xf3   : > { %v4862_v10 = vpop.permute.xlu1 %1082  ;;  %1676 = vrot.lane.b32.xlu0 %v4840_v28, %s3832_s22 }
  0xf4   : > { %6419 = vst [vmem:[#allocation46_spill] sm:$0xff] %v4862_v10  ;;  %v1866_v10 = vmul.f32 0.26601171, %v4766_v30  ;;  %v1823_v30 = vadd.f32 %v1816_v37, %v1806_v51  ;;  %v1855_v4 = vsel %vm597_vm1, %v1853_v54, %v1854_v5  ;;  %v1890_v37 = vrot.slane %v4860_v52, 6 }
  0xf5   : > { %1694 = vrot.lane.b32.xlu1 %v1686_v38, %s3836_s26  ;;  %v4881_v34 = vpop.permute.xlu0 %1080  ;;  %v1901_v51 = vrot.slane %v4821_v55, 7 }
  0xf6   : > { %6420 = vst [vmem:[#allocation47_spill] sm:$0xff] %v4881_v34  ;;  %v1837_v34 = vrot.slane %v4875_v33, 3  ;;  %v1874_v42 = vrot.slane %v1866_v10, 5  ;;  %v1863_v10 = vadd.f32 %v1855_v4, %v1842_v27  ;;  %v1917_v27 = vmul.f32 0.007598758, %v4832_v61 }
  0xf7   : > { %v4887_v26 = vpop.permute.xlu1 %1092  ;;  %1692 = vrot.lane.b32.xlu0 %v4865_v0, %s3836_s26  ;;  %v1904_v19 = vsel %vm647_vm4, %v1901_v51, %v1903_v62 }
  0xf8   : > { %6421 = vst [vmem:[#allocation48_spill] sm:$0xff] %v4887_v26  ;;  %v1848_v26 = vmul.f32 0.21300554, %v4832_v61  ;;  %v1838_v56 = vsel %vm575_vm0, %v1835_v58, %v1837_v34  ;;  %v1887_v34 = vrot.slane %v1845_v46, 6  ;;  %v1876_v5 = vsel %vm619_vm2, %v1874_v42, %v1875_v48 }
  0xf9   : > { %1710 = vrot.lane.b32.xlu1 %v1703_v36, %s3834_s24  ;;  %v4899_v44 = vpop.permute.xlu0 %1084  ;;  %v1844_v24 = vadd.f32 %v1838_v56, %v1823_v30  ;;  %v1884_v46 = vadd.f32 %v1876_v5, %v1863_v10 }
  0xfa   : > { %6422 = vst [vmem:[#allocation49_spill] sm:$0xff] %v4899_v44  ;;  %v1858_v36 = vrot.slane %v1848_v26, 4  ;;  %v1892_v30 = vrot.slane %v1848_v26, 6  ;;  %v1905_v26 = vrot.slane %v4875_v33, 7 }
  0xfb   : > { %v4902_v13 = vpop.permute.xlu1 %1096  ;;  %1708 = vrot.lane.b32.xlu0 %v1702_v45, %s3834_s24  ;;  %v1878_v45 = vsel %vm619_vm2, %v1875_v48, %v1877_v53  ;;  %v1900_v48 = vrot.slane %v4849_v7, 7 }
  0xfc   : > { %6423 = vst [vmem:[#allocation50_spill] sm:$0xff] %v4902_v13  ;;  %v1888_v13 = vrot.slane %v4857_v57, 6  ;;  %v1885_v54 = vadd.f32 %v1878_v45, %v1864_v59  ;;  %v1859_v21 = vsel %vm597_vm1, %v1856_v11, %v1858_v36  ;;  %v1919_v59 = vrot.slane %v1917_v27, 1 }
  0xfd   : > { %1720 = vrot.lane.b32.xlu1 %v4814_v25, %s3837_s27  ;;  %v4911_v18 = vpop.permute.xlu0 %1094  ;;  %v1879_v25 = vrot.slane %v1869_v43, 5  ;;  %v1926_v36 = vmul.f32 0.0010283801, %v4832_v61 }
  0xfe   : > { %v1891_v52 = vsel %vm633_vm3, %v1888_v13, %v1890_v37  ;;  %v1889_v11 = vsel %vm633_vm3, %v1887_v34, %v1888_v13  ;;  %v1902_v13 = vsel %vm647_vm4, %v1900_v48, %v1901_v51  ;;  %v1920_v10 = vsel %vm537_vm5, %v4790_v49, %v1919_v59  ;;  %v5015_v48 = vld [vmem:[%s481_s17] sm:$0xff] }
  0xff   : > { %v4916_v58 = vpop.permute.xlu1 %1106  ;;  %1712 = vrot.lane.b32.xlu0 %v1704_v35, %s3834_s24  ;;  %v1898_v35 = vadd.f32 %v1891_v52, %v1885_v54  ;;  %v1880_v55 = vsel %vm619_vm2, %v1877_v53, %v1879_v25  ;;  %v1897_v7 = vadd.f32 %v1889_v11, %v1884_v46  ;;  %v1933_v34 = vrot.slane %v1926_v36, 2  ;;  %6439 = vst [vmem:[#allocation66_spill] sm:$0xff] %v5015_v48 }
 0x100   : > { %6424 = vst [vmem:[#allocation51_spill] sm:$0xff] %v4916_v58  ;;  %v1930_v49 = vrot.slane %v4803_v41, 2  ;;  %v5060_v36 = vmul.f32 0.10936069, %v5015_v48 }
 0x101   : > { %1724 = vrot.lane.b32.xlu1 %v1686_v38, %s3837_s27  ;;  %v4922_v57 = vpop.permute.xlu0 %1104  ;;  %v1865_v38 = vadd.f32 %v1859_v21, %v1844_v24  ;;  %v1911_v53 = vadd.f32 %v1904_v19, %v1898_v35  ;;  %v1931_v24 = vrot.slane %v4868_v1, 2  ;;  %v4974_v1 = vmul.f32 0.0010283801, %v4724_v50 }
 0x102   : > { %6425 = vst [vmem:[#allocation52_spill] sm:$0xff] %v4922_v57  ;;  %v4989_v50 = vmul.f32 0.0010283801, %v4740_v8  ;;  %v2224_v35 = vmul.f32 0.007598758, %v5015_v48 }
 0x103   : > { %v4927_v60 = vpop.permute.xlu1 %1116  ;;  %1722 = vrot.lane.b32.xlu0 %v4865_v0, %s3837_s27  ;;  %v1886_v42 = vadd.f32 %v1880_v55, %v1865_v38  ;;  %6433 = vst [vmem:[#allocation60_spill] sm:$0xff] %v4974_v1  ;;  %v1934_v25 = vsel %vm555_vm6, %v1931_v24, %v1933_v34 }
 0x104   : > { %6426 = vst [vmem:[#allocation53_spill] sm:$0xff] %v4927_v60  ;;  %6436 = vst [vmem:[#allocation63_spill] sm:$0xff] %v4989_v50 }
 0x105   : > { %1734 = vrot.lane.b32.xlu1 %v4788_v32, %s3838_s28  ;;  %v4936_v56 = vpop.permute.xlu0 %1108  ;;  %v1893_v32 = vsel %vm633_vm3, %v1890_v37, %v1892_v30  ;;  %v1906_v37 = vsel %vm647_vm4, %v1903_v62, %v1905_v26  ;;  %v5055_v26 = vld [vmem:[%s503_s20] sm:$0xff] }
 0x106   : > { %6427 = vst [vmem:[#allocation54_spill] sm:$0xff] %v4936_v56  ;;  %v1899_v45 = vadd.f32 %v1893_v32, %v1886_v42  ;;  %v2223_v42 = vmul.f32 0.0010283801, %v5015_v48  ;;  %6443 = vst [vmem:[#allocation70_spill] sm:$0xff] %v5055_v26 }
 0x107   : > { %v4940_v0 = vpop.permute.xlu1 %1120  ;;  %1732 = vrot.lane.b32.xlu0 %v4808_v2, %s3838_s28  ;;  %v1910_v2 = vadd.f32 %v1902_v13, %v1897_v7  ;;  %v5047_v7 = vld [vmem:[%s481_s17 + $0x8] sm:$0xff]  ;;  %v2226_v13 = vrot.slane %v2224_v35, 1  ;;  %s3733_s17 = sshll.u32 %s6588_s14, 2 }
 0x108   : > { %6428 = vst [vmem:[#allocation55_spill] sm:$0xff] %v4940_v0 }
 0x109   : > { %1744 = vrot.lane.b32.xlu1 %v4745_v16, %s3839_s29  ;;  %v4949_v4 = vpop.permute.xlu0 %1118  ;;  %v1915_v16 = vadd.f32 %v1911_v53, %v4798_v6  ;;  %v1913_v6 = vmul.f32 0.036000773, %v4832_v61  ;;  %v2229_v53 = vmul.f32 0.036000773, %v5015_v48 }
 0x10a   : > { %6429 = vst [vmem:[#allocation56_spill] sm:$0xff] %v4949_v4 }
 0x10b   : > { %v4952_v43 = vpop.permute.xlu1 %1130  ;;  %1736 = vrot.lane.b32.xlu0 %v4840_v28, %s3838_s28  ;;  %v1914_v28 = vadd.f32 %v1910_v2, %v4795_v23  ;;  %v1924_v54 = vadd.f32 %v1920_v10, %v1915_v16  ;;  %v5063_v2 = vmul.f32 0.10936069, %v5047_v7  ;;  %v2336_v10 = vmul.f32 0.007598758, %v5055_v26 }
 0x10c   : > { %6430 = vst [vmem:[#allocation57_spill] sm:$0xff] %v4952_v43 }
 0x10d   : > { %1748 = vrot.lane.b32.xlu1 %v4771_v22, %s3839_s29  ;;  %v4960_v33 = vpop.permute.xlu0 %1128  ;;  %v1912_v22 = vadd.f32 %v1906_v37, %v1899_v45  ;;  %v4992_v41 = vadd.f32 %v1934_v25, %v1924_v54  ;;  %v2228_v37 = vadd.f32 %v2226_v13, %v2223_v42  ;;  %v2239_v54 = vrot.slane %v5063_v2, 3 }
 0x10e   : > { %6431 = vst [vmem:[#allocation58_spill] sm:$0xff] %v4960_v33  ;;  %v2338_v35 = vrot.slane %v2336_v10, 1  ;;  %v2341_v33 = vmul.f32 0.036000773, %v5055_v26 }
 0x10f   : > { %v4965_v5 = vpop.permute.xlu1 %1143  ;;  %1746 = vrot.lane.b32.xlu0 %v4782_v12, %s3839_s29  ;;  %v1923_v12 = vadd.f32 %v1914_v28, %v4818_v40  ;;  %v1916_v23 = vadd.f32 %v1913_v6, %v1912_v22  ;;  %v5011_v62 = vmul.f32 0.007598758, %v4992_v41  ;;  %v5068_v45 = vmul.f32 0.036000773, %v4992_v41 }
 0x110   : > { %6432 = vst [vmem:[#allocation59_spill] sm:$0xff] %v4965_v5  ;;  %v5073_v16 = vmul.f32 0.10936069, %v4992_v41  ;;  %v5079_v28 = vmul.f32 0.21300554, %v5015_v48  ;;  %v2343_v56 = vrot.slane %v2341_v33, 2 }
 0x111   : > { %1758 = vrot.lane.b32.xlu1 %v4729_v63, %s3840_s30  ;;  %v4977_v21 = vpop.permute.xlu0 %1132  ;;  %v1932_v63 = vsel %vm555_vm6, %v1930_v49, %v1931_v24  ;;  %v1925_v40 = vadd.f32 %v1919_v59, %v1916_v23  ;;  %v2231_v24 = vrot.slane %v2229_v53, 2  ;;  %v5082_v22 = vmul.f32 0.21300554, %v5047_v7 }
 0x112   : > { %6434 = vst [vmem:[#allocation61_spill] sm:$0xff] %v4977_v21  ;;  %v5006_v8 = vadd.f32 %v1932_v63, %v1923_v12  ;;  %v2238_v49 = vrot.slane %v5060_v36, 3  ;;  %v5093_v12 = vld [vmem:[%s503_s20 + $0x8] sm:$0xff]  ;;  %v2247_v13 = vrot.slane %v5079_v28, 4  ;;  %v2253_v5 = vmul.f32 0.26601171, %v5047_v7  ;;  %s489_s20 = scalar_lea.vmem %s6340_s3, %s3733_s17 }
 0x113   : > { %v4980_v51 = vpop.permute.xlu1 %1147  ;;  %1756 = vrot.lane.b32.xlu0 %v4738_v20, %s3840_s30  ;;  %v5004_v20 = vmul.f32 0.0010283801, %v4713_v31  ;;  %v2233_v63 = vadd.f32 %v2231_v24, %v2228_v37  ;;  %v2248_v53 = vrot.slane %v5082_v22, 4  ;;  %v5112_v37 = vmul.f32 0.10936069, %v5055_v26 }
 0x114   : > { %6435 = vst [vmem:[#allocation62_spill] sm:$0xff] %v4980_v51  ;;  %v5022_v31 = vmul.f32 0.007598758, %v5006_v8  ;;  %v5029_v11 = vmul.f32 0.036000773, %v5006_v8 }
 0x115   : > { %1771 = vrot.lane.b32.xlu1 %v4974_v1, %s3841_s11  ;;  %v4994_v61 = vpop.permute.xlu0 %1145  ;;  %v5091_v25 = vmul.f32 0.10936069, %v5006_v8  ;;  %v5098_v23 = vmul.f32 0.21300554, %v5006_v8  ;;  %v2252_v51 = vmul.f32 0.26601171, %v5015_v48 }
 0x116   : > { %6437 = vst [vmem:[#allocation64_spill] sm:$0xff] %v4994_v61  ;;  %v5115_v24 = vmul.f32 0.10936069, %v5093_v12  ;;  %v2017_v33 = vmul.f32 0.26601171, %v4992_v41 }
 0x117   : > { %v4996_v52 = vpop.permute.xlu1 %1324  ;;  %1760 = vrot.lane.b32.xlu0 %v4762_v15, %s3840_s30  ;;  %v5024_v15 = vadd.f32 %v1933_v34, %v1925_v40  ;;  %v2335_v40 = vmul.f32 0.0010283801, %v5055_v26 }
 0x118   : > { %v2351_v60 = vrot.slane %v5115_v24, 3 }
 0x119   : > { %1775 = vrot.lane.b32.xlu1 %v4989_v50, %s3841_s11  ;;  %v5013_v46 = vpop.permute.xlu0 %1322  ;;  %v5042_v19 = vmul.f32 0.007598758, %v5024_v15  ;;  %v5045_v27 = vmul.f32 0.036000773, %v5024_v15  ;;  %v5120_v10 = vmul.f32 0.10936069, %v5024_v15  ;;  %v2340_v0 = vadd.f32 %v2338_v35, %v2335_v40 }
 0x11a   : > { %6438 = vst [vmem:[#allocation65_spill] sm:$0xff] %v5013_v46  ;;  %v2350_v50 = vrot.slane %v5112_v37, 3  ;;  %v2016_v40 = vmul.f32 0.26601171, %v5006_v8  ;;  %v2262_v46 = vrot.slane %v5082_v22, 6  ;;  %v5178_v22 = vmul.f32 %v5047_v7, %v5047_v7 }
 0x11b   : > { %v5017_v38 = vpop.permute.xlu1 %1340  ;;  %1773 = vrot.lane.b32.xlu0 %v5004_v20, %s3841_s11  ;;  %v2345_v44 = vadd.f32 %v2343_v56, %v2340_v0  ;;  %v5171_v56 = vmul.f32 %v5055_v26, %v5055_v26  ;;  %v2018_v0 = vmul.f32 0.26601171, %v5024_v15 }
 0x11c   : > { %6440 = vst [vmem:[#allocation67_spill] sm:$0xff] %v5017_v38  ;;  %v5137_v38 = vmul.f32 0.21300554, %v4992_v41  ;;  %v2352_v1 = vsel %vm575_vm0, %v2350_v50, %v2351_v60 }
 0x11d   : > { %1952 = vrot.lane.b32.xlu1 %v5011_v62, %s3833_s23  ;;  %v5032_v55 = vpop.permute.xlu0 %1326  ;;  %v2354_v43 = vadd.f32 %v2352_v1, %v2345_v44  ;;  %v5198_v1 = vmul.f32 0.10936069, %v5178_v22 }
 0x11e   : > { %6441 = vst [vmem:[#allocation68_spill] sm:$0xff] %v5032_v55 }
 0x11f   : > { %v5034_v30 = vpop.permute.xlu1 %1344  ;;  %1950 = vrot.lane.b32.xlu0 %v5022_v31, %s3833_s23 }
 0x120   : > { %6442 = vst [vmem:[#allocation69_spill] sm:$0xff] %v5034_v30  ;;  %v2240_v30 = vsel %vm575_vm0, %v2238_v49, %v2239_v54 }
 0x121   : > { %1968 = vrot.lane.b32.xlu1 %v5029_v11, %s3835_s25  ;;  %v5053_v32 = vpop.permute.xlu0 %1342  ;;  %v2242_v54 = vadd.f32 %v2240_v30, %v2233_v63  ;;  %v5140_v30 = vmul.f32 0.21300554, %v5055_v26 }
 0x123   : > { %v5057_v59 = vpop.permute.xlu1 %1360  ;;  %1954 = vrot.lane.b32.xlu0 %v5042_v19, %s3833_s23  ;;  %v2359_v61 = vrot.slane %v5140_v30, 4 }
 0x125   : > { %1972 = vrot.lane.b32.xlu1 %v5045_v27, %s3835_s25  ;;  %v5076_v34 = vpop.permute.xlu0 %1358 }
 0x126   : > { %6444 = vst [vmem:[#allocation71_spill] sm:$0xff] %v5076_v34  ;;  %v2257_v34 = vrot.slane %v2253_v5, 5  ;;  %v5150_v5 = vmul.f32 %v5015_v48, %v5015_v48 }
 0x127   : > { %v5084_v6 = vpop.permute.xlu1 %1376  ;;  %1970 = vrot.lane.b32.xlu0 %v5068_v45, %s3835_s25 }
 0x128   : > { %6445 = vst [vmem:[#allocation72_spill] sm:$0xff] %v5084_v6  ;;  %v2256_v6 = vrot.slane %v2252_v51, 5  ;;  %v5143_v51 = vmul.f32 0.21300554, %v5093_v12  ;;  %v5195_v44 = vmul.f32 0.10936069, %v5150_v5 }
 0x129   : > { %1988 = vrot.lane.b32.xlu1 %v5073_v16, %s3832_s22  ;;  %v5101_v42 = vpop.permute.xlu0 %1362 }
 0x12a   : > { %6446 = vst [vmem:[#allocation73_spill] sm:$0xff] %v5101_v42  ;;  %v2249_v42 = vsel %vm597_vm1, %v2247_v13, %v2248_v53  ;;  %v2261_v13 = vrot.slane %v5079_v28, 6  ;;  %v2258_v57 = vsel %vm619_vm2, %v2256_v6, %v2257_v34  ;;  %v2365_v28 = vmul.f32 0.26601171, %v5093_v12 }
 0x12b   : > { %v5107_v21 = vpop.permute.xlu1 %1380  ;;  %1986 = vrot.lane.b32.xlu0 %v5091_v25, %s3832_s22  ;;  %v2251_v35 = vadd.f32 %v2249_v42, %v2242_v54  ;;  %v2364_v42 = vmul.f32 0.26601171, %v5055_v26  ;;  %v2450_v34 = vmul.f32 0.007598758, %v5150_v5  ;;  %v2479_v26 = vmul.f32 0.26601171, %v5178_v22 }
 0x12c   : > { %6447 = vst [vmem:[#allocation74_spill] sm:$0xff] %v5107_v21  ;;  %v5125_v21 = vmul.f32 0.21300554, %v5024_v15  ;;  %v2263_v54 = vsel %vm633_vm3, %v2261_v13, %v2262_v46  ;;  %v2369_v58 = vrot.slane %v2365_v28, 5  ;;  %v2564_v46 = vmul.f32 0.007598758, %v5171_v56 }
 0x12d   : > { %2004 = vrot.lane.b32.xlu1 %v5098_v23, %s3836_s26  ;;  %v5127_v49 = vpop.permute.xlu0 %1378  ;;  %v2260_v50 = vadd.f32 %v2258_v57, %v2251_v35  ;;  %v2368_v4 = vrot.slane %v2364_v42, 5  ;;  %v2455_v57 = vmul.f32 0.036000773, %v5150_v5  ;;  %v2449_v35 = vmul.f32 0.0010283801, %v5150_v5 }
 0x12e   : > { %v2373_v13 = vrot.slane %v5140_v30, 6  ;;  %v2374_v42 = vrot.slane %v5143_v51, 6  ;;  %v2566_v30 = vrot.slane %v2564_v46, 1  ;;  %v2379_v46 = vrot.slane %v5115_v24, 7 }
 0x12f   : > { %v5130_v55 = vpop.permute.xlu1 %1396  ;;  %1990 = vrot.lane.b32.xlu0 %v5120_v10, %s3832_s22  ;;  %v2370_v28 = vsel %vm619_vm2, %v2368_v4, %v2369_v58  ;;  %v2464_v58 = vrot.slane %v5195_v44, 3  ;;  %v2465_v4 = vrot.slane %v5198_v1, 3 }
 0x130   : > { %6448 = vst [vmem:[#allocation75_spill] sm:$0xff] %v5130_v55 }
 0x131   : > { %2008 = vrot.lane.b32.xlu1 %v5125_v21, %s3836_s26  ;;  %v5152_v63 = vpop.permute.xlu0 %1394 }
 0x132   : > { %6449 = vst [vmem:[#allocation76_spill] sm:$0xff] %v5152_v63  ;;  %v2360_v63 = vrot.slane %v5143_v51, 4  ;;  %v2569_v51 = vmul.f32 0.036000773, %v5171_v56 }
 0x133   : > { %v5156_v53 = vpop.permute.xlu1 %1406  ;;  %2006 = vrot.lane.b32.xlu0 %v5137_v38, %s3836_s26 }
 0x134   : > { %6450 = vst [vmem:[#allocation77_spill] sm:$0xff] %v5156_v53  ;;  %v2267_v53 = vrot.slane %v5063_v2, 7  ;;  %v2265_v2 = vadd.f32 %v2263_v54, %v2260_v50  ;;  %v5212_v50 = vmul.f32 0.21300554, %v5150_v5  ;;  %v5215_v54 = vmul.f32 0.21300554, %v5178_v22 }
 0x135   : > { %2024 = vrot.lane.b32.xlu1 %v2017_v33, %s3834_s24  ;;  %v5173_v60 = vpop.permute.xlu0 %1398  ;;  %v2266_v33 = vrot.slane %v5060_v36, 7 }
 0x136   : > { %6451 = vst [vmem:[#allocation78_spill] sm:$0xff] %v5173_v60  ;;  %v2361_v60 = vsel %vm597_vm1, %v2359_v61, %v2360_v63  ;;  %v5202_v61 = vmul.f32 %v5093_v12, %v5093_v12 }
 0x137   : > { %v5180_v6 = vpop.permute.xlu1 %1410  ;;  %2022 = vrot.lane.b32.xlu0 %v2016_v40, %s3834_s24  ;;  %v2363_v40 = vadd.f32 %v2361_v60, %v2354_v43  ;;  %v2563_v43 = vmul.f32 0.0010283801, %v5171_v56 }
 0x138   : > { %6452 = vst [vmem:[#allocation79_spill] sm:$0xff] %v5180_v6  ;;  %v2452_v6 = vrot.slane %v2450_v34, 1  ;;  %v2457_v34 = vrot.slane %v2455_v57, 2 }
 0x139   : > { %2034 = vrot.lane.b32.xlu1 %v5098_v23, %s3837_s27  ;;  %v5192_v36 = vpop.permute.xlu0 %1408  ;;  %v2268_v23 = vsel %vm647_vm4, %v2266_v33, %v2267_v53  ;;  %v5229_v33 = vmul.f32 0.10936069, %v5202_v61 }
 0x13a   : > { %6453 = vst [vmem:[#allocation80_spill] sm:$0xff] %v5192_v36  ;;  %v2454_v53 = vadd.f32 %v2452_v6, %v2449_v35  ;;  %v2375_v6 = vsel %vm633_vm3, %v2373_v13, %v2374_v42  ;;  %v2378_v35 = vrot.slane %v5112_v37, 7  ;;  %v2478_v36 = vmul.f32 0.26601171, %v5150_v5 }
 0x13b   : > { %v5204_v63 = vpop.permute.xlu1 %1420  ;;  %2026 = vrot.lane.b32.xlu0 %v2018_v0, %s3834_s24  ;;  %v5226_v0 = vmul.f32 0.10936069, %v5171_v56  ;;  %v2568_v13 = vadd.f32 %v2566_v30, %v2563_v43  ;;  %v2571_v42 = vrot.slane %v2569_v51, 2  ;;  %v5245_v37 = vmul.f32 0.21300554, %v5171_v56 }
 0x13c   : > { %6454 = vst [vmem:[#allocation81_spill] sm:$0xff] %v5204_v63  ;;  %v2474_v63 = vrot.slane %v5215_v54, 4  ;;  %v5253_v5 = vmul.f32 0.21300554, %v5202_v61  ;;  %v2380_v30 = vsel %vm647_vm4, %v2378_v35, %v2379_v46  ;;  %v2383_v35 = vmul.f32 0.036000773, %v5093_v12 }
 0x13d   : > { %2038 = vrot.lane.b32.xlu1 %v5125_v21, %s3837_s27  ;;  %v5221_v60 = vpop.permute.xlu0 %1418  ;;  %v2372_v21 = vadd.f32 %v2370_v28, %v2363_v40  ;;  %v2459_v40 = vadd.f32 %v2457_v34, %v2454_v53  ;;  %v2578_v28 = vrot.slane %v5226_v0, 3  ;;  %v2271_v34 = vmul.f32 0.036000773, %v5047_v7 }
 0x13e   : > { %6455 = vst [vmem:[#allocation82_spill] sm:$0xff] %v5221_v60  ;;  %v2473_v60 = vrot.slane %v5212_v50, 4  ;;  %v2273_v53 = vmul.f32 0.007598758, %v5047_v7  ;;  %v2487_v46 = vrot.slane %v5212_v50, 6 }
 0x13f   : > { %v5231_v57 = vpop.permute.xlu1 %1430  ;;  %2036 = vrot.lane.b32.xlu0 %v5137_v38, %s3837_s27  ;;  %v2466_v38 = vsel %vm575_vm0, %v2464_v58, %v2465_v4  ;;  %v2377_v43 = vadd.f32 %v2375_v6, %v2372_v21  ;;  %v2482_v58 = vrot.slane %v2478_v36, 5  ;;  %v2592_v21 = vmul.f32 0.26601171, %v5171_v56 }
 0x140   : > { %6456 = vst [vmem:[#allocation83_spill] sm:$0xff] %v5231_v57  ;;  %v2579_v57 = vrot.slane %v5229_v33, 3  ;;  %v2475_v51 = vsel %vm597_vm1, %v2473_v60, %v2474_v63  ;;  %v2468_v4 = vadd.f32 %v2466_v38, %v2459_v40  ;;  %v2593_v6 = vmul.f32 0.26601171, %v5202_v61 }
 0x141   : > { %2048 = vrot.lane.b32.xlu1 %v5073_v16, %s3838_s28  ;;  %v5247_v24 = vpop.permute.xlu0 %1422  ;;  %v2270_v16 = vadd.f32 %v2268_v23, %v2265_v2  ;;  %v2587_v2 = vrot.slane %v5245_v37, 4  ;;  %v2275_v60 = vrot.slane %v2273_v53, 1  ;;  %v2488_v40 = vrot.slane %v5215_v54, 6 }
 0x142   : > { %6457 = vst [vmem:[#allocation84_spill] sm:$0xff] %v5247_v24  ;;  %v2483_v24 = vrot.slane %v2479_v26, 5  ;;  %v2580_v55 = vsel %vm575_vm0, %v2578_v28, %v2579_v57  ;;  %v2382_v26 = vadd.f32 %v2380_v30, %v2377_v43  ;;  %v2385_v57 = vmul.f32 0.007598758, %v5093_v12 }
 0x143   : > { %v5255_v48 = vpop.permute.xlu1 %1434  ;;  %2046 = vrot.lane.b32.xlu0 %v5091_v25, %s3838_s28  ;;  %v2588_v25 = vrot.slane %v5253_v5, 4  ;;  %v2272_v36 = vadd.f32 %v2271_v34, %v2270_v16  ;;  %v2477_v56 = vadd.f32 %v2475_v51, %v2468_v4  ;;  %v2596_v28 = vrot.slane %v2592_v21, 5 }
 0x144   : > { %6458 = vst [vmem:[#allocation85_spill] sm:$0xff] %v5255_v48  ;;  %v2573_v48 = vadd.f32 %v2571_v42, %v2568_v13  ;;  %v2597_v16 = vrot.slane %v2593_v6, 5  ;;  %v5290_v53 = vmul.f32 0.0010283801, %v5006_v8  ;;  %v2384_v54 = vadd.f32 %v2383_v35, %v2382_v26 }
 0x145   : > { %2058 = vrot.lane.b32.xlu1 %v5029_v11, %s3839_s29  ;;  %v5266_v23 = vpop.permute.xlu0 %1432  ;;  %v2278_v11 = vmul.f32 0.0010283801, %v5047_v7  ;;  %v2589_v38 = vsel %vm597_vm1, %v2587_v2, %v2588_v25  ;;  %v2492_v43 = vrot.slane %v5195_v44, 7  ;;  %v2493_v30 = vrot.slane %v5198_v1, 7 }
 0x146   : > { %v2582_v13 = vadd.f32 %v2580_v55, %v2573_v48  ;;  %6459 = vst [vmem:[#allocation86_spill] sm:$0xff] %v5290_v53  ;;  %v2387_v48 = vrot.slane %v2385_v57, 1  ;;  %v2390_v55 = vmul.f32 0.0010283801, %v5093_v12  ;;  %v2601_v4 = vrot.slane %v5245_v37, 6 }
 0x147   : > { %v5272_v63 = vpop.permute.xlu1 %1444  ;;  %2050 = vrot.lane.b32.xlu0 %v5120_v10, %s3838_s28  ;;  %v2484_v10 = vsel %vm619_vm2, %v2482_v58, %v2483_v24  ;;  %v2280_v50 = vrot.slane %v2278_v11, 2  ;;  %v2489_v58 = vsel %vm633_vm3, %v2487_v46, %v2488_v40  ;;  %v2602_v2 = vrot.slane %v5253_v5, 6 }
 0x148   : > { %v2486_v24 = vadd.f32 %v2484_v10, %v2477_v56  ;;  %v2591_v51 = vadd.f32 %v2589_v38, %v2582_v13  ;;  %v2392_v44 = vrot.slane %v2390_v55, 2  ;;  %v5312_v1 = vmul.f32 0.0010283801, %v5024_v15 }
 0x149   : > { %2062 = vrot.lane.b32.xlu1 %v5045_v27, %s3839_s29  ;;  %v5283_v42 = vpop.permute.xlu0 %1442  ;;  %v2277_v27 = vadd.f32 %v2275_v60, %v2272_v36  ;;  %v2494_v5 = vsel %vm647_vm4, %v2492_v43, %v2493_v30  ;;  %v2603_v60 = vsel %vm633_vm3, %v2601_v4, %v2602_v2  ;;  %v2607_v11 = vrot.slane %v5229_v33, 7 }
 0x14a   : > { %6461 = vst [vmem:[#allocation88_spill] sm:$0xff] %v5312_v1  ;;  %v2491_v6 = vadd.f32 %v2489_v58, %v2486_v24  ;;  %v5327_v15 = vmul.f32 0.0010283801, %v4992_v41  ;;  %v2499_v57 = vmul.f32 0.007598758, %v5178_v22 }
 0x14b   : > { %v5287_v34 = vpop.permute.xlu1 %1457  ;;  %2060 = vrot.lane.b32.xlu0 %v5068_v45, %s3839_s29  ;;  %v2598_v45 = vsel %vm619_vm2, %v2596_v28, %v2597_v16  ;;  %v5314_v21 = vadd.f32 %v2280_v50, %v2277_v27  ;;  %v2497_v33 = vmul.f32 0.036000773, %v5178_v22  ;;  %v2504_v38 = vmul.f32 0.0010283801, %v5178_v22 }
 0x14c   : > { %v2600_v36 = vadd.f32 %v2598_v45, %v2591_v51  ;;  %6463 = vst [vmem:[#allocation90_spill] sm:$0xff] %v5327_v15  ;;  %v2501_v10 = vrot.slane %v2499_v57, 1  ;;  %v2611_v27 = vmul.f32 0.036000773, %v5202_v61  ;;  %v2613_v50 = vmul.f32 0.007598758, %v5202_v61 }
 0x14d   : > { %2072 = vrot.lane.b32.xlu1 %v5011_v62, %s3840_s30  ;;  %v5299_v8 = vpop.permute.xlu0 %1446  ;;  %v2389_v62 = vadd.f32 %v2387_v48, %v2384_v54  ;;  %6462 = vst [vmem:[#allocation89_spill] sm:$0xff] %v5314_v21  ;;  %v5335_v56 = vmul.f32 0.007598758, %v5314_v21  ;;  %v5358_v55 = vmul.f32 0.036000773, %v5314_v21  ;;  %v2506_v24 = vrot.slane %v2504_v38, 2 }
 0x14e   : > { %v2605_v46 = vadd.f32 %v2603_v60, %v2600_v36  ;;  %v2615_v30 = vrot.slane %v2613_v50, 1  ;;  %v2618_v51 = vmul.f32 0.0010283801, %v5202_v61 }
 0x14f   : > { %v5305_v25 = vpop.permute.xlu1 %1461  ;;  %2070 = vrot.lane.b32.xlu0 %v5022_v31, %s3840_s30  ;;  %v2606_v31 = vrot.slane %v5226_v0, 7  ;;  %v5329_v35 = vadd.f32 %v2392_v44, %v2389_v62  ;;  %6465 = vst [vmem:[#allocation92_spill] sm:$0xff] %v5335_v56  ;;  %v2496_v0 = vadd.f32 %v2494_v5, %v2491_v6 }
 0x150   : > { %6460 = vst [vmem:[#allocation87_spill] sm:$0xff] %v5305_v25  ;;  %v2620_v44 = vrot.slane %v2618_v51, 2  ;;  %v6529_v25 = vld [vmem:[#allocation65_spill] sm:$0xff] }
 0x151   : > { %2085 = vrot.lane.b32.xlu1 %v5290_v53, %s3841_s11  ;;  %v5316_v37 = vpop.permute.xlu0 %1459  ;;  %6464 = vst [vmem:[#allocation91_spill] sm:$0xff] %v5329_v35  ;;  %v5346_v13 = vmul.f32 0.007598758, %v5329_v35  ;;  %v2498_v28 = vadd.f32 %v2497_v33, %v2496_v0  ;;  %v5366_v4 = vmul.f32 0.036000773, %v5329_v35  ;;  %v6527_v53 = vld [vmem:[#allocation49_spill] sm:$0xff] }
 0x152   : > { %v5393_v33 = vmul.f32 0.10936069, %v5314_v21 }
 0x153   : > { %v5322_v26 = vpop.permute.xlu1 %1638  ;;  %2074 = vrot.lane.b32.xlu0 %v5042_v19, %s3840_s30  ;;  %v2608_v19 = vsel %vm647_vm4, %v2606_v31, %v2607_v11  ;;  %6466 = vst [vmem:[#allocation93_spill] sm:$0xff] %v5346_v13  ;;  %v2503_v22 = vadd.f32 %v2501_v10, %v2498_v28  ;;  %6467 = vst [vmem:[#allocation94_spill] sm:$0xff] %v5366_v4  ;;  %v5402_v10 = vmul.f32 0.10936069, %v5329_v35 }
 0x154   : > { %v2610_v16 = vadd.f32 %v2608_v19, %v2605_v46 }
 0x155   : > { %2089 = vrot.lane.b32.xlu1 %v5312_v1, %s3841_s11  ;;  %v5338_v40 = vpop.permute.xlu0 %1636  ;;  %v5368_v2 = vadd.f32 %v2506_v24, %v2503_v22  ;;  %6471 = vst [vmem:[#allocation98_spill] sm:$0xff] %v5402_v10  ;;  %v708_v24 = vadd.f32 %v4506_v3, %v4248_v17  ;;  %v1018_v22 = vadd.f32 %v4717_v29, %v4438_v39  ;;  %v6475_v39 = vld [vmem:[#allocation12_spill] sm:$0xff] }
 0x156   : > { %v2612_v43 = vadd.f32 %v2611_v27, %v2610_v16 }
 0x157   : > { %v5341_v41 = vpop.permute.xlu1 %1654  ;;  %2087 = vrot.lane.b32.xlu0 %v5327_v15, %s3841_s11  ;;  %v5377_v61 = vmul.f32 0.007598758, %v5368_v2  ;;  %v726_v51 = vadd.f32 %v4534_v14, %v708_v24  ;;  %v6478_v14 = vld [vmem:[#allocation6_spill] sm:$0xff] }
 0x158   : > { %v2617_v62 = vadd.f32 %v2615_v30, %v2612_v43  ;;  %v5422_v43 = vmul.f32 0.21300554, %v5314_v21  ;;  %v709_v30 = vadd.f32 %v4433_v47, %v4240_v9  ;;  %v1646_v9 = vadd.f32 %v5322_v26, %v5004_v20  ;;  %v6481_v20 = vld [vmem:[#allocation16_spill] sm:$0xff] }
 0x159   : > { %2286 = vrot.lane.b32.xlu1 %v5335_v56, %s3833_s23  ;;  %v5353_v54 = vpop.permute.xlu0 %1640  ;;  %6468 = vst [vmem:[#allocation95_spill] sm:$0xff] %v5377_v61  ;;  %v744_v29 = vadd.f32 %v6475_v39, %v726_v51  ;;  %v5442_v47 = vmul.f32 0.21300554, %v5329_v35  ;;  %v6484_v35 = vld [vmem:[#allocation9_spill] sm:$0xff] }
 0x15a   : > { %v5379_v5 = vadd.f32 %v2620_v44, %v2617_v62  ;;  %v6473_v62 = vld [vmem:[#allocation39_spill] sm:$0xff]  ;;  %v727_v24 = vadd.f32 %v6478_v14, %v709_v30  ;;  %v6528_v56 = vld [vmem:[#allocation29_spill] sm:$0xff] }
 0x15b   : > { %v5355_v48 = vpop.permute.xlu1 %1658  ;;  %v1036_v44 = vadd.f32 %v6473_v62, %v1018_v22  ;;  %6477 = vst [vmem:[#allocation39_spill] sm:$0xff] %v5442_v47  ;;  %v6480_v22 = vld [vmem:[#allocation45_spill] sm:$0xff] }
 0x15c   : > { %6469 = vst [vmem:[#allocation96_spill] sm:$0xff] %v5379_v5  ;;  %v5388_v11 = vmul.f32 0.007598758, %v5379_v5  ;;  %v5411_v16 = vmul.f32 0.036000773, %v5379_v5 }
 0x15d   : > { %2398 = vrot.lane.b32.xlu1 %v5346_v13, %s3833_s23  ;;  %v1657_v58 = vpop.permute.xlu0 %1656  ;;  %v6474_v13 = vld [vmem:[#allocation34_spill] sm:$0xff] }
 0x15e   : > { %6470 = vst [vmem:[#allocation97_spill] sm:$0xff] %v5388_v11  ;;  %6472 = vst [vmem:[#allocation99_spill] sm:$0xff] %v5411_v16  ;;  %v1332_v17 = vadd.f32 %v4996_v52, %v6474_v13  ;;  %v6479_v52 = vld [vmem:[#allocation15_spill] sm:$0xff] }
 0x15f   : > { %v1675_v45 = vpop.permute.xlu1 %1674  ;;  %v762_v13 = vadd.f32 %v6479_v52, %v744_v29 }
 0x161   : > { %2292 = vrot.lane.b32.xlu1 %v5358_v55, %s3835_s25  ;;  %v5370_v6 = vpop.permute.xlu0 %1672  ;;  %v780_v26 = vadd.f32 %v6481_v20, %v762_v13  ;;  %v6487_v13 = vld [vmem:[#allocation11_spill] sm:$0xff]  ;;  %v6491_v20 = vld [vmem:[#allocation20_spill] sm:$0xff] }
 0x163   : > { %v5372_v36 = vpop.permute.xlu1 %1690 }
 0x165   : > { %2404 = vrot.lane.b32.xlu1 %v5366_v4, %s3835_s25  ;;  %v5381_v60 = vpop.permute.xlu0 %1676 }
 0x167   : > { %v5383_v31 = vpop.permute.xlu1 %1694 }
 0x169   : > { %2512 = vrot.lane.b32.xlu1 %v5377_v61, %s3833_s23  ;;  %v1693_v57 = vpop.permute.xlu0 %1692  ;;  %v6483_v61 = vld [vmem:[#allocation2_spill] sm:$0xff] }
 0x16a   : > { %v707_v15 = vadd.f32 %v6484_v35, %v6483_v61 }
 0x16b   : > { %v1711_v0 = vpop.permute.xlu1 %1710 }
 0x16d   : > { %2626 = vrot.lane.b32.xlu1 %v5388_v11, %s3833_s23  ;;  %v5395_v46 = vpop.permute.xlu0 %1708 }
 0x16f   : > { %v5397_v19 = vpop.permute.xlu1 %1720 }
 0x171   : > { %2298 = vrot.lane.b32.xlu1 %v5393_v33, %s3832_s22  ;;  %v5404_v38 = vpop.permute.xlu0 %1712 }
 0x173   : > { %v5406_v28 = vpop.permute.xlu1 %1724 }
 0x175   : > { %2410 = vrot.lane.b32.xlu1 %v5402_v10, %s3832_s22  ;;  %v1723_v27 = vpop.permute.xlu0 %1722  ;;  %v1350_v10 = vadd.f32 %v5053_v32, %v1332_v17  ;;  %v1664_v32 = vadd.f32 %v1657_v58, %v1646_v9  ;;  %v6482_v17 = vld [vmem:[#allocation46_spill] sm:$0xff] }
 0x177   : > { %v5413_v50 = vpop.permute.xlu1 %1734  ;;  %v1682_v14 = vadd.f32 %v1675_v45, %v1664_v32  ;;  %v6489_v45 = vld [vmem:[#allocation66_spill] sm:$0xff] }
 0x179   : > { %2632 = vrot.lane.b32.xlu1 %v5411_v16, %s3835_s25  ;;  %v5428_v11 = vpop.permute.xlu0 %1732  ;;  %v6476_v16 = vld [vmem:[#allocation40_spill] sm:$0xff]  ;;  %v1700_v61 = vadd.f32 %v1693_v57, %v1682_v14 }
 0x17a   : > { %v1054_v4 = vadd.f32 %v6476_v16, %v1036_v44  ;;  %v1368_v16 = vadd.f32 %v5057_v59, %v1350_v10  ;;  %v6485_v59 = vld [vmem:[#allocation5_spill] sm:$0xff]  ;;  %v6486_v10 = vld [vmem:[#allocation19_spill] sm:$0xff]  ;;  %v6496_v57 = vld [vmem:[#allocation8_spill] sm:$0xff] }
 0x17b   : > { %v5432_v3 = vpop.permute.xlu1 %1744  ;;  %v745_v58 = vadd.f32 %v6485_v59, %v727_v24  ;;  %v792_v29 = vadd.f32 %v6486_v10, %v780_v26  ;;  %v6493_v24 = vld [vmem:[#allocation13_spill] sm:$0xff]  ;;  %v6494_v26 = vld [vmem:[#allocation80_spill] sm:$0xff] }
 0x17c   : > { %v1072_v62 = vadd.f32 %v6480_v22, %v1054_v4  ;;  %v1386_v30 = vadd.f32 %v5127_v49, %v1368_v16  ;;  %v5460_v4 = vmul.f32 0.10936069, %v5368_v2  ;;  %v725_v22 = vadd.f32 %v6487_v13, %v707_v15  ;;  %v6490_v16 = vld [vmem:[#allocation70_spill] sm:$0xff]  ;;  %v6498_v13 = vld [vmem:[#allocation3_spill] sm:$0xff] }
 0x17d   : > { %2304 = vrot.lane.b32.xlu1 %v5422_v43, %s3836_s26  ;;  %v5447_v51 = vpop.permute.xlu0 %1736  ;;  %v5469_v32 = vmul.f32 %v6490_v16, %v6489_v45  ;;  %v5478_v15 = vmul.f32 0.10936069, %v5379_v5  ;;  %v6500_v45 = vld [vmem:[#allocation56_spill] sm:$0xff] }
 0x17e   : > { %v1090_v39 = vadd.f32 %v6482_v17, %v1072_v62  ;;  %v6488_v62 = vld [vmem:[#allocation75_spill] sm:$0xff]  ;;  %v804_v17 = vadd.f32 %v6491_v20, %v792_v29  ;;  %v743_v59 = vadd.f32 %v6493_v24, %v725_v22  ;;  %v6501_v22 = vld [vmem:[#allocation14_spill] sm:$0xff] }
 0x17f   : > { %v5450_v44 = vpop.permute.xlu1 %1748  ;;  %v1404_v35 = vadd.f32 %v6488_v62, %v1386_v30  ;;  %6495 = vst [vmem:[#allocation34_spill] sm:$0xff] %v5478_v15  ;;  %v6497_v30 = vld [vmem:[#allocation25_spill] sm:$0xff]  ;;  %v6499_v62 = vld [vmem:[#allocation35_spill] sm:$0xff]  ;;  %v2678_v24 = vmul.f32 0.007598758, %v5469_v32 }
 0x180   : > { %v1102_v9 = vadd.f32 %v4911_v18, %v1090_v39  ;;  %v1718_v18 = vadd.f32 %v1711_v0, %v1700_v61  ;;  %v763_v39 = vadd.f32 %v6496_v57, %v745_v58  ;;  %v816_v14 = vadd.f32 %v6497_v30, %v804_v17  ;;  %v6502_v0 = vld [vmem:[#allocation81_spill] sm:$0xff]  ;;  %v6504_v57 = vld [vmem:[#allocation36_spill] sm:$0xff] }
 0x181   : > { %2416 = vrot.lane.b32.xlu1 %v5442_v47, %s3836_s26  ;;  %v1747_v52 = vpop.permute.xlu0 %1746  ;;  %v6492_v47 = vld [vmem:[#allocation51_spill] sm:$0xff]  ;;  %v1416_v10 = vadd.f32 %v6494_v26, %v1404_v35  ;;  %v1017_v29 = vadd.f32 %v6499_v62, %v6498_v13  ;;  %v761_v35 = vadd.f32 %v6501_v22, %v743_v59  ;;  %v6503_v26 = vld [vmem:[#allocation26_spill] sm:$0xff]  ;;  %v6505_v30 = vld [vmem:[#allocation57_spill] sm:$0xff] }
 0x182   : > { %v1114_v1 = vadd.f32 %v6492_v47, %v1102_v9  ;;  %v1730_v16 = vadd.f32 %v1723_v27, %v1718_v18  ;;  %v828_v58 = vadd.f32 %v6503_v26, %v816_v14  ;;  %v6506_v13 = vld [vmem:[#allocation17_spill] sm:$0xff]  ;;  %v2680_v26 = vrot.slane %v2678_v24, 1  ;;  %v6514_v24 = vld [vmem:[#allocation7_spill] sm:$0xff] }
 0x183   : > { %v1759_v49 = vpop.permute.xlu1 %1758  ;;  %v1428_v61 = vadd.f32 %v6502_v0, %v1416_v10  ;;  %v1035_v17 = vadd.f32 %v6504_v57, %v1017_v29  ;;  %v779_v62 = vadd.f32 %v6506_v13, %v761_v35  ;;  %v2308_v10 = vmul.f32 0.26601171, %v5314_v21  ;;  %v6507_v18 = vld [vmem:[#allocation33_spill] sm:$0xff]  ;;  %v6508_v29 = vld [vmem:[#allocation4_spill] sm:$0xff] }
 0x184   : > { %v1126_v47 = vadd.f32 %v6500_v45, %v1114_v1  ;;  %v5497_v1 = vmul.f32 %v5093_v12, %v5047_v7  ;;  %v1742_v27 = vadd.f32 %v5413_v50, %v1730_v16  ;;  %v5506_v14 = vadd.f32 %v6507_v18, %v828_v58  ;;  %v6509_v45 = vld [vmem:[#allocation37_spill] sm:$0xff]  ;;  %v6511_v12 = vld [vmem:[#allocation64_spill] sm:$0xff]  ;;  %v6512_v58 = vld [vmem:[#allocation38_spill] sm:$0xff] }
 0x185   : > { %2524 = vrot.lane.b32.xlu1 %v5460_v4, %s3832_s22  ;;  %v5485_v9 = vpop.permute.xlu0 %1756  ;;  %v1440_v59 = vadd.f32 %v5266_v23, %v1428_v61  ;;  %v6510_v22 = vld [vmem:[#allocation41_spill] sm:$0xff]  ;;  %v2677_v16 = vmul.f32 0.0010283801, %v5469_v32  ;;  %v5523_v13 = vmul.f32 0.10936069, %v5469_v32 }
 0x186   : > { %v1138_v5 = vadd.f32 %v6505_v30, %v1126_v47  ;;  %v1019_v47 = vadd.f32 %v6509_v45, %v6508_v29  ;;  %v1053_v7 = vadd.f32 %v6510_v22, %v1035_v17  ;;  %v1754_v50 = vadd.f32 %v1747_v52, %v1742_v27  ;;  %v6513_v17 = vld [vmem:[#allocation42_spill] sm:$0xff] }
 0x187   : > { %v5489_v20 = vpop.permute.xlu1 %1771  ;;  %v1452_v23 = vadd.f32 %v5272_v63, %v1440_v59  ;;  %v2683_v30 = vmul.f32 0.036000773, %v5469_v32  ;;  %v5532_v59 = vmul.f32 0.21300554, %v5368_v2  ;;  %v781_v27 = vadd.f32 %v6514_v24, %v763_v39  ;;  %v6515_v29 = vld [vmem:[#allocation18_spill] sm:$0xff] }
 0x188   : > { %v5512_v0 = vadd.f32 %v6511_v12, %v1138_v5  ;;  %v1037_v57 = vadd.f32 %v6512_v58, %v1019_v47  ;;  %v5526_v5 = vmul.f32 0.10936069, %v5497_v1  ;;  %v1071_v18 = vadd.f32 %v6513_v17, %v1053_v7  ;;  %v6516_v12 = vld [vmem:[#allocation43_spill] sm:$0xff] }
 0x189   : > { %2638 = vrot.lane.b32.xlu1 %v5478_v15, %s3832_s22  ;;  %v5514_v35 = vpop.permute.xlu0 %1760  ;;  %v1467_v63 = vadd.f32 %v5316_v37, %v1452_v23  ;;  %v1766_v52 = vadd.f32 %v1759_v49, %v1754_v50  ;;  %v791_v45 = vadd.f32 %v6515_v29, %v779_v62  ;;  %v2098_v47 = vmul.f32 %v5506_v14, %v5506_v14  ;;  %v6517_v15 = vld [vmem:[#allocation47_spill] sm:$0xff]  ;;  %v6520_v29 = vld [vmem:[#allocation44_spill] sm:$0xff] }
 0x18a   : > { %v1055_v58 = vadd.f32 %v6516_v12, %v1037_v57  ;;  %v1089_v7 = vadd.f32 %v6517_v15, %v1071_v18  ;;  %v2104_v37 = vmul.f32 %v5512_v0, %v5512_v0  ;;  %v2685_v23 = vrot.slane %v2683_v30, 2  ;;  %v6519_v18 = vld [vmem:[#allocation10_spill] sm:$0xff]  ;;  %v6522_v30 = vld [vmem:[#allocation21_spill] sm:$0xff]  ;;  %v6523_v12 = vld [vmem:[#allocation48_spill] sm:$0xff] }
 0x18b   : > { %v5517_v61 = vpop.permute.xlu1 %1775  ;;  %v2692_v39 = vrot.slane %v5523_v13, 3  ;;  %v2693_v62 = vrot.slane %v5526_v5, 3  ;;  %v2101_v50 = vsub.f32 %v1467_v63, %v2098_v47  ;;  %v5549_v57 = vmul.f32 0.21300554, %v5469_v32  ;;  %v6524_v47 = vld [vmem:[#allocation60_spill] sm:$0xff] }
 0x18c   : > { %v5552_v15 = vmul.f32 0.21300554, %v5497_v1  ;;  %v1101_v63 = vadd.f32 %v6523_v12, %v1089_v7  ;;  %v6535_v12 = vld [vmem:[#allocation67_spill] sm:$0xff] }
 0x18d   : > { %2310 = vrot.lane.b32.xlu1 %v2308_v10, %s3834_s24  ;;  %v1774_v22 = vpop.permute.xlu0 %1773  ;;  %v2682_v10 = vadd.f32 %v2680_v26, %v2677_v16  ;;  %v1073_v16 = vadd.f32 %v6520_v29, %v1055_v58  ;;  %v2534_v58 = vmul.f32 0.26601171, %v5368_v2 }
 0x18e   : > { %v1781_v17 = vadd.f32 %v1774_v22, %v1766_v52  ;;  %v793_v52 = vadd.f32 %v6519_v18, %v781_v27  ;;  %v803_v22 = vadd.f32 %v6522_v30, %v791_v45  ;;  %v1331_v27 = vadd.f32 %v6529_v25, %v6528_v56 }
 0x18f   : > { %v5542_v49 = vpop.permute.xlu1 %1952  ;;  %v1091_v21 = vadd.f32 %v6527_v53, %v1073_v16  ;;  %v2687_v18 = vadd.f32 %v2685_v23, %v2682_v10  ;;  %v2694_v45 = vsel %vm575_vm0, %v2692_v39, %v2693_v62  ;;  %v2702_v7 = vrot.slane %v5552_v15, 4  ;;  %v6531_v53 = vld [vmem:[#allocation52_spill] sm:$0xff]  ;;  %v6534_v23 = vld [vmem:[#allocation50_spill] sm:$0xff] }
 0x190   : > { %6518 = vst [vmem:[#allocation12_spill] sm:$0xff] %v5542_v49  ;;  %v2107_v24 = vsub.f32 %v1781_v17, %v2104_v37  ;;  %v1645_v17 = vadd.f32 %v5338_v40, %v6524_v47  ;;  %v2701_v40 = vrot.slane %v5549_v57, 4  ;;  %v1113_v16 = vadd.f32 %v6531_v53, %v1101_v63  ;;  %v6538_v53 = vld [vmem:[#allocation63_spill] sm:$0xff] }
 0x191   : > { %2530 = vrot.lane.b32.xlu1 %v5532_v59, %s3836_s26  ;;  %v5556_v26 = vpop.permute.xlu0 %1950  ;;  %v2706_v25 = vmul.f32 0.26601171, %v5469_v32  ;;  %v2707_v56 = vmul.f32 0.26601171, %v5497_v1  ;;  %v1349_v39 = vadd.f32 %v6535_v12, %v1331_v27  ;;  %v2696_v32 = vadd.f32 %v2694_v45, %v2687_v18  ;;  %v6541_v27 = vld [vmem:[#allocation32_spill] sm:$0xff]  ;;  %v6543_v18 = vld [vmem:[#allocation27_spill] sm:$0xff] }
 0x192   : > { %6521 = vst [vmem:[#allocation40_spill] sm:$0xff] %v5556_v26  ;;  %v5562_v37 = vadd.f32 %v2107_v24, %v2101_v50  ;;  %v1663_v29 = vadd.f32 %v5341_v41, %v1645_v17  ;;  %v6530_v50 = vld [vmem:[#allocation23_spill] sm:$0xff]  ;;  %v6533_v41 = vld [vmem:[#allocation22_spill] sm:$0xff]  ;;  %v6536_v17 = vld [vmem:[#allocation24_spill] sm:$0xff] }
 0x193   : > { %v5564_v49 = vpop.permute.xlu1 %1968  ;;  %v805_v24 = vadd.f32 %v6530_v50, %v793_v52  ;;  %v815_v10 = vadd.f32 %v6533_v41, %v803_v22  ;;  %v6537_v50 = vld [vmem:[#allocation53_spill] sm:$0xff]  ;;  %v6540_v26 = vld [vmem:[#allocation71_spill] sm:$0xff] }
 0x194   : > { %6525 = vst [vmem:[#allocation6_spill] sm:$0xff] %v5562_v37  ;;  %6526 = vst [vmem:[#allocation15_spill] sm:$0xff] %v5564_v49  ;;  %v1681_v62 = vadd.f32 %v5370_v6, %v1663_v29  ;;  %v1125_v63 = vadd.f32 %v6537_v50, %v1113_v16  ;;  %v1647_v37 = vadd.f32 %v5353_v54, %v6538_v53  ;;  %v6542_v29 = vld [vmem:[#allocation68_spill] sm:$0xff]  ;;  %v2711_v54 = vrot.slane %v2707_v56, 5  ;;  %v6550_v53 = vld [vmem:[#allocation73_spill] sm:$0xff] }
 0x195   : > { %2314 = vrot.lane.b32.xlu1 %v5422_v43, %s3837_s27  ;;  %v5578_v30 = vpop.permute.xlu0 %1954  ;;  %v1103_v43 = vadd.f32 %v6534_v23, %v1091_v21  ;;  %v817_v52 = vadd.f32 %v6536_v17, %v805_v24  ;;  %v1367_v22 = vadd.f32 %v6540_v26, %v1349_v39  ;;  %v2703_v6 = vsel %vm597_vm1, %v2701_v40, %v2702_v7  ;;  %v6545_v26 = vld [vmem:[#allocation72_spill] sm:$0xff]  ;;  %v6546_v40 = vld [vmem:[#allocation58_spill] sm:$0xff]  ;;  %v6547_v39 = vld [vmem:[#allocation69_spill] sm:$0xff] }
 0x196   : > { %6532 = vst [vmem:[#allocation45_spill] sm:$0xff] %v5578_v30  ;;  %v6539_v30 = vld [vmem:[#allocation54_spill] sm:$0xff]  ;;  %v1699_v21 = vadd.f32 %v5372_v36, %v1681_v62  ;;  %v1333_v41 = vadd.f32 %v6542_v29, %v6541_v27  ;;  %v1665_v24 = vadd.f32 %v5355_v48, %v1647_v37  ;;  %v2710_v23 = vrot.slane %v2706_v25, 5  ;;  %v6548_v17 = vld [vmem:[#allocation76_spill] sm:$0xff] }
 0x197   : > { %v5586_v47 = vpop.permute.xlu1 %1972  ;;  %v1115_v49 = vadd.f32 %v6539_v30, %v1103_v43  ;;  %v827_v45 = vadd.f32 %v6543_v18, %v815_v10  ;;  %v6544_v30 = vld [vmem:[#allocation55_spill] sm:$0xff]  ;;  %v1385_v12 = vadd.f32 %v6545_v26, %v1367_v22  ;;  %v1137_v7 = vadd.f32 %v6546_v40, %v1125_v63  ;;  %v6549_v10 = vld [vmem:[#allocation61_spill] sm:$0xff] }
 0x198   : > { %v1717_v36 = vadd.f32 %v5395_v46, %v1699_v21  ;;  %v1351_v62 = vadd.f32 %v6547_v39, %v1333_v41  ;;  %v1683_v48 = vadd.f32 %v5381_v60, %v1665_v24  ;;  %v2705_v37 = vadd.f32 %v2703_v6, %v2696_v32  ;;  %v6551_v32 = vld [vmem:[#allocation28_spill] sm:$0xff]  ;;  %v6554_v41 = vld [vmem:[#allocation30_spill] sm:$0xff] }
 0x199   : > { %2536 = vrot.lane.b32.xlu1 %v2534_v58, %s3834_s24  ;;  %v5600_v16 = vpop.permute.xlu0 %1970  ;;  %v1127_v43 = vadd.f32 %v6544_v30, %v1115_v49  ;;  %v1403_v25 = vadd.f32 %v6548_v17, %v1385_v12  ;;  %v2715_v49 = vrot.slane %v5549_v57, 6  ;;  %v2716_v46 = vrot.slane %v5552_v15, 6  ;;  %v6556_v30 = vld [vmem:[#allocation74_spill] sm:$0xff] }
 0x19a   : > { %v1729_v56 = vadd.f32 %v5397_v19, %v1717_v36  ;;  %v1369_v63 = vadd.f32 %v6550_v53, %v1351_v62  ;;  %v1701_v22 = vadd.f32 %v5383_v31, %v1683_v48  ;;  %v2712_v60 = vsel %vm619_vm2, %v2710_v23, %v2711_v54  ;;  %v6552_v19 = vld [vmem:[#allocation59_spill] sm:$0xff]  ;;  %v6555_v31 = vld [vmem:[#allocation62_spill] sm:$0xff] }
 0x19b   : > { %v5606_v58 = vpop.permute.xlu1 %1988  ;;  %v1139_v50 = vadd.f32 %v6549_v10, %v1127_v43  ;;  %v5624_v6 = vadd.f32 %v6551_v32, %v827_v45  ;;  %v5627_v27 = vadd.f32 %v6552_v19, %v1137_v7  ;;  %v829_v24 = vadd.f32 %v6554_v41, %v817_v52  ;;  %v6557_v45 = vld [vmem:[#allocation82_spill] sm:$0xff]  ;;  %v6559_v62 = vld [vmem:[#allocation31_spill] sm:$0xff] }
 0x19c   : > { %v1741_v15 = vadd.f32 %v5428_v11, %v1729_v56  ;;  %v1387_v23 = vadd.f32 %v6556_v30, %v1369_v63  ;;  %v1719_v54 = vadd.f32 %v5404_v38, %v1701_v22  ;;  %v2714_v11 = vadd.f32 %v2712_v60, %v2705_v37  ;;  %v6558_v36 = vld [vmem:[#allocation78_spill] sm:$0xff]  ;;  %v6560_v48 = vld [vmem:[#allocation83_spill] sm:$0xff] }
 0x19d   : > { %2318 = vrot.lane.b32.xlu1 %v5393_v33, %s3838_s28  ;;  %v5620_v21 = vpop.permute.xlu0 %1986  ;;  %v6553_v33 = vld [vmem:[#allocation77_spill] sm:$0xff]  ;;  %v5635_v18 = vadd.f32 %v6555_v31, %v1139_v50  ;;  %v2717_v12 = vsel %vm633_vm3, %v2715_v49, %v2716_v46  ;;  %v2720_v39 = vrot.slane %v5523_v13, 7  ;;  %v2721_v38 = vrot.slane %v5526_v5, 7  ;;  %v6561_v13 = vld [vmem:[#allocation79_spill] sm:$0xff] }
 0x19e   : > { %v1415_v57 = vadd.f32 %v6553_v33, %v1403_v25  ;;  %v1753_v26 = vadd.f32 %v5432_v3, %v1741_v15  ;;  %v1405_v40 = vadd.f32 %v6558_v36, %v1387_v23  ;;  %v1731_v52 = vadd.f32 %v5406_v28, %v1719_v54 }
 0x19f   : > { %v5631_v29 = vpop.permute.xlu1 %2004  ;;  %v5652_v3 = vadd.f32 %v6559_v62, %v829_v24  ;;  %v5662_v28 = vadd.f32 1.0, %v5624_v6  ;;  %v2097_v46 = vmul.f32 %v5624_v6, %v5624_v6  ;;  %v2103_v32 = vmul.f32 %v5627_v27, %v5627_v27  ;;  %v2842_v24 = vld [vmem:[%s5677_s16] sm:$0xff] }
 0x1a0   : > { %v1427_v43 = vadd.f32 %v6557_v45, %v1415_v57  ;;  %v1765_v17 = vadd.f32 %v5485_v9, %v1753_v26  ;;  %v1417_v56 = vadd.f32 %v6561_v13, %v1405_v40  ;;  %v1743_v5 = vadd.f32 %v5447_v51, %v1731_v52  ;;  %v6563_v57 = vld [vmem:[#allocation85_spill] sm:$0xff] }
 0x1a1   : > { %2540 = vrot.lane.b32.xlu1 %v5532_v59, %s3837_s27  ;;  %v5646_v7 = vpop.permute.xlu0 %1990  ;;  %v5655_v59 = vadd.f32 1.0, %v5627_v27  ;;  %v2719_v9 = vadd.f32 %v2717_v12, %v2714_v11  ;;  %v5680_v51 = vadd.f32 1.0, %v5635_v18  ;;  %v5700_v33 = vadd.f32 1.0, %v5512_v0 }
 0x1a2   : > { %v1439_v37 = vadd.f32 %v6560_v48, %v1427_v43  ;;  %v1780_v10 = vadd.f32 %v5489_v20, %v1765_v17  ;;  %v1755_v53 = vadd.f32 %v5450_v44, %v1743_v5  ;;  %v2722_v20 = vsel %vm647_vm4, %v2720_v39, %v2721_v38  ;;  %v6564_v39 = vld [vmem:[#allocation87_spill] sm:$0xff]  ;;  %v6565_v48 = vld [vmem:[#allocation92_spill] sm:$0xff] }
 0x1a3   : > { %v5659_v25 = vpop.permute.xlu1 %2008  ;;  %v2124_v22 = vmul.f32 %v5655_v59, %v5655_v59  ;;  %v2121_v44 = vmul.f32 %v5662_v28, %v5662_v28  ;;  %v2725_v30 = vmul.f32 0.036000773, %v5497_v1  ;;  %v2727_v23 = vmul.f32 0.007598758, %v5497_v1 }
 0x1a4   : > { %v1451_v49 = vadd.f32 %v5283_v42, %v1439_v37  ;;  %v6562_v42 = vld [vmem:[#allocation84_spill] sm:$0xff]  ;;  %v1767_v41 = vadd.f32 %v5514_v35, %v1755_v53  ;;  %v2106_v31 = vsub.f32 %v1780_v10, %v2103_v32  ;;  %v5710_v54 = vadd.f32 1.0, %v5506_v14 }
 0x1a5   : > { %2322 = vrot.lane.b32.xlu1 %v5358_v55, %s3839_s29  ;;  %v1429_v50 = vadd.f32 %v6562_v42, %v1417_v56  ;;  %v5684_v63 = vpop.permute.xlu0 %2006  ;;  %v5688_v55 = vadd.f32 1.0, %v5652_v3  ;;  %v2126_v45 = vmul.f32 %v5680_v51, %v5680_v51  ;;  %v2166_v11 = vadd.f32 %v2124_v22, %v2121_v44  ;;  %v6566_v44 = vld [vmem:[#allocation89_spill] sm:$0xff] }
 0x1a6   : > { %v1466_v60 = vadd.f32 %v5287_v34, %v1451_v49  ;;  %v2724_v34 = vadd.f32 %v2722_v20, %v2719_v9  ;;  %v1782_v35 = vadd.f32 %v5517_v61, %v1767_v41  ;;  %v5722_v40 = vmul.f32 0.036351766, %v2842_v24 }
 0x1a7   : > { %v5695_v19 = vpop.permute.xlu1 %2024  ;;  %v1441_v15 = vadd.f32 %v6563_v57, %v1429_v50  ;;  %v2125_v52 = vmul.f32 %v5700_v33, %v5700_v33  ;;  %v5730_v61 = vmul.f32 0.036000773, %v5368_v2  ;;  %v2729_v17 = vrot.slane %v2727_v23, 1 }
 0x1a8   : > { %v2100_v12 = vsub.f32 %v1466_v60, %v2097_v46  ;;  %v2726_v37 = vadd.f32 %v2725_v30, %v2724_v34  ;;  %v2732_v13 = vmul.f32 0.0010283801, %v5497_v1  ;;  %v2122_v56 = vmul.f32 %v5710_v54, %v5710_v54 }
 0x1a9   : > { %2544 = vrot.lane.b32.xlu1 %v5460_v4, %s3838_s28  ;;  %v1453_v43 = vadd.f32 %v5299_v8, %v1441_v15  ;;  %v5716_v26 = vpop.permute.xlu0 %2022  ;;  %v2123_v4 = vmul.f32 %v5688_v55, %v5688_v55  ;;  %v2105_v8 = vmul.f32 %v5635_v18, %v5635_v18  ;;  %v2099_v49 = vmul.f32 %v5652_v3, %v5652_v3 }
 0x1aa   : > { %v2136_v62 = vadd.f32 %v2106_v31, %v2100_v12  ;;  %v2844_v42 = vmul.f32 0.0076728435, %v2842_v24  ;;  %v2847_v50 = vrot.slane %v5722_v40, 1  ;;  %v5744_v53 = vmul.f32 0.11042692, %v2842_v24 }
 0x1ab   : > { %v5720_v36 = vpop.permute.xlu1 %2034  ;;  %v1468_v38 = vadd.f32 %v6564_v39, %v1453_v43  ;;  %v2168_v5 = vadd.f32 %v2126_v45, %v2123_v4  ;;  %v2108_v46 = vsub.f32 %v1782_v35, %v2105_v8  ;;  %v5746_v20 = vadd.f32 0.0004, %v2166_v11  ;;  %v6567_v45 = vld [vmem:[#allocation86_spill] sm:$0xff]  ;;  %v6568_v43 = vld [vmem:[#allocation40_spill] sm:$0xff] }
 0x1ac   : > { %v2167_v1 = vadd.f32 %v2125_v52, %v2122_v56  ;;  %v5748_v60 = vmul.f32 %v2842_v24, %v2842_v24  ;;  %v5750_v32 = vadd.f32 0.0036, %v2136_v62  ;;  %v5755_v57 = vmul.f32 0.0010283801, %v6566_v44  ;;  %v6570_v56 = vld [vmem:[#allocation88_spill] sm:$0xff] }
 0x1ad   : > { %2326 = vrot.lane.b32.xlu1 %v6565_v48, %s3840_s30  ;;  %v5739_v10 = vpop.permute.xlu0 %2026  ;;  %v2102_v22 = vsub.f32 %v1468_v38, %v2099_v49  ;;  %v2731_v15 = vadd.f32 %v2729_v17, %v2726_v37  ;;  %v2734_v41 = vrot.slane %v2732_v13, 2  ;;  %v5757_v31 = vadd.f32 0.0004, %v2168_v5  ;;  %v6569_v38 = vld [vmem:[#allocation15_spill] sm:$0xff]  ;;  %v6571_v5 = vld [vmem:[#allocation45_spill] sm:$0xff] }
 0x1ae   : > { %v5761_v23 = vmul.f32 0.21508227, %v2842_v24  ;;  %v1959_v35 = vadd.f32 %v6568_v43, %v6567_v45  ;;  %v2849_v11 = vadd.f32 %v2847_v50, %v2844_v42  ;;  %v2852_v12 = vrot.slane %v5744_v53, 2 }
 0x1af   : > { %v5741_v9 = vpop.permute.xlu1 %2038  ;;  %v2138_v34 = vadd.f32 %v2108_v46, %v2102_v22  ;;  %3787 = vrcp.f32 %v5746_v20  ;;  %v5769_v52 = vadd.f32 0.0004, %v2167_v1  ;;  %v5772_v39 = vmul.f32 0.036351766, %v5748_v60  ;;  %v6572_v22 = vld [vmem:[#allocation6_spill] sm:$0xff] }
 0x1b0   : > { %3789 = vrcp.f32 %v5750_v32  ;;  %v1977_v8 = vadd.f32 %v6569_v38, %v1959_v35  ;;  %v5778_v62 = vadd.f32 %v2734_v41, %v2731_v15  ;;  %v2857_v17 = vrot.slane %v5761_v23, 3  ;;  %v6575_v35 = vld [vmem:[#allocation95_spill] sm:$0xff] }
 0x1b1   : > { %2548 = vrot.lane.b32.xlu1 %v5730_v61, %s3839_s29  ;;  %v5759_v30 = vpop.permute.xlu0 %2036  ;;  %3791 = vrcp.f32 %v5757_v31  ;;  %v5781_v48 = vadd.f32 0.0036, %v2138_v34  ;;  %v2860_v13 = vmul.f32 0.26860526, %v2842_v24  ;;  %v1961_v49 = vadd.f32 %v6571_v5, %v6570_v56  ;;  %v6573_v24 = vld [vmem:[#allocation90_spill] sm:$0xff]  ;;  %v6574_v34 = vld [vmem:[#allocation12_spill] sm:$0xff] }
 0x1b2   : > { %v1995_v46 = vadd.f32 %v5620_v21, %v1977_v8  ;;  %v2854_v50 = vadd.f32 %v2852_v12, %v2849_v11  ;;  %v2979_v1 = vmul.f32 0.0076728435, %v5748_v60  ;;  %3793 = vrcp.f32 %v5769_v52 }
 0x1b3   : > { %v5765_v4 = vpop.permute.xlu1 %2048  ;;  %v5790_v44 = vadd.f32 0.0036, %v6572_v22  ;;  %v2982_v15 = vrot.slane %v5772_v39, 1  ;;  %v5794_v41 = vmul.f32 0.11042692, %v5748_v60  ;;  %v1960_v45 = vadd.f32 %v6574_v34, %v6573_v24 }
 0x1b4   : > { %v1979_v43 = vadd.f32 %v5586_v47, %v1961_v49  ;;  %v2013_v21 = vadd.f32 %v5631_v29, %v1995_v46  ;;  %v5803_v11 = vmul.f32 0.007598758, %v5778_v62  ;;  %v2127_v12 = vmul.f32 %v5655_v59, %v5662_v28 }
 0x1b5   : > { %2331 = vrot.lane.b32.xlu1 %v5755_v57, %s3841_s11  ;;  %v2047_v37 = vpop.permute.xlu0 %2046  ;;  %3795 = vrcp.f32 %v5781_v48  ;;  %v2862_v8 = vrot.slane %v2860_v13, 4  ;;  %v1978_v56 = vadd.f32 %v5600_v16, %v1960_v45  ;;  %v2859_v49 = vadd.f32 %v2857_v17, %v2854_v50 }
 0x1b6   : > { %v1997_v5 = vadd.f32 %v5646_v7, %v1979_v43  ;;  %v2031_v47 = vadd.f32 %v5716_v26, %v2013_v21  ;;  %3797 = vrcp.f32 %v5790_v44  ;;  %v2984_v46 = vadd.f32 %v2982_v15, %v2979_v1  ;;  %v6576_v7 = vld [vmem:[#allocation96_spill] sm:$0xff] }
 0x1b7   : > { %v2059_v42 = vpop.permute.xlu1 %2058  ;;  %v2987_v22 = vrot.slane %v5794_v41, 2  ;;  %v5814_v24 = vmul.f32 0.21508227, %v5748_v60  ;;  %v1996_v59 = vadd.f32 %v5606_v58, %v1978_v56  ;;  %v5822_v26 = vmul.f32 0.0010283801, %v6576_v7 }
 0x1b8   : > { %v2015_v28 = vadd.f32 %v5659_v25, %v1997_v5  ;;  %v2043_v16 = vadd.f32 %v5720_v36, %v2031_v47  ;;  %v2157_v13 = vmul.f32 2.0, %v2127_v12  ;;  %v2109_v1 = vmul.f32 %v5627_v27, %v5624_v6 }
 0x1b9   : > { %2552 = vrot.lane.b32.xlu1 %v6575_v35, %s3840_s30  ;;  %v2051_v38 = vpop.permute.xlu0 %2050  ;;  %v5824_v17 = vpop.eup %3787  ;;  %v2014_v58 = vadd.f32 %v5684_v63, %v1996_v59  ;;  %v2865_v45 = vrot.slane %v5761_v23, 5  ;;  %v2864_v21 = vadd.f32 %v2862_v8, %v2859_v49  ;;  %v2989_v35 = vadd.f32 %v2987_v22, %v2984_v46 }
 0x1ba   : > { %v3790_v15 = vpop.eup %3789  ;;  %v2033_v25 = vadd.f32 %v5739_v10, %v2015_v28  ;;  %v2055_v34 = vadd.f32 %v2047_v37, %v2043_v16  ;;  %v2992_v56 = vrot.slane %v5814_v24, 3  ;;  %v2995_v12 = vmul.f32 0.26860526, %v5748_v60 }
 0x1bb   : > { %v2063_v29 = vpop.permute.xlu1 %2062  ;;  %v5831_v43 = vpop.eup %3791  ;;  %v2032_v5 = vadd.f32 %v5695_v19, %v2014_v58  ;;  %v2750_v63 = vmul.f32 0.10936069, %v5778_v62  ;;  %v2128_v23 = vmul.f32 %v5700_v33, %v5710_v54  ;;  %v2129_v37 = vmul.f32 %v5680_v51, %v5688_v55 }
 0x1bc   : > { %v2045_v6 = vadd.f32 %v5741_v9, %v2033_v25  ;;  %v2067_v27 = vadd.f32 %v2059_v42, %v2055_v34  ;;  %v5840_v10 = vpop.eup %3793  ;;  %v2145_v60 = vmul.f32 %v3790_v15, %v5750_v32  ;;  %v2111_v19 = vmul.f32 %v5635_v18, %v5652_v3 }
 0x1bd   : > { %2740 = vrot.lane.b32.xlu1 %v5803_v11, %s3833_s23  ;;  %v2061_v50 = vpop.permute.xlu0 %2060  ;;  %v5849_v9 = vadd.f32 0.0004, %v2157_v13  ;;  %v2044_v42 = vadd.f32 %v5759_v30, %v2032_v5  ;;  %v2867_v59 = vadd.f32 %v2865_v45, %v2864_v21  ;;  %v2868_v33 = vrot.slane %v5744_v53, 6 }
 0x1be   : > { %v2057_v47 = vadd.f32 %v2051_v38, %v2045_v6  ;;  %v2994_v54 = vadd.f32 %v2992_v56, %v2989_v35  ;;  %v2997_v28 = vrot.slane %v2995_v12, 4  ;;  %v2762_v18 = vmul.f32 0.26601171, %v5778_v62 }
 0x1bf   : > { %v2073_v36 = vpop.permute.xlu1 %2072  ;;  %v3796_v22 = vpop.eup %3795  ;;  %v2056_v51 = vadd.f32 %v5765_v4, %v2044_v42  ;;  %v2158_v16 = vmul.f32 2.0, %v2128_v23  ;;  %v2159_v30 = vmul.f32 2.0, %v2129_v37  ;;  %v2148_v38 = vsub.f32 2.0, %v2145_v60 }
 0x1c0   : > { %v2069_v55 = vadd.f32 %v2063_v29, %v2057_v47  ;;  %v3798_v3 = vpop.eup %3797  ;;  %v2110_v58 = vmul.f32 %v5512_v0, %v5506_v14  ;;  %v2147_v53 = vmul.f32 %v3796_v22, %v5781_v48  ;;  %v2870_v29 = vadd.f32 %v2868_v33, %v2867_v59 }
 0x1c1   : > { %2671 = vrot.lane.b32.xlu1 %v5822_v26, %s3841_s11  ;;  %v2071_v8 = vpop.permute.xlu0 %2070  ;;  %v2068_v25 = vadd.f32 %v2061_v50, %v2056_v51  ;;  %v2871_v21 = vrot.slane %v5722_v40, 7  ;;  %v2999_v35 = vadd.f32 %v2997_v28, %v2994_v54  ;;  %v3000_v56 = vrot.slane %v5814_v24, 5 }
 0x1c2   : > { %v2079_v49 = vadd.f32 %v2071_v8, %v2067_v27  ;;  %v2146_v12 = vmul.f32 %v3798_v3, %v5790_v44  ;;  %v2175_v14 = vmul.f32 %v5824_v17, %v5746_v20  ;;  %v2176_v0 = vmul.f32 %v5840_v10, %v5769_v52 }
 0x1c3   : > { %v2086_v46 = vpop.permute.xlu1 %2085  ;;  %v2080_v5 = vadd.f32 %v2073_v36, %v2068_v25  ;;  %v2151_v48 = vmul.f32 %v3790_v15, %v2148_v38  ;;  %v2177_v40 = vmul.f32 %v5831_v43, %v5757_v31  ;;  %v5871_v37 = vadd.f32 %v2871_v21, %v2870_v29 }
 0x1c4   : > { %v2094_v32 = vadd.f32 %v2086_v46, %v2079_v49  ;;  %v3002_v60 = vadd.f32 %v3000_v56, %v2999_v35  ;;  %v3003_v20 = vrot.slane %v5794_v41, 6  ;;  %v2149_v8 = vsub.f32 2.0, %v2146_v12 }
 0x1c5   : > { %2752 = vrot.lane.b32.xlu1 %v2750_v63, %s3832_s22  ;;  %v2075_v13 = vpop.permute.xlu0 %2074  ;;  %v2162_v47 = vadd.f32 0.0004, %v2159_v30  ;;  %v2178_v31 = vsub.f32 2.0, %v2175_v14  ;;  %v2179_v49 = vsub.f32 2.0, %v2176_v0  ;;  %v2180_v46 = vsub.f32 2.0, %v2177_v40 }
 0x1c6   : > { %v2081_v34 = vadd.f32 %v2075_v13, %v2069_v55  ;;  %v2112_v45 = vsub.f32 %v2094_v32, %v2109_v1  ;;  %v2150_v1 = vsub.f32 2.0, %v2147_v53  ;;  %v5879_v51 = vmul.f32 0.036351766, %v5871_v37 }
 0x1c7   : > { %v2090_v4 = vpop.permute.xlu1 %2089  ;;  %v3005_v41 = vadd.f32 %v3003_v20, %v3002_v60  ;;  %v3006_v55 = vrot.slane %v5772_v39, 7  ;;  %v2182_v39 = vmul.f32 %v5840_v10, %v2179_v49  ;;  %v2887_v14 = vmul.f32 0.21508227, %v5871_v37 }
 0x1c8   : > { %v2130_v6 = vmul.f32 2.0, %v2112_v45  ;;  %v2096_v27 = vadd.f32 %v2090_v4, %v2081_v34  ;;  %v5888_v34 = vmul.f32 0.11042692, %v5871_v37  ;;  %v2893_v40 = vmul.f32 0.26860526, %v5871_v37 }
 0x1c9   : > { %2764 = vrot.lane.b32.xlu1 %v2762_v18, %s3834_s24  ;;  %v2088_v50 = vpop.permute.xlu0 %2087  ;;  %v2152_v18 = vmul.f32 %v3798_v3, %v2149_v8 }
 0x1ca   : > { %v2133_v24 = vadd.f32 0.0036, %v2130_v6  ;;  %v2095_v23 = vadd.f32 %v2088_v50, %v2080_v5  ;;  %v2114_v44 = vsub.f32 %v2096_v27, %v2111_v19  ;;  %v2153_v19 = vmul.f32 %v3796_v22, %v2150_v1  ;;  %v5924_v1 = vld [vmem:[%s489_s20] sm:$0xf]  ;;  %s493_s20 = scalar_lea.vmem %s6341_s4, %s6120_s21 }
 0x1cb   : > { %v5869_v36 = vpop.permute.xlu1 %2286  ;;  %v2161_v22 = vadd.f32 0.0004, %v2158_v16  ;;  %v5894_v16 = vadd.f32 %v3006_v55, %v3005_v41  ;;  %v3220_v20 = vmul.f32 0.13646486, %v5924_v1 }
 0x1cc   : > { %v2154_v42 = vmul.f32 %v2151_v48, %v2133_v24  ;;  %v2113_v52 = vsub.f32 %v2095_v23, %v2110_v58  ;;  %v2132_v15 = vmul.f32 2.0, %v2114_v44  ;;  %v2181_v58 = vmul.f32 %v5824_v17, %v2178_v31 }
 0x1cd   : > { %2772 = vrot.lane.b32.xlu1 %v2750_v63, %s3838_s28  ;;  %v5906_v56 = vmul.f32 0.036351766, %v5894_v16  ;;  %v3016_v48 = vmul.f32 0.11042692, %v5894_v16  ;;  %v3221_v23 = vmul.f32 0.26579726, %v5924_v1 }
 0x1ce   : > { %v2131_v59 = vmul.f32 2.0, %v2113_v52  ;;  %v2135_v33 = vadd.f32 0.0036, %v2132_v15  ;;  %v2204_v28 = vsel %vm2187_vm7, %v2154_v42, 0.0  ;;  %v2163_v63 = vmul.f32 %v5849_v9, %v2154_v42 }
 0x1cf   : > { %v5875_v54 = vpop.permute.xlu1 %2398  ;;  %v2183_v9 = vmul.f32 %v5831_v43, %v2180_v46  ;;  %v3022_v44 = vmul.f32 0.21508227, %v5894_v16  ;;  %v3223_v8 = vrot.slane %v3221_v23, 1  ;;  %v3226_v42 = vmul.f32 0.33194062, %v5924_v1  ;;  %v6577_v46 = vld [vmem:[#allocation91_spill] sm:$0xff] }
 0x1d0   : > { %v2134_v32 = vadd.f32 0.0036, %v2131_v59  ;;  %v2156_v30 = vmul.f32 %v2153_v19, %v2135_v33  ;;  %v2289_v15 = vadd.f32 %v5869_v36, %v5755_v57  ;;  %v3028_v49 = vmul.f32 0.26860526, %v5894_v16 }
 0x1d1   : > { %2780 = vrot.lane.b32.xlu1 %v5803_v11, %s3840_s30  ;;  %v2184_v11 = vmul.f32 %v2181_v58, %v2163_v63  ;;  %v3228_v31 = vrot.slane %v3226_v42, 2  ;;  %v2420_v59 = vmul.f32 0.26601171, %v6577_v46  ;;  %v3231_v41 = vrot.slane %v3221_v23, 3  ;;  %v5995_v23 = vld [vmem:[%s507_s18] sm:$0xff] }
 0x1d2   : > { %v2155_v38 = vmul.f32 %v2152_v18, %v2134_v32  ;;  %v2165_v13 = vmul.f32 %v2162_v47, %v2156_v30  ;;  %v2207_v25 = vsel %vm2191_vm8, %v2156_v30, 0.0  ;;  %v3225_v47 = vadd.f32 %v3223_v8, %v3220_v20  ;;  %v6582_v20 = vld [vmem:[#allocation93_spill] sm:$0xff] }
 0x1d3   : > { %v2293_v53 = vpop.permute.xlu1 %2292  ;;  %v2188_v43 = vsel %vm2187_vm7, %v2184_v11, 0.0  ;;  %v3282_v57 = vmul.f32 %v5924_v1, %v5924_v1  ;;  %v2642_v32 = vmul.f32 0.21300554, %v6576_v7 }
 0x1d4   : > { %v2164_v3 = vmul.f32 %v2161_v22, %v2155_v38  ;;  %v2205_v45 = vsel %vm2187_vm7, %v2155_v38, 0.0  ;;  %v2186_v29 = vmul.f32 %v2183_v9, %v2165_v13  ;;  %v2295_v33 = vadd.f32 %v2293_v53, %v2289_v15  ;;  %v6578_v9 = vld [vmem:[#allocation39_spill] sm:$0xff] }
 0x1d5   : > { %2877 = vrot.lane.b32.xlu1 %v5879_v51, %s3833_s23  ;;  %v2206_v17 = vadd.f32 %v2205_v45, %v2204_v28  ;;  %v3230_v28 = vadd.f32 %v3228_v31, %v3225_v47  ;;  %v3283_v58 = vmul.f32 0.13646486, %v3282_v57  ;;  %v2911_v15 = vmul.f32 0.0076728435, %v5995_v23 }
 0x1d6   : > { %v2185_v4 = vmul.f32 %v2182_v39, %v2164_v3  ;;  %v2192_v5 = vsel %vm2191_vm8, %v2186_v29, 0.0  ;;  %v2917_v31 = vmul.f32 0.11042692, %v5995_v23 }
 0x1d7   : > { %v5897_v21 = vpop.permute.xlu1 %2404  ;;  %v5899_v35 = vadd.f32 %v2207_v25, %v2206_v17  ;;  %v5950_v63 = vadd.f32 %v3231_v41, %v3230_v28  ;;  %v3289_v25 = vmul.f32 0.33194062, %v3282_v57 }
 0x1d8   : > { %v2189_v10 = vsel %vm2187_vm7, %v2185_v4, 0.0  ;;  %v2919_v41 = vrot.slane %v2917_v31, 2 }
 0x1d9   : > { %2883 = vrot.lane.b32.xlu1 %v5888_v34, %s3835_s25  ;;  %v2190_v12 = vadd.f32 %v2189_v10, %v2188_v43  ;;  %v3235_v22 = vmul.f32 0.26579726, %v5950_v63  ;;  %v3291_v45 = vrot.slane %v3289_v25, 2  ;;  %v6579_v10 = vld [vmem:[#allocation98_spill] sm:$0xff]  ;;  %v2744_v25 = vmul.f32 0.036000773, %v5778_v62 }
 0x1db   : > { %v5909_v6 = vpop.permute.xlu1 %2512  ;;  %v2193_v27 = vadd.f32 %v2192_v5, %v2190_v12  ;;  %v3241_v12 = vmul.f32 0.33194062, %v5950_v63 }
 0x1dd   : > { %3012 = vrot.lane.b32.xlu1 %v5906_v56, %s3833_s23  ;;  %2194 = vadd.xlane.f32.xlu0 %v2193_v27 }
 0x1df   : > { %v2627_v0 = vpop.permute.xlu1 %2626 }
 0x1e0   : > { %v2629_v55 = vadd.f32 %v2627_v0, %v5822_v26  ;;  %v6580_v0 = vld [vmem:[#allocation94_spill] sm:$0xff] }
 0x1e1   : > { %2889 = vrot.lane.b32.xlu1 %v2887_v14, %s3832_s22 }
 0x1e3   : > { %v2299_v50 = vpop.permute.xlu1 %2298 }
 0x1e4   : > { %v2301_v18 = vadd.f32 %v2299_v50, %v2295_v33 }
 0x1e5   : > { %3018 = vrot.lane.b32.xlu1 %v3016_v48, %s3835_s25 }
 0x1e7   : > { %v5926_v24 = vpop.permute.xlu1 %2410 }
 0x1e9   : > { %2895 = vrot.lane.b32.xlu1 %v2893_v40, %s3836_s26  ;;  %v6581_v40 = vld [vmem:[#allocation34_spill] sm:$0xff] }
 0x1eb   : > { %v2633_v60 = vpop.permute.xlu1 %2632 }
 0x1ec   : > { %v2635_v30 = vadd.f32 %v2633_v60, %v2629_v55  ;;  %v2912_v60 = vmul.f32 0.036351766, %v5995_v23  ;;  %v2922_v55 = vmul.f32 0.21508227, %v5995_v23 }
 0x1ed   : > { %3024 = vrot.lane.b32.xlu1 %v3022_v44, %s3832_s22 }
 0x1ee   : > { %v2914_v47 = vrot.slane %v2912_v60, 1 }
 0x1ef   : > { %v2305_v52 = vpop.permute.xlu1 %2304 }
 0x1f0   : > { %v2307_v38 = vadd.f32 %v2305_v52, %v2301_v18  ;;  %v2916_v28 = vadd.f32 %v2914_v47, %v2911_v15  ;;  %v2938_v15 = vrot.slane %v2912_v60, 7 }
 0x1f1   : > { %2899 = vrot.lane.b32.xlu1 %v2887_v14, %s3834_s24 }
 0x1f2   : > { %v2921_v18 = vadd.f32 %v2919_v41, %v2916_v28 }
 0x1f3   : > { %v5939_v19 = vpop.permute.xlu1 %2416  ;;  %2518 = vrot.lane.b32.xlu0 %v5730_v61, %s3835_s25  ;;  %v3284_v61 = vmul.f32 0.26579726, %v3282_v57 }
 0x1f5   : > { %3030 = vrot.lane.b32.xlu1 %v3028_v49, %s3836_s26  ;;  %v3286_v53 = vrot.slane %v3284_v61, 1  ;;  %v3294_v29 = vrot.slane %v3284_v61, 3  ;;  %v6583_v49 = vld [vmem:[#allocation99_spill] sm:$0xff]  ;;  %v2927_v61 = vmul.f32 0.26860526, %v5995_v23 }
 0x1f7   : > { %v5947_v36 = vpop.permute.xlu1 %2524  ;;  %2422 = vrot.lane.b32.xlu0 %v2420_v59, %s3834_s24  ;;  %v3288_v11 = vadd.f32 %v3286_v53, %v3283_v58  ;;  %v3046_v59 = vmul.f32 %v5995_v23, %v5995_v23 }
 0x1f9   : > { %2903 = vrot.lane.b32.xlu1 %v5888_v34, %s3837_s27  ;;  %v2648_v34 = vmul.f32 0.26601171, %v6576_v7  ;;  %v3293_v4 = vadd.f32 %v3291_v45, %v3288_v11  ;;  %v3053_v53 = vmul.f32 0.11042692, %v3046_v59  ;;  %v3058_v45 = vmul.f32 0.21508227, %v3046_v59 }
 0x1fb   : > { %v2639_v26 = vpop.permute.xlu1 %2638  ;;  %2644 = vrot.lane.b32.xlu0 %v2642_v32, %s3836_s26  ;;  %v5973_v5 = vadd.f32 %v3294_v29, %v3293_v4  ;;  %v3055_v11 = vrot.slane %v3053_v53, 2  ;;  %v2756_v4 = vmul.f32 0.21300554, %v5778_v62  ;;  %v3071_v41 = vrot.slane %v3053_v53, 6 }
 0x1fc   : > { %v5957_v13 = vadd.f32 %v2639_v26, %v2635_v30  ;;  %v2924_v30 = vrot.slane %v2922_v55, 3 }
 0x1fd   : > { %3034 = vrot.lane.b32.xlu1 %v3022_v44, %s3834_s24  ;;  %v3304_v42 = vmul.f32 0.33194062, %v5973_v5 }
 0x1ff   : > { %v2311_v39 = vpop.permute.xlu1 %2310  ;;  %2426 = vrot.lane.b32.xlu0 %v6578_v9, %s3837_s27  ;;  %v2929_v9 = vrot.slane %v2927_v61, 4 }
 0x200   : > { %v2313_v3 = vadd.f32 %v2311_v39, %v2307_v38  ;;  %v3047_v38 = vmul.f32 0.0076728435, %v3046_v59  ;;  %v2926_v39 = vadd.f32 %v2924_v30, %v2921_v18 }
 0x201   : > { %3237 = vrot.lane.b32.xlu1 %v3235_v22, %s3833_s23 }
 0x202   : > { %v2931_v29 = vadd.f32 %v2929_v9, %v2926_v39 }
 0x203   : > { %v5964_v17 = vpop.permute.xlu1 %2530  ;;  %2650 = vrot.lane.b32.xlu0 %v2648_v34, %s3834_s24 }
 0x205   : > { %2907 = vrot.lane.b32.xlu1 %v5879_v51, %s3838_s28  ;;  %v5980_v51 = vmul.f32 0.26579726, %v5973_v5 }
 0x207   : > { %v2315_v43 = vpop.permute.xlu1 %2314  ;;  %2430 = vrot.lane.b32.xlu0 %v6579_v10, %s3838_s28  ;;  %v2932_v10 = vrot.slane %v2922_v55, 5 }
 0x208   : > { %v2317_v7 = vadd.f32 %v2315_v43, %v2313_v3 }
 0x209   : > { %3038 = vrot.lane.b32.xlu1 %v3016_v48, %s3837_s27 }
 0x20b   : > { %v5975_v27 = vpop.permute.xlu1 %2536  ;;  %2654 = vrot.lane.b32.xlu0 %v2642_v32, %s3837_s27  ;;  %v3048_v32 = vmul.f32 0.036351766, %v3046_v59 }
 0x20d   : > { %3243 = vrot.lane.b32.xlu1 %v3241_v12, %s3835_s25  ;;  %v3050_v58 = vrot.slane %v3048_v32, 1  ;;  %v3060_v12 = vrot.slane %v3058_v45, 3  ;;  %v3074_v18 = vrot.slane %v3048_v32, 7  ;;  %v2874_v32 = vmul.f32 0.0076728435, %v5871_v37 }
 0x20f   : > { %v2319_v14 = vpop.permute.xlu1 %2318  ;;  %2434 = vrot.lane.b32.xlu0 %v6580_v0, %s3839_s29  ;;  %v3052_v3 = vadd.f32 %v3050_v58, %v3047_v38 }
 0x210   : > { %v2321_v50 = vadd.f32 %v2319_v14, %v2317_v7  ;;  %v3063_v14 = vmul.f32 0.26860526, %v3046_v59  ;;  %v6046_v59 = vmul.f32 0.0010283801, %v5778_v62 }
 0x211   : > { %3300 = vrot.lane.b32.xlu1 %v5980_v51, %s3833_s23  ;;  %v3057_v7 = vadd.f32 %v3055_v11, %v3052_v3  ;;  %v3009_v11 = vmul.f32 0.0076728435, %v5894_v16 }
 0x213   : > { %v5991_v48 = vpop.permute.xlu1 %2540  ;;  %2658 = vrot.lane.b32.xlu0 %v6581_v40, %s3838_s28  ;;  %v2935_v40 = vrot.slane %v2917_v31, 6 }
 0x215   : > { %3042 = vrot.lane.b32.xlu1 %v5906_v56, %s3838_s28  ;;  %v6009_v56 = vmul.f32 0.0010283801, %v6577_v46  ;;  %v6020_v46 = vmul.f32 0.0010283801, %v5368_v2 }
 0x217   : > { %v2323_v44 = vpop.permute.xlu1 %2322  ;;  %2438 = vrot.lane.b32.xlu0 %v6582_v20, %s3840_s30  ;;  %v3065_v20 = vrot.slane %v3063_v14, 4 }
 0x218   : > { %v2325_v8 = vadd.f32 %v2323_v44, %v2321_v50  ;;  %v2934_v50 = vadd.f32 %v2932_v10, %v2931_v29  ;;  %v3062_v44 = vadd.f32 %v3060_v12, %v3057_v7 }
 0x219   : > { %3247 = vrot.lane.b32.xlu1 %v3235_v22, %s3832_s22  ;;  %v6584_v22 = vld [vmem:[#allocation97_spill] sm:$0xff] }
 0x21a   : > { %v3067_v47 = vadd.f32 %v3065_v20, %v3062_v44 }
 0x21b   : > { %v6004_v52 = vpop.permute.xlu1 %2544  ;;  %2662 = vrot.lane.b32.xlu0 %v6583_v49, %s3839_s29  ;;  %v3068_v49 = vrot.slane %v3058_v45, 5 }
 0x21d   : > { %3306 = vrot.lane.b32.xlu1 %v3304_v42, %s3835_s25  ;;  %v2937_v42 = vadd.f32 %v2935_v40, %v2934_v50  ;;  %v3070_v31 = vadd.f32 %v3068_v49, %v3067_v47 }
 0x21f   : > { %v2327_v33 = vpop.permute.xlu1 %2326  ;;  %2443 = vrot.lane.b32.xlu0 %v6009_v56, %s3841_s11  ;;  %v6048_v28 = vadd.f32 %v2938_v15, %v2937_v42 }
 0x220   : > { %v2329_v57 = vadd.f32 %v2327_v33, %v2325_v8 }
 0x221   : > { %v6055_v60 = vmul.f32 0.036351766, %v6048_v28  ;;  %v2948_v62 = vmul.f32 0.11042692, %v6048_v28  ;;  %v2954_v53 = vmul.f32 0.21508227, %v6048_v28 }
 0x222   : > { %v2960_v37 = vmul.f32 0.26860526, %v6048_v28 }
 0x223   : > { %v6023_v26 = vpop.permute.xlu1 %2548  ;;  %2666 = vrot.lane.b32.xlu0 %v6584_v22, %s3840_s30 }
 0x227   : > { %v2332_v34 = vpop.permute.xlu1 %2331  ;;  %2557 = vrot.lane.b32.xlu0 %v6020_v46, %s3841_s11 }
 0x228   : > { %v6030_v2 = vadd.f32 %v2332_v34, %v2329_v57  ;;  %v3073_v57 = vadd.f32 %v3071_v41, %v3070_v31 }
 0x22a   : > { %v6062_v61 = vadd.f32 %v3074_v18, %v3073_v57 }
 0x22b   : > { %v6033_v43 = vpop.permute.xlu1 %2552  ;;  %2746 = vrot.lane.b32.xlu0 %v2744_v25, %s3835_s25 }
 0x22c   : > { %v6069_v38 = vmul.f32 0.036351766, %v6062_v61  ;;  %v3090_v29 = vmul.f32 0.21508227, %v6062_v61  ;;  %v3096_v15 = vmul.f32 0.26860526, %v6062_v61 }
 0x22f   : > { %v6036_v0 = vpop.permute.xlu1 %2740  ;;  %2758 = vrot.lane.b32.xlu0 %v2756_v4, %s3836_s26 }
 0x233   : > { %v6039_v8 = vpop.permute.xlu1 %2671  ;;  %2768 = vrot.lane.b32.xlu0 %v2756_v4, %s3837_s27 }
 0x237   : > { %v6042_v33 = vpop.permute.xlu1 %2752  ;;  %2776 = vrot.lane.b32.xlu0 %v2744_v25, %s3839_s29 }
 0x23b   : > { %v6050_v55 = vpop.permute.xlu1 %2764  ;;  %2785 = vrot.lane.b32.xlu0 %v6046_v59, %s3841_s11  ;;  %s511_s11 = scalar_lea.vmem %s6345_s8, %s3733_s17 }
 0x23c   : > { %v6084_v3 = vld [vmem:[%s511_s11] sm:$0xf] }
 0x23d   : > { %v3252_v45 = vmul.f32 0.26579726, %v6084_v3  ;;  %v3251_v12 = vmul.f32 0.13646486, %v6084_v3  ;;  %v3257_v50 = vmul.f32 0.33194062, %v6084_v3  ;;  %v3314_v57 = vmul.f32 %v6084_v3, %v6084_v3 }
 0x23f   : > { %v6057_v30 = vpop.permute.xlu1 %2772  ;;  %2944 = vrot.lane.b32.xlu0 %v6055_v60, %s3833_s23  ;;  %v3254_v14 = vrot.slane %v3252_v45, 1  ;;  %v3259_v16 = vrot.slane %v3257_v50, 2  ;;  %v3262_v31 = vrot.slane %v3252_v45, 3 }
 0x241   : > { %2209 = vadd.xlane.f32.xlu1 %v5899_v35  ;;  %v3084_v35 = vmul.f32 0.11042692, %v6062_v61  ;;  %v3256_v20 = vadd.f32 %v3254_v14, %v3251_v12 }
 0x243   : > { %v6065_v22 = vpop.permute.xlu1 %2780  ;;  %2950 = vrot.lane.b32.xlu0 %v2948_v62, %s3835_s25  ;;  %v3261_v49 = vadd.f32 %v3259_v16, %v3256_v20 }
 0x247   : > { %v2878_v58 = vpop.permute.xlu1 %2877  ;;  %3080 = vrot.lane.b32.xlu0 %v6069_v38, %s3833_s23 }
 0x248   : > { %v2880_v25 = vadd.f32 %v2878_v58, %v2874_v32  ;;  %v6098_v32 = vadd.f32 %v3262_v31, %v3261_v49 }
 0x24b   : > { %v2884_v39 = vpop.permute.xlu1 %2883  ;;  %2956 = vrot.lane.b32.xlu0 %v2954_v53, %s3832_s22 }
 0x24c   : > { %v2886_v9 = vadd.f32 %v2884_v39, %v2880_v25  ;;  %v3316_v25 = vmul.f32 0.26579726, %v3314_v57 }
 0x24e   : > { %v3326_v16 = vrot.slane %v3316_v25, 3 }
 0x24f   : > { %v3013_v34 = vpop.permute.xlu1 %3012  ;;  %3086 = vrot.lane.b32.xlu0 %v3084_v35, %s3835_s25 }
 0x250   : > { %v3015_v10 = vadd.f32 %v3013_v34, %v3009_v11  ;;  %v3315_v34 = vmul.f32 0.13646486, %v3314_v57  ;;  %v3321_v11 = vmul.f32 0.33194062, %v3314_v57 }
 0x252   : > { %v3323_v14 = vrot.slane %v3321_v11, 2 }
 0x253   : > { %v2890_v4 = vpop.permute.xlu1 %2889  ;;  %2962 = vrot.lane.b32.xlu0 %v2960_v37, %s3836_s26  ;;  %v3318_v37 = vrot.slane %v3316_v25, 1  ;;  %v3234_v25 = vmul.f32 0.13646486, %v5950_v63  ;;  %v6129_v63 = vld [vmem:[%s493_s20] sm:$0x3] }
 0x254   : > { %v2892_v7 = vadd.f32 %v2890_v4, %v2886_v9 }
 0x255   : > { %v3320_v12 = vadd.f32 %v3318_v37, %v3315_v34 }
 0x257   : > { %v3019_v40 = vpop.permute.xlu1 %3018  ;;  %3092 = vrot.lane.b32.xlu0 %v3090_v29, %s3832_s22 }
 0x258   : > { %v3021_v44 = vadd.f32 %v3019_v40, %v3015_v10 }
 0x25b   : > { %v2896_v42 = vpop.permute.xlu1 %2895  ;;  %2966 = vrot.lane.b32.xlu0 %v2954_v53, %s3834_s24  ;;  %v3266_v53 = vmul.f32 0.26579726, %v6098_v32 }
 0x25c   : > { %v2898_v47 = vadd.f32 %v2896_v42, %v2892_v7 }
 0x25f   : > { %v3025_v41 = vpop.permute.xlu1 %3024  ;;  %3098 = vrot.lane.b32.xlu0 %v3096_v15, %s3836_s26 }
 0x260   : > { %v3027_v18 = vadd.f32 %v3025_v41, %v3021_v44  ;;  %v3272_v41 = vmul.f32 0.33194062, %v6098_v32 }
 0x263   : > { %v2900_v58 = vpop.permute.xlu1 %2899  ;;  %2970 = vrot.lane.b32.xlu0 %v2948_v62, %s3837_s27 }
 0x264   : > { %v2902_v39 = vadd.f32 %v2900_v58, %v2898_v47 }
 0x267   : > { %v3031_v9 = vpop.permute.xlu1 %3030  ;;  %3102 = vrot.lane.b32.xlu0 %v3090_v29, %s3834_s24  ;;  %v3325_v29 = vadd.f32 %v3323_v14, %v3320_v12  ;;  %v3417_v14 = vmul.f32 0.5553281, %v6129_v63 }
 0x268   : > { %v3033_v45 = vadd.f32 %v3031_v9, %v3027_v18 }
 0x269   : > { %v6110_v57 = vadd.f32 %v3326_v16, %v3325_v29  ;;  %v3416_v16 = vmul.f32 0.44467196, %v6129_v63 }
 0x26a   : > { %v2195_v4 = vpop.xlane.xlu0 %2194 }
 0x26b   : > { %v2904_v10 = vpop.permute.xlu1 %2903  ;;  %v2196_v7 = vrot.slane %v2195_v4, 4  ;;  %3268 = vrot.lane.b32.xlu0 %v3266_v53, %s3833_s23 }
 0x26c   : > { %v2906_v50 = vadd.f32 %v2904_v10, %v2902_v39 }
 0x26d   : > { %v2197_v62 = vadd.f32 %v2196_v7, %v2195_v4  ;;  %v2401_v7 = vadd.f32 %v5875_v54, %v6009_v56 }
 0x26e   : > { %v2519_v40 = vpop.permute.xlu0 %2518 }
 0x26f   : > { %v3035_v44 = vpop.permute.xlu1 %3034  ;;  %v2198_v20 = vrot.slane %v2197_v62, 2  ;;  %2974 = vrot.lane.b32.xlu0 %v6055_v60, %s3838_s28  ;;  %v3330_v60 = vmul.f32 0.26579726, %v6110_v57  ;;  %v2407_v54 = vadd.f32 %v5897_v21, %v2401_v7 }
 0x270   : > { %v3037_v42 = vadd.f32 %v3035_v44, %v3033_v45  ;;  %v6142_v44 = vld [vmem:[%s515_s15] sm:$0x3] }
 0x271   : > { %v2199_v15 = vadd.f32 %v2198_v20, %v2197_v62  ;;  %v2515_v62 = vadd.f32 %v5909_v6, %v6020_v46  ;;  %v3430_v6 = vmul.f32 0.5553281, %v6142_v44  ;;  %v3297_v46 = vmul.f32 0.13646486, %v5973_v5 }
 0x272   : > { %v6106_v47 = vpop.permute.xlu0 %2422  ;;  %v2413_v21 = vadd.f32 %v5926_v24, %v2407_v54 }
 0x273   : > { %v3238_v49 = vpop.permute.xlu1 %3237  ;;  %v2200_v31 = vrot.slane %v2199_v15, 1  ;;  %3106 = vrot.lane.b32.xlu0 %v3084_v35, %s3837_s27  ;;  %v2521_v20 = vadd.f32 %v2519_v40, %v2515_v62 }
 0x274   : > { %v3240_v37 = vadd.f32 %v3238_v49, %v3234_v25  ;;  %v3432_v25 = vrot.slane %v3430_v6, 1 }
 0x275   : > { %v2201_v18 = vadd.f32 %v2200_v31, %v2199_v15  ;;  %v2527_v40 = vadd.f32 %v5947_v36, %v2521_v20 }
 0x276   : > { %v6112_v58 = vpop.permute.xlu0 %2644 }
 0x277   : > { %v2908_v39 = vpop.permute.xlu1 %2907  ;;  %3749 = vpush %v2201_v18  ;;  %3274 = vrot.lane.b32.xlu0 %v3272_v41, %s3835_s25  ;;  %v2533_v36 = vadd.f32 %v5964_v17, %v2527_v40 }
 0x278   : > { %v6117_v9 = vadd.f32 %v2908_v39, %v2906_v50  ;;  %v3429_v39 = vmul.f32 0.44467196, %v6142_v44 }
 0x27a   : > { %v2427_v35 = vpop.permute.xlu0 %2426  ;;  %v6146_v29 = vmul.f32 %v6117_v9, %v6117_v9  ;;  %v6170_v7 = vadd.f32 %v3432_v25, %v3429_v39  ;;  %v2789_v39 = vmul.f32 %v6030_v2, %v6030_v2 }
 0x27b   : > { %v3039_v34 = vpop.permute.xlu1 %3038  ;;  %3332 = vrot.lane.b32.xlu0 %v3330_v60, %s3833_s23 }
 0x27c   : > { %v3041_v11 = vadd.f32 %v3039_v34, %v3037_v42  ;;  %v3419_v42 = vrot.slane %v3417_v14, 1  ;;  %v3436_v17 = vmul.f32 0.5553281, %v6170_v7 }
 0x27e   : > { %v2651_v45 = vpop.permute.xlu0 %2650  ;;  %v6159_v41 = vadd.f32 %v3419_v42, %v3416_v16 }
 0x27f   : > { %v3244_v4 = vpop.permute.xlu1 %3243  ;;  %3110 = vrot.lane.b32.xlu0 %v6069_v38, %s3838_s28  ;;  %v3336_v38 = vmul.f32 0.33194062, %v6110_v57 }
 0x280   : > { %v3246_v10 = vadd.f32 %v3244_v4, %v3240_v37  ;;  %v2419_v4 = vadd.f32 %v5939_v19, %v2413_v21  ;;  %v3423_v24 = vmul.f32 0.5553281, %v6159_v41  ;;  %v2647_v19 = vadd.f32 %v6112_v58, %v5957_v13 }
 0x281   : > { %v2795_v13 = vadd.f32 2.0, %v6030_v2 }
 0x282   : > { %v2431_v12 = vpop.permute.xlu0 %2430  ;;  %v2653_v54 = vadd.f32 %v2651_v45, %v2647_v19 }
 0x283   : > { %v3301_v50 = vpop.permute.xlu1 %3300  ;;  %3278 = vrot.lane.b32.xlu0 %v3266_v53, %s3832_s22 }
 0x284   : > { %v3303_v5 = vadd.f32 %v3301_v50, %v3297_v46  ;;  %v2425_v50 = vadd.f32 %v6106_v47, %v2419_v4 }
 0x286   : > { %v2655_v56 = vpop.permute.xlu0 %2654  ;;  %v2429_v62 = vadd.f32 %v2427_v35, %v2425_v50 }
 0x287   : > { %v3043_v15 = vpop.permute.xlu1 %3042  ;;  %3338 = vrot.lane.b32.xlu0 %v3336_v38, %s3835_s25 }
 0x288   : > { %v6153_v53 = vadd.f32 %v3043_v15, %v3041_v11 }
 0x28a   : > { %v3183_v49 = vsub.f32 %v6153_v53, %v6146_v29  ;;  %v2435_v31 = vpop.permute.xlu0 %2434 }
 0x28b   : > { %v3248_v18 = vpop.permute.xlu1 %3247  ;;  %3310 = vrot.lane.b32.xlu0 %v5980_v51, %s3832_s22  ;;  %v2539_v51 = vadd.f32 %v5975_v27, %v2533_v36  ;;  %v2657_v27 = vadd.f32 %v2655_v56, %v2653_v54  ;;  %v2797_v56 = vmul.f32 %v2795_v13, %v2795_v13 }
 0x28c   : > { %v6164_v34 = vadd.f32 %v3248_v18, %v3246_v10 }
 0x28d   : > { %v2543_v38 = vadd.f32 %v5991_v48, %v2539_v51 }
 0x28e   : > { %v2659_v37 = vpop.permute.xlu0 %2658 }
 0x28f   : > { %v3307_v11 = vpop.permute.xlu1 %3306  ;;  %3342 = vrot.lane.b32.xlu0 %v3330_v60, %s3832_s22  ;;  %v2433_v60 = vadd.f32 %v2431_v12, %v2429_v62  ;;  %v2547_v47 = vadd.f32 %v6004_v52, %v2543_v38  ;;  %v2661_v15 = vadd.f32 %v2659_v37, %v2657_v27 }
 0x290   : > { %v6172_v14 = vadd.f32 %v3307_v11, %v3303_v5 }
 0x291   : > { %v2437_v16 = vadd.f32 %v2435_v31, %v2433_v60  ;;  %v2551_v21 = vadd.f32 %v6023_v26, %v2547_v47  ;;  %v2743_v26 = vadd.f32 %v6036_v0, %v6046_v59 }
 0x292   : > { %v2439_v10 = vpop.permute.xlu0 %2438 }
 0x293   : > { %3425 = vrot.lane.b32.xlu0 %v3423_v24, %s3833_s23  ;;  %v2441_v42 = vadd.f32 %v2439_v10, %v2437_v16  ;;  %v2555_v31 = vadd.f32 %v6033_v43, %v2551_v21  ;;  %v3823_v10 = vld [vmem:[%s5677_s16] sm:$0xff] }
 0x294   : > { %v3114_v62 = vmul.f32 %v3823_v10, %v5995_v23 }
 0x296   : > { %v2663_v20 = vpop.permute.xlu0 %2662  ;;  %v6195_v0 = vmul.f32 0.036351766, %v3114_v62  ;;  %v3115_v54 = vmul.f32 0.0076728435, %v3114_v62  ;;  %v3126_v21 = vmul.f32 0.21508227, %v3114_v62 }
 0x297   : > { %3438 = vrot.lane.b32.xlu0 %v3436_v17, %s3833_s23  ;;  %v2665_v46 = vadd.f32 %v2663_v20, %v2661_v15 }
 0x298   : > { %v3118_v16 = vrot.slane %v6195_v0, 1 }
 0x29a   : > { %v2444_v35 = vpop.permute.xlu0 %2443 }
 0x29b   : > { %v2446_v6 = vadd.f32 %v2444_v35, %v2441_v42 }
 0x29d   : > { %v2796_v40 = vadd.f32 2.0, %v2446_v6  ;;  %v2791_v52 = vmul.f32 %v2446_v6, %v2446_v6 }
 0x29e   : > { %v2667_v58 = vpop.permute.xlu0 %2666 }
 0x29f   : > { %v2669_v48 = vadd.f32 %v2667_v58, %v2665_v46  ;;  %v2798_v12 = vmul.f32 %v2796_v40, %v2796_v40  ;;  %v3120_v46 = vadd.f32 %v3118_v16, %v3115_v54  ;;  %v2799_v58 = vmul.f32 %v2796_v40, %v2795_v13 }
 0x2a0   : > { %v3456_v16 = vmul.f32 %v6142_v44, %v6142_v44 }
 0x2a1   : > { %v2674_v45 = vadd.f32 %v6039_v8, %v2669_v48  ;;  %v2812_v5 = vadd.f32 %v2798_v12, %v2797_v56  ;;  %v2793_v48 = vmul.f32 %v2446_v6, %v6030_v2  ;;  %v3442_v2 = vmul.f32 %v6129_v63, %v6129_v63 }
 0x2a2   : > { %v2558_v18 = vpop.permute.xlu0 %2557 }
 0x2a3   : > { %v2560_v25 = vadd.f32 %v2558_v18, %v2555_v31  ;;  %v2792_v36 = vsub.f32 %v2674_v45, %v2791_v52  ;;  %v2813_v8 = vadd.f32 0.0004, %v2812_v5  ;;  %v3444_v10 = vmul.f32 0.5553281, %v3442_v2 }
 0x2a5   : > { %v2790_v37 = vsub.f32 %v2560_v25, %v2789_v39  ;;  %v3128_v39 = vrot.slane %v3126_v21, 3  ;;  %v2809_v25 = vmul.f32 2.0, %v2799_v58  ;;  %v3446_v54 = vrot.slane %v3444_v10, 1 }
 0x2a6   : > { %v2747_v11 = vpop.permute.xlu0 %2746  ;;  %v3458_v58 = vmul.f32 0.5553281, %v3456_v16 }
 0x2a7   : > { %v2802_v4 = vadd.f32 %v2792_v36, %v2790_v37  ;;  %v2749_v24 = vadd.f32 %v2747_v11, %v2743_v26  ;;  %v3131_v26 = vmul.f32 0.26860526, %v3114_v62  ;;  %v2810_v13 = vadd.f32 0.0004, %v2809_v25 }
 0x2a9   : > { %v2803_v51 = vadd.f32 0.0036, %v2802_v4  ;;  %v2755_v43 = vadd.f32 %v6042_v33, %v2749_v24  ;;  %v3121_v33 = vmul.f32 0.11042692, %v3114_v62  ;;  %v3133_v24 = vrot.slane %v3131_v26, 4 }
 0x2aa   : > { %v2759_v50 = vpop.permute.xlu0 %2758  ;;  %v3077_v62 = vmul.f32 0.0076728435, %v6062_v61 }
 0x2ab   : > { %3799 = vrcp.f32 %v2803_v51  ;;  %v2761_v17 = vadd.f32 %v2759_v50, %v2755_v43 }
 0x2ac   : > { %3801 = vrcp.f32 %v2813_v8 }
 0x2ad   : > { %v2767_v19 = vadd.f32 %v6050_v55, %v2761_v17  ;;  %v3123_v55 = vrot.slane %v3121_v33, 2 }
 0x2ae   : > { %v2769_v60 = vpop.permute.xlu0 %2768 }
 0x2af   : > { %v2771_v59 = vadd.f32 %v2769_v60, %v2767_v19  ;;  %v3125_v52 = vadd.f32 %v3123_v55, %v3120_v46  ;;  %v3136_v60 = vrot.slane %v3126_v21, 5  ;;  %v3142_v21 = vrot.slane %v6195_v0, 7 }
 0x2b1   : > { %v2775_v38 = vadd.f32 %v6057_v30, %v2771_v59  ;;  %v2941_v30 = vmul.f32 0.0076728435, %v6048_v28  ;;  %v3130_v6 = vadd.f32 %v3128_v39, %v3125_v52  ;;  %v3460_v52 = vrot.slane %v3458_v58, 1 }
 0x2b2   : > { %v2777_v20 = vpop.permute.xlu0 %2776 }
 0x2b3   : > { %v2779_v27 = vadd.f32 %v2777_v20, %v2775_v38  ;;  %v3135_v19 = vadd.f32 %v3133_v24, %v3130_v6  ;;  %v3443_v20 = vmul.f32 0.44467196, %v3442_v2 }
 0x2b5   : > { %v3800_v42 = vpop.eup %3799  ;;  %v2783_v23 = vadd.f32 %v6065_v22, %v2779_v27 }
 0x2b6   : > { %v3802_v47 = vpop.eup %3801  ;;  %v2805_v35 = vmul.f32 %v3800_v42, %v2803_v51  ;;  %v2786_v15 = vpop.permute.xlu0 %2785 }
 0x2b7   : > { %v2788_v12 = vadd.f32 %v2786_v15, %v2783_v23  ;;  %v2815_v56 = vmul.f32 %v3802_v47, %v2813_v8  ;;  %v3138_v23 = vadd.f32 %v3136_v60, %v3135_v19  ;;  %v6211_v15 = vadd.f32 %v3446_v54, %v3443_v20 }
 0x2b8   : > { %v2806_v45 = vsub.f32 2.0, %v2805_v35  ;;  %v3346_v35 = vmul.f32 %v6084_v3, %v5924_v1 }
 0x2b9   : > { %v2794_v31 = vsub.f32 %v2788_v12, %v2793_v48  ;;  %v2816_v11 = vsub.f32 2.0, %v2815_v56 }
 0x2ba   : > { %v2945_v18 = vpop.permute.xlu0 %2944  ;;  %v2807_v37 = vmul.f32 %v3800_v42, %v2806_v45  ;;  %v3348_v48 = vmul.f32 0.26579726, %v3346_v35  ;;  %v3347_v3 = vmul.f32 0.13646486, %v3346_v35  ;;  %v3353_v25 = vmul.f32 0.33194062, %v3346_v35 }
 0x2bb   : > { %v2800_v22 = vmul.f32 2.0, %v2794_v31  ;;  %v2947_v5 = vadd.f32 %v2945_v18, %v2941_v30  ;;  %v2817_v43 = vmul.f32 %v3802_v47, %v2816_v11  ;;  %v3139_v47 = vrot.slane %v3121_v33, 6 }
 0x2bc   : > { %v3450_v31 = vmul.f32 0.5553281, %v6211_v15  ;;  %v3457_v33 = vmul.f32 0.44467196, %v3456_v16  ;;  %v3350_v39 = vrot.slane %v3348_v48, 1 }
 0x2bd   : > { %v2801_v36 = vadd.f32 0.0036, %v2800_v22  ;;  %v3141_v55 = vadd.f32 %v3139_v47, %v3138_v23  ;;  %v3188_v47 = vadd.f32 3.0, %v6117_v9 }
 0x2be   : > { %v2951_v4 = vpop.permute.xlu0 %2950  ;;  %v3352_v11 = vadd.f32 %v3350_v39, %v3347_v3 }
 0x2bf   : > { %v2953_v28 = vadd.f32 %v2951_v4, %v2947_v5  ;;  %v2808_v40 = vmul.f32 %v2807_v37, %v2801_v36  ;;  %v6215_v18 = vadd.f32 %v3142_v21, %v3141_v55  ;;  %v6219_v36 = vadd.f32 %v3460_v52, %v3457_v33 }
 0x2c0   : > { %v3355_v4 = vrot.slane %v3353_v25, 2  ;;  %v3190_v21 = vmul.f32 %v3188_v47, %v3188_v47 }
 0x2c1   : > { %v2831_v8 = vsel %vm2819_vm9, %v2808_v40, 0.0  ;;  %v2811_v51 = vmul.f32 %v2810_v13, %v2808_v40  ;;  %v3146_v0 = vmul.f32 0.036351766, %v6215_v18  ;;  %v3464_v40 = vmul.f32 0.5553281, %v6219_v36 }
 0x2c2   : > { %2832 = vadd.xlane.f32.xlu1 %v2831_v8  ;;  %v3081_v50 = vpop.permute.xlu0 %3080  ;;  %v3152_v13 = vmul.f32 0.11042692, %v6215_v18  ;;  %v3357_v8 = vadd.f32 %v3355_v4, %v3352_v11  ;;  %v3158_v10 = vmul.f32 0.21508227, %v6215_v18  ;;  %v3164_v60 = vmul.f32 0.26860526, %v6215_v18 }
 0x2c3   : > { %v2818_v17 = vmul.f32 %v2817_v43, %v2811_v51  ;;  %v3083_v27 = vadd.f32 %v3081_v50, %v3077_v62  ;;  %v3358_v51 = vrot.slane %v3348_v48, 3  ;;  %v3470_v43 = vmul.f32 %v6142_v44, %v6129_v63 }
 0x2c4   : > { %v3265_v11 = vmul.f32 0.13646486, %v6098_v32  ;;  %v3329_v4 = vmul.f32 0.13646486, %v6110_v57 }
 0x2c5   : > { %v2820_v59 = vsel %vm2819_vm9, %v2818_v17, 0.0  ;;  %v6229_v62 = vadd.f32 %v3358_v51, %v3357_v8  ;;  %v3472_v17 = vmul.f32 0.5553281, %v3470_v43  ;;  %v3471_v44 = vmul.f32 0.44467196, %v3470_v43 }
 0x2c6   : > { %2821 = vadd.xlane.f32.xlu0 %v2820_v59  ;;  %v2957_v38 = vpop.permute.xlu0 %2956  ;;  %v3435_v8 = vmul.f32 0.44467196, %v6170_v7 }
 0x2c7   : > { %v2959_v42 = vadd.f32 %v2957_v38, %v2953_v28  ;;  %v3362_v63 = vmul.f32 0.26579726, %v6229_v62  ;;  %v3474_v59 = vrot.slane %v3472_v17, 1  ;;  %v3368_v20 = vmul.f32 0.33194062, %v6229_v62 }
 0x2c9   : > { %v6238_v54 = vadd.f32 %v3474_v59, %v3471_v44  ;;  %v3463_v59 = vmul.f32 0.44467196, %v6219_v36 }
 0x2ca   : > { %v3087_v61 = vpop.permute.xlu0 %3086 }
 0x2cb   : > { %v3089_v46 = vadd.f32 %v3087_v61, %v3083_v27  ;;  %v3478_v27 = vmul.f32 0.5553281, %v6238_v54 }
 0x2ce   : > { %v2210_v12 = vpop.xlane.xlu1 %2209  ;;  %v2963_v30 = vpop.permute.xlu0 %2962 }
 0x2cf   : > { %v2211_v45 = vrot.slane %v2210_v12, 4  ;;  %v2965_v56 = vadd.f32 %v2963_v30, %v2959_v42 }
 0x2d1   : > { %v2212_v1 = vadd.f32 %v2211_v45, %v2210_v12 }
 0x2d2   : > { %v3093_v5 = vpop.permute.xlu0 %3092 }
 0x2d3   : > { %v2213_v22 = vrot.slane %v2212_v1, 2  ;;  %v3095_v26 = vadd.f32 %v3093_v5, %v3089_v46  ;;  %3452 = vrot.lane.b32.xlu1 %v3450_v31, %s3833_s23 }
 0x2d5   : > { %v2214_v37 = vadd.f32 %v2213_v22, %v2212_v1 }
 0x2d6   : > { %v2967_v2 = vpop.permute.xlu0 %2966 }
 0x2d7   : > { %v2215_v6 = vrot.slane %v2214_v37, 1  ;;  %v2969_v28 = vadd.f32 %v2967_v2, %v2965_v56  ;;  %3148 = vrot.lane.b32.xlu1 %v3146_v0, %s3833_s23 }
 0x2d9   : > { %v2216_v24 = vadd.f32 %v2215_v6, %v2214_v37 }
 0x2da   : > { %v3099_v50 = vpop.permute.xlu0 %3098 }
 0x2db   : > { %3751 = vpush %v2216_v24  ;;  %3154 = vrot.lane.b32.xlu1 %v3152_v13, %s3835_s25  ;;  %v3101_v45 = vadd.f32 %v3099_v50, %v3095_v26 }
 0x2dc   : > { %3466 = vrot.lane.b32.xlu0 %v3464_v40, %s3833_s23 }
 0x2de   : > { %v2971_v19 = vpop.permute.xlu0 %2970 }
 0x2df   : > { %3160 = vrot.lane.b32.xlu1 %v3158_v10, %s3832_s22  ;;  %v2973_v42 = vadd.f32 %v2971_v19, %v2969_v28 }
 0x2e0   : > { %3170 = vrot.lane.b32.xlu0 %v3158_v10, %s3834_s24  ;;  %v3449_v10 = vmul.f32 0.44467196, %v6211_v15 }
 0x2e2   : > { %v3103_v38 = vpop.permute.xlu0 %3102 }
 0x2e3   : > { %3166 = vrot.lane.b32.xlu1 %v3164_v60, %s3836_s26  ;;  %v3105_v56 = vadd.f32 %v3103_v38, %v3101_v45  ;;  %v6278_v38 = vadd.f32 4.0, %v6164_v34 }
 0x2e4   : > { %3364 = vrot.lane.b32.xlu0 %v3362_v63, %s3833_s23 }
 0x2e5   : > { %v3386_v45 = vmul.f32 %v6278_v38, %v6278_v38 }
 0x2e6   : > { %v3269_v16 = vpop.permute.xlu0 %3268 }
 0x2e7   : > { %3174 = vrot.lane.b32.xlu1 %v3152_v13, %s3837_s27  ;;  %v3271_v6 = vadd.f32 %v3269_v16, %v3265_v11 }
 0x2e8   : > { %3370 = vrot.lane.b32.xlu0 %v3368_v20, %s3835_s25 }
 0x2ea   : > { %v2975_v23 = vpop.permute.xlu0 %2974 }
 0x2eb   : > { %v2977_v35 = vadd.f32 %v2975_v23, %v2973_v42  ;;  %3178 = vrot.lane.b32.xlu1 %v3146_v0, %s3838_s28  ;;  %v3378_v0 = vmul.f32 %v6164_v34, %v6164_v34 }
 0x2ec   : > { %3480 = vrot.lane.b32.xlu0 %v3478_v27, %s3833_s23 }
 0x2ed   : > { %v3189_v61 = vadd.f32 3.0, %v2977_v35  ;;  %v6247_v46 = vmul.f32 %v2977_v35, %v6117_v9  ;;  %v3184_v1 = vmul.f32 %v2977_v35, %v2977_v35 }
 0x2ee   : > { %v3107_v55 = vpop.permute.xlu0 %3106 }
 0x2ef   : > { %v3191_v58 = vmul.f32 %v3189_v61, %v3189_v61  ;;  %3374 = vrot.lane.b32.xlu1 %v3362_v63, %s3832_s22  ;;  %v6250_v48 = vmul.f32 %v3189_v61, %v3188_v47  ;;  %v3109_v33 = vadd.f32 %v3107_v55, %v3105_v56  ;;  %s3750_s22 = spop %3749 }
 0x2f0   : > { %s2203_s25 = smul.f32 0.00034435262, %s3750_s22 }
 0x2f1   : > { %v6252_v12 = vadd.f32 %v3191_v58, %v3190_v21 }
 0x2f2   : > { %v3275_v30 = vpop.permute.xlu0 %3274 }
 0x2f3   : > { %v3277_v13 = vadd.f32 %v3275_v30, %v3271_v6 }
 0x2f6   : > { %v3333_v31 = vpop.permute.xlu0 %3332 }
 0x2f7   : > { %v3335_v28 = vadd.f32 %v3333_v31, %v3329_v4  ;;  %v3145_v31 = vmul.f32 0.0076728435, %v6215_v18 }
 0x2fa   : > { %v3111_v52 = vpop.permute.xlu0 %3110 }
 0x2fb   : > { %v3113_v3 = vadd.f32 %v3111_v52, %v3109_v33 }
 0x2fd   : > { %v3185_v39 = vsub.f32 %v3113_v3, %v3184_v1  ;;  %v3206_v1 = vadd.f32 0.0004, %v6252_v12 }
 0x2fe   : > { %v3279_v9 = vpop.permute.xlu0 %3278 }
 0x2ff   : > { %v3195_v25 = vadd.f32 %v3185_v39, %v3183_v49  ;;  %v6262_v29 = vadd.f32 %v3279_v9, %v3277_v13  ;;  %v3422_v49 = vmul.f32 0.44467196, %v6159_v41 }
 0x301   : > { %v3380_v32 = vmul.f32 %v6262_v29, %v6262_v29  ;;  %v6269_v57 = vadd.f32 4.0, %v6262_v29  ;;  %v3196_v20 = vadd.f32 0.0036, %v3195_v25 }
 0x302   : > { %v3339_v22 = vpop.permute.xlu0 %3338 }
 0x303   : > { %v3341_v24 = vadd.f32 %v3339_v22, %v3335_v28  ;;  %v3387_v16 = vmul.f32 %v6269_v57, %v6269_v57  ;;  %3803 = vrcp.f32 %v3196_v20 }
 0x304   : > { %3805 = vrcp.f32 %v3206_v1 }
 0x306   : > { %v3311_v5 = vpop.permute.xlu0 %3310 }
 0x307   : > { %v3313_v37 = vadd.f32 %v3311_v5, %v6172_v14 }
 0x309   : > { %v3379_v26 = vsub.f32 %v3313_v37, %v3378_v0 }
 0x30a   : > { %v3343_v2 = vpop.permute.xlu0 %3342 }
 0x30b   : > { %v3345_v53 = vadd.f32 %v3343_v2, %v3341_v24 }
 0x30c   : > { %s3752_s23 = spop %3751 }
 0x30d   : > { %v3381_v17 = vsub.f32 %v3345_v53, %v3380_v32  ;;  %v3361_v32 = vmul.f32 0.13646486, %v6229_v62  ;;  %s2218_s26 = smul.f32 0.00034435262, %s3752_s23 }
 0x30e   : > { %v3426_v40 = vpop.permute.xlu0 %3425 }
 0x30f   : > { %v6272_v19 = vadd.f32 %v3426_v40, %v3422_v49  ;;  %v3391_v42 = vadd.f32 %v3381_v17, %v3379_v26  ;;  %v3401_v26 = vadd.f32 %v3387_v16, %v3386_v45 }
 0x311   : > { %v6283_v23 = vadd.f32 5.0, %v6272_v19  ;;  %v3484_v36 = vmul.f32 %v6272_v19, %v6272_v19  ;;  %v3392_v3 = vadd.f32 0.0036, %v3391_v42  ;;  %v3402_v13 = vadd.f32 0.0004, %v3401_v26 }
 0x312   : > { %v3439_v51 = vpop.permute.xlu0 %3438 }
 0x313   : > { %v6274_v60 = vadd.f32 %v3439_v51, %v3435_v8  ;;  %v3492_v39 = vmul.f32 %v6283_v23, %v6283_v23  ;;  %3807 = vrcp.f32 %v3392_v3 }
 0x315   : > { %v6286_v47 = vadd.f32 5.0, %v6274_v60  ;;  %v3486_v58 = vmul.f32 %v6274_v60, %v6274_v60 }
 0x317   : > { %v3493_v9 = vmul.f32 %v6286_v47, %v6286_v47 }
 0x319   : > { %v3507_v28 = vadd.f32 %v3493_v9, %v3492_v39 }
 0x31b   : > { %v3508_v8 = vadd.f32 0.0004, %v3507_v28 }
 0x34f   : > { %v2833_v14 = vpop.xlane.xlu1 %2832 }
 0x350   : > { %v2834_v43 = vrot.slane %v2833_v14, 4 }
 0x352   : > { %v2835_v50 = vadd.f32 %v2834_v43, %v2833_v14  ;;  %v3477_v14 = vmul.f32 0.44467196, %v6238_v54  ;;  %v3804_v43 = vpop.eup %3803 }
 0x353   : > { %v3453_v41 = vpop.permute.xlu1 %3452  ;;  %v2822_v63 = vpop.xlane.xlu0 %2821 }
 0x354   : > { %v2836_v7 = vrot.slane %v2835_v50, 2  ;;  %v2823_v44 = vrot.slane %v2822_v63, 4  ;;  %v3455_v27 = vadd.f32 %v3453_v41, %v3449_v10  ;;  %v3806_v41 = vpop.eup %3805 }
 0x356   : > { %v2824_v15 = vadd.f32 %v2823_v44, %v2822_v63  ;;  %v2837_v55 = vadd.f32 %v2836_v7, %v2835_v50  ;;  %v3485_v56 = vsub.f32 %v3455_v27, %v3484_v36  ;;  %v3488_v63 = vmul.f32 %v6274_v60, %v6272_v19  ;;  %v3808_v44 = vpop.eup %3807 }
 0x357   : > { %v3149_v35 = vpop.permute.xlu1 %3148  ;;  %v3467_v61 = vpop.permute.xlu0 %3466  ;;  %v3394_v62 = vmul.f32 %v3808_v44, %v3392_v3  ;;  %v3208_v36 = vmul.f32 %v3806_v41, %v3206_v1  ;;  %v3202_v60 = vmul.f32 2.0, %v6250_v48  ;;  %v3494_v1 = vmul.f32 %v6286_v47, %v6283_v23 }
 0x358   : > { %v2825_v21 = vrot.slane %v2824_v15, 2  ;;  %v3469_v30 = vadd.f32 %v3467_v61, %v3463_v59  ;;  %v2838_v5 = vrot.slane %v2837_v55, 1  ;;  %v3151_v18 = vadd.f32 %v3149_v35, %v3145_v31 }
 0x359   : > { %v3198_v59 = vmul.f32 %v3804_v43, %v3196_v20  ;;  %v3388_v20 = vmul.f32 %v6269_v57, %v6278_v38  ;;  %v3395_v39 = vsub.f32 2.0, %v3394_v62 }
 0x35a   : > { %v3487_v33 = vsub.f32 %v3469_v30, %v3486_v58  ;;  %v2826_v52 = vadd.f32 %v2825_v21, %v2824_v15  ;;  %v2839_v6 = vadd.f32 %v2838_v5, %v2837_v55 }
 0x35b   : > { %v3155_v25 = vpop.permute.xlu1 %3154  ;;  %v3171_v22 = vpop.permute.xlu0 %3170  ;;  %v3199_v55 = vsub.f32 2.0, %v3198_v59  ;;  %v3398_v26 = vmul.f32 2.0, %v3388_v20  ;;  %v3396_v23 = vmul.f32 %v3808_v44, %v3395_v39 }
 0x35c   : > { %v3497_v0 = vadd.f32 %v3487_v33, %v3485_v56  ;;  %v2827_v37 = vrot.slane %v2826_v52, 1  ;;  %v3157_v40 = vadd.f32 %v3155_v25, %v3151_v18  ;;  %v3209_v25 = vsub.f32 2.0, %v3208_v36 }
 0x35d   : > { %v3200_v9 = vmul.f32 %v3804_v43, %v3199_v55  ;;  %v3504_v18 = vmul.f32 2.0, %v3494_v1  ;;  %v3520_v43 = vlaneseq }
 0x35e   : > { %v3498_v11 = vadd.f32 0.0036, %v3497_v0  ;;  %v2828_v4 = vadd.f32 %v2827_v37, %v2826_v52  ;;  %v3382_v52 = vmul.f32 %v6262_v29, %v6164_v34  ;;  %v3203_v37 = vadd.f32 0.0004, %v3202_v60 }
 0x35f   : > { %v3161_v12 = vpop.permute.xlu1 %3160  ;;  %v3365_v2 = vpop.permute.xlu0 %3364 }
 0x360   : > { %3809 = vrcp.f32 %v3498_v11  ;;  %3753 = vpush %v2828_v4  ;;  %v3163_v24 = vadd.f32 %v3161_v12, %v3157_v40  ;;  %v3367_v27 = vadd.f32 %v3365_v2, %v3361_v32  ;;  %v3210_v4 = vmul.f32 %v3806_v41, %v3209_v25 }
 0x361   : > { %3755 = vpush %v2839_v6  ;;  %3811 = vrcp.f32 %v3402_v13  ;;  %v3399_v2 = vadd.f32 0.0004, %v3398_v26  ;;  %v3505_v40 = vadd.f32 0.0004, %v3504_v18  ;;  %v3521_v32 = vshrl.u32 %v3520_v43, 7 }
 0x362   : > { %3813 = vrcp.f32 %v3508_v8 }
 0x363   : > { %v3167_v53 = vpop.permute.xlu1 %3166  ;;  %v3371_v49 = vpop.permute.xlu0 %3370  ;;  %vm3524_vm10 = vcmp.eq.s32.totalorder %v3521_v32, 0  ;;  %vm3529_vm12 = vcmp.eq.s32.totalorder %v3521_v32, 1 }
 0x364   : > { %v3169_v51 = vadd.f32 %v3167_v53, %v3163_v24  ;;  %v3373_v30 = vadd.f32 %v3371_v49, %v3367_v27 }
 0x366   : > { %v3173_v50 = vadd.f32 %v3171_v22, %v3169_v51 }
 0x367   : > { %v3175_v10 = vpop.permute.xlu1 %3174  ;;  %v3481_v17 = vpop.permute.xlu0 %3480 }
 0x368   : > { %v3483_v7 = vadd.f32 %v3481_v17, %v3477_v14  ;;  %v3177_v15 = vadd.f32 %v3175_v10, %v3173_v50  ;;  %v3523_v50 = vand.u32 127, %v3520_v43  ;;  %v3527_v10 = vstv %s2203_s25 }
 0x369   : > { %v3531_v17 = vstv %s2218_s26  ;;  %s519_s26 = scalar_lea.vmem %s6347_s10, %s6120_s21 }
 0x36a   : > { %v3810_v16 = vpop.eup %3809  ;;  %v3489_v42 = vsub.f32 %v3483_v7, %v3488_v63  ;;  %vm3525_vm11 = vcmp.eq.s32.totalorder %v3523_v50, 0  ;;  %vm3533_vm13 = vcmp.eq.s32.totalorder %v3523_v50, 1  ;;  %vm3540_vm1 = vcmp.eq.s32.totalorder %v3523_v50, 2 }
 0x36b   : > { %v3500_v54 = vmul.f32 %v3810_v16, %v3498_v11  ;;  %v3179_v35 = vpop.permute.xlu1 %3178  ;;  %v3812_v21 = vpop.eup %3811  ;;  %vm3526_vm14 = vmand %vm3524_vm10, %vm3525_vm11  ;;  %vm3547_vm4 = vcmp.eq.s32.totalorder %v3523_v50, 3  ;;  %vm3554_vm6 = vcmp.eq.s32.totalorder %v3523_v50, 4 }
 0x36c   : > { %v3181_v61 = vadd.f32 %v3179_v35, %v3177_v15  ;;  %v3495_v45 = vmul.f32 2.0, %v3489_v42  ;;  %v3814_v3 = vpop.eup %3813  ;;  %v3404_v22 = vmul.f32 %v3812_v21, %v3402_v13  ;;  %vm3530_vm15 = vmand %vm3529_vm12, %vm3525_vm11  ;;  %v3528_v63 = vsel %vm3526_vm14, %v3527_v10, 0.0 }
 0x36d   : > { %v3501_v58 = vsub.f32 2.0, %v3500_v54  ;;  %v3510_v11 = vmul.f32 %v3814_v3, %v3508_v8  ;;  %vm3534_vm0 = vmand %vm3524_vm10, %vm3533_vm13  ;;  %v3532_v7 = vsel %vm3530_vm15, %v3531_v17, %v3528_v63 }
 0x36e   : > { %v3187_v31 = vsub.f32 %v3181_v61, %v6247_v46  ;;  %v3496_v46 = vadd.f32 0.0036, %v3495_v45  ;;  %v3405_v34 = vsub.f32 2.0, %v3404_v22  ;;  %vm3537_vm2 = vmand %vm3529_vm12, %vm3533_vm13 }
 0x36f   : > { %v3375_v19 = vpop.permute.xlu1 %3374  ;;  %v3502_v48 = vmul.f32 %v3810_v16, %v3501_v58  ;;  %v3511_v13 = vsub.f32 2.0, %v3510_v11  ;;  %vm6317_vm3 = vmand %vm3524_vm10, %vm3540_vm1 }
 0x370   : > { %v3193_v56 = vmul.f32 2.0, %v3187_v31  ;;  %v3377_v33 = vadd.f32 %v3375_v19, %v3373_v30  ;;  %v3406_v53 = vmul.f32 %v3812_v21, %v3405_v34  ;;  %vm3544_vm5 = vmand %vm3529_vm12, %vm3540_vm1 }
 0x371   : > { %v3503_v47 = vmul.f32 %v3502_v48, %v3496_v46  ;;  %v3512_v14 = vmul.f32 %v3814_v3, %v3511_v13  ;;  %vm3548_vm7 = vmand %vm3524_vm10, %vm3547_vm4 }
 0x372   : > { %v3194_v5 = vadd.f32 0.0036, %v3193_v56  ;;  %v3383_v0 = vsub.f32 %v3377_v33, %v3382_v52  ;;  %vm3551_vm8 = vmand %vm3529_vm12, %vm3547_vm4 }
 0x373   : > { %v3506_v49 = vmul.f32 %v3505_v40, %v3503_v47  ;;  %vm3555_vm9 = vmand %vm3524_vm10, %vm3554_vm6 }
 0x374   : > { %v3389_v57 = vmul.f32 2.0, %v3383_v0  ;;  %v3201_v38 = vmul.f32 %v3200_v9, %v3194_v5  ;;  %vm3558_vm11 = vmand %vm3529_vm12, %vm3554_vm6 }
 0x375   : > { %v3513_v8 = vmul.f32 %v3512_v14, %v3506_v49 }
 0x376   : > { %v3390_v29 = vadd.f32 0.0036, %v3389_v57  ;;  %v3204_v12 = vmul.f32 %v3203_v37, %v3201_v38 }
 0x378   : > { %v3211_v6 = vmul.f32 %v3210_v4, %v3204_v12  ;;  %v3397_v28 = vmul.f32 %v3396_v23, %v3390_v29 }
 0x37a   : > { %3757 = vpush %v3211_v6  ;;  %v3400_v24 = vmul.f32 %v3399_v2, %v3397_v28 }
 0x37b   : > { %3759 = vpush %v3201_v38 }
 0x37c   : > { %v3407_v51 = vmul.f32 %v3406_v53, %v3400_v24 }
 0x37e   : > { %3761 = vpush %v3407_v51 }
 0x37f   : > { %3763 = vpush %v3397_v28 }
 0x380   : > { %3765 = vpush %v3513_v8 }
 0x381   : > { %3767 = vpush %v3503_v47 }
 0x391   : > { %s3754_s24 = spop %3753 }
 0x392   : > { %s2830_s27 = smul.f32 0.0046296297, %s3754_s24  ;;  %s3756_s28 = spop %3755 }
 0x393   : > { %s2841_s16 = smul.f32 0.0046296297, %s3756_s28 }
 0x394   : > { %v3535_v41 = vstv %s2830_s27 }
 0x395   : > { %v3536_v44 = vsel %vm3534_vm0, %v3535_v41, %v3532_v7  ;;  %v3538_v59 = vstv %s2841_s16 }
 0x396   : > { %v3539_v27 = vsel %vm3537_vm2, %v3538_v59, %v3536_v44 }
 0x3ab   : > { %s3758_s18 = spop %3757 }
 0x3ac   : > { %s3214_s29 = smul.f32 0.16666667, %s3758_s18  ;;  %s3760_s30 = spop %3759 }
 0x3ad   : > { %s3217_s11 = smul.f32 0.16666667, %s3760_s30 }
 0x3ae   : > { %v3542_v15 = vstv %s3214_s29 }
 0x3af   : > { %v3543_v42 = vsel %vm6317_vm3, %v3542_v15, %v3539_v27  ;;  %v3545_v54 = vstv %s3217_s11  ;;  %s3762_s17 = spop %3761 }
 0x3b0   : > { %s3410_s19 = smul.f32 0.16666667, %s3762_s17  ;;  %s3764_s20 = spop %3763  ;;  %v3546_v35 = vsel %vm3544_vm5, %v3545_v54, %v3543_v42 }
 0x3b1   : > { %s3413_s14 = smul.f32 0.16666667, %s3764_s20  ;;  %s3766_s12 = spop %3765 }
 0x3b2   : > { %v3549_v61 = vstv %s3410_s19  ;;  %s3516_s15 = smul.f32 0.16666667, %s3766_s12  ;;  %s3768_s22 = spop %3767 }
 0x3b3   : > { %v3550_v55 = vsel %vm3548_vm7, %v3549_v61, %v3546_v35  ;;  %v3552_v62 = vstv %s3413_s14  ;;  %s3519_s23 = smul.f32 0.16666667, %s3768_s22 }
 0x3b4   : > { %v3553_v36 = vsel %vm3551_vm8, %v3552_v62, %v3550_v55  ;;  %v3556_v21 = vstv %s3516_s15 }
 0x3b5   : > { %v3557_v58 = vsel %vm3555_vm9, %v3556_v21, %v3553_v36  ;;  %v3559_v30 = vstv %s3519_s23 }
 0x3b6   : > { %v3560_v45 = vsel %vm3558_vm11, %v3559_v30, %v3557_v58 }
 0x3b7   : > { %3561 = vst [vmem:[%s519_s26] sm:$0x3] %v3560_v45 }
 0x3b8 PF: > { %s20_s13 = sadd.s32 1, %s3830_s13  }
 0x3b9   : > { %p17_p4 = scmp.ge.s32.totalorder %s20_s13, 8  }
 0x3bb   :  { %19 = sbr.rel (!%p17_p4) target bundleno = 1 (0x1), region = 117 }

</bundles_post_ra>
